<compile_context>
chip_gen: v6e
topology: v6e:2x2x1
jax: 0.10.0
libtpu: 0.0.40
codegen_flags: <defaults>
</compile_context>

<pallas_src>
import functools

import jax
import jax.numpy as jnp
from jax.experimental import pallas as pl
from jax.experimental.pallas import tpu as pltpu


def _rup(x, m):
    return (x + m - 1) // m * m


def _sigmoid(y):
    # sigmoid(x) = 0.5*(tanh(x/2)+1): stable (no exp overflow), exact [0, 1].
    return jnp.clip(0.5 * (jnp.tanh(0.5 * y) + 1.0), 0.0, 1.0)


# ---------------------------------------------------------------------------
# Generic fused kernel: act((sum_i x_i @ w_i) * scale + bias).
#   - bf16 inputs on the MXU, f32 accumulation/epilogue (v5e-friendly).
#   - K and N are single blocks; grid is 1-D over M tiles ("parallel").
#   - act == "mixed": sigmoid where act_mask==1, ReLU elsewhere (used to fuse
#     the erase branch and deconv1 into one call).
# ---------------------------------------------------------------------------
def _fused_mm_kernel(*refs, n_ops, act):
    o_ref = refs[-1]
    acc = jnp.dot(refs[0][...], refs[1][...],
                  preferred_element_type=jnp.float32)
    for p in range(1, n_ops):
        acc = acc + jnp.dot(refs[2 * p][...], refs[2 * p + 1][...],
                            preferred_element_type=jnp.float32)
    i = 2 * n_ops
    y = acc * refs[i][...] + refs[i + 1][...]
    if act == "relu":
        y = jnp.maximum(y, 0.0)
    elif act == "sigmoid":
        y = _sigmoid(y)
    elif act == "mixed":
        m = refs[i + 2][...]                      # (1, N) {0,1} mask
        y = m * _sigmoid(y) + (1.0 - m) * jnp.maximum(y, 0.0)
    o_ref[...] = y.astype(o_ref.dtype)


def fused_matmul(xs, ws, scale, bias, act="none", act_mask=None,
                 out_dtype=jnp.bfloat16):
    """act((sum_i x_i @ w_i) * scale + bias); scale/bias broadcast over rows."""
    M = xs[0].shape[0]
    N = ws[0].shape[1]
    n_ops = len(xs)
    tm = 256 if M >= 512 else _rup(M, 8)     # >=2 M-blocks on the big layers
    Mp = _rup(M, tm)

    ins, in_specs = [], []
    for x, w in zip(xs, ws):
        K = x.shape[1]
        xb = x.astype(jnp.bfloat16)
        if Mp != M:
            xb = jnp.pad(xb, ((0, Mp - M), (0, 0)))
        ins.append(xb)
        in_specs.append(pl.BlockSpec((tm, K), lambda i: (i, 0)))
        ins.append(w.astype(jnp.bfloat16))
        in_specs.append(pl.BlockSpec((K, N), lambda i: (0, 0)))
    ins.append(scale.reshape(1, N).astype(jnp.float32))
    in_specs.append(pl.BlockSpec((1, N), lambda i: (0, 0)))
    ins.append(bias.reshape(1, N).astype(jnp.float32))
    in_specs.append(pl.BlockSpec((1, N), lambda i: (0, 0)))
    if act == "mixed":
        ins.append(act_mask.reshape(1, N).astype(jnp.float32))
        in_specs.append(pl.BlockSpec((1, N), lambda i: (0, 0)))

    out = pl.pallas_call(
        functools.partial(_fused_mm_kernel, n_ops=n_ops, act=act),
        out_shape=jax.ShapeDtypeStruct((Mp, N), out_dtype),
        grid_spec=pltpu.PrefetchScalarGridSpec(
            num_scalar_prefetch=0,
            grid=(Mp // tm,),
            in_specs=in_specs,
            out_specs=pl.BlockSpec((tm, N), lambda i: (i, 0)),
        ),
        compiler_params=pltpu.CompilerParams(
            dimension_semantics=("parallel",)),
    )(*ins)
    return out[:M] if Mp != M else out


# ---------------------------------------------------------------------------
# Layer helpers built on the fused kernel.
# ---------------------------------------------------------------------------
def conv3x3_s2(x, p):
    """3x3 stride-2 pad-1 conv + folded BN + ReLU (encoder). x: NHWC bf16."""
    # TODO(synk): im2col of the strided 3x3 conv is still (bf16) XLA glue;
    # folding it into the kernel would need halo'd spatial BlockSpecs.
    kh = kw = 3
    stride = 2
    xp = jnp.pad(x, ((0, 0), (1, 1), (1, 1), (0, 0)))
    n, hp, wp_, cin = xp.shape
    ho = (hp - kh) // stride + 1
    wo = (wp_ - kw) // stride + 1
    patches = [xp[:, i:i + stride * (ho - 1) + 1:stride,
                  j:j + stride * (wo - 1) + 1:stride, :]
               for i in range(kh) for j in range(kw)]
    cols = jnp.concatenate(patches, axis=-1).reshape(n * ho * wo, kh * kw * cin)
    cout = p["w"].shape[-1]
    y = fused_matmul([cols], [p["w"].reshape(kh * kw * cin, cout)],
                     p["scale"], p["bias"], act="relu")
    return y.reshape(n, ho, wo, cout)


def conv1x1(x, p, act="relu"):
    n, h, w, cin = x.shape
    cout = p["w"].shape[-1]
    y = fused_matmul([x.reshape(n * h * w, cin)], [p["w"].reshape(cin, cout)],
                     p["scale"], p["bias"], act=act)
    return y.reshape(n, h, w, cout)


def up2(x):
    return jnp.repeat(jnp.repeat(x, 2, axis=1), 2, axis=2)


def decoder_block(low, skip, p):
    """1x1 conv + BN + ReLU on concat([up2(low), skip]): the channel concat is
    never materialized -- the weight is split along K and the kernel sums two
    matmuls (x_up @ Wa + x_skip @ Wb) in a single pass."""
    n, h, w, cl = low.shape
    cs = skip.shape[-1]
    cout = p["w"].shape[-1]
    # TODO(synk): up2(low) is still a tiny jnp.repeat through HBM; full fusion
    # would fold the x2 upsample into the consumer's index_map.
    xu = up2(low).reshape(n * 4 * h * w, cl)
    xs = skip.reshape(-1, cs)
    wfull = p["w"].reshape(cl + cs, cout)
    y = fused_matmul([xu, xs], [wfull[:cl], wfull[cl:]],
                     p["scale"], p["bias"], act="relu")
    return y.reshape(n, 2 * h, 2 * w, cout)


def _subpixel_phase_weights(w_eff):
    """ConvTranspose2d(k=3, s=2, p=1, output_padding=1) as 4 subpixel phases of
    the equivalent conv on the zero-inserted input (weights stored directly in
    that effective HWIO layout, as in the previous version).  Tap order is
    [x(i,j), x(i,j+1), x(i+1,j), x(i+1,j+1)]; returns one (4*cin, cout) weight
    per output phase (p, q) in row-major phase order."""
    _, _, cin, cout = w_eff.shape
    z = jnp.zeros((cin, cout), w_eff.dtype)
    return [
        jnp.concatenate([w_eff[1, 1], z, z, z], axis=0),                  # (0,0)
        jnp.concatenate([w_eff[1, 0], w_eff[1, 2], z, z], axis=0),        # (0,1)
        jnp.concatenate([w_eff[0, 1], z, w_eff[2, 1], z], axis=0),        # (1,0)
        jnp.concatenate([w_eff[0, 0], w_eff[0, 2],
                         w_eff[2, 0], w_eff[2, 2]], axis=0),              # (1,1)
    ]


def erase_and_deconv1(xd, p_er, p_dc):
    """Both stride-2 deconvs (erase -> sigmoid, deconv1 -> BN+ReLU) share the
    same input, so they run as ONE subpixel matmul with a per-column activation
    mask.  No zero-inserted 2Hx2W tensor is built.  Output stays phase-blocked:
    rows ordered (b, i, j, phase), columns = [erase(2), deconv1(64)]."""
    n, h, w, c = xd.shape
    xp = jnp.pad(xd, ((0, 0), (0, 1), (0, 1), (0, 0)))
    taps = [xp[:, :h, :w, :], xp[:, :h, 1:, :],
            xp[:, 1:, :w, :], xp[:, 1:, 1:, :]]
    cols = jnp.concatenate(taps, axis=-1).reshape(n * h * w, 4 * c)

    ph_e = _subpixel_phase_weights(p_er["w"])
    ph_d = _subpixel_phase_weights(p_dc["w"])
    w_big = jnp.concatenate(
        [jnp.concatenate([pe, pd], axis=1) for pe, pd in zip(ph_e, ph_d)],
        axis=1)
    c_er = p_er["w"].shape[-1]
    c_dc = p_dc["w"].shape[-1]
    s_big = jnp.tile(jnp.concatenate([p_er["scale"], p_dc["scale"]]), 4)
    b_big = jnp.tile(jnp.concatenate([p_er["bias"], p_dc["bias"]]), 4)
    m_big = jnp.tile(jnp.concatenate([jnp.ones((c_er,), jnp.float32),
                                      jnp.zeros((c_dc,), jnp.float32)]), 4)

    y = fused_matmul([cols], [w_big], s_big, b_big,
                     act="mixed", act_mask=m_big)          # (n*h*w, 4*(2+64))
    return y.reshape(n * h * w * 4, c_er + c_dc), (n, h, w)


# ---------------------------------------------------------------------------
# Fused tail: [Conv1x1(64->64)+BN+ReLU] -> cat(x1, .) -> Conv1x1(66->1) -> sigmoid.
# The concat is never materialized (final weight split along K) and the
# 64-channel deconv2 activation never touches HBM.  Cout=1 is done as a VPU
# multiply + cross-lane reduce instead of a padded MXU pass.
# ---------------------------------------------------------------------------
def _final_kernel(x1_ref, x2_ref, w2_ref, s2_ref, b2_ref,
                  wf1_ref, wf2_ref, bf_ref, o_ref):
    h = jnp.dot(x2_ref[...], w2_ref[...], preferred_element_type=jnp.float32)
    h = jnp.maximum(h * s2_ref[...] + b2_ref[...], 0.0)          # deconv2
    y = jnp.sum(x1_ref[...].astype(jnp.float32) * wf1_ref[...],
                axis=1, keepdims=True)
    y = y + jnp.sum(h * wf2_ref[...], axis=1, keepdims=True)
    y = y + bf_ref[...]
    o_ref[...] = _sigmoid(y).astype(o_ref.dtype)


def deconv2_and_finalconv(x1, x2, p_dc2, p_fin, tm=256):
    M = x1.shape[0]
    assert M % tm == 0
    c1 = x1.shape[1]
    cin2, cout2 = p_dc2["w"].shape[-2], p_dc2["w"].shape[-1]
    w2 = p_dc2["w"].reshape(cin2, cout2)
    wf = p_fin["w"].reshape(-1, 1) * p_fin["scale"].reshape(1, 1)
    out = pl.pallas_call(
        _final_kernel,
        out_shape=jax.ShapeDtypeStruct((M, 1), jnp.float32),
        grid_spec=pltpu.PrefetchScalarGridSpec(
            num_scalar_prefetch=0,
            grid=(M // tm,),
            in_specs=[
                pl.BlockSpec((tm, c1), lambda i: (i, 0)),
                pl.BlockSpec((tm, cin2), lambda i: (i, 0)),
                pl.BlockSpec((cin2, cout2), lambda i: (0, 0)),
                pl.BlockSpec((1, cout2), lambda i: (0, 0)),
                pl.BlockSpec((1, cout2), lambda i: (0, 0)),
                pl.BlockSpec((1, c1), lambda i: (0, 0)),
                pl.BlockSpec((1, cout2), lambda i: (0, 0)),
                pl.BlockSpec((1, 1), lambda i: (0, 0)),
            ],
            out_specs=pl.BlockSpec((tm, 1), lambda i: (i, 0)),
        ),
        compiler_params=pltpu.CompilerParams(
            dimension_semantics=("parallel",)),
    )(x1.astype(jnp.bfloat16), x2.astype(jnp.bfloat16),
      w2.astype(jnp.bfloat16),
      p_dc2["scale"].reshape(1, cout2).astype(jnp.float32),
      p_dc2["bias"].reshape(1, cout2).astype(jnp.float32),
      wf[:c1].reshape(1, c1).astype(jnp.float32),
      wf[c1:].reshape(1, cout2).astype(jnp.float32),
      p_fin["bias"].reshape(1, 1).astype(jnp.float32))
    return out


# ---------------------------------------------------------------------------
# Deterministic parameter init (synthetic; no checkpoint loading).
# ---------------------------------------------------------------------------
def _make_layer(key, kh, kw, cin, cout, *, bn=True, conv_bias=False):
    kw_, kb, kg, kbeta = jax.random.split(key, 4)
    fan_in = kh * kw * cin
    w = (fan_in ** -0.5) * jax.random.normal(kw_, (kh, kw, cin, cout), jnp.float32)
    cb = 0.05 * jax.random.normal(kb, (cout,), jnp.float32) if conv_bias \
        else jnp.zeros((cout,), jnp.float32)
    if bn:
        # eval-mode BN folded: running_mean=0, running_var=1, eps=1e-5.
        gamma = 1.0 + 0.1 * jax.random.normal(kg, (cout,), jnp.float32)
        beta = 0.1 * jax.random.normal(kbeta, (cout,), jnp.float32)
        s = gamma / jnp.sqrt(1.0 + 1e-5)
        return {"w": w, "scale": s, "bias": s * cb + beta}
    return {"w": w, "scale": jnp.ones((cout,), jnp.float32), "bias": cb}


def init_params(key):
    keys = iter(jax.random.split(key, 32))
    p = {}
    # --- encoder stand-in (BAM_LinkNet50_T) ---
    p["stem"] = _make_layer(next(keys), 3, 3, 3, 16)
    p["e1"] = _make_layer(next(keys), 3, 3, 16, 16)
    p["e2"] = _make_layer(next(keys), 3, 3, 16, 32)
    p["e3"] = _make_layer(next(keys), 3, 3, 32, 64)
    p["e4"] = _make_layer(next(keys), 3, 3, 64, 128)
    # --- decoder stand-in (build_decoder) ---
    p["d3"] = _make_layer(next(keys), 1, 1, 128 + 64, 64)
    p["d2"] = _make_layer(next(keys), 1, 1, 64 + 32, 64)
    p["d1"] = _make_layer(next(keys), 1, 1, 64 + 16, 64)
    p["d0"] = _make_layer(next(keys), 1, 1, 64, 64)
    # --- erase branch stand-in (build_erase, erase_channel=2) ---
    p["erase_deconv"] = _make_layer(next(keys), 3, 3, 64, 2, bn=False, conv_bias=True)
    # --- deconv block (exactly as in GAMSNet_OAM.__init__) ---
    p["deconv1"] = _make_layer(next(keys), 3, 3, 64, 64, bn=True, conv_bias=True)
    p["deconv2"] = _make_layer(next(keys), 1, 1, 64, 64, bn=True, conv_bias=False)
    # --- finalconv: Conv2d(64 + 2, 1, 1) with bias, no BN ---
    p["final"] = _make_layer(next(keys), 1, 1, 66, 1, bn=False, conv_bias=True)
    return p


# ---------------------------------------------------------------------------
# Forward pass (mirrors GAMSNet_OAM.forward).
# ---------------------------------------------------------------------------
def gamsnet_oam_forward(params, x_nchw):
    x = jnp.transpose(x_nchw, (0, 2, 3, 1)).astype(jnp.bfloat16)  # NCHW->NHWC

    # e1, e2, e3, e4 = self.resnet(x)
    # TODO(synk): BAM_LinkNet50_T internals not provided; deterministic strided
    # conv/BN/ReLU stack producing the 4 encoder scales stands in.
    s = conv3x3_s2(x, params["stem"])
    e1 = conv3x3_s2(s, params["e1"])
    e2 = conv3x3_s2(e1, params["e2"])
    e3 = conv3x3_s2(e2, params["e3"])
    e4 = conv3x3_s2(e3, params["e4"])

    # x = self.decoder(e1, e2, e3, e4)
    # TODO(synk): build_decoder internals not provided; LinkNet-style fuse-up
    # stand-in (1x1 conv on [up2(deep), skip]) producing 64 ch at H/2.
    d3 = decoder_block(e4, e3, params["d3"])
    d2 = decoder_block(d3, e2, params["d2"])
    d1 = decoder_block(d2, e1, params["d1"])
    # 1x1 conv + pointwise BN/ReLU commute with nearest-neighbour x2 upsample,
    # so d0 runs at the low resolution (4x fewer rows), then upsample.
    xd = up2(conv1x1(d1, params["d0"], act="relu"))       # (N, H/2, W/2, 64)

    # x1 = self.erase(x); x2 = deconv[ConvTranspose+BN+ReLU](x) -- one fused
    # subpixel deconv kernel with a per-column sigmoid/ReLU mask.
    yc, (n, h, w) = erase_and_deconv1(xd, params["erase_deconv"],
                                      params["deconv1"])
    x1 = yc[:, :2]     # erase output (post-sigmoid), rows = (b, i, j, phase)
    x2 = yc[:, 2:]     # deconv1 output (post BN+ReLU)

    # x2 = Conv1x1+BN+ReLU(x2); x = sigmoid(finalconv(cat(x1, x2))) -- fused.
    yf = deconv2_and_finalconv(x1, x2, params["deconv2"], params["final"])

    # Undo the phase-blocked row order on the 1-channel output:
    # rows (b, i, j, p, q) -> spatial (b, 2i+p, 2j+q).
    out = yf.reshape(n, h, w, 2, 2, 1)
    out = out.transpose(0, 1, 3, 2, 4, 5).reshape(n, 2 * h, 2 * w, 1)
    return jnp.transpose(out, (0, 3, 1, 2)).astype(jnp.float32)  # NCHW


if __name__ == "__main__":
    key = jax.random.PRNGKey(0)
    kx, kp = jax.random.split(key)
    x = jax.random.normal(kx, (2, 3, 32, 32), dtype=jnp.float32)  # NCHW
    params = init_params(kp)

    fwd = jax.jit(gamsnet_oam_forward)
    y = fwd(params, x)
    y = jax.block_until_ready(y)

    assert y.shape == (2, 1, 32, 32), y.shape
    assert bool(jnp.all(jnp.isfinite(y)))
    assert bool(jnp.all((y >= 0.0) & (y <= 1.0)))  # sigmoid output range
    print("KERNEL_OK")
</pallas_src>

<mosaic_0001>
module attributes {stable_mosaic.version = 11 : i64} {
  func.func @_fused_mm_kernel(%arg0: i32, %arg1: memref<256x27xbf16, #tpu.memory_space<vmem>>, %arg2: memref<27x16xbf16, #tpu.memory_space<vmem>>, %arg3: memref<1x16xf32, #tpu.memory_space<vmem>>, %arg4: memref<1x16xf32, #tpu.memory_space<vmem>>, %arg5: memref<256x16xbf16, #tpu.memory_space<vmem>>) attributes {dimension_semantics = [#tpu.dimension_semantics<parallel>], iteration_bounds = array<i64: 2>, scalar_prefetch = 0 : i64, scratch_operands = 0 : i64, tpu.core_type = #tpu.core_type<tc>, window_params = [{transform_indices = @transform_0, window_bounds = array<i64: 256, 27>}, {pipeline_mode = #tpu.pipeline_mode<synchronous>, transform_indices = @transform_1, window_bounds = array<i64: 27, 16>}, {pipeline_mode = #tpu.pipeline_mode<synchronous>, transform_indices = @transform_2, window_bounds = array<i64: 1, 16>}, {pipeline_mode = #tpu.pipeline_mode<synchronous>, transform_indices = @transform_3, window_bounds = array<i64: 1, 16>}, {transform_indices = @transform_4, window_bounds = array<i64: 256, 16>}]} {
    %c0 = arith.constant 0 : index
    %c0_0 = arith.constant 0 : index
    %0 = vector.load %arg1[%c0, %c0_0] : memref<256x27xbf16, #tpu.memory_space<vmem>>, vector<256x27xbf16>
    %c0_1 = arith.constant 0 : index
    %c0_2 = arith.constant 0 : index
    %1 = vector.load %arg2[%c0_1, %c0_2] : memref<27x16xbf16, #tpu.memory_space<vmem>>, vector<27x16xbf16>
    %cst = arith.constant dense<0.000000e+00> : vector<256x16xf32>
    %2 = tpu.matmul %0, %1, %cst {dimension_numbers = #tpu.dot_dimension_numbers<[1], [0], [0], [1], [0, 0, 1, 1], [], []>} : vector<256x27xbf16>, vector<27x16xbf16>, vector<256x16xf32> -> vector<256x16xf32>
    %c0_3 = arith.constant 0 : index
    %c0_4 = arith.constant 0 : index
    %3 = vector.load %arg3[%c0_3, %c0_4] : memref<1x16xf32, #tpu.memory_space<vmem>>, vector<1x16xf32>
    %4 = vector.broadcast %3 : vector<1x16xf32> to vector<256x16xf32>
    %5 = arith.mulf %2, %4 : vector<256x16xf32>
    %c0_5 = arith.constant 0 : index
    %c0_6 = arith.constant 0 : index
    %6 = vector.load %arg4[%c0_5, %c0_6] : memref<1x16xf32, #tpu.memory_space<vmem>>, vector<1x16xf32>
    %7 = vector.broadcast %6 : vector<1x16xf32> to vector<256x16xf32>
    %8 = arith.addf %5, %7 : vector<256x16xf32>
    %cst_7 = arith.constant 0.000000e+00 : f32
    %9 = vector.broadcast %cst_7 : f32 to vector<256x16xf32>
    %10 = arith.maximumf %8, %9 : vector<256x16xf32>
    %11 = arith.truncf %10 : vector<256x16xf32> to vector<256x16xbf16>
    %c0_8 = arith.constant 0 : index
    %c0_9 = arith.constant 0 : index
    %12 = vector.load %arg5[%c0_8, %c0_9] : memref<256x16xbf16, #tpu.memory_space<vmem>>, vector<256x16xbf16>
    tpu.vector_store %arg5[%c0_8, %c0_9], %11 {strides = array<i32>} : memref<256x16xbf16, #tpu.memory_space<vmem>>, vector<256x16xbf16>,
    return
  }
  func.func @transform_0(%arg0: i32) -> (i32, i32) {
    %c0_i32 = arith.constant 0 : i32
    %c0_i32_0 = arith.constant 0 : i32
    return %arg0, %c0_i32 : i32, i32
  }
  func.func @transform_1(%arg0: i32) -> (i32, i32) {
    %c0_i32 = arith.constant 0 : i32
    %c0_i32_0 = arith.constant 0 : i32
    %c0_i32_1 = arith.constant 0 : i32
    return %c0_i32, %c0_i32_0 : i32, i32
  }
  func.func @transform_2(%arg0: i32) -> (i32, i32) {
    %c0_i32 = arith.constant 0 : i32
    %c0_i32_0 = arith.constant 0 : i32
    %c0_i32_1 = arith.constant 0 : i32
    return %c0_i32, %c0_i32_0 : i32, i32
  }
  func.func @transform_3(%arg0: i32) -> (i32, i32) {
    %c0_i32 = arith.constant 0 : i32
    %c0_i32_0 = arith.constant 0 : i32
    %c0_i32_1 = arith.constant 0 : i32
    return %c0_i32, %c0_i32_0 : i32, i32
  }
  func.func @transform_4(%arg0: i32) -> (i32, i32) {
    %c0_i32 = arith.constant 0 : i32
    %c0_i32_0 = arith.constant 0 : i32
    return %arg0, %c0_i32 : i32, i32
  }
}

module attributes {stable_mosaic.version = 11 : i64} {
  func.func @_fused_mm_kernel(%arg0: i32, %arg1: memref<128x144xbf16, #tpu.memory_space<vmem>>, %arg2: memref<144x16xbf16, #tpu.memory_space<vmem>>, %arg3: memref<1x16xf32, #tpu.memory_space<vmem>>, %arg4: memref<1x16xf32, #tpu.memory_space<vmem>>, %arg5: memref<128x16xbf16, #tpu.memory_space<vmem>>) attributes {dimension_semantics = [#tpu.dimension_semantics<parallel>], iteration_bounds = array<i64: 1>, scalar_prefetch = 0 : i64, scratch_operands = 0 : i64, tpu.core_type = #tpu.core_type<tc>, window_params = [{transform_indices = @transform_0, window_bounds = array<i64: 128, 144>}, {pipeline_mode = #tpu.pipeline_mode<synchronous>, transform_indices = @transform_1, window_bounds = array<i64: 144, 16>}, {pipeline_mode = #tpu.pipeline_mode<synchronous>, transform_indices = @transform_2, window_bounds = array<i64: 1, 16>}, {pipeline_mode = #tpu.pipeline_mode<synchronous>, transform_indices = @transform_3, window_bounds = array<i64: 1, 16>}, {transform_indices = @transform_4, window_bounds = array<i64: 128, 16>}]} {
    %c0 = arith.constant 0 : index
    %c0_0 = arith.constant 0 : index
    %0 = vector.load %arg1[%c0, %c0_0] : memref<128x144xbf16, #tpu.memory_space<vmem>>, vector<128x144xbf16>
    %c0_1 = arith.constant 0 : index
    %c0_2 = arith.constant 0 : index
    %1 = vector.load %arg2[%c0_1, %c0_2] : memref<144x16xbf16, #tpu.memory_space<vmem>>, vector<144x16xbf16>
    %cst = arith.constant dense<0.000000e+00> : vector<128x16xf32>
    %2 = tpu.matmul %0, %1, %cst {dimension_numbers = #tpu.dot_dimension_numbers<[1], [0], [0], [1], [0, 0, 1, 1], [], []>} : vector<128x144xbf16>, vector<144x16xbf16>, vector<128x16xf32> -> vector<128x16xf32>
    %c0_3 = arith.constant 0 : index
    %c0_4 = arith.constant 0 : index
    %3 = vector.load %arg3[%c0_3, %c0_4] : memref<1x16xf32, #tpu.memory_space<vmem>>, vector<1x16xf32>
    %4 = vector.broadcast %3 : vector<1x16xf32> to vector<128x16xf32>
    %5 = arith.mulf %2, %4 : vector<128x16xf32>
    %c0_5 = arith.constant 0 : index
    %c0_6 = arith.constant 0 : index
    %6 = vector.load %arg4[%c0_5, %c0_6] : memref<1x16xf32, #tpu.memory_space<vmem>>, vector<1x16xf32>
    %7 = vector.broadcast %6 : vector<1x16xf32> to vector<128x16xf32>
    %8 = arith.addf %5, %7 : vector<128x16xf32>
    %cst_7 = arith.constant 0.000000e+00 : f32
    %9 = vector.broadcast %cst_7 : f32 to vector<128x16xf32>
    %10 = arith.maximumf %8, %9 : vector<128x16xf32>
    %11 = arith.truncf %10 : vector<128x16xf32> to vector<128x16xbf16>
    %c0_8 = arith.constant 0 : index
    %c0_9 = arith.constant 0 : index
    %12 = vector.load %arg5[%c0_8, %c0_9] : memref<128x16xbf16, #tpu.memory_space<vmem>>, vector<128x16xbf16>
    tpu.vector_store %arg5[%c0_8, %c0_9], %11 {strides = array<i32>} : memref<128x16xbf16, #tpu.memory_space<vmem>>, vector<128x16xbf16>,
    return
  }
  func.func @transform_0(%arg0: i32) -> (i32, i32) {
    %c0_i32 = arith.constant 0 : i32
    %c0_i32_0 = arith.constant 0 : i32
    return %arg0, %c0_i32 : i32, i32
  }
  func.func @transform_1(%arg0: i32) -> (i32, i32) {
    %c0_i32 = arith.constant 0 : i32
    %c0_i32_0 = arith.constant 0 : i32
    %c0_i32_1 = arith.constant 0 : i32
    return %c0_i32, %c0_i32_0 : i32, i32
  }
  func.func @transform_2(%arg0: i32) -> (i32, i32) {
    %c0_i32 = arith.constant 0 : i32
    %c0_i32_0 = arith.constant 0 : i32
    %c0_i32_1 = arith.constant 0 : i32
    return %c0_i32, %c0_i32_0 : i32, i32
  }
  func.func @transform_3(%arg0: i32) -> (i32, i32) {
    %c0_i32 = arith.constant 0 : i32
    %c0_i32_0 = arith.constant 0 : i32
    %c0_i32_1 = arith.constant 0 : i32
    return %c0_i32, %c0_i32_0 : i32, i32
  }
  func.func @transform_4(%arg0: i32) -> (i32, i32) {
    %c0_i32 = arith.constant 0 : i32
    %c0_i32_0 = arith.constant 0 : i32
    return %arg0, %c0_i32 : i32, i32
  }
}

module attributes {stable_mosaic.version = 11 : i64} {
  func.func @_fused_mm_kernel(%arg0: i32, %arg1: memref<32x144xbf16, #tpu.memory_space<vmem>>, %arg2: memref<144x32xbf16, #tpu.memory_space<vmem>>, %arg3: memref<1x32xf32, #tpu.memory_space<vmem>>, %arg4: memref<1x32xf32, #tpu.memory_space<vmem>>, %arg5: memref<32x32xbf16, #tpu.memory_space<vmem>>) attributes {dimension_semantics = [#tpu.dimension_semantics<parallel>], iteration_bounds = array<i64: 1>, scalar_prefetch = 0 : i64, scratch_operands = 0 : i64, tpu.core_type = #tpu.core_type<tc>, window_params = [{transform_indices = @transform_0, window_bounds = array<i64: 32, 144>}, {pipeline_mode = #tpu.pipeline_mode<synchronous>, transform_indices = @transform_1, window_bounds = array<i64: 144, 32>}, {pipeline_mode = #tpu.pipeline_mode<synchronous>, transform_indices = @transform_2, window_bounds = array<i64: 1, 32>}, {pipeline_mode = #tpu.pipeline_mode<synchronous>, transform_indices = @transform_3, window_bounds = array<i64: 1, 32>}, {transform_indices = @transform_4, window_bounds = array<i64: 32, 32>}]} {
    %c0 = arith.constant 0 : index
    %c0_0 = arith.constant 0 : index
    %0 = vector.load %arg1[%c0, %c0_0] : memref<32x144xbf16, #tpu.memory_space<vmem>>, vector<32x144xbf16>
    %c0_1 = arith.constant 0 : index
    %c0_2 = arith.constant 0 : index
    %1 = vector.load %arg2[%c0_1, %c0_2] : memref<144x32xbf16, #tpu.memory_space<vmem>>, vector<144x32xbf16>
    %cst = arith.constant dense<0.000000e+00> : vector<32x32xf32>
    %2 = tpu.matmul %0, %1, %cst {dimension_numbers = #tpu.dot_dimension_numbers<[1], [0], [0], [1], [0, 0, 1, 1], [], []>} : vector<32x144xbf16>, vector<144x32xbf16>, vector<32x32xf32> -> vector<32x32xf32>
    %c0_3 = arith.constant 0 : index
    %c0_4 = arith.constant 0 : index
    %3 = vector.load %arg3[%c0_3, %c0_4] : memref<1x32xf32, #tpu.memory_space<vmem>>, vector<1x32xf32>
    %4 = vector.broadcast %3 : vector<1x32xf32> to vector<32x32xf32>
    %5 = arith.mulf %2, %4 : vector<32x32xf32>
    %c0_5 = arith.constant 0 : index
    %c0_6 = arith.constant 0 : index
    %6 = vector.load %arg4[%c0_5, %c0_6] : memref<1x32xf32, #tpu.memory_space<vmem>>, vector<1x32xf32>
    %7 = vector.broadcast %6 : vector<1x32xf32> to vector<32x32xf32>
    %8 = arith.addf %5, %7 : vector<32x32xf32>
    %cst_7 = arith.constant 0.000000e+00 : f32
    %9 = vector.broadcast %cst_7 : f32 to vector<32x32xf32>
    %10 = arith.maximumf %8, %9 : vector<32x32xf32>
    %11 = arith.truncf %10 : vector<32x32xf32> to vector<32x32xbf16>
    %c0_8 = arith.constant 0 : index
    %c0_9 = arith.constant 0 : index
    %12 = vector.load %arg5[%c0_8, %c0_9] : memref<32x32xbf16, #tpu.memory_space<vmem>>, vector<32x32xbf16>
    tpu.vector_store %arg5[%c0_8, %c0_9], %11 {strides = array<i32>} : memref<32x32xbf16, #tpu.memory_space<vmem>>, vector<32x32xbf16>,
    return
  }
  func.func @transform_0(%arg0: i32) -> (i32, i32) {
    %c0_i32 = arith.constant 0 : i32
    %c0_i32_0 = arith.constant 0 : i32
    return %arg0, %c0_i32 : i32, i32
  }
  func.func @transform_1(%arg0: i32) -> (i32, i32) {
    %c0_i32 = arith.constant 0 : i32
    %c0_i32_0 = arith.constant 0 : i32
    %c0_i32_1 = arith.constant 0 : i32
    return %c0_i32, %c0_i32_0 : i32, i32
  }
  func.func @transform_2(%arg0: i32) -> (i32, i32) {
    %c0_i32 = arith.constant 0 : i32
    %c0_i32_0 = arith.constant 0 : i32
    %c0_i32_1 = arith.constant 0 : i32
    return %c0_i32, %c0_i32_0 : i32, i32
  }
  func.func @transform_3(%arg0: i32) -> (i32, i32) {
    %c0_i32 = arith.constant 0 : i32
    %c0_i32_0 = arith.constant 0 : i32
    %c0_i32_1 = arith.constant 0 : i32
    return %c0_i32, %c0_i32_0 : i32, i32
  }
  func.func @transform_4(%arg0: i32) -> (i32, i32) {
    %c0_i32 = arith.constant 0 : i32
    %c0_i32_0 = arith.constant 0 : i32
    return %arg0, %c0_i32 : i32, i32
  }
}

module attributes {stable_mosaic.version = 11 : i64} {
  func.func @_fused_mm_kernel(%arg0: i32, %arg1: memref<8x288xbf16, #tpu.memory_space<vmem>>, %arg2: memref<288x64xbf16, #tpu.memory_space<vmem>>, %arg3: memref<1x64xf32, #tpu.memory_space<vmem>>, %arg4: memref<1x64xf32, #tpu.memory_space<vmem>>, %arg5: memref<8x64xbf16, #tpu.memory_space<vmem>>) attributes {dimension_semantics = [#tpu.dimension_semantics<parallel>], iteration_bounds = array<i64: 1>, scalar_prefetch = 0 : i64, scratch_operands = 0 : i64, tpu.core_type = #tpu.core_type<tc>, window_params = [{transform_indices = @transform_0, window_bounds = array<i64: 8, 288>}, {pipeline_mode = #tpu.pipeline_mode<synchronous>, transform_indices = @transform_1, window_bounds = array<i64: 288, 64>}, {pipeline_mode = #tpu.pipeline_mode<synchronous>, transform_indices = @transform_2, window_bounds = array<i64: 1, 64>}, {pipeline_mode = #tpu.pipeline_mode<synchronous>, transform_indices = @transform_3, window_bounds = array<i64: 1, 64>}, {transform_indices = @transform_4, window_bounds = array<i64: 8, 64>}]} {
    %c0 = arith.constant 0 : index
    %c0_0 = arith.constant 0 : index
    %0 = vector.load %arg1[%c0, %c0_0] : memref<8x288xbf16, #tpu.memory_space<vmem>>, vector<8x288xbf16>
    %c0_1 = arith.constant 0 : index
    %c0_2 = arith.constant 0 : index
    %1 = vector.load %arg2[%c0_1, %c0_2] : memref<288x64xbf16, #tpu.memory_space<vmem>>, vector<288x64xbf16>
    %cst = arith.constant dense<0.000000e+00> : vector<8x64xf32>
    %2 = tpu.matmul %0, %1, %cst {dimension_numbers = #tpu.dot_dimension_numbers<[1], [0], [0], [1], [0, 0, 1, 1], [], []>} : vector<8x288xbf16>, vector<288x64xbf16>, vector<8x64xf32> -> vector<8x64xf32>
    %c0_3 = arith.constant 0 : index
    %c0_4 = arith.constant 0 : index
    %3 = vector.load %arg3[%c0_3, %c0_4] : memref<1x64xf32, #tpu.memory_space<vmem>>, vector<1x64xf32>
    %4 = vector.broadcast %3 : vector<1x64xf32> to vector<8x64xf32>
    %5 = arith.mulf %2, %4 : vector<8x64xf32>
    %c0_5 = arith.constant 0 : index
    %c0_6 = arith.constant 0 : index
    %6 = vector.load %arg4[%c0_5, %c0_6] : memref<1x64xf32, #tpu.memory_space<vmem>>, vector<1x64xf32>
    %7 = vector.broadcast %6 : vector<1x64xf32> to vector<8x64xf32>
    %8 = arith.addf %5, %7 : vector<8x64xf32>
    %cst_7 = arith.constant 0.000000e+00 : f32
    %9 = vector.broadcast %cst_7 : f32 to vector<8x64xf32>
    %10 = arith.maximumf %8, %9 : vector<8x64xf32>
    %11 = arith.truncf %10 : vector<8x64xf32> to vector<8x64xbf16>
    %c0_8 = arith.constant 0 : index
    %c0_9 = arith.constant 0 : index
    %12 = vector.load %arg5[%c0_8, %c0_9] : memref<8x64xbf16, #tpu.memory_space<vmem>>, vector<8x64xbf16>
    tpu.vector_store %arg5[%c0_8, %c0_9], %11 {strides = array<i32>} : memref<8x64xbf16, #tpu.memory_space<vmem>>, vector<8x64xbf16>,
    return
  }
  func.func @transform_0(%arg0: i32) -> (i32, i32) {
    %c0_i32 = arith.constant 0 : i32
    %c0_i32_0 = arith.constant 0 : i32
    return %arg0, %c0_i32 : i32, i32
  }
  func.func @transform_1(%arg0: i32) -> (i32, i32) {
    %c0_i32 = arith.constant 0 : i32
    %c0_i32_0 = arith.constant 0 : i32
    %c0_i32_1 = arith.constant 0 : i32
    return %c0_i32, %c0_i32_0 : i32, i32
  }
  func.func @transform_2(%arg0: i32) -> (i32, i32) {
    %c0_i32 = arith.constant 0 : i32
    %c0_i32_0 = arith.constant 0 : i32
    %c0_i32_1 = arith.constant 0 : i32
    return %c0_i32, %c0_i32_0 : i32, i32
  }
  func.func @transform_3(%arg0: i32) -> (i32, i32) {
    %c0_i32 = arith.constant 0 : i32
    %c0_i32_0 = arith.constant 0 : i32
    %c0_i32_1 = arith.constant 0 : i32
    return %c0_i32, %c0_i32_0 : i32, i32
  }
  func.func @transform_4(%arg0: i32) -> (i32, i32) {
    %c0_i32 = arith.constant 0 : i32
    %c0_i32_0 = arith.constant 0 : i32
    return %arg0, %c0_i32 : i32, i32
  }
}

module attributes {stable_mosaic.version = 11 : i64} {
  func.func @_fused_mm_kernel(%arg0: i32, %arg1: memref<8x576xbf16, #tpu.memory_space<vmem>>, %arg2: memref<576x128xbf16, #tpu.memory_space<vmem>>, %arg3: memref<1x128xf32, #tpu.memory_space<vmem>>, %arg4: memref<1x128xf32, #tpu.memory_space<vmem>>, %arg5: memref<8x128xbf16, #tpu.memory_space<vmem>>) attributes {dimension_semantics = [#tpu.dimension_semantics<parallel>], iteration_bounds = array<i64: 1>, scalar_prefetch = 0 : i64, scratch_operands = 0 : i64, tpu.core_type = #tpu.core_type<tc>, window_params = [{transform_indices = @transform_0, window_bounds = array<i64: 8, 576>}, {pipeline_mode = #tpu.pipeline_mode<synchronous>, transform_indices = @transform_1, window_bounds = array<i64: 576, 128>}, {pipeline_mode = #tpu.pipeline_mode<synchronous>, transform_indices = @transform_2, window_bounds = array<i64: 1, 128>}, {pipeline_mode = #tpu.pipeline_mode<synchronous>, transform_indices = @transform_3, window_bounds = array<i64: 1, 128>}, {transform_indices = @transform_4, window_bounds = array<i64: 8, 128>}]} {
    %c0 = arith.constant 0 : index
    %c0_0 = arith.constant 0 : index
    %0 = vector.load %arg1[%c0, %c0_0] : memref<8x576xbf16, #tpu.memory_space<vmem>>, vector<8x576xbf16>
    %c0_1 = arith.constant 0 : index
    %c0_2 = arith.constant 0 : index
    %1 = vector.load %arg2[%c0_1, %c0_2] : memref<576x128xbf16, #tpu.memory_space<vmem>>, vector<576x128xbf16>
    %cst = arith.constant dense<0.000000e+00> : vector<8x128xf32>
    %2 = tpu.matmul %0, %1, %cst {dimension_numbers = #tpu.dot_dimension_numbers<[1], [0], [0], [1], [0, 0, 1, 1], [], []>} : vector<8x576xbf16>, vector<576x128xbf16>, vector<8x128xf32> -> vector<8x128xf32>
    %c0_3 = arith.constant 0 : index
    %c0_4 = arith.constant 0 : index
    %3 = vector.load %arg3[%c0_3, %c0_4] : memref<1x128xf32, #tpu.memory_space<vmem>>, vector<1x128xf32>
    %4 = vector.broadcast %3 : vector<1x128xf32> to vector<8x128xf32>
    %5 = arith.mulf %2, %4 : vector<8x128xf32>
    %c0_5 = arith.constant 0 : index
    %c0_6 = arith.constant 0 : index
    %6 = vector.load %arg4[%c0_5, %c0_6] : memref<1x128xf32, #tpu.memory_space<vmem>>, vector<1x128xf32>
    %7 = vector.broadcast %6 : vector<1x128xf32> to vector<8x128xf32>
    %8 = arith.addf %5, %7 : vector<8x128xf32>
    %cst_7 = arith.constant 0.000000e+00 : f32
    %9 = vector.broadcast %cst_7 : f32 to vector<8x128xf32>
    %10 = arith.maximumf %8, %9 : vector<8x128xf32>
    %11 = arith.truncf %10 : vector<8x128xf32> to vector<8x128xbf16>
    %c0_8 = arith.constant 0 : index
    %c0_9 = arith.constant 0 : index
    %12 = vector.load %arg5[%c0_8, %c0_9] : memref<8x128xbf16, #tpu.memory_space<vmem>>, vector<8x128xbf16>
    tpu.vector_store %arg5[%c0_8, %c0_9], %11 {strides = array<i32>} : memref<8x128xbf16, #tpu.memory_space<vmem>>, vector<8x128xbf16>,
    return
  }
  func.func @transform_0(%arg0: i32) -> (i32, i32) {
    %c0_i32 = arith.constant 0 : i32
    %c0_i32_0 = arith.constant 0 : i32
    return %arg0, %c0_i32 : i32, i32
  }
  func.func @transform_1(%arg0: i32) -> (i32, i32) {
    %c0_i32 = arith.constant 0 : i32
    %c0_i32_0 = arith.constant 0 : i32
    %c0_i32_1 = arith.constant 0 : i32
    return %c0_i32, %c0_i32_0 : i32, i32
  }
  func.func @transform_2(%arg0: i32) -> (i32, i32) {
    %c0_i32 = arith.constant 0 : i32
    %c0_i32_0 = arith.constant 0 : i32
    %c0_i32_1 = arith.constant 0 : i32
    return %c0_i32, %c0_i32_0 : i32, i32
  }
  func.func @transform_3(%arg0: i32) -> (i32, i32) {
    %c0_i32 = arith.constant 0 : i32
    %c0_i32_0 = arith.constant 0 : i32
    %c0_i32_1 = arith.constant 0 : i32
    return %c0_i32, %c0_i32_0 : i32, i32
  }
  func.func @transform_4(%arg0: i32) -> (i32, i32) {
    %c0_i32 = arith.constant 0 : i32
    %c0_i32_0 = arith.constant 0 : i32
    return %arg0, %c0_i32 : i32, i32
  }
}

module attributes {stable_mosaic.version = 11 : i64} {
  func.func @_fused_mm_kernel(%arg0: i32, %arg1: memref<8x128xbf16, #tpu.memory_space<vmem>>, %arg2: memref<128x64xbf16, #tpu.memory_space<vmem>>, %arg3: memref<8x64xbf16, #tpu.memory_space<vmem>>, %arg4: memref<64x64xbf16, #tpu.memory_space<vmem>>, %arg5: memref<1x64xf32, #tpu.memory_space<vmem>>, %arg6: memref<1x64xf32, #tpu.memory_space<vmem>>, %arg7: memref<8x64xbf16, #tpu.memory_space<vmem>>) attributes {dimension_semantics = [#tpu.dimension_semantics<parallel>], iteration_bounds = array<i64: 1>, scalar_prefetch = 0 : i64, scratch_operands = 0 : i64, tpu.core_type = #tpu.core_type<tc>, window_params = [{transform_indices = @transform_0, window_bounds = array<i64: 8, 128>}, {pipeline_mode = #tpu.pipeline_mode<synchronous>, transform_indices = @transform_1, window_bounds = array<i64: 128, 64>}, {transform_indices = @transform_2, window_bounds = array<i64: 8, 64>}, {pipeline_mode = #tpu.pipeline_mode<synchronous>, transform_indices = @transform_3, window_bounds = array<i64: 64, 64>}, {pipeline_mode = #tpu.pipeline_mode<synchronous>, transform_indices = @transform_4, window_bounds = array<i64: 1, 64>}, {pipeline_mode = #tpu.pipeline_mode<synchronous>, transform_indices = @transform_5, window_bounds = array<i64: 1, 64>}, {transform_indices = @transform_6, window_bounds = array<i64: 8, 64>}]} {
    %c0 = arith.constant 0 : index
    %c0_0 = arith.constant 0 : index
    %0 = vector.load %arg1[%c0, %c0_0] : memref<8x128xbf16, #tpu.memory_space<vmem>>, vector<8x128xbf16>
    %c0_1 = arith.constant 0 : index
    %c0_2 = arith.constant 0 : index
    %1 = vector.load %arg2[%c0_1, %c0_2] : memref<128x64xbf16, #tpu.memory_space<vmem>>, vector<128x64xbf16>
    %cst = arith.constant dense<0.000000e+00> : vector<8x64xf32>
    %2 = tpu.matmul %0, %1, %cst {dimension_numbers = #tpu.dot_dimension_numbers<[1], [0], [0], [1], [0, 0, 1, 1], [], []>} : vector<8x128xbf16>, vector<128x64xbf16>, vector<8x64xf32> -> vector<8x64xf32>
    %c0_3 = arith.constant 0 : index
    %c0_4 = arith.constant 0 : index
    %3 = vector.load %arg3[%c0_3, %c0_4] : memref<8x64xbf16, #tpu.memory_space<vmem>>, vector<8x64xbf16>
    %c0_5 = arith.constant 0 : index
    %c0_6 = arith.constant 0 : index
    %4 = vector.load %arg4[%c0_5, %c0_6] : memref<64x64xbf16, #tpu.memory_space<vmem>>, vector<64x64xbf16>
    %cst_7 = arith.constant dense<0.000000e+00> : vector<8x64xf32>
    %5 = tpu.matmul %3, %4, %cst_7 {dimension_numbers = #tpu.dot_dimension_numbers<[1], [0], [0], [1], [0, 0, 1, 1], [], []>} : vector<8x64xbf16>, vector<64x64xbf16>, vector<8x64xf32> -> vector<8x64xf32>
    %6 = arith.addf %2, %5 : vector<8x64xf32>
    %c0_8 = arith.constant 0 : index
    %c0_9 = arith.constant 0 : index
    %7 = vector.load %arg5[%c0_8, %c0_9] : memref<1x64xf32, #tpu.memory_space<vmem>>, vector<1x64xf32>
    %8 = vector.broadcast %7 : vector<1x64xf32> to vector<8x64xf32>
    %9 = arith.mulf %6, %8 : vector<8x64xf32>
    %c0_10 = arith.constant 0 : index
    %c0_11 = arith.constant 0 : index
    %10 = vector.load %arg6[%c0_10, %c0_11] : memref<1x64xf32, #tpu.memory_space<vmem>>, vector<1x64xf32>
    %11 = vector.broadcast %10 : vector<1x64xf32> to vector<8x64xf32>
    %12 = arith.addf %9, %11 : vector<8x64xf32>
    %cst_12 = arith.constant 0.000000e+00 : f32
    %13 = vector.broadcast %cst_12 : f32 to vector<8x64xf32>
    %14 = arith.maximumf %12, %13 : vector<8x64xf32>
    %15 = arith.truncf %14 : vector<8x64xf32> to vector<8x64xbf16>
    %c0_13 = arith.constant 0 : index
    %c0_14 = arith.constant 0 : index
    %16 = vector.load %arg7[%c0_13, %c0_14] : memref<8x64xbf16, #tpu.memory_space<vmem>>, vector<8x64xbf16>
    tpu.vector_store %arg7[%c0_13, %c0_14], %15 {strides = array<i32>} : memref<8x64xbf16, #tpu.memory_space<vmem>>, vector<8x64xbf16>,
    return
  }
  func.func @transform_0(%arg0: i32) -> (i32, i32) {
    %c0_i32 = arith.constant 0 : i32
    %c0_i32_0 = arith.constant 0 : i32
    return %arg0, %c0_i32 : i32, i32
  }
  func.func @transform_1(%arg0: i32) -> (i32, i32) {
    %c0_i32 = arith.constant 0 : i32
    %c0_i32_0 = arith.constant 0 : i32
    %c0_i32_1 = arith.constant 0 : i32
    return %c0_i32, %c0_i32_0 : i32, i32
  }
  func.func @transform_2(%arg0: i32) -> (i32, i32) {
    %c0_i32 = arith.constant 0 : i32
    %c0_i32_0 = arith.constant 0 : i32
    return %arg0, %c0_i32 : i32, i32
  }
  func.func @transform_3(%arg0: i32) -> (i32, i32) {
    %c0_i32 = arith.constant 0 : i32
    %c0_i32_0 = arith.constant 0 : i32
    %c0_i32_1 = arith.constant 0 : i32
    return %c0_i32, %c0_i32_0 : i32, i32
  }
  func.func @transform_4(%arg0: i32) -> (i32, i32) {
    %c0_i32 = arith.constant 0 : i32
    %c0_i32_0 = arith.constant 0 : i32
    %c0_i32_1 = arith.constant 0 : i32
    return %c0_i32, %c0_i32_0 : i32, i32
  }
  func.func @transform_5(%arg0: i32) -> (i32, i32) {
    %c0_i32 = arith.constant 0 : i32
    %c0_i32_0 = arith.constant 0 : i32
    %c0_i32_1 = arith.constant 0 : i32
    return %c0_i32, %c0_i32_0 : i32, i32
  }
  func.func @transform_6(%arg0: i32) -> (i32, i32) {
    %c0_i32 = arith.constant 0 : i32
    %c0_i32_0 = arith.constant 0 : i32
    return %arg0, %c0_i32 : i32, i32
  }
}

module attributes {stable_mosaic.version = 11 : i64} {
  func.func @_fused_mm_kernel(%arg0: i32, %arg1: memref<32x64xbf16, #tpu.memory_space<vmem>>, %arg2: memref<64x64xbf16, #tpu.memory_space<vmem>>, %arg3: memref<32x32xbf16, #tpu.memory_space<vmem>>, %arg4: memref<32x64xbf16, #tpu.memory_space<vmem>>, %arg5: memref<1x64xf32, #tpu.memory_space<vmem>>, %arg6: memref<1x64xf32, #tpu.memory_space<vmem>>, %arg7: memref<32x64xbf16, #tpu.memory_space<vmem>>) attributes {dimension_semantics = [#tpu.dimension_semantics<parallel>], iteration_bounds = array<i64: 1>, scalar_prefetch = 0 : i64, scratch_operands = 0 : i64, tpu.core_type = #tpu.core_type<tc>, window_params = [{transform_indices = @transform_0, window_bounds = array<i64: 32, 64>}, {pipeline_mode = #tpu.pipeline_mode<synchronous>, transform_indices = @transform_1, window_bounds = array<i64: 64, 64>}, {transform_indices = @transform_2, window_bounds = array<i64: 32, 32>}, {pipeline_mode = #tpu.pipeline_mode<synchronous>, transform_indices = @transform_3, window_bounds = array<i64: 32, 64>}, {pipeline_mode = #tpu.pipeline_mode<synchronous>, transform_indices = @transform_4, window_bounds = array<i64: 1, 64>}, {pipeline_mode = #tpu.pipeline_mode<synchronous>, transform_indices = @transform_5, window_bounds = array<i64: 1, 64>}, {transform_indices = @transform_6, window_bounds = array<i64: 32, 64>}]} {
    %c0 = arith.constant 0 : index
    %c0_0 = arith.constant 0 : index
    %0 = vector.load %arg1[%c0, %c0_0] : memref<32x64xbf16, #tpu.memory_space<vmem>>, vector<32x64xbf16>
    %c0_1 = arith.constant 0 : index
    %c0_2 = arith.constant 0 : index
    %1 = vector.load %arg2[%c0_1, %c0_2] : memref<64x64xbf16, #tpu.memory_space<vmem>>, vector<64x64xbf16>
    %cst = arith.constant dense<0.000000e+00> : vector<32x64xf32>
    %2 = tpu.matmul %0, %1, %cst {dimension_numbers = #tpu.dot_dimension_numbers<[1], [0], [0], [1], [0, 0, 1, 1], [], []>} : vector<32x64xbf16>, vector<64x64xbf16>, vector<32x64xf32> -> vector<32x64xf32>
    %c0_3 = arith.constant 0 : index
    %c0_4 = arith.constant 0 : index
    %3 = vector.load %arg3[%c0_3, %c0_4] : memref<32x32xbf16, #tpu.memory_space<vmem>>, vector<32x32xbf16>
    %c0_5 = arith.constant 0 : index
    %c0_6 = arith.constant 0 : index
    %4 = vector.load %arg4[%c0_5, %c0_6] : memref<32x64xbf16, #tpu.memory_space<vmem>>, vector<32x64xbf16>
    %cst_7 = arith.constant dense<0.000000e+00> : vector<32x64xf32>
    %5 = tpu.matmul %3, %4, %cst_7 {dimension_numbers = #tpu.dot_dimension_numbers<[1], [0], [0], [1], [0, 0, 1, 1], [], []>} : vector<32x32xbf16>, vector<32x64xbf16>, vector<32x64xf32> -> vector<32x64xf32>
    %6 = arith.addf %2, %5 : vector<32x64xf32>
    %c0_8 = arith.constant 0 : index
    %c0_9 = arith.constant 0 : index
    %7 = vector.load %arg5[%c0_8, %c0_9] : memref<1x64xf32, #tpu.memory_space<vmem>>, vector<1x64xf32>
    %8 = vector.broadcast %7 : vector<1x64xf32> to vector<32x64xf32>
    %9 = arith.mulf %6, %8 : vector<32x64xf32>
    %c0_10 = arith.constant 0 : index
    %c0_11 = arith.constant 0 : index
    %10 = vector.load %arg6[%c0_10, %c0_11] : memref<1x64xf32, #tpu.memory_space<vmem>>, vector<1x64xf32>
    %11 = vector.broadcast %10 : vector<1x64xf32> to vector<32x64xf32>
    %12 = arith.addf %9, %11 : vector<32x64xf32>
    %cst_12 = arith.constant 0.000000e+00 : f32
    %13 = vector.broadcast %cst_12 : f32 to vector<32x64xf32>
    %14 = arith.maximumf %12, %13 : vector<32x64xf32>
    %15 = arith.truncf %14 : vector<32x64xf32> to vector<32x64xbf16>
    %c0_13 = arith.constant 0 : index
    %c0_14 = arith.constant 0 : index
    %16 = vector.load %arg7[%c0_13, %c0_14] : memref<32x64xbf16, #tpu.memory_space<vmem>>, vector<32x64xbf16>
    tpu.vector_store %arg7[%c0_13, %c0_14], %15 {strides = array<i32>} : memref<32x64xbf16, #tpu.memory_space<vmem>>, vector<32x64xbf16>,
    return
  }
  func.func @transform_0(%arg0: i32) -> (i32, i32) {
    %c0_i32 = arith.constant 0 : i32
    %c0_i32_0 = arith.constant 0 : i32
    return %arg0, %c0_i32 : i32, i32
  }
  func.func @transform_1(%arg0: i32) -> (i32, i32) {
    %c0_i32 = arith.constant 0 : i32
    %c0_i32_0 = arith.constant 0 : i32
    %c0_i32_1 = arith.constant 0 : i32
    return %c0_i32, %c0_i32_0 : i32, i32
  }
  func.func @transform_2(%arg0: i32) -> (i32, i32) {
    %c0_i32 = arith.constant 0 : i32
    %c0_i32_0 = arith.constant 0 : i32
    return %arg0, %c0_i32 : i32, i32
  }
  func.func @transform_3(%arg0: i32) -> (i32, i32) {
    %c0_i32 = arith.constant 0 : i32
    %c0_i32_0 = arith.constant 0 : i32
    %c0_i32_1 = arith.constant 0 : i32
    return %c0_i32, %c0_i32_0 : i32, i32
  }
  func.func @transform_4(%arg0: i32) -> (i32, i32) {
    %c0_i32 = arith.constant 0 : i32
    %c0_i32_0 = arith.constant 0 : i32
    %c0_i32_1 = arith.constant 0 : i32
    return %c0_i32, %c0_i32_0 : i32, i32
  }
  func.func @transform_5(%arg0: i32) -> (i32, i32) {
    %c0_i32 = arith.constant 0 : i32
    %c0_i32_0 = arith.constant 0 : i32
    %c0_i32_1 = arith.constant 0 : i32
    return %c0_i32, %c0_i32_0 : i32, i32
  }
  func.func @transform_6(%arg0: i32) -> (i32, i32) {
    %c0_i32 = arith.constant 0 : i32
    %c0_i32_0 = arith.constant 0 : i32
    return %arg0, %c0_i32 : i32, i32
  }
}

module attributes {stable_mosaic.version = 11 : i64} {
  func.func @_fused_mm_kernel(%arg0: i32, %arg1: memref<128x64xbf16, #tpu.memory_space<vmem>>, %arg2: memref<64x64xbf16, #tpu.memory_space<vmem>>, %arg3: memref<128x16xbf16, #tpu.memory_space<vmem>>, %arg4: memref<16x64xbf16, #tpu.memory_space<vmem>>, %arg5: memref<1x64xf32, #tpu.memory_space<vmem>>, %arg6: memref<1x64xf32, #tpu.memory_space<vmem>>, %arg7: memref<128x64xbf16, #tpu.memory_space<vmem>>) attributes {dimension_semantics = [#tpu.dimension_semantics<parallel>], iteration_bounds = array<i64: 1>, scalar_prefetch = 0 : i64, scratch_operands = 0 : i64, tpu.core_type = #tpu.core_type<tc>, window_params = [{transform_indices = @transform_0, window_bounds = array<i64: 128, 64>}, {pipeline_mode = #tpu.pipeline_mode<synchronous>, transform_indices = @transform_1, window_bounds = array<i64: 64, 64>}, {transform_indices = @transform_2, window_bounds = array<i64: 128, 16>}, {pipeline_mode = #tpu.pipeline_mode<synchronous>, transform_indices = @transform_3, window_bounds = array<i64: 16, 64>}, {pipeline_mode = #tpu.pipeline_mode<synchronous>, transform_indices = @transform_4, window_bounds = array<i64: 1, 64>}, {pipeline_mode = #tpu.pipeline_mode<synchronous>, transform_indices = @transform_5, window_bounds = array<i64: 1, 64>}, {transform_indices = @transform_6, window_bounds = array<i64: 128, 64>}]} {
    %c0 = arith.constant 0 : index
    %c0_0 = arith.constant 0 : index
    %0 = vector.load %arg1[%c0, %c0_0] : memref<128x64xbf16, #tpu.memory_space<vmem>>, vector<128x64xbf16>
    %c0_1 = arith.constant 0 : index
    %c0_2 = arith.constant 0 : index
    %1 = vector.load %arg2[%c0_1, %c0_2] : memref<64x64xbf16, #tpu.memory_space<vmem>>, vector<64x64xbf16>
    %cst = arith.constant dense<0.000000e+00> : vector<128x64xf32>
    %2 = tpu.matmul %0, %1, %cst {dimension_numbers = #tpu.dot_dimension_numbers<[1], [0], [0], [1], [0, 0, 1, 1], [], []>} : vector<128x64xbf16>, vector<64x64xbf16>, vector<128x64xf32> -> vector<128x64xf32>
    %c0_3 = arith.constant 0 : index
    %c0_4 = arith.constant 0 : index
    %3 = vector.load %arg3[%c0_3, %c0_4] : memref<128x16xbf16, #tpu.memory_space<vmem>>, vector<128x16xbf16>
    %c0_5 = arith.constant 0 : index
    %c0_6 = arith.constant 0 : index
    %4 = vector.load %arg4[%c0_5, %c0_6] : memref<16x64xbf16, #tpu.memory_space<vmem>>, vector<16x64xbf16>
    %cst_7 = arith.constant dense<0.000000e+00> : vector<128x64xf32>
    %5 = tpu.matmul %3, %4, %cst_7 {dimension_numbers = #tpu.dot_dimension_numbers<[1], [0], [0], [1], [0, 0, 1, 1], [], []>} : vector<128x16xbf16>, vector<16x64xbf16>, vector<128x64xf32> -> vector<128x64xf32>
    %6 = arith.addf %2, %5 : vector<128x64xf32>
    %c0_8 = arith.constant 0 : index
    %c0_9 = arith.constant 0 : index
    %7 = vector.load %arg5[%c0_8, %c0_9] : memref<1x64xf32, #tpu.memory_space<vmem>>, vector<1x64xf32>
    %8 = vector.broadcast %7 : vector<1x64xf32> to vector<128x64xf32>
    %9 = arith.mulf %6, %8 : vector<128x64xf32>
    %c0_10 = arith.constant 0 : index
    %c0_11 = arith.constant 0 : index
    %10 = vector.load %arg6[%c0_10, %c0_11] : memref<1x64xf32, #tpu.memory_space<vmem>>, vector<1x64xf32>
    %11 = vector.broadcast %10 : vector<1x64xf32> to vector<128x64xf32>
    %12 = arith.addf %9, %11 : vector<128x64xf32>
    %cst_12 = arith.constant 0.000000e+00 : f32
    %13 = vector.broadcast %cst_12 : f32 to vector<128x64xf32>
    %14 = arith.maximumf %12, %13 : vector<128x64xf32>
    %15 = arith.truncf %14 : vector<128x64xf32> to vector<128x64xbf16>
    %c0_13 = arith.constant 0 : index
    %c0_14 = arith.constant 0 : index
    %16 = vector.load %arg7[%c0_13, %c0_14] : memref<128x64xbf16, #tpu.memory_space<vmem>>, vector<128x64xbf16>
    tpu.vector_store %arg7[%c0_13, %c0_14], %15 {strides = array<i32>} : memref<128x64xbf16, #tpu.memory_space<vmem>>, vector<128x64xbf16>,
    return
  }
  func.func @transform_0(%arg0: i32) -> (i32, i32) {
    %c0_i32 = arith.constant 0 : i32
    %c0_i32_0 = arith.constant 0 : i32
    return %arg0, %c0_i32 : i32, i32
  }
  func.func @transform_1(%arg0: i32) -> (i32, i32) {
    %c0_i32 = arith.constant 0 : i32
    %c0_i32_0 = arith.constant 0 : i32
    %c0_i32_1 = arith.constant 0 : i32
    return %c0_i32, %c0_i32_0 : i32, i32
  }
  func.func @transform_2(%arg0: i32) -> (i32, i32) {
    %c0_i32 = arith.constant 0 : i32
    %c0_i32_0 = arith.constant 0 : i32
    return %arg0, %c0_i32 : i32, i32
  }
  func.func @transform_3(%arg0: i32) -> (i32, i32) {
    %c0_i32 = arith.constant 0 : i32
    %c0_i32_0 = arith.constant 0 : i32
    %c0_i32_1 = arith.constant 0 : i32
    return %c0_i32, %c0_i32_0 : i32, i32
  }
  func.func @transform_4(%arg0: i32) -> (i32, i32) {
    %c0_i32 = arith.constant 0 : i32
    %c0_i32_0 = arith.constant 0 : i32
    %c0_i32_1 = arith.constant 0 : i32
    return %c0_i32, %c0_i32_0 : i32, i32
  }
  func.func @transform_5(%arg0: i32) -> (i32, i32) {
    %c0_i32 = arith.constant 0 : i32
    %c0_i32_0 = arith.constant 0 : i32
    %c0_i32_1 = arith.constant 0 : i32
    return %c0_i32, %c0_i32_0 : i32, i32
  }
  func.func @transform_6(%arg0: i32) -> (i32, i32) {
    %c0_i32 = arith.constant 0 : i32
    %c0_i32_0 = arith.constant 0 : i32
    return %arg0, %c0_i32 : i32, i32
  }
}

module attributes {stable_mosaic.version = 11 : i64} {
  func.func @_fused_mm_kernel(%arg0: i32, %arg1: memref<128x64xbf16, #tpu.memory_space<vmem>>, %arg2: memref<64x64xbf16, #tpu.memory_space<vmem>>, %arg3: memref<1x64xf32, #tpu.memory_space<vmem>>, %arg4: memref<1x64xf32, #tpu.memory_space<vmem>>, %arg5: memref<128x64xbf16, #tpu.memory_space<vmem>>) attributes {dimension_semantics = [#tpu.dimension_semantics<parallel>], iteration_bounds = array<i64: 1>, scalar_prefetch = 0 : i64, scratch_operands = 0 : i64, tpu.core_type = #tpu.core_type<tc>, window_params = [{transform_indices = @transform_0, window_bounds = array<i64: 128, 64>}, {pipeline_mode = #tpu.pipeline_mode<synchronous>, transform_indices = @transform_1, window_bounds = array<i64: 64, 64>}, {pipeline_mode = #tpu.pipeline_mode<synchronous>, transform_indices = @transform_2, window_bounds = array<i64: 1, 64>}, {pipeline_mode = #tpu.pipeline_mode<synchronous>, transform_indices = @transform_3, window_bounds = array<i64: 1, 64>}, {transform_indices = @transform_4, window_bounds = array<i64: 128, 64>}]} {
    %c0 = arith.constant 0 : index
    %c0_0 = arith.constant 0 : index
    %0 = vector.load %arg1[%c0, %c0_0] : memref<128x64xbf16, #tpu.memory_space<vmem>>, vector<128x64xbf16>
    %c0_1 = arith.constant 0 : index
    %c0_2 = arith.constant 0 : index
    %1 = vector.load %arg2[%c0_1, %c0_2] : memref<64x64xbf16, #tpu.memory_space<vmem>>, vector<64x64xbf16>
    %cst = arith.constant dense<0.000000e+00> : vector<128x64xf32>
    %2 = tpu.matmul %0, %1, %cst {dimension_numbers = #tpu.dot_dimension_numbers<[1], [0], [0], [1], [0, 0, 1, 1], [], []>} : vector<128x64xbf16>, vector<64x64xbf16>, vector<128x64xf32> -> vector<128x64xf32>
    %c0_3 = arith.constant 0 : index
    %c0_4 = arith.constant 0 : index
    %3 = vector.load %arg3[%c0_3, %c0_4] : memref<1x64xf32, #tpu.memory_space<vmem>>, vector<1x64xf32>
    %4 = vector.broadcast %3 : vector<1x64xf32> to vector<128x64xf32>
    %5 = arith.mulf %2, %4 : vector<128x64xf32>
    %c0_5 = arith.constant 0 : index
    %c0_6 = arith.constant 0 : index
    %6 = vector.load %arg4[%c0_5, %c0_6] : memref<1x64xf32, #tpu.memory_space<vmem>>, vector<1x64xf32>
    %7 = vector.broadcast %6 : vector<1x64xf32> to vector<128x64xf32>
    %8 = arith.addf %5, %7 : vector<128x64xf32>
    %cst_7 = arith.constant 0.000000e+00 : f32
    %9 = vector.broadcast %cst_7 : f32 to vector<128x64xf32>
    %10 = arith.maximumf %8, %9 : vector<128x64xf32>
    %11 = arith.truncf %10 : vector<128x64xf32> to vector<128x64xbf16>
    %c0_8 = arith.constant 0 : index
    %c0_9 = arith.constant 0 : index
    %12 = vector.load %arg5[%c0_8, %c0_9] : memref<128x64xbf16, #tpu.memory_space<vmem>>, vector<128x64xbf16>
    tpu.vector_store %arg5[%c0_8, %c0_9], %11 {strides = array<i32>} : memref<128x64xbf16, #tpu.memory_space<vmem>>, vector<128x64xbf16>,
    return
  }
  func.func @transform_0(%arg0: i32) -> (i32, i32) {
    %c0_i32 = arith.constant 0 : i32
    %c0_i32_0 = arith.constant 0 : i32
    return %arg0, %c0_i32 : i32, i32
  }
  func.func @transform_1(%arg0: i32) -> (i32, i32) {
    %c0_i32 = arith.constant 0 : i32
    %c0_i32_0 = arith.constant 0 : i32
    %c0_i32_1 = arith.constant 0 : i32
    return %c0_i32, %c0_i32_0 : i32, i32
  }
  func.func @transform_2(%arg0: i32) -> (i32, i32) {
    %c0_i32 = arith.constant 0 : i32
    %c0_i32_0 = arith.constant 0 : i32
    %c0_i32_1 = arith.constant 0 : i32
    return %c0_i32, %c0_i32_0 : i32, i32
  }
  func.func @transform_3(%arg0: i32) -> (i32, i32) {
    %c0_i32 = arith.constant 0 : i32
    %c0_i32_0 = arith.constant 0 : i32
    %c0_i32_1 = arith.constant 0 : i32
    return %c0_i32, %c0_i32_0 : i32, i32
  }
  func.func @transform_4(%arg0: i32) -> (i32, i32) {
    %c0_i32 = arith.constant 0 : i32
    %c0_i32_0 = arith.constant 0 : i32
    return %arg0, %c0_i32 : i32, i32
  }
}

module attributes {stable_mosaic.version = 11 : i64} {
  func.func @_fused_mm_kernel(%arg0: i32, %arg1: memref<256x256xbf16, #tpu.memory_space<vmem>>, %arg2: memref<256x264xbf16, #tpu.memory_space<vmem>>, %arg3: memref<1x264xf32, #tpu.memory_space<vmem>>, %arg4: memref<1x264xf32, #tpu.memory_space<vmem>>, %arg5: memref<1x264xf32, #tpu.memory_space<vmem>>, %arg6: memref<256x264xbf16, #tpu.memory_space<vmem>>) attributes {dimension_semantics = [#tpu.dimension_semantics<parallel>], iteration_bounds = array<i64: 2>, scalar_prefetch = 0 : i64, scratch_operands = 0 : i64, tpu.core_type = #tpu.core_type<tc>, window_params = [{transform_indices = @transform_0, window_bounds = array<i64: 256, 256>}, {pipeline_mode = #tpu.pipeline_mode<synchronous>, transform_indices = @transform_1, window_bounds = array<i64: 256, 264>}, {pipeline_mode = #tpu.pipeline_mode<synchronous>, transform_indices = @transform_2, window_bounds = array<i64: 1, 264>}, {pipeline_mode = #tpu.pipeline_mode<synchronous>, transform_indices = @transform_3, window_bounds = array<i64: 1, 264>}, {pipeline_mode = #tpu.pipeline_mode<synchronous>, transform_indices = @transform_4, window_bounds = array<i64: 1, 264>}, {transform_indices = @transform_5, window_bounds = array<i64: 256, 264>}]} {
    %c0 = arith.constant 0 : index
    %c0_0 = arith.constant 0 : index
    %0 = vector.load %arg1[%c0, %c0_0] : memref<256x256xbf16, #tpu.memory_space<vmem>>, vector<256x256xbf16>
    %c0_1 = arith.constant 0 : index
    %c0_2 = arith.constant 0 : index
    %1 = vector.load %arg2[%c0_1, %c0_2] : memref<256x264xbf16, #tpu.memory_space<vmem>>, vector<256x264xbf16>
    %cst = arith.constant dense<0.000000e+00> : vector<256x264xf32>
    %2 = tpu.matmul %0, %1, %cst {dimension_numbers = #tpu.dot_dimension_numbers<[1], [0], [0], [1], [0, 0, 1, 1], [], []>} : vector<256x256xbf16>, vector<256x264xbf16>, vector<256x264xf32> -> vector<256x264xf32>
    %c0_3 = arith.constant 0 : index
    %c0_4 = arith.constant 0 : index
    %3 = vector.load %arg3[%c0_3, %c0_4] : memref<1x264xf32, #tpu.memory_space<vmem>>, vector<1x264xf32>
    %4 = vector.broadcast %3 : vector<1x264xf32> to vector<256x264xf32>
    %5 = arith.mulf %2, %4 : vector<256x264xf32>
    %c0_5 = arith.constant 0 : index
    %c0_6 = arith.constant 0 : index
    %6 = vector.load %arg4[%c0_5, %c0_6] : memref<1x264xf32, #tpu.memory_space<vmem>>, vector<1x264xf32>
    %7 = vector.broadcast %6 : vector<1x264xf32> to vector<256x264xf32>
    %8 = arith.addf %5, %7 : vector<256x264xf32>
    %c0_7 = arith.constant 0 : index
    %c0_8 = arith.constant 0 : index
    %9 = vector.load %arg5[%c0_7, %c0_8] : memref<1x264xf32, #tpu.memory_space<vmem>>, vector<1x264xf32>
    %cst_9 = arith.constant 5.000000e-01 : f32
    %10 = vector.broadcast %cst_9 : f32 to vector<256x264xf32>
    %11 = arith.mulf %10, %8 : vector<256x264xf32>
    %12 = math.tanh %11 : vector<256x264xf32>
    %cst_10 = arith.constant 1.000000e+00 : f32
    %13 = vector.broadcast %cst_10 : f32 to vector<256x264xf32>
    %14 = arith.addf %12, %13 : vector<256x264xf32>
    %cst_11 = arith.constant 5.000000e-01 : f32
    %15 = vector.broadcast %cst_11 : f32 to vector<256x264xf32>
    %16 = arith.mulf %15, %14 : vector<256x264xf32>
    %cst_12 = arith.constant 0.000000e+00 : f32
    %cst_13 = arith.constant 1.000000e+00 : f32
    %17 = vector.broadcast %cst_12 : f32 to vector<256x264xf32>
    %18 = arith.maximumf %17, %16 : vector<256x264xf32>
    %19 = vector.broadcast %cst_13 : f32 to vector<256x264xf32>
    %20 = arith.minimumf %19, %18 : vector<256x264xf32>
    %21 = vector.broadcast %9 : vector<1x264xf32> to vector<256x264xf32>
    %22 = arith.mulf %21, %20 : vector<256x264xf32>
    %cst_14 = arith.constant 1.000000e+00 : f32
    %23 = vector.broadcast %cst_14 : f32 to vector<1x264xf32>
    %24 = arith.subf %23, %9 : vector<1x264xf32>
    %cst_15 = arith.constant 0.000000e+00 : f32
    %25 = vector.broadcast %cst_15 : f32 to vector<256x264xf32>
    %26 = arith.maximumf %8, %25 : vector<256x264xf32>
    %27 = vector.broadcast %24 : vector<1x264xf32> to vector<256x264xf32>
    %28 = arith.mulf %27, %26 : vector<256x264xf32>
    %29 = arith.addf %22, %28 : vector<256x264xf32>
    %30 = arith.truncf %29 : vector<256x264xf32> to vector<256x264xbf16>
    %c0_16 = arith.constant 0 : index
    %c0_17 = arith.constant 0 : index
    %31 = vector.load %arg6[%c0_16, %c0_17] : memref<256x264xbf16, #tpu.memory_space<vmem>>, vector<256x264xbf16>
    tpu.vector_store %arg6[%c0_16, %c0_17], %30 {strides = array<i32>} : memref<256x264xbf16, #tpu.memory_space<vmem>>, vector<256x264xbf16>,
    return
  }
  func.func @transform_0(%arg0: i32) -> (i32, i32) {
    %c0_i32 = arith.constant 0 : i32
    %c0_i32_0 = arith.constant 0 : i32
    return %arg0, %c0_i32 : i32, i32
  }
  func.func @transform_1(%arg0: i32) -> (i32, i32) {
    %c0_i32 = arith.constant 0 : i32
    %c0_i32_0 = arith.constant 0 : i32
    %c0_i32_1 = arith.constant 0 : i32
    return %c0_i32, %c0_i32_0 : i32, i32
  }
  func.func @transform_2(%arg0: i32) -> (i32, i32) {
    %c0_i32 = arith.constant 0 : i32
    %c0_i32_0 = arith.constant 0 : i32
    %c0_i32_1 = arith.constant 0 : i32
    return %c0_i32, %c0_i32_0 : i32, i32
  }
  func.func @transform_3(%arg0: i32) -> (i32, i32) {
    %c0_i32 = arith.constant 0 : i32
    %c0_i32_0 = arith.constant 0 : i32
    %c0_i32_1 = arith.constant 0 : i32
    return %c0_i32, %c0_i32_0 : i32, i32
  }
  func.func @transform_4(%arg0: i32) -> (i32, i32) {
    %c0_i32 = arith.constant 0 : i32
    %c0_i32_0 = arith.constant 0 : i32
    %c0_i32_1 = arith.constant 0 : i32
    return %c0_i32, %c0_i32_0 : i32, i32
  }
  func.func @transform_5(%arg0: i32) -> (i32, i32) {
    %c0_i32 = arith.constant 0 : i32
    %c0_i32_0 = arith.constant 0 : i32
    return %arg0, %c0_i32 : i32, i32
  }
}

module attributes {stable_mosaic.version = 11 : i64} {
  func.func @_final_kernel(%arg0: i32, %arg1: memref<256x2xbf16, #tpu.memory_space<vmem>>, %arg2: memref<256x64xbf16, #tpu.memory_space<vmem>>, %arg3: memref<64x64xbf16, #tpu.memory_space<vmem>>, %arg4: memref<1x64xf32, #tpu.memory_space<vmem>>, %arg5: memref<1x64xf32, #tpu.memory_space<vmem>>, %arg6: memref<1x2xf32, #tpu.memory_space<vmem>>, %arg7: memref<1x64xf32, #tpu.memory_space<vmem>>, %arg8: memref<1x1xf32, #tpu.memory_space<vmem>>, %arg9: memref<256x1xf32, #tpu.memory_space<vmem>>) attributes {dimension_semantics = [#tpu.dimension_semantics<parallel>], iteration_bounds = array<i64: 8>, scalar_prefetch = 0 : i64, scratch_operands = 0 : i64, tpu.core_type = #tpu.core_type<tc>, window_params = [{transform_indices = @transform_0, window_bounds = array<i64: 256, 2>}, {transform_indices = @transform_1, window_bounds = array<i64: 256, 64>}, {pipeline_mode = #tpu.pipeline_mode<synchronous>, transform_indices = @transform_2, window_bounds = array<i64: 64, 64>}, {pipeline_mode = #tpu.pipeline_mode<synchronous>, transform_indices = @transform_3, window_bounds = array<i64: 1, 64>}, {pipeline_mode = #tpu.pipeline_mode<synchronous>, transform_indices = @transform_4, window_bounds = array<i64: 1, 64>}, {pipeline_mode = #tpu.pipeline_mode<synchronous>, transform_indices = @transform_5, window_bounds = array<i64: 1, 2>}, {pipeline_mode = #tpu.pipeline_mode<synchronous>, transform_indices = @transform_6, window_bounds = array<i64: 1, 64>}, {pipeline_mode = #tpu.pipeline_mode<synchronous>, transform_indices = @transform_7, window_bounds = array<i64: 1, 1>}, {transform_indices = @transform_8, window_bounds = array<i64: 256, 1>}]} {
    %c0 = arith.constant 0 : index
    %c0_0 = arith.constant 0 : index
    %0 = vector.load %arg2[%c0, %c0_0] : memref<256x64xbf16, #tpu.memory_space<vmem>>, vector<256x64xbf16>
    %c0_1 = arith.constant 0 : index
    %c0_2 = arith.constant 0 : index
    %1 = vector.load %arg3[%c0_1, %c0_2] : memref<64x64xbf16, #tpu.memory_space<vmem>>, vector<64x64xbf16>
    %cst = arith.constant dense<0.000000e+00> : vector<256x64xf32>
    %2 = tpu.matmul %0, %1, %cst {dimension_numbers = #tpu.dot_dimension_numbers<[1], [0], [0], [1], [0, 0, 1, 1], [], []>} : vector<256x64xbf16>, vector<64x64xbf16>, vector<256x64xf32> -> vector<256x64xf32>
    %c0_3 = arith.constant 0 : index
    %c0_4 = arith.constant 0 : index
    %3 = vector.load %arg4[%c0_3, %c0_4] : memref<1x64xf32, #tpu.memory_space<vmem>>, vector<1x64xf32>
    %4 = vector.broadcast %3 : vector<1x64xf32> to vector<256x64xf32>
    %5 = arith.mulf %2, %4 : vector<256x64xf32>
    %c0_5 = arith.constant 0 : index
    %c0_6 = arith.constant 0 : index
    %6 = vector.load %arg5[%c0_5, %c0_6] : memref<1x64xf32, #tpu.memory_space<vmem>>, vector<1x64xf32>
    %7 = vector.broadcast %6 : vector<1x64xf32> to vector<256x64xf32>
    %8 = arith.addf %5, %7 : vector<256x64xf32>
    %cst_7 = arith.constant 0.000000e+00 : f32
    %9 = vector.broadcast %cst_7 : f32 to vector<256x64xf32>
    %10 = arith.maximumf %8, %9 : vector<256x64xf32>
    %c0_8 = arith.constant 0 : index
    %c0_9 = arith.constant 0 : index
    %11 = vector.load %arg1[%c0_8, %c0_9] : memref<256x2xbf16, #tpu.memory_space<vmem>>, vector<256x2xbf16>
    %12 = arith.extf %11 : vector<256x2xbf16> to vector<256x2xf32>
    %c0_10 = arith.constant 0 : index
    %c0_11 = arith.constant 0 : index
    %13 = vector.load %arg6[%c0_10, %c0_11] : memref<1x2xf32, #tpu.memory_space<vmem>>, vector<1x2xf32>
    %14 = vector.broadcast %13 : vector<1x2xf32> to vector<256x2xf32>
    %15 = arith.mulf %12, %14 : vector<256x2xf32>
    %cst_12 = arith.constant dense<0.000000e+00> : vector<256xf32>
    %16 = vector.multi_reduction <add>, %15, %cst_12 [1] : vector<256x2xf32> to vector<256xf32>
    %17 = vector.shape_cast %16 : vector<256xf32> to vector<256x1xf32>
    %c0_13 = arith.constant 0 : index
    %c0_14 = arith.constant 0 : index
    %18 = vector.load %arg7[%c0_13, %c0_14] : memref<1x64xf32, #tpu.memory_space<vmem>>, vector<1x64xf32>
    %19 = vector.broadcast %18 : vector<1x64xf32> to vector<256x64xf32>
    %20 = arith.mulf %10, %19 : vector<256x64xf32>
    %cst_15 = arith.constant dense<0.000000e+00> : vector<256xf32>
    %21 = vector.multi_reduction <add>, %20, %cst_15 [1] : vector<256x64xf32> to vector<256xf32>
    %22 = vector.shape_cast %21 : vector<256xf32> to vector<256x1xf32>
    %23 = arith.addf %17, %22 : vector<256x1xf32>
    %c0_16 = arith.constant 0 : index
    %c0_17 = arith.constant 0 : index
    %24 = vector.load %arg8[%c0_16, %c0_17] : memref<1x1xf32, #tpu.memory_space<vmem>>, vector<1x1xf32>
    %25 = vector.broadcast %24 : vector<1x1xf32> to vector<256x1xf32>
    %26 = arith.addf %23, %25 : vector<256x1xf32>
    %cst_18 = arith.constant 5.000000e-01 : f32
    %27 = vector.broadcast %cst_18 : f32 to vector<256x1xf32>
    %28 = arith.mulf %27, %26 : vector<256x1xf32>
    %29 = math.tanh %28 : vector<256x1xf32>
    %cst_19 = arith.constant 1.000000e+00 : f32
    %30 = vector.broadcast %cst_19 : f32 to vector<256x1xf32>
    %31 = arith.addf %29, %30 : vector<256x1xf32>
    %cst_20 = arith.constant 5.000000e-01 : f32
    %32 = vector.broadcast %cst_20 : f32 to vector<256x1xf32>
    %33 = arith.mulf %32, %31 : vector<256x1xf32>
    %cst_21 = arith.constant 0.000000e+00 : f32
    %cst_22 = arith.constant 1.000000e+00 : f32
    %34 = vector.broadcast %cst_21 : f32 to vector<256x1xf32>
    %35 = arith.maximumf %34, %33 : vector<256x1xf32>
    %36 = vector.broadcast %cst_22 : f32 to vector<256x1xf32>
    %37 = arith.minimumf %36, %35 : vector<256x1xf32>
    %c0_23 = arith.constant 0 : index
    %c0_24 = arith.constant 0 : index
    %38 = vector.load %arg9[%c0_23, %c0_24] : memref<256x1xf32, #tpu.memory_space<vmem>>, vector<256x1xf32>
    tpu.vector_store %arg9[%c0_23, %c0_24], %37 {strides = array<i32>} : memref<256x1xf32, #tpu.memory_space<vmem>>, vector<256x1xf32>,
    return
  }
  func.func @transform_0(%arg0: i32) -> (i32, i32) {
    %c0_i32 = arith.constant 0 : i32
    %c0_i32_0 = arith.constant 0 : i32
    return %arg0, %c0_i32 : i32, i32
  }
  func.func @transform_1(%arg0: i32) -> (i32, i32) {
    %c0_i32 = arith.constant 0 : i32
    %c0_i32_0 = arith.constant 0 : i32
    return %arg0, %c0_i32 : i32, i32
  }
  func.func @transform_2(%arg0: i32) -> (i32, i32) {
    %c0_i32 = arith.constant 0 : i32
    %c0_i32_0 = arith.constant 0 : i32
    %c0_i32_1 = arith.constant 0 : i32
    return %c0_i32, %c0_i32_0 : i32, i32
  }
  func.func @transform_3(%arg0: i32) -> (i32, i32) {
    %c0_i32 = arith.constant 0 : i32
    %c0_i32_0 = arith.constant 0 : i32
    %c0_i32_1 = arith.constant 0 : i32
    return %c0_i32, %c0_i32_0 : i32, i32
  }
  func.func @transform_4(%arg0: i32) -> (i32, i32) {
    %c0_i32 = arith.constant 0 : i32
    %c0_i32_0 = arith.constant 0 : i32
    %c0_i32_1 = arith.constant 0 : i32
    return %c0_i32, %c0_i32_0 : i32, i32
  }
  func.func @transform_5(%arg0: i32) -> (i32, i32) {
    %c0_i32 = arith.constant 0 : i32
    %c0_i32_0 = arith.constant 0 : i32
    %c0_i32_1 = arith.constant 0 : i32
    return %c0_i32, %c0_i32_0 : i32, i32
  }
  func.func @transform_6(%arg0: i32) -> (i32, i32) {
    %c0_i32 = arith.constant 0 : i32
    %c0_i32_0 = arith.constant 0 : i32
    %c0_i32_1 = arith.constant 0 : i32
    return %c0_i32, %c0_i32_0 : i32, i32
  }
  func.func @transform_7(%arg0: i32) -> (i32, i32) {
    %c0_i32 = arith.constant 0 : i32
    %c0_i32_0 = arith.constant 0 : i32
    %c0_i32_1 = arith.constant 0 : i32
    return %c0_i32, %c0_i32_0 : i32, i32
  }
  func.func @transform_8(%arg0: i32) -> (i32, i32) {
    %c0_i32 = arith.constant 0 : i32
    %c0_i32_0 = arith.constant 0 : i32
    return %arg0, %c0_i32 : i32, i32
  }
}

</mosaic_0001>

<bundles_post_ra>
// kernel: tile.17
= control target key start
LH: loop header
LB: loop body
LE: loop exit
PB: predicated region body
PF: predicated region fallthrough
CT: control target
= control target key end

     0   :  { %s22_s0 = inlined_call_operand.vmem [shape: f32[66], index: 0, kind: input, shape index: {}]   ;;  %s23_s1 = inlined_call_operand.vmem [shape: f32[4,66], index: 1, kind: output, shape index: {}]  }
   0x1   :  { %v4_v0 = vld [vmem:[%s22_s0] ss:$0 sm:$0xff] }
   0x2   :  { %5 = vst [vmem:[%s23_s1] sm:$0xf] %v4_v0 }

// kernel: tile.25
= control target key start
LH: loop header
LB: loop body
LE: loop exit
PB: predicated region body
PF: predicated region fallthrough
CT: control target
= control target key end

     0   :  { %vm14_vm0 = vcmask 474112   ;;  %vm28_vm1 = vcmask 506880   ;;  %vm8_vm2 = vcmask 539648   ;;  %s72_s8 = smov 4   ;;  %s73_s9 = smov 66   ;;  %vm18_vm3 = vcmask 64512   ;;  %s96_s0 = inlined_call_operand.vmem [shape: f32[4,66], index: 0, kind: input, shape index: {}]   ;;  %s97_s1 = inlined_call_operand.vmem [shape: f32[1,264], index: 1, kind: output, shape index: {}]  }
   0x1   :  { %v5_v0 = vld [vmem:[%s96_s0] sm:$0xf]  ;;  %s71_s0 = smov 70   ;;  %vm21_vm4 = vcmask 1048112   ;;  %vm32_vm5 = vcmask 31744   ;;  %vm35_vm6 = vcmask 1048080  }
   0x2   :  { %6 = vst [vmem:[#allocation1] sm:$0xf] %v5_v0  ;;  %vm41_vm7 = vcmask 572448  }
   0x9   :  { %v11_v1 = vld [vmem:[#allocation1 + $0x3] sm:$0x1]   ;;  %v25_v3 = vld [vmem:[#allocation1 + $0x1] sm:$0x1]   ;;  %v38_v6 = vld [vmem:[#allocation1 + $0x2] sm:$0x1]  }
   0xa   :  { %v13_v2 = vld [vmem:[#allocation1 + $0x3] sm:$0x1]   ;;  %v27_v5 = vld [vmem:[#allocation1 + $0x1] sm:$0x1]   ;;  %v7_v7 = vld [vmem:[#allocation1] sm:$0x1]   ;;  %39 = vrot.lane.b32.xlu1 %v38_v6, %s72_s8 }
   0xb   :  { %v15_v4 = vsel %vm14_vm0, %v13_v2, %v11_v1  ;;  %9 = vst.msk [vmem:[#allocation0] sm:$0x1] %vm8_vm2, %v7_v7   ;;  %v29_v8 = vsel %vm28_vm1, %v27_v5, %v25_v3 }
   0xc   :  { %16 = vrot.lane.b32.xlu0 %v15_v4, %s71_s0 }
  0x10   :  { %30 = vrot.lane.b32.xlu0 %v29_v8, %s73_s9 }
  0x7c   :  { %v40_v10 = vpop.permute.xlu1 %39  }
  0x7e   :  { %v17_v9 = vpop.permute.xlu0 %16  }
  0x7f   :  { %20 = vst.msk [vmem:[#allocation0 + $0x10] sm:$0x1] %vm18_vm3, %v17_v9  }
  0x80   :  { %23 = vst.msk [vmem:[#allocation0 + $0x8] sm:$0x1] %vm21_vm4, %v17_v9  }
  0x82   :  { %v31_v11 = vpop.permute.xlu0 %30  }
  0x83   :  { %34 = vst.msk [vmem:[#allocation0 + $0x8] sm:$0x1] %vm32_vm5, %v31_v11  }
  0x84   :  { %36 = vst.msk [vmem:[#allocation0] sm:$0x1] %vm35_vm6, %v31_v11  }
  0x85   :  { %43 = vst.msk [vmem:[#allocation0 + $0x8] sm:$0x1] %vm41_vm7, %v40_v10  }
  0x86   :  { %v59_v12 = vld [vmem:[#allocation0 + $0x10] sm:$0x1] }
  0x87   :  { %67 = vst [vmem:[%s97_s1 + $0x2] sm:$0x1] %v59_v12 }
  0x8b   :  { %v48_v13 = vld [vmem:[#allocation0] sm:$0x1] }
  0x8c   :  { %51 = vst [vmem:[%s97_s1] sm:$0x1] %v48_v13  ;;  %v53_v14 = vld [vmem:[#allocation0 + $0x8] sm:$0x1] }
  0x8d   :  { %66 = vst [vmem:[%s97_s1 + $0x1] sm:$0x1] %v53_v14 }

// kernel: gamsnet_oam_forward.11
= control target key start
LH: loop header
LB: loop body
LE: loop exit
PB: predicated region body
PF: predicated region fallthrough
CT: control target
= control target key end

     0   :  { %s1103_s15 = smov 0   ;;  %s1307_s0 = inlined_call_operand.vmem [shape: bf16[512,27], index: 0, kind: input, shape index: {}]   ;;  %s1308_s1 = inlined_call_operand.vmem [shape: bf16[27,16], index: 1, kind: input, shape index: {}]   ;;  %s1309_s2 = inlined_call_operand.vmem [shape: f32[1,16], index: 2, kind: input, shape index: {}]   ;;  %s1310_s3 = inlined_call_operand.vmem [shape: f32[1,16], index: 3, kind: input, shape index: {}]   ;;  %s1311_s4 = inlined_call_operand.vmem [shape: bf16[512,16], index: 4, kind: output, shape index: {}]  }
   0x1 LB: > { %s873_s16 = sadd.s32 4294967295, %s1075_s15   ;;  %p877_p0 = scmp.ge.s32.totalorder %s1075_s15, 1  ;;  %s1075_s15 = sphi %s1103_s15, %s14_s15  }
   0x2   : > { %p163_p1 = scmp.lt.s32.totalorder %s1075_s15, 3 }
   0x4   : > { %p164_p2 = pnand %p877_p0, %p163_p1 }
   0x5   : > { %s878_s19 = sshll.u32 (!%p164_p2), %s873_s16, 5 }
   0x6   : > { %167 = sbr.rel (%p164_p2) target bundleno = 259 (0x103), region = 36  ;;  %p190_p3 = scmp.lt.s32.totalorder (!%p164_p2), %s878_s19, 63 }
   0xb   : > { %v1051_v0 = vld [vmem:[%s1308_s1 + $0x8] sm:$0x3f]   ;;  %vm378_vm0 = vcmask 1044480   ;;  %vm379_vm1 = vcmask 1045504   ;;  %v1077_v1 = vmov 65535   ;;  %v1052_v5 = vld [vmem:[%s1308_s1] sm:$0xff]  }
   0xc   : > { %v380_v2 = vsel %vm378_vm0, 4294967295, %v1077_v1  ;;  %s1313_s19 = smov (!%p190_p3, %s878_s19), 63  ;;  %vm329_vm2 = vcmask 220160   ;;  %v1162_v22 = vld [vmem:[%s1309_s2] ss:$0 sm:$0xff]  ;;  %vm784_vm3 = vcmask 125952  }
   0xd   : > { %v381_v3 = vsel %vm379_vm1, %v380_v2, 0  ;;  %s879_s22 = sshll.u32 %s1313_s19, 2  ;;  %v1167_v24 = vld [vmem:[%s1310_s3] ss:$0 sm:$0xff] }
   0xe   : > { %v383_v4 = vand.u32 %v1051_v0, %v381_v3  ;;  %s1125_s25 = scalar_lea.vmem %s1307_s0, %s879_s22  ;;  %s1182_s6 = scalar_lea.vmem %s1311_s4, %s879_s22 }
   0xf   : > { %v1053_v6 = vld [vmem:[%s1125_s25] sm:$0xff]   ;;  %v1055_v8 = vld [vmem:[%s1125_s25 + $0x8] sm:$0xff]   ;;  %v1057_v10 = vld [vmem:[%s1125_s25 + $0x10] sm:$0xff]  }
  0x10   : > { %1002 = vmatprep.subr.bf16.mxu0 %v383_v4  ;;  %1038 = vmatprep.subr.bf16.mxu1 %v383_v4  ;;  %v1054_v7 = vld [vmem:[%s1125_s25 + $0x40] sm:$0xff]   ;;  %v1056_v9 = vld [vmem:[%s1125_s25 + $0x48] sm:$0xff]   ;;  %v1058_v11 = vld [vmem:[%s1125_s25 + $0x50] sm:$0xff]  }
  0x11   : > { %1003 = vmatpush3.bf16.msra.mxu0 %v383_v4  ;;  %1040 = vmatpush3.bf16.msra.mxu1 %v383_v4  ;;  %v1059_v12 = vld [vmem:[%s1125_s25 + $0x18] sm:$0xff]   ;;  %v1061_v14 = vld [vmem:[%s1125_s25 + $0x20] sm:$0xff]   ;;  %v1063_v16 = vld [vmem:[%s1125_s25 + $0x28] sm:$0xff]  }
  0x12   : > { %1004 = vmatprep.subr.bf16.mxu0 %v1052_v5  ;;  %1039 = vmatprep.subr.bf16.mxu1 %v1052_v5  ;;  %v1060_v13 = vld [vmem:[%s1125_s25 + $0x58] sm:$0xff]   ;;  %v1062_v15 = vld [vmem:[%s1125_s25 + $0x60] sm:$0xff]   ;;  %v1064_v17 = vld [vmem:[%s1125_s25 + $0x68] sm:$0xff]  }
  0x13   : > { %1006 = vmatprep.mubr.msk.bf16.mxu0 %vm329_vm2, %v1053_v6  ;;  %1022 = vmatprep.mubr.msk.bf16.mxu1 %vm329_vm2, %v1054_v7  ;;  %v1065_v18 = vld [vmem:[%s1125_s25 + $0x30] sm:$0xff]   ;;  %v1067_v20 = vld [vmem:[%s1125_s25 + $0x38] sm:$0xff]  }
  0x14   : > { %v1066_v19 = vld [vmem:[%s1125_s25 + $0x70] sm:$0xff]   ;;  %v1068_v21 = vld [vmem:[%s1125_s25 + $0x78] sm:$0xff]  }
  0x15   : > { %1005 = vmatpush3.bf16.msra.mxu0 %v1052_v5  ;;  %1041 = vmatpush3.bf16.msra.mxu1 %v1052_v5 }
  0x18   : > { %1007 = vmatmul.mubr.msk.bf16.vlgmr.msra.gmra.mxu0 %vm329_vm2, %v1055_v8  ;;  %1023 = vmatmul.mubr.msk.bf16.vlgmr.msra.gmra.mxu1 %vm329_vm2, %v1056_v9 }
  0x19   : > { %1010 = vmatprep.mubr.msk.bf16.mxu0 %vm329_vm2, %v1057_v10  ;;  %1026 = vmatprep.mubr.msk.bf16.mxu1 %vm329_vm2, %v1058_v11 }
  0x20   : > { %1011 = vmatmul.mubr.msk.bf16.gmra.mxu0 %vm329_vm2, %v1059_v12  ;;  %1027 = vmatmul.mubr.msk.bf16.gmra.mxu1 %vm329_vm2, %v1060_v13 }
  0x21   : > { %1014 = vmatprep.mubr.msk.bf16.mxu0 %vm329_vm2, %v1061_v14  ;;  %1030 = vmatprep.mubr.msk.bf16.mxu1 %vm329_vm2, %v1062_v15 }
  0x28   : > { %1015 = vmatmul.mubr.msk.bf16.gmra.mxu0 %vm329_vm2, %v1063_v16  ;;  %1031 = vmatmul.mubr.msk.bf16.gmra.mxu1 %vm329_vm2, %v1064_v17 }
  0x29   : > { %1018 = vmatprep.mubr.msk.bf16.mxu0 %vm329_vm2, %v1065_v18  ;;  %1034 = vmatprep.mubr.msk.bf16.mxu1 %vm329_vm2, %v1066_v19 }
  0x30   : > { %1019 = vmatmul.mubr.msk.bf16.gmra.mxu0 %vm329_vm2, %v1067_v20  ;;  %1035 = vmatmul.mubr.msk.bf16.gmra.mxu1 %vm329_vm2, %v1068_v21 }
  0xd8   : > { %v1008_v23 = vpop.f32.mrf.mxu0  ;;  %v1024_v25 = vpop.f32.mrf.mxu1 }
  0xd9   : > { %v555_v26 = vmul.f32 %v1008_v23, %v1162_v22  ;;  %v571_v27 = vmul.f32 %v1024_v25, %v1162_v22 }
  0xda   : > { %v419_v28 = vpop.f32.mrf.mxu0  ;;  %v483_v29 = vpop.f32.mrf.mxu1 }
  0xdb   : > { %v594_v30 = vadd.f32 %v1167_v24, %v555_v26  ;;  %v610_v31 = vadd.f32 %v1167_v24, %v571_v27  ;;  %v553_v32 = vmul.f32 %v1162_v22, %v419_v28  ;;  %v569_v33 = vmul.f32 %v1162_v22, %v483_v29 }
  0xdc   : > { %v1009_v34 = vpop.f32.mrf.mxu0  ;;  %v1025_v35 = vpop.f32.mrf.mxu1 }
  0xdd   : > { %v626_v36 = vmax.f32 %v594_v30, 0.0  ;;  %v642_v37 = vmax.f32 %v610_v31, 0.0  ;;  %v592_v38 = vadd.f32 %v1167_v24, %v553_v32  ;;  %v608_v39 = vadd.f32 %v1167_v24, %v569_v33 }
  0xde   : > { %v556_v40 = vmul.f32 %v1009_v34, %v1162_v22  ;;  %v572_v41 = vmul.f32 %v1025_v35, %v1162_v22  ;;  %v422_v42 = vpop.f32.mrf.mxu0  ;;  %v486_v43 = vpop.f32.mrf.mxu1 }
  0xdf   : > { %v954_v44 = vpack.c.bf16 %v626_v36, %v626_v36  ;;  %v970_v45 = vpack.c.bf16 %v642_v37, %v642_v37  ;;  %v624_v46 = vmax.f32 %v592_v38, 0.0  ;;  %v640_v47 = vmax.f32 %v608_v39, 0.0 }
  0xe0   : > { %v595_v48 = vadd.f32 %v1167_v24, %v556_v40  ;;  %v611_v49 = vadd.f32 %v1167_v24, %v572_v41  ;;  %v554_v50 = vmul.f32 %v1162_v22, %v422_v42  ;;  %v570_v51 = vmul.f32 %v1162_v22, %v486_v43  ;;  %v1012_v52 = vpop.f32.mrf.mxu0  ;;  %v1028_v53 = vpop.f32.mrf.mxu1 }
  0xe1   : > { %787 = vst.msk [vmem:[%s1182_s6 + $0x8] sm:$0xf] %vm784_vm3, %v954_v44  ;;  %803 = vst.msk [vmem:[%s1182_s6 + $0x48] sm:$0xf] %vm784_vm3, %v970_v45  ;;  %v952_v54 = vpack.c.bf16 %v624_v46, %v624_v46  ;;  %v968_v55 = vpack.c.bf16 %v640_v47, %v640_v47  ;;  %v559_v56 = vmul.f32 %v1012_v52, %v1162_v22 }
  0xe2   : > { %v575_v57 = vmul.f32 %v1028_v53, %v1162_v22  ;;  %v627_v58 = vmax.f32 %v595_v48, 0.0  ;;  %v643_v59 = vmax.f32 %v611_v49, 0.0  ;;  %v593_v60 = vadd.f32 %v1167_v24, %v554_v50  ;;  %v435_v62 = vpop.f32.mrf.mxu0  ;;  %v499_v63 = vpop.f32.mrf.mxu1 }
  0xe3   : > { %v609_v61 = vadd.f32 %v1167_v24, %v570_v51  ;;  %785 = vst.msk [vmem:[%s1182_s6] sm:$0xf] %vm784_vm3, %v952_v54  ;;  %801 = vst.msk [vmem:[%s1182_s6 + $0x40] sm:$0xf] %vm784_vm3, %v968_v55  ;;  %v598_v0 = vadd.f32 %v1167_v24, %v559_v56  ;;  %v557_v2 = vmul.f32 %v1162_v22, %v435_v62 }
  0xe4   : > { %v614_v1 = vadd.f32 %v1167_v24, %v575_v57  ;;  %v573_v3 = vmul.f32 %v1162_v22, %v499_v63  ;;  %v955_v4 = vpack.c.bf16 %v627_v58, %v627_v58  ;;  %v971_v5 = vpack.c.bf16 %v643_v59, %v643_v59  ;;  %v1013_v8 = vpop.f32.mrf.mxu0  ;;  %v1029_v9 = vpop.f32.mrf.mxu1 }
  0xe5   : > { %v625_v6 = vmax.f32 %v593_v60, 0.0  ;;  %v641_v7 = vmax.f32 %v609_v61, 0.0  ;;  %v630_v10 = vmax.f32 %v598_v0, 0.0  ;;  %v596_v12 = vadd.f32 %v1167_v24, %v557_v2 }
  0xe6   : > { %v646_v11 = vmax.f32 %v614_v1, 0.0  ;;  %v612_v13 = vadd.f32 %v1167_v24, %v573_v3  ;;  %788 = vst.msk [vmem:[%s1182_s6 + $0xc] sm:$0xf] %vm784_vm3, %v955_v4  ;;  %804 = vst.msk [vmem:[%s1182_s6 + $0x4c] sm:$0xf] %vm784_vm3, %v971_v5  ;;  %v560_v16 = vmul.f32 %v1013_v8, %v1162_v22  ;;  %v576_v17 = vmul.f32 %v1029_v9, %v1162_v22  ;;  %v438_v18 = vpop.f32.mrf.mxu0  ;;  %v502_v19 = vpop.f32.mrf.mxu1 }
  0xe7   : > { %v953_v14 = vpack.c.bf16 %v625_v6, %v625_v6  ;;  %v969_v15 = vpack.c.bf16 %v641_v7, %v641_v7  ;;  %v958_v20 = vpack.c.bf16 %v630_v10, %v630_v10  ;;  %v628_v23 = vmax.f32 %v596_v12, 0.0 }
  0xe8   : > { %v974_v21 = vpack.c.bf16 %v646_v11, %v646_v11  ;;  %v644_v25 = vmax.f32 %v612_v13, 0.0  ;;  %v599_v26 = vadd.f32 %v1167_v24, %v560_v16  ;;  %v615_v27 = vadd.f32 %v1167_v24, %v576_v17  ;;  %v1016_v30 = vpop.f32.mrf.mxu0  ;;  %v1032_v31 = vpop.f32.mrf.mxu1 }
  0xe9   : > { %786 = vst.msk [vmem:[%s1182_s6 + $0x4] sm:$0xf] %vm784_vm3, %v953_v14  ;;  %802 = vst.msk [vmem:[%s1182_s6 + $0x44] sm:$0xf] %vm784_vm3, %v969_v15  ;;  %v558_v28 = vmul.f32 %v1162_v22, %v438_v18  ;;  %v574_v29 = vmul.f32 %v1162_v22, %v502_v19  ;;  %v956_v32 = vpack.c.bf16 %v628_v23, %v628_v23 }
  0xea   : > { %791 = vst.msk [vmem:[%s1182_s6 + $0x18] sm:$0xf] %vm784_vm3, %v958_v20  ;;  %807 = vst.msk [vmem:[%s1182_s6 + $0x58] sm:$0xf] %vm784_vm3, %v974_v21  ;;  %v972_v33 = vpack.c.bf16 %v644_v25, %v644_v25  ;;  %v563_v34 = vmul.f32 %v1016_v30, %v1162_v22  ;;  %v579_v35 = vmul.f32 %v1032_v31, %v1162_v22  ;;  %v631_v36 = vmax.f32 %v599_v26, 0.0  ;;  %v451_v40 = vpop.f32.mrf.mxu0  ;;  %v515_v41 = vpop.f32.mrf.mxu1 }
  0xeb   : > { %v647_v37 = vmax.f32 %v615_v27, 0.0  ;;  %v597_v38 = vadd.f32 %v1167_v24, %v558_v28  ;;  %v613_v39 = vadd.f32 %v1167_v24, %v574_v29  ;;  %789 = vst.msk [vmem:[%s1182_s6 + $0x10] sm:$0xf] %vm784_vm3, %v956_v32  ;;  %v561_v44 = vmul.f32 %v1162_v22, %v451_v40 }
  0xec   : > { %805 = vst.msk [vmem:[%s1182_s6 + $0x50] sm:$0xf] %vm784_vm3, %v972_v33  ;;  %v602_v42 = vadd.f32 %v1167_v24, %v563_v34  ;;  %v618_v43 = vadd.f32 %v1167_v24, %v579_v35  ;;  %v577_v45 = vmul.f32 %v1162_v22, %v515_v41  ;;  %v959_v46 = vpack.c.bf16 %v631_v36, %v631_v36  ;;  %v1017_v50 = vpop.f32.mrf.mxu0  ;;  %v1033_v51 = vpop.f32.mrf.mxu1 }
  0xed   : > { %v975_v47 = vpack.c.bf16 %v647_v37, %v647_v37  ;;  %v629_v48 = vmax.f32 %v597_v38, 0.0  ;;  %v645_v49 = vmax.f32 %v613_v39, 0.0  ;;  %v600_v54 = vadd.f32 %v1167_v24, %v561_v44 }
  0xee   : > { %v634_v52 = vmax.f32 %v602_v42, 0.0  ;;  %v650_v53 = vmax.f32 %v618_v43, 0.0  ;;  %v616_v55 = vadd.f32 %v1167_v24, %v577_v45  ;;  %792 = vst.msk [vmem:[%s1182_s6 + $0x1c] sm:$0xf] %vm784_vm3, %v959_v46  ;;  %v564_v58 = vmul.f32 %v1017_v50, %v1162_v22  ;;  %v454_v60 = vpop.f32.mrf.mxu0  ;;  %v518_v61 = vpop.f32.mrf.mxu1 }
  0xef   : > { %808 = vst.msk [vmem:[%s1182_s6 + $0x5c] sm:$0xf] %vm784_vm3, %v975_v47  ;;  %v957_v56 = vpack.c.bf16 %v629_v48, %v629_v48  ;;  %v973_v57 = vpack.c.bf16 %v645_v49, %v645_v49  ;;  %v580_v59 = vmul.f32 %v1033_v51, %v1162_v22  ;;  %v632_v0 = vmax.f32 %v600_v54, 0.0 }
  0xf0   : > { %v962_v62 = vpack.c.bf16 %v634_v52, %v634_v52  ;;  %v978_v63 = vpack.c.bf16 %v650_v53, %v650_v53  ;;  %v648_v1 = vmax.f32 %v616_v55, 0.0  ;;  %v603_v2 = vadd.f32 %v1167_v24, %v564_v58  ;;  %v1020_v6 = vpop.f32.mrf.mxu0  ;;  %v1036_v7 = vpop.f32.mrf.mxu1 }
  0xf1   : > { %790 = vst.msk [vmem:[%s1182_s6 + $0x14] sm:$0xf] %vm784_vm3, %v957_v56  ;;  %806 = vst.msk [vmem:[%s1182_s6 + $0x54] sm:$0xf] %vm784_vm3, %v973_v57  ;;  %v619_v3 = vadd.f32 %v1167_v24, %v580_v59  ;;  %v562_v4 = vmul.f32 %v1162_v22, %v454_v60  ;;  %v578_v5 = vmul.f32 %v1162_v22, %v518_v61 }
  0xf2   : > { %795 = vst.msk [vmem:[%s1182_s6 + $0x28] sm:$0xf] %vm784_vm3, %v962_v62  ;;  %811 = vst.msk [vmem:[%s1182_s6 + $0x68] sm:$0xf] %vm784_vm3, %v978_v63  ;;  %v960_v8 = vpack.c.bf16 %v632_v0, %v632_v0  ;;  %v976_v9 = vpack.c.bf16 %v648_v1, %v648_v1  ;;  %v567_v10 = vmul.f32 %v1020_v6, %v1162_v22  ;;  %v635_v12 = vmax.f32 %v603_v2, 0.0  ;;  %v467_v16 = vpop.f32.mrf.mxu0  ;;  %v531_v17 = vpop.f32.mrf.mxu1 }
  0xf3   : > { %v583_v11 = vmul.f32 %v1036_v7, %v1162_v22  ;;  %v651_v13 = vmax.f32 %v619_v3, 0.0  ;;  %v601_v14 = vadd.f32 %v1167_v24, %v562_v4  ;;  %v617_v15 = vadd.f32 %v1167_v24, %v578_v5 }
  0xf4   : > { %793 = vst.msk [vmem:[%s1182_s6 + $0x20] sm:$0xf] %vm784_vm3, %v960_v8  ;;  %809 = vst.msk [vmem:[%s1182_s6 + $0x60] sm:$0xf] %vm784_vm3, %v976_v9  ;;  %v606_v18 = vadd.f32 %v1167_v24, %v567_v10  ;;  %v565_v20 = vmul.f32 %v1162_v22, %v467_v16  ;;  %v581_v21 = vmul.f32 %v1162_v22, %v531_v17  ;;  %v1021_v28 = vpop.f32.mrf.mxu0  ;;  %v1037_v29 = vpop.f32.mrf.mxu1 }
  0xf5   : > { %v622_v19 = vadd.f32 %v1167_v24, %v583_v11  ;;  %v963_v23 = vpack.c.bf16 %v635_v12, %v635_v12  ;;  %v979_v25 = vpack.c.bf16 %v651_v13, %v651_v13  ;;  %v633_v26 = vmax.f32 %v601_v14, 0.0 }
  0xf6   : > { %v649_v27 = vmax.f32 %v617_v15, 0.0  ;;  %v638_v30 = vmax.f32 %v606_v18, 0.0  ;;  %v604_v32 = vadd.f32 %v1167_v24, %v565_v20  ;;  %v620_v33 = vadd.f32 %v1167_v24, %v581_v21  ;;  %v470_v38 = vpop.f32.mrf.mxu0  ;;  %v534_v39 = vpop.f32.mrf.mxu1 }
  0xf7   : > { %v654_v31 = vmax.f32 %v622_v19, 0.0  ;;  %796 = vst.msk [vmem:[%s1182_s6 + $0x2c] sm:$0xf] %vm784_vm3, %v963_v23  ;;  %812 = vst.msk [vmem:[%s1182_s6 + $0x6c] sm:$0xf] %vm784_vm3, %v979_v25  ;;  %v961_v34 = vpack.c.bf16 %v633_v26, %v633_v26  ;;  %v568_v36 = vmul.f32 %v1021_v28, %v1162_v22  ;;  %v584_v37 = vmul.f32 %v1037_v29, %v1162_v22 }
  0xf8   : > { %v977_v35 = vpack.c.bf16 %v649_v27, %v649_v27  ;;  %v966_v40 = vpack.c.bf16 %v638_v30, %v638_v30  ;;  %v636_v42 = vmax.f32 %v604_v32, 0.0  ;;  %v652_v43 = vmax.f32 %v620_v33, 0.0 }
  0xf9   : > { %v982_v41 = vpack.c.bf16 %v654_v31, %v654_v31  ;;  %794 = vst.msk [vmem:[%s1182_s6 + $0x24] sm:$0xf] %vm784_vm3, %v961_v34  ;;  %v607_v44 = vadd.f32 %v1167_v24, %v568_v36  ;;  %v623_v45 = vadd.f32 %v1167_v24, %v584_v37  ;;  %v566_v46 = vmul.f32 %v1162_v22, %v470_v38 }
  0xfa   : > { %810 = vst.msk [vmem:[%s1182_s6 + $0x64] sm:$0xf] %vm784_vm3, %v977_v35  ;;  %v582_v47 = vmul.f32 %v1162_v22, %v534_v39  ;;  %799 = vst.msk [vmem:[%s1182_s6 + $0x38] sm:$0xf] %vm784_vm3, %v966_v40  ;;  %v964_v48 = vpack.c.bf16 %v636_v42, %v636_v42  ;;  %v980_v49 = vpack.c.bf16 %v652_v43, %v652_v43 }
  0xfb   : > { %815 = vst.msk [vmem:[%s1182_s6 + $0x78] sm:$0xf] %vm784_vm3, %v982_v41  ;;  %v639_v50 = vmax.f32 %v607_v44, 0.0  ;;  %v655_v51 = vmax.f32 %v623_v45, 0.0  ;;  %v605_v52 = vadd.f32 %v1167_v24, %v566_v46 }
  0xfc   : > { %v621_v53 = vadd.f32 %v1167_v24, %v582_v47  ;;  %797 = vst.msk [vmem:[%s1182_s6 + $0x30] sm:$0xf] %vm784_vm3, %v964_v48  ;;  %813 = vst.msk [vmem:[%s1182_s6 + $0x70] sm:$0xf] %vm784_vm3, %v980_v49 }
  0xfd   : > { %v967_v22 = vpack.c.bf16 %v639_v50, %v639_v50  ;;  %v983_v54 = vpack.c.bf16 %v655_v51, %v655_v51  ;;  %v637_v55 = vmax.f32 %v605_v52, 0.0 }
  0xfe   : > { %v653_v56 = vmax.f32 %v621_v53, 0.0 }
  0xff   : > { %800 = vst.msk [vmem:[%s1182_s6 + $0x3c] sm:$0xf] %vm784_vm3, %v967_v22  ;;  %816 = vst.msk [vmem:[%s1182_s6 + $0x7c] sm:$0xf] %vm784_vm3, %v983_v54  ;;  %v965_v57 = vpack.c.bf16 %v637_v55, %v637_v55 }
 0x100   : > { %v981_v58 = vpack.c.bf16 %v653_v56, %v653_v56 }
 0x101   : > { %798 = vst.msk [vmem:[%s1182_s6 + $0x34] sm:$0xf] %vm784_vm3, %v965_v57 }
 0x102   : > { %814 = vst.msk [vmem:[%s1182_s6 + $0x74] sm:$0xf] %vm784_vm3, %v981_v58 }
 0x103 PF: > { %s14_s15 = sadd.s32 1, %s1075_s15  }
 0x104   : > { %p11_p4 = scmp.ge.s32.totalorder %s14_s15, 4  }
 0x106   :  { %13 = sbr.rel (!%p11_p4) target bundleno = 1 (0x1), region = 66 }

// kernel: gamsnet_oam_forward.12
= control target key start
LH: loop header
LB: loop body
LE: loop exit
PB: predicated region body
PF: predicated region fallthrough
CT: control target
= control target key end

     0   :  { %v566_v0 = vmov 0   ;;  %vm178_vm0 = vcmask 130048   ;;  %vm426_vm1 = vcmask 125952   ;;  %s781_s1 = inlined_call_operand.vmem [shape: bf16[144,16], index: 1, kind: input, shape index: {}]   ;;  %s782_s0 = inlined_call_operand.vmem [shape: bf16[128,144], index: 0, kind: input, shape index: {}]   ;;  %s783_s2 = inlined_call_operand.vmem [shape: f32[1,16], index: 2, kind: input, shape index: {}]   ;;  %s784_s3 = inlined_call_operand.vmem [shape: f32[1,16], index: 3, kind: input, shape index: {}]   ;;  %s785_s4 = inlined_call_operand.vmem [shape: bf16[128,16], index: 4, kind: output, shape index: {}]  }
   0x1   :  { %203 = vmatprep.subr.bf16.mxu0 %v566_v0  ;;  %514 = vmatprep.subr.bf16.mxu1 %v566_v0  ;;  %v533_v1 = vld [vmem:[%s781_s1 + $0x38] sm:$0xff]   ;;  %v534_v2 = vld [vmem:[%s781_s1 + $0x30] sm:$0xff]   ;;  %v535_v3 = vld [vmem:[%s781_s1 + $0x28] sm:$0xff]  }
   0x2   :  { %204 = vmatpush1.bf16.msra.mxu0 %v533_v1  ;;  %523 = vmatpush1.bf16.msra.mxu1 %v533_v1  ;;  %v536_v4 = vld [vmem:[%s781_s1 + $0x20] sm:$0xff]   ;;  %v537_v7 = vld [vmem:[%s781_s1 + $0x18] sm:$0xff]   ;;  %v538_v8 = vld [vmem:[%s781_s1 + $0x10] sm:$0xff]  }
   0x3   :  { %205 = vmatprep.subr.bf16.mxu0 %v566_v0  ;;  %515 = vmatprep.subr.bf16.mxu1 %v566_v0  ;;  %v544_v5 = vld [vmem:[%s782_s0 + $0x4] ss:$8 sps:$4 sm:$0xff]   ;;  %v542_v12 = vld [vmem:[%s782_s0] ss:$8 sps:$4 sm:$0xff]   ;;  %v548_v14 = vld [vmem:[%s782_s0 + $0x14] ss:$8 sps:$4 sm:$0xff]  }
   0x4   :  { %v547_v6 = vld [vmem:[%s782_s0 + $0x44] ss:$8 sps:$4 sm:$0xff]   ;;  %472 = vmatprep.mubr.msk.bf16.mxu0 %vm178_vm0, %v544_v5  ;;  %v545_v13 = vld [vmem:[%s782_s0 + $0x40] ss:$8 sps:$4 sm:$0xff]   ;;  %v550_v15 = vld [vmem:[%s782_s0 + $0x54] ss:$8 sps:$4 sm:$0xff]  }
   0x5   :  { %476 = vmatprep.mubr.msk.bf16.mxu1 %vm178_vm0, %v547_v6  ;;  %v539_v9 = vld [vmem:[%s781_s1 + $0x8] sm:$0xff]   ;;  %v540_v10 = vld [vmem:[%s781_s1] sm:$0xff]   ;;  %v552_v16 = vld [vmem:[%s782_s0 + $0x10] ss:$8 sps:$4 sm:$0xff]  }
   0x6   :  { %206 = vmatpush1.bf16.msra.mxu0 %v534_v2  ;;  %524 = vmatpush1.bf16.msra.mxu1 %v534_v2  ;;  %v541_v11 = vld [vmem:[%s781_s1 + $0x40] sm:$0xff]   ;;  %v553_v17 = vld [vmem:[%s782_s0 + $0x50] ss:$8 sps:$4 sm:$0xff]   ;;  %v560_v22 = vld [vmem:[%s782_s0 + $0x34] ss:$8 sps:$4 sm:$0xff]  }
   0x7   :  { %207 = vmatprep.subr.bf16.mxu0 %v566_v0  ;;  %516 = vmatprep.subr.bf16.mxu1 %v566_v0  ;;  %v554_v18 = vld [vmem:[%s782_s0 + $0x24] ss:$8 sps:$4 sm:$0xff]   ;;  %v558_v20 = vld [vmem:[%s782_s0 + $0x20] ss:$8 sps:$4 sm:$0xff]   ;;  %v562_v23 = vld [vmem:[%s782_s0 + $0x74] ss:$8 sps:$4 sm:$0xff]  }
   0x8   :  { %v556_v19 = vld [vmem:[%s782_s0 + $0x64] ss:$8 sps:$4 sm:$0xff]   ;;  %v559_v21 = vld [vmem:[%s782_s0 + $0x60] ss:$8 sps:$4 sm:$0xff]   ;;  %v564_v24 = vld [vmem:[%s782_s0 + $0x30] ss:$8 sps:$4 sm:$0xff]  }
   0x9   :  { %v565_v25 = vld [vmem:[%s782_s0 + $0x70] ss:$8 sps:$4 sm:$0xff]   ;;  %v678_v26 = vld [vmem:[%s783_s2] ss:$0 sm:$0xff] }
   0xa   :  { %208 = vmatpush1.bf16.msra.mxu0 %v535_v3  ;;  %525 = vmatpush1.bf16.msra.mxu1 %v535_v3  ;;  %v683_v28 = vld [vmem:[%s784_s3] ss:$0 sm:$0xff] }
   0xb   :  { %209 = vmatprep.subr.bf16.mxu0 %v566_v0  ;;  %517 = vmatprep.subr.bf16.mxu1 %v566_v0 }
   0xe   :  { %210 = vmatpush1.bf16.msra.mxu0 %v536_v4  ;;  %526 = vmatpush1.bf16.msra.mxu1 %v536_v4 }
   0xf   :  { %211 = vmatprep.subr.bf16.mxu0 %v566_v0  ;;  %518 = vmatprep.subr.bf16.mxu1 %v566_v0 }
  0x12   :  { %212 = vmatpush1.bf16.msra.mxu0 %v537_v7  ;;  %527 = vmatpush1.bf16.msra.mxu1 %v537_v7 }
  0x13   :  { %213 = vmatprep.subr.bf16.mxu0 %v566_v0  ;;  %519 = vmatprep.subr.bf16.mxu1 %v566_v0 }
  0x16   :  { %214 = vmatpush1.bf16.msra.mxu0 %v538_v8  ;;  %528 = vmatpush1.bf16.msra.mxu1 %v538_v8 }
  0x17   :  { %215 = vmatprep.subr.bf16.mxu0 %v566_v0  ;;  %520 = vmatprep.subr.bf16.mxu1 %v566_v0 }
  0x1a   :  { %216 = vmatpush1.bf16.msra.mxu0 %v539_v9  ;;  %529 = vmatpush1.bf16.msra.mxu1 %v539_v9 }
  0x1b   :  { %217 = vmatprep.subr.bf16.mxu0 %v566_v0  ;;  %521 = vmatprep.subr.bf16.mxu1 %v566_v0 }
  0x1e   :  { %218 = vmatpush1.bf16.msra.mxu0 %v540_v10  ;;  %530 = vmatpush1.bf16.msra.mxu1 %v540_v10 }
  0x1f   :  { %233 = vmatprep.subr.bf16.mxu0 %v566_v0  ;;  %522 = vmatprep.subr.bf16.mxu1 %v566_v0 }
  0x22   :  { %234 = vmatpush2.bf16.msra.mxu0 %v541_v11  ;;  %531 = vmatpush2.bf16.msra.mxu1 %v541_v11 }
  0x25   :  { %236 = vmatmul.mubr.bf16.vlgmr.msra.gmra.mxu0 %v542_v12  ;;  %268 = vmatmul.mubr.bf16.vlgmr.msra.gmra.mxu1 %v545_v13 }
  0x26   :  { %473 = vmatprep.mubr.msk.bf16.mxu0 %vm178_vm0, %v548_v14  ;;  %477 = vmatprep.mubr.msk.bf16.mxu1 %vm178_vm0, %v550_v15 }
  0x2d   :  { %244 = vmatmul.mubr.bf16.gmra.mxu0 %v552_v16  ;;  %276 = vmatmul.mubr.bf16.gmra.mxu1 %v553_v17 }
  0x2e   :  { %474 = vmatprep.mubr.msk.bf16.mxu0 %vm178_vm0, %v554_v18  ;;  %478 = vmatprep.mubr.msk.bf16.mxu1 %vm178_vm0, %v556_v19 }
  0x35   :  { %252 = vmatmul.mubr.bf16.gmra.mxu0 %v558_v20  ;;  %284 = vmatmul.mubr.bf16.gmra.mxu1 %v559_v21 }
  0x36   :  { %475 = vmatprep.mubr.msk.bf16.mxu0 %vm178_vm0, %v560_v22  ;;  %479 = vmatprep.mubr.msk.bf16.mxu1 %vm178_vm0, %v562_v23 }
  0x3d   :  { %260 = vmatmul.mubr.bf16.gmra.mxu0 %v564_v24  ;;  %292 = vmatmul.mubr.bf16.gmra.mxu1 %v565_v25 }
  0xe5   :  { %v237_v27 = vpop.f32.mrf.mxu0  ;;  %v269_v29 = vpop.f32.mrf.mxu1 }
  0xe6   :  { %v307_v30 = vmul.f32 %v678_v26, %v237_v27  ;;  %v315_v31 = vmul.f32 %v678_v26, %v269_v29 }
  0xe7   :  { %v239_v32 = vpop.f32.mrf.mxu0  ;;  %v271_v33 = vpop.f32.mrf.mxu1 }
  0xe8   :  { %v330_v34 = vadd.f32 %v683_v28, %v307_v30  ;;  %v338_v35 = vadd.f32 %v683_v28, %v315_v31 }
  0xe9   :  { %v240_v36 = vpop.f32.mrf.mxu0  ;;  %v272_v37 = vpop.f32.mrf.mxu1 }
  0xea   :  { %v346_v38 = vmax.f32 %v330_v34, 0.0  ;;  %v354_v39 = vmax.f32 %v338_v35, 0.0  ;;  %v308_v40 = vmul.f32 %v678_v26, %v240_v36  ;;  %v316_v41 = vmul.f32 %v678_v26, %v272_v37 }
  0xeb   :  { %v242_v42 = vpop.f32.mrf.mxu0  ;;  %v274_v43 = vpop.f32.mrf.mxu1 }
  0xec   :  { %v498_v44 = vpack.c.bf16 %v346_v38, %v346_v38  ;;  %v506_v45 = vpack.c.bf16 %v354_v39, %v354_v39  ;;  %v331_v46 = vadd.f32 %v683_v28, %v308_v40  ;;  %v339_v47 = vadd.f32 %v683_v28, %v316_v41 }
  0xed   :  { %v245_v48 = vpop.f32.mrf.mxu0  ;;  %v277_v49 = vpop.f32.mrf.mxu1 }
  0xee   :  { %427 = vst.msk [vmem:[%s785_s4] sm:$0xf] %vm426_vm1, %v498_v44  ;;  %435 = vst.msk [vmem:[%s785_s4 + $0x20] sm:$0xf] %vm426_vm1, %v506_v45  ;;  %v347_v50 = vmax.f32 %v331_v46, 0.0  ;;  %v355_v51 = vmax.f32 %v339_v47, 0.0  ;;  %v309_v52 = vmul.f32 %v678_v26, %v245_v48  ;;  %v317_v53 = vmul.f32 %v678_v26, %v277_v49 }
  0xef   :  { %v247_v54 = vpop.f32.mrf.mxu0  ;;  %v279_v55 = vpop.f32.mrf.mxu1 }
  0xf0   :  { %v499_v56 = vpack.c.bf16 %v347_v50, %v347_v50  ;;  %v507_v57 = vpack.c.bf16 %v355_v51, %v355_v51  ;;  %v332_v58 = vadd.f32 %v683_v28, %v309_v52  ;;  %v340_v59 = vadd.f32 %v683_v28, %v317_v53 }
  0xf1   :  { %v248_v60 = vpop.f32.mrf.mxu0  ;;  %v280_v61 = vpop.f32.mrf.mxu1 }
  0xf2   :  { %428 = vst.msk [vmem:[%s785_s4 + $0x4] sm:$0xf] %vm426_vm1, %v499_v56  ;;  %436 = vst.msk [vmem:[%s785_s4 + $0x24] sm:$0xf] %vm426_vm1, %v507_v57  ;;  %v348_v62 = vmax.f32 %v332_v58, 0.0  ;;  %v356_v63 = vmax.f32 %v340_v59, 0.0  ;;  %v310_v0 = vmul.f32 %v678_v26, %v248_v60  ;;  %v318_v1 = vmul.f32 %v678_v26, %v280_v61 }
  0xf3   :  { %v250_v2 = vpop.f32.mrf.mxu0  ;;  %v282_v3 = vpop.f32.mrf.mxu1 }
  0xf4   :  { %v500_v4 = vpack.c.bf16 %v348_v62, %v348_v62  ;;  %v508_v5 = vpack.c.bf16 %v356_v63, %v356_v63  ;;  %v333_v6 = vadd.f32 %v683_v28, %v310_v0  ;;  %v341_v7 = vadd.f32 %v683_v28, %v318_v1 }
  0xf5   :  { %v253_v8 = vpop.f32.mrf.mxu0  ;;  %v285_v9 = vpop.f32.mrf.mxu1 }
  0xf6   :  { %429 = vst.msk [vmem:[%s785_s4 + $0x8] sm:$0xf] %vm426_vm1, %v500_v4  ;;  %437 = vst.msk [vmem:[%s785_s4 + $0x28] sm:$0xf] %vm426_vm1, %v508_v5  ;;  %v349_v10 = vmax.f32 %v333_v6, 0.0  ;;  %v357_v11 = vmax.f32 %v341_v7, 0.0  ;;  %v311_v12 = vmul.f32 %v678_v26, %v253_v8  ;;  %v319_v13 = vmul.f32 %v678_v26, %v285_v9 }
  0xf7   :  { %v255_v14 = vpop.f32.mrf.mxu0  ;;  %v287_v15 = vpop.f32.mrf.mxu1 }
  0xf8   :  { %v501_v16 = vpack.c.bf16 %v349_v10, %v349_v10  ;;  %v509_v17 = vpack.c.bf16 %v357_v11, %v357_v11  ;;  %v334_v18 = vadd.f32 %v683_v28, %v311_v12  ;;  %v342_v19 = vadd.f32 %v683_v28, %v319_v13 }
  0xf9   :  { %v256_v20 = vpop.f32.mrf.mxu0  ;;  %v288_v21 = vpop.f32.mrf.mxu1 }
  0xfa   :  { %430 = vst.msk [vmem:[%s785_s4 + $0xc] sm:$0xf] %vm426_vm1, %v501_v16  ;;  %438 = vst.msk [vmem:[%s785_s4 + $0x2c] sm:$0xf] %vm426_vm1, %v509_v17  ;;  %v350_v22 = vmax.f32 %v334_v18, 0.0  ;;  %v358_v23 = vmax.f32 %v342_v19, 0.0  ;;  %v312_v24 = vmul.f32 %v678_v26, %v256_v20  ;;  %v320_v25 = vmul.f32 %v678_v26, %v288_v21 }
  0xfb   :  { %v258_v27 = vpop.f32.mrf.mxu0  ;;  %v290_v29 = vpop.f32.mrf.mxu1 }
  0xfc   :  { %v502_v30 = vpack.c.bf16 %v350_v22, %v350_v22  ;;  %v510_v31 = vpack.c.bf16 %v358_v23, %v358_v23  ;;  %v335_v32 = vadd.f32 %v683_v28, %v312_v24  ;;  %v343_v33 = vadd.f32 %v683_v28, %v320_v25 }
  0xfd   :  { %v261_v34 = vpop.f32.mrf.mxu0  ;;  %v293_v35 = vpop.f32.mrf.mxu1 }
  0xfe   :  { %431 = vst.msk [vmem:[%s785_s4 + $0x10] sm:$0xf] %vm426_vm1, %v502_v30  ;;  %439 = vst.msk [vmem:[%s785_s4 + $0x30] sm:$0xf] %vm426_vm1, %v510_v31  ;;  %v351_v36 = vmax.f32 %v335_v32, 0.0  ;;  %v359_v37 = vmax.f32 %v343_v33, 0.0  ;;  %v313_v38 = vmul.f32 %v678_v26, %v261_v34  ;;  %v321_v39 = vmul.f32 %v678_v26, %v293_v35 }
  0xff   :  { %v263_v40 = vpop.f32.mrf.mxu0  ;;  %v295_v41 = vpop.f32.mrf.mxu1 }
 0x100   :  { %v503_v42 = vpack.c.bf16 %v351_v36, %v351_v36  ;;  %v511_v43 = vpack.c.bf16 %v359_v37, %v359_v37  ;;  %v336_v44 = vadd.f32 %v683_v28, %v313_v38  ;;  %v344_v45 = vadd.f32 %v683_v28, %v321_v39 }
 0x101   :  { %v264_v46 = vpop.f32.mrf.mxu0  ;;  %v296_v47 = vpop.f32.mrf.mxu1 }
 0x102   :  { %432 = vst.msk [vmem:[%s785_s4 + $0x14] sm:$0xf] %vm426_vm1, %v503_v42  ;;  %440 = vst.msk [vmem:[%s785_s4 + $0x34] sm:$0xf] %vm426_vm1, %v511_v43  ;;  %v352_v48 = vmax.f32 %v336_v44, 0.0  ;;  %v360_v49 = vmax.f32 %v344_v45, 0.0  ;;  %v314_v50 = vmul.f32 %v678_v26, %v264_v46  ;;  %v322_v51 = vmul.f32 %v678_v26, %v296_v47 }
 0x103   :  { %v266_v52 = vpop.f32.mrf.mxu0  ;;  %v298_v53 = vpop.f32.mrf.mxu1 }
 0x104   :  { %v504_v54 = vpack.c.bf16 %v352_v48, %v352_v48  ;;  %v512_v55 = vpack.c.bf16 %v360_v49, %v360_v49  ;;  %v337_v56 = vadd.f32 %v683_v28, %v314_v50  ;;  %v345_v57 = vadd.f32 %v683_v28, %v322_v51 }
 0x106   :  { %433 = vst.msk [vmem:[%s785_s4 + $0x18] sm:$0xf] %vm426_vm1, %v504_v54  ;;  %441 = vst.msk [vmem:[%s785_s4 + $0x38] sm:$0xf] %vm426_vm1, %v512_v55  ;;  %v353_v58 = vmax.f32 %v337_v56, 0.0  ;;  %v361_v26 = vmax.f32 %v345_v57, 0.0 }
 0x108   :  { %v505_v59 = vpack.c.bf16 %v353_v58, %v353_v58  ;;  %v513_v60 = vpack.c.bf16 %v361_v26, %v361_v26 }
 0x10a   :  { %434 = vst.msk [vmem:[%s785_s4 + $0x1c] sm:$0xf] %vm426_vm1, %v505_v59  ;;  %442 = vst.msk [vmem:[%s785_s4 + $0x3c] sm:$0xf] %vm426_vm1, %v513_v60 }

// kernel: gamsnet_oam_forward.13
= control target key start
LH: loop header
LB: loop body
LE: loop exit
PB: predicated region body
PF: predicated region fallthrough
CT: control target
= control target key end

     0   :  { %v278_v0 = vmov 0   ;;  %vm112_vm0 = vcmask 130048   ;;  %vm210_vm1 = vcmask 257024   ;;  %s361_s1 = inlined_call_operand.vmem [shape: bf16[144,32], index: 1, kind: input, shape index: {}]   ;;  %s362_s0 = inlined_call_operand.vmem [shape: bf16[32,144], index: 0, kind: input, shape index: {}]   ;;  %s363_s2 = inlined_call_operand.vmem [shape: f32[1,32], index: 2, kind: input, shape index: {}]   ;;  %s364_s3 = inlined_call_operand.vmem [shape: f32[1,32], index: 3, kind: input, shape index: {}]   ;;  %s365_s4 = inlined_call_operand.vmem [shape: bf16[32,32], index: 4, kind: output, shape index: {}]  }
   0x1   :  { %119 = vmatprep.subr.bf16.mxu0 %v278_v0  ;;  %244 = vmatprep.subr.bf16.mxu1 %v278_v0  ;;  %v263_v1 = vld [vmem:[%s361_s1 + $0x38] sm:$0xff]   ;;  %v264_v2 = vld [vmem:[%s361_s1 + $0x30] sm:$0xff]   ;;  %v265_v3 = vld [vmem:[%s361_s1 + $0x28] sm:$0xff]  }
   0x2   :  { %120 = vmatpush1.bf16.msra.mxu0 %v263_v1  ;;  %253 = vmatpush1.bf16.msra.mxu1 %v263_v1  ;;  %v266_v4 = vld [vmem:[%s361_s1 + $0x20] sm:$0xff]   ;;  %v277_v6 = vld [vmem:[%s362_s0 + $0x14] ss:$8 sps:$4 sm:$0xff]   ;;  %v269_v9 = vld [vmem:[%s361_s1 + $0x8] sm:$0xff]  }
   0x3   :  { %121 = vmatprep.subr.bf16.mxu0 %v278_v0  ;;  %245 = vmatprep.subr.bf16.mxu1 %v278_v0  ;;  %v274_v5 = vld [vmem:[%s362_s0 + $0x4] ss:$8 sps:$4 sm:$0xff]   ;;  %v267_v7 = vld [vmem:[%s361_s1 + $0x18] sm:$0xff]   ;;  %v268_v8 = vld [vmem:[%s361_s1 + $0x10] sm:$0xff]  }
   0x4   :  { %232 = vmatprep.mubr.msk.bf16.mxu0 %vm112_vm0, %v274_v5  ;;  %233 = vmatprep.mubr.msk.bf16.mxu1 %vm112_vm0, %v277_v6  ;;  %v270_v10 = vld [vmem:[%s361_s1] sm:$0xff]   ;;  %v275_v13 = vld [vmem:[%s362_s0 + $0x10] ss:$8 sps:$4 sm:$0xff]  }
   0x5   :  { %v271_v11 = vld [vmem:[%s361_s1 + $0x40] sm:$0xff]  }
   0x6   :  { %122 = vmatpush1.bf16.msra.mxu0 %v264_v2  ;;  %254 = vmatpush1.bf16.msra.mxu1 %v264_v2  ;;  %v272_v12 = vld [vmem:[%s362_s0] ss:$8 sps:$4 sm:$0xff]  }
   0x7   :  { %123 = vmatprep.subr.bf16.mxu0 %v278_v0  ;;  %246 = vmatprep.subr.bf16.mxu1 %v278_v0  ;;  %v234_v14 = vld [vmem:[%s363_s2] ss:$0 sm:$0xff] }
   0x8   :  { %v235_v16 = vld [vmem:[%s364_s3] ss:$0 sm:$0xff] }
   0xa   :  { %124 = vmatpush1.bf16.msra.mxu0 %v265_v3  ;;  %255 = vmatpush1.bf16.msra.mxu1 %v265_v3 }
   0xb   :  { %125 = vmatprep.subr.bf16.mxu0 %v278_v0  ;;  %247 = vmatprep.subr.bf16.mxu1 %v278_v0 }
   0xe   :  { %126 = vmatpush1.bf16.msra.mxu0 %v266_v4  ;;  %256 = vmatpush1.bf16.msra.mxu1 %v266_v4 }
   0xf   :  { %127 = vmatprep.subr.bf16.mxu0 %v278_v0  ;;  %248 = vmatprep.subr.bf16.mxu1 %v278_v0 }
  0x12   :  { %128 = vmatpush1.bf16.msra.mxu0 %v267_v7  ;;  %257 = vmatpush1.bf16.msra.mxu1 %v267_v7 }
  0x13   :  { %129 = vmatprep.subr.bf16.mxu0 %v278_v0  ;;  %249 = vmatprep.subr.bf16.mxu1 %v278_v0 }
  0x16   :  { %130 = vmatpush1.bf16.msra.mxu0 %v268_v8  ;;  %258 = vmatpush1.bf16.msra.mxu1 %v268_v8 }
  0x17   :  { %131 = vmatprep.subr.bf16.mxu0 %v278_v0  ;;  %250 = vmatprep.subr.bf16.mxu1 %v278_v0 }
  0x1a   :  { %132 = vmatpush1.bf16.msra.mxu0 %v269_v9  ;;  %259 = vmatpush1.bf16.msra.mxu1 %v269_v9 }
  0x1b   :  { %133 = vmatprep.subr.bf16.mxu0 %v278_v0  ;;  %251 = vmatprep.subr.bf16.mxu1 %v278_v0 }
  0x1e   :  { %134 = vmatpush1.bf16.msra.mxu0 %v270_v10  ;;  %260 = vmatpush1.bf16.msra.mxu1 %v270_v10 }
  0x1f   :  { %149 = vmatprep.subr.bf16.mxu0 %v278_v0  ;;  %252 = vmatprep.subr.bf16.mxu1 %v278_v0 }
  0x22   :  { %150 = vmatpush2.bf16.msra.mxu0 %v271_v11  ;;  %261 = vmatpush2.bf16.msra.mxu1 %v271_v11 }
  0x25   :  { %152 = vmatmul.mubr.bf16.vlgmr.msra.gmra.mxu0 %v272_v12  ;;  %160 = vmatmul.mubr.bf16.vlgmr.msra.gmra.mxu1 %v275_v13 }
  0xe5   :  { %v153_v15 = vpop.f32.mrf.mxu0  ;;  %v161_v17 = vpop.f32.mrf.mxu1 }
  0xe6   :  { %v175_v18 = vmul.f32 %v234_v14, %v153_v15  ;;  %v177_v19 = vmul.f32 %v234_v14, %v161_v17 }
  0xe7   :  { %v155_v20 = vpop.f32.mrf.mxu0  ;;  %v163_v21 = vpop.f32.mrf.mxu1 }
  0xe8   :  { %v186_v22 = vadd.f32 %v235_v16, %v175_v18  ;;  %v188_v23 = vadd.f32 %v235_v16, %v177_v19 }
  0xe9   :  { %v156_v24 = vpop.f32.mrf.mxu0  ;;  %v164_v25 = vpop.f32.mrf.mxu1 }
  0xea   :  { %v190_v26 = vmax.f32 %v186_v22, 0.0  ;;  %v192_v27 = vmax.f32 %v188_v23, 0.0  ;;  %v176_v28 = vmul.f32 %v234_v14, %v156_v24  ;;  %v178_v29 = vmul.f32 %v234_v14, %v164_v25 }
  0xeb   :  { %v158_v30 = vpop.f32.mrf.mxu0  ;;  %v166_v31 = vpop.f32.mrf.mxu1 }
  0xec   :  { %v240_v32 = vpack.c.bf16 %v190_v26, %v190_v26  ;;  %v242_v33 = vpack.c.bf16 %v192_v27, %v192_v27  ;;  %v187_v34 = vadd.f32 %v235_v16, %v176_v28  ;;  %v189_v35 = vadd.f32 %v235_v16, %v178_v29 }
  0xee   :  { %211 = vst.msk [vmem:[%s365_s4] sm:$0xf] %vm210_vm1, %v240_v32  ;;  %213 = vst.msk [vmem:[%s365_s4 + $0x8] sm:$0xf] %vm210_vm1, %v242_v33  ;;  %v191_v36 = vmax.f32 %v187_v34, 0.0  ;;  %v193_v37 = vmax.f32 %v189_v35, 0.0 }
  0xf0   :  { %v241_v38 = vpack.c.bf16 %v191_v36, %v191_v36  ;;  %v243_v39 = vpack.c.bf16 %v193_v37, %v193_v37 }
  0xf2   :  { %212 = vst.msk [vmem:[%s365_s4 + $0x4] sm:$0xf] %vm210_vm1, %v241_v38  ;;  %214 = vst.msk [vmem:[%s365_s4 + $0xc] sm:$0xf] %vm210_vm1, %v243_v39 }

// kernel: gamsnet_oam_forward.14
= control target key start
LH: loop header
LB: loop body
LE: loop exit
PB: predicated region body
PF: predicated region fallthrough
CT: control target
= control target key end

     0   :  { %v362_v1 = vmov 0.0   ;;  %vm363_vm0 = vmmov 0   ;;  %vm174_vm1 = vcmask 261120   ;;  %vm276_vm2 = vcmask 519168   ;;  %s458_s1 = inlined_call_operand.vmem [shape: bf16[288,64], index: 1, kind: input, shape index: {}]   ;;  %s459_s0 = inlined_call_operand.vmem [shape: bf16[8,288], index: 0, kind: input, shape index: {}]   ;;  %s460_s2 = inlined_call_operand.vmem [shape: f32[1,64], index: 2, kind: input, shape index: {}]   ;;  %s461_s3 = inlined_call_operand.vmem [shape: f32[1,64], index: 3, kind: input, shape index: {}]   ;;  %s462_s4 = inlined_call_operand.vmem [shape: bf16[8,64], index: 4, kind: output, shape index: {}]  }
   0x1   :  { %v341_v0 = vld [vmem:[%s458_s1 + $0x78] sm:$0xff]   ;;  %331 = vmatprep.subr.bf16.mxu1 %v362_v1  ;;  %335 = vmatprep.mubr.msk.bf16.mxu1 %vm363_vm0, %v362_v1  ;;  %v343_v3 = vld [vmem:[%s458_s1 + $0x70] sm:$0xff]   ;;  %v345_v5 = vld [vmem:[%s458_s1 + $0x68] sm:$0xff]  }
   0x2   :  { %v342_v2 = vld [vmem:[%s458_s1 + $0x38] sm:$0xff]   ;;  %306 = vmatprep.subr.bf16.mxu0 %v341_v0  ;;  %v344_v4 = vld [vmem:[%s458_s1 + $0x30] sm:$0xff]   ;;  %v346_v6 = vld [vmem:[%s458_s1 + $0x28] sm:$0xff]  }
   0x3   :  { %307 = vmatpush3.bf16.msra.mxu0 %v342_v2  ;;  %v347_v7 = vld [vmem:[%s458_s1 + $0x60] sm:$0xff]   ;;  %v349_v9 = vld [vmem:[%s458_s1 + $0x58] sm:$0xff]   ;;  %v353_v10 = vld [vmem:[%s458_s1 + $0x88] sm:$0xff]  }
   0x4   :  { %308 = vmatprep.subr.bf16.mxu0 %v343_v3  ;;  %v348_v8 = vld [vmem:[%s458_s1 + $0x20] sm:$0xff]   ;;  %v350_v11 = vld [vmem:[%s458_s1 + $0x18] sm:$0xff]   ;;  %332 = vmatpush3.bf16.msra.mxu1 %v353_v10  ;;  %v351_v13 = vld [vmem:[%s458_s1 + $0x50] sm:$0xff]  }
   0x5   :  { %333 = vmatprep.subr.bf16.mxu1 %v362_v1  ;;  %v356_v12 = vld [vmem:[%s458_s1 + $0x80] sm:$0xff]   ;;  %v359_v14 = vld [vmem:[%s459_s0 + $0x8] ss:$0 sps:$4 sm:$0xff]   ;;  %v352_v16 = vld [vmem:[%s458_s1 + $0x10] sm:$0xff]  }
   0x6   :  { %v18_v15 = vld [vmem:[%s459_s0] sm:$0xff]  ;;  %v354_v18 = vld [vmem:[%s458_s1 + $0x48] sm:$0xff]  }
   0x7   :  { %309 = vmatpush3.bf16.msra.mxu0 %v344_v4  ;;  %v283_v17 = vcombine.high %v18_v15, %v18_v15  ;;  %v355_v19 = vld [vmem:[%s458_s1 + $0x8] sm:$0xff]   ;;  %v357_v20 = vld [vmem:[%s458_s1 + $0x40] sm:$0xff]   ;;  %v282_v22 = vcombine.low %v18_v15, %v18_v15 }
   0x8   :  { %310 = vmatprep.subr.bf16.mxu0 %v345_v5  ;;  %334 = vmatpush3.bf16.msra.mxu1 %v356_v12  ;;  %v358_v21 = vld [vmem:[%s458_s1] sm:$0xff]  }
   0x9   :  { %210 = vmatprep.mubr.bf16.mxu0 %v283_v17  ;;  %v304_v30 = vld [vmem:[%s460_s2] ss:$0 sm:$0xff] }
   0xa   :  { %v305_v33 = vld [vmem:[%s461_s3] ss:$0 sm:$0xff] }
   0xb   :  { %311 = vmatpush3.bf16.msra.mxu0 %v346_v6  ;;  %336 = vmatmul.mubr.msk.bf16.vlgmr.msra.gmra.mxu1 %vm174_vm1, %v359_v14 }
   0xc   :  { %312 = vmatprep.subr.bf16.mxu0 %v347_v7 }
   0xf   :  { %313 = vmatpush3.bf16.msra.mxu0 %v348_v8 }
  0x10   :  { %314 = vmatprep.subr.bf16.mxu0 %v349_v9 }
  0x13   :  { %315 = vmatpush3.bf16.msra.mxu0 %v350_v11 }
  0x14   :  { %316 = vmatprep.subr.bf16.mxu0 %v351_v13 }
  0x17   :  { %317 = vmatpush3.bf16.msra.mxu0 %v352_v16 }
  0x18   :  { %318 = vmatprep.subr.bf16.mxu0 %v354_v18 }
  0x1b   :  { %319 = vmatpush3.bf16.msra.mxu0 %v355_v19 }
  0x1c   :  { %320 = vmatprep.subr.bf16.mxu0 %v357_v20 }
  0x1f   :  { %321 = vmatpush3.bf16.msra.mxu0 %v358_v21 }
  0x22   :  { %211 = vmatmul.mubr.bf16.vlgmr.msra.gmra.mxu0 %v282_v22 }
  0xcb   :  { %v252_v23 = vpop.f32.mrf.mxu1 }
  0xcd   :  { %v337_v24 = vpop.f32.mrf.mxu1 }
  0xcf   :  { %v255_v25 = vpop.f32.mrf.mxu1 }
  0xd1   :  { %v338_v26 = vpop.f32.mrf.mxu1 }
  0xe2   :  { %v322_v27 = vpop.f32.mrf.mxu0 }
  0xe4   :  { %v323_v28 = vpop.f32.mrf.mxu0 }
  0xe5   :  { %v324_v29 = vadd.f32 %v323_v28, %v322_v27 }
  0xe6   :  { %v325_v31 = vpop.f32.mrf.mxu0 }
  0xe7   :  { %v253_v32 = vadd.f32 %v324_v29, %v252_v23 }
  0xe8   :  { %v326_v34 = vpop.f32.mrf.mxu0 }
  0xe9   :  { %v265_v35 = vmul.f32 %v304_v30, %v253_v32 }
  0xeb   :  { %v273_v36 = vadd.f32 %v305_v33, %v265_v35 }
  0xed   :  { %v274_v37 = vmax.f32 %v273_v36, 0.0 }
  0xef   :  { %v275_v38 = vpack.c.bf16 %v274_v37, %v274_v37 }
  0xf1   :  { %277 = vst.msk [vmem:[%s462_s4] sm:$0xf] %vm276_vm2, %v275_v38 }

// kernel: gamsnet_oam_forward.16
= control target key start
LH: loop header
LB: loop body
LE: loop exit
PB: predicated region body
PF: predicated region fallthrough
CT: control target
= control target key end

     0   :  { %v305_v0 = vmov 0.0   ;;  %vm306_vm0 = vmmov 0   ;;  %vm74_vm1 = vcmask 523264   ;;  %vm224_vm2 = vcmask 519168   ;;  %s393_s1 = inlined_call_operand.vmem [shape: bf16[128,64], index: 1, kind: input, shape index: {}]   ;;  %s394_s3 = inlined_call_operand.vmem [shape: bf16[64,64], index: 3, kind: input, shape index: {}]   ;;  %s395_s2 = inlined_call_operand.vmem [shape: bf16[8,64], index: 2, kind: input, shape index: {}]   ;;  %s396_s0 = inlined_call_operand.vmem [shape: bf16[8,128], index: 0, kind: input, shape index: {}]   ;;  %s397_s4 = inlined_call_operand.vmem [shape: f32[1,64], index: 4, kind: input, shape index: {}]   ;;  %s398_s5 = inlined_call_operand.vmem [shape: f32[1,64], index: 5, kind: input, shape index: {}]   ;;  %s399_s6 = inlined_call_operand.vmem [shape: bf16[8,64], index: 6, kind: output, shape index: {}]  }
   0x1   :  { %271 = vmatprep.subr.bf16.mxu1 %v305_v0  ;;  %v293_v1 = vld [vmem:[%s393_s1 + $0x38] sm:$0xff]   ;;  %259 = vmatprep.subr.bf16.mxu0 %v305_v0  ;;  %v294_v2 = vld [vmem:[%s393_s1 + $0x30] sm:$0xff]   ;;  %v295_v5 = vld [vmem:[%s393_s1 + $0x28] sm:$0xff]  }
   0x2   :  { %267 = vmatprep.mubr.msk.bf16.mxu0 %vm306_vm0, %v305_v0  ;;  %287 = vmatprep.mubr.msk.bf16.mxu1 %vm306_vm0, %v305_v0  ;;  %v296_v3 = vld [vmem:[%s394_s3 + $0x18] sm:$0xff]   ;;  %v298_v4 = vld [vmem:[%s394_s3 + $0x10] sm:$0xff]   ;;  %v300_v6 = vld [vmem:[%s394_s3 + $0x8] sm:$0xff]  }
   0x3   :  { %272 = vmatpush3.bf16.msra.mxu1 %v293_v1  ;;  %260 = vmatpush3.bf16.msra.mxu0 %v296_v3  ;;  %v297_v7 = vld [vmem:[%s393_s1 + $0x20] sm:$0xff]   ;;  %v299_v9 = vld [vmem:[%s393_s1 + $0x18] sm:$0xff]   ;;  %v301_v11 = vld [vmem:[%s393_s1 + $0x10] sm:$0xff]  }
   0x4   :  { %273 = vmatprep.subr.bf16.mxu1 %v305_v0  ;;  %261 = vmatprep.subr.bf16.mxu0 %v305_v0  ;;  %v302_v8 = vld [vmem:[%s394_s3] sm:$0xff]   ;;  %v303_v12 = vld [vmem:[%s393_s1 + $0x8] sm:$0xff]  }
   0x5   :  { %v41_v10 = vld [vmem:[%s395_s2] sm:$0xf] }
   0x6   :  { %v304_v13 = vld [vmem:[%s393_s1] sm:$0xff]  }
   0x7   :  { %274 = vmatpush3.bf16.msra.mxu1 %v294_v2  ;;  %262 = vmatpush3.bf16.msra.mxu0 %v298_v4  ;;  %v24_v14 = vld [vmem:[%s396_s0] sm:$0xf] }
   0x8   :  { %275 = vmatprep.subr.bf16.mxu1 %v305_v0  ;;  %263 = vmatprep.subr.bf16.mxu0 %v305_v0  ;;  %v243_v20 = vld [vmem:[%s397_s4] ss:$0 sm:$0xff] }
   0x9   :  { %v244_v22 = vld [vmem:[%s398_s5] ss:$0 sm:$0xff] }
   0xb   :  { %276 = vmatpush3.bf16.msra.mxu1 %v295_v5  ;;  %264 = vmatpush3.bf16.msra.mxu0 %v300_v6 }
   0xc   :  { %277 = vmatprep.subr.bf16.mxu1 %v305_v0  ;;  %265 = vmatprep.subr.bf16.mxu0 %v305_v0 }
   0xf   :  { %278 = vmatpush3.bf16.msra.mxu1 %v297_v7  ;;  %266 = vmatpush3.bf16.msra.mxu0 %v302_v8 }
  0x10   :  { %279 = vmatprep.subr.bf16.mxu1 %v305_v0 }
  0x12   :  { %268 = vmatmul.mubr.msk.bf16.vlgmr.msra.gmra.mxu0 %vm74_vm1, %v41_v10 }
  0x13   :  { %280 = vmatpush3.bf16.msra.mxu1 %v299_v9 }
  0x14   :  { %281 = vmatprep.subr.bf16.mxu1 %v305_v0 }
  0x17   :  { %282 = vmatpush3.bf16.msra.mxu1 %v301_v11 }
  0x18   :  { %283 = vmatprep.subr.bf16.mxu1 %v305_v0 }
  0x1b   :  { %284 = vmatpush3.bf16.msra.mxu1 %v303_v12 }
  0x1c   :  { %285 = vmatprep.subr.bf16.mxu1 %v305_v0 }
  0x1f   :  { %286 = vmatpush3.bf16.msra.mxu1 %v304_v13 }
  0x22   :  { %288 = vmatmul.mubr.bf16.vlgmr.msra.gmra.mxu1 %v24_v14 }
  0xd2   :  { %v112_v15 = vpop.f32.mrf.mxu0 }
  0xd4   :  { %v269_v16 = vpop.f32.mrf.mxu0 }
  0xd6   :  { %v115_v17 = vpop.f32.mrf.mxu0 }
  0xd8   :  { %v270_v18 = vpop.f32.mrf.mxu0 }
  0xe2   :  { %v200_v19 = vpop.f32.mrf.mxu1 }
  0xe3   :  { %v201_v21 = vadd.f32 %v200_v19, %v112_v15 }
  0xe4   :  { %v289_v23 = vpop.f32.mrf.mxu1 }
  0xe5   :  { %v213_v24 = vmul.f32 %v243_v20, %v201_v21 }
  0xe6   :  { %v203_v25 = vpop.f32.mrf.mxu1 }
  0xe7   :  { %v221_v26 = vadd.f32 %v244_v22, %v213_v24 }
  0xe8   :  { %v290_v27 = vpop.f32.mrf.mxu1 }
  0xe9   :  { %v222_v28 = vmax.f32 %v221_v26, 0.0 }
  0xeb   :  { %v223_v29 = vpack.c.bf16 %v222_v28, %v222_v28 }
  0xed   :  { %225 = vst.msk [vmem:[%s399_s6] sm:$0xf] %vm224_vm2, %v223_v29 }

// kernel: gamsnet_oam_forward.17
= control target key start
LH: loop header
LB: loop body
LE: loop exit
PB: predicated region body
PF: predicated region fallthrough
CT: control target
= control target key end

     0   :  { %vm66_vm0 = vcmask 261120   ;;  %vm156_vm1 = vcmask 523264   ;;  %vm254_vm2 = vcmask 519168   ;;  %s410_s1 = inlined_call_operand.vmem [shape: bf16[64,64], index: 1, kind: input, shape index: {}]   ;;  %s411_s3 = inlined_call_operand.vmem [shape: bf16[32,64], index: 3, kind: input, shape index: {}]   ;;  %s412_s2 = inlined_call_operand.vmem [shape: bf16[32,32], index: 2, kind: input, shape index: {}]   ;;  %s413_s0 = inlined_call_operand.vmem [shape: bf16[32,64], index: 0, kind: input, shape index: {}]   ;;  %s414_s4 = inlined_call_operand.vmem [shape: f32[1,64], index: 4, kind: input, shape index: {}]   ;;  %s415_s5 = inlined_call_operand.vmem [shape: f32[1,64], index: 5, kind: input, shape index: {}]   ;;  %s416_s6 = inlined_call_operand.vmem [shape: bf16[32,64], index: 6, kind: output, shape index: {}]  }
   0x1   :  { %v317_v0 = vld [vmem:[%s410_s1 + $0x18] sm:$0xff]   ;;  %v318_v1 = vld [vmem:[%s411_s3 + $0x8] sm:$0xff]   ;;  %v319_v2 = vld [vmem:[%s410_s1 + $0x10] sm:$0xff]  }
   0x2   :  { %305 = vmatprep.subr.bf16.mxu1 %v317_v0  ;;  %297 = vmatprep.subr.bf16.mxu0 %v318_v1  ;;  %v320_v3 = vld [vmem:[%s411_s3] sm:$0xff]   ;;  %v321_v4 = vld [vmem:[%s410_s1 + $0x8] sm:$0xff]  }
   0x3   :  { %306 = vmatpush3.bf16.msra.mxu1 %v317_v0  ;;  %298 = vmatpush3.bf16.msra.mxu0 %v318_v1  ;;  %v322_v5 = vld [vmem:[%s412_s2] sm:$0xff]   ;;  %v323_v6 = vld [vmem:[%s412_s2 + $0x8] sm:$0xff]  }
   0x4   :  { %307 = vmatprep.subr.bf16.mxu1 %v319_v2  ;;  %299 = vmatprep.subr.bf16.mxu0 %v320_v3  ;;  %v324_v7 = vld [vmem:[%s410_s1] sm:$0xff]   ;;  %v326_v9 = vld [vmem:[%s413_s0 + $0x8] sm:$0xff]  }
   0x5   :  { %301 = vmatprep.mubr.msk.bf16.mxu0 %vm66_vm0, %v322_v5  ;;  %v325_v8 = vld [vmem:[%s413_s0] sm:$0xff]  }
   0x6   :  { %313 = vmatprep.mubr.msk.bf16.mxu1 %vm156_vm1, %v325_v8  ;;  %v277_v13 = vld [vmem:[%s414_s4] ss:$0 sm:$0xff] }
   0x7   :  { %308 = vmatpush3.bf16.msra.mxu1 %v319_v2  ;;  %300 = vmatpush3.bf16.msra.mxu0 %v320_v3  ;;  %v278_v16 = vld [vmem:[%s415_s5] ss:$0 sm:$0xff] }
   0x8   :  { %309 = vmatprep.subr.bf16.mxu1 %v321_v4 }
   0xa   :  { %302 = vmatmul.mubr.msk.bf16.vlgmr.msra.gmra.mxu0 %vm66_vm0, %v323_v6 }
   0xb   :  { %310 = vmatpush3.bf16.msra.mxu1 %v321_v4 }
   0xc   :  { %311 = vmatprep.subr.bf16.mxu1 %v324_v7 }
   0xf   :  { %312 = vmatpush3.bf16.msra.mxu1 %v324_v7 }
  0x12   :  { %314 = vmatmul.mubr.msk.bf16.vlgmr.msra.gmra.mxu1 %vm156_vm1, %v326_v9 }
  0xca   :  { %v303_v10 = vpop.f32.mrf.mxu0 }
  0xcc   :  { %v107_v11 = vpop.f32.mrf.mxu0 }
  0xce   :  { %v304_v15 = vpop.f32.mrf.mxu0 }
  0xd0   :  { %v110_v24 = vpop.f32.mrf.mxu0 }
  0xd2   :  { %v315_v12 = vpop.f32.mrf.mxu1 }
  0xd3   :  { %v206_v14 = vadd.f32 %v315_v12, %v303_v10 }
  0xd4   :  { %v197_v17 = vpop.f32.mrf.mxu1 }
  0xd5   :  { %v221_v18 = vmul.f32 %v277_v13, %v206_v14  ;;  %v198_v19 = vadd.f32 %v197_v17, %v107_v11 }
  0xd6   :  { %v316_v20 = vpop.f32.mrf.mxu1 }
  0xd7   :  { %v232_v21 = vadd.f32 %v278_v16, %v221_v18  ;;  %v219_v22 = vmul.f32 %v277_v13, %v198_v19  ;;  %v209_v23 = vadd.f32 %v316_v20, %v304_v15 }
  0xd8   :  { %v200_v25 = vpop.f32.mrf.mxu1 }
  0xd9   :  { %v236_v26 = vmax.f32 %v232_v21, 0.0  ;;  %v230_v27 = vadd.f32 %v278_v16, %v219_v22  ;;  %v222_v28 = vmul.f32 %v277_v13, %v209_v23  ;;  %v201_v29 = vadd.f32 %v200_v25, %v110_v24 }
  0xdb   :  { %v285_v30 = vpack.c.bf16 %v236_v26, %v236_v26  ;;  %v234_v31 = vmax.f32 %v230_v27, 0.0  ;;  %v233_v32 = vadd.f32 %v278_v16, %v222_v28  ;;  %v220_v33 = vmul.f32 %v277_v13, %v201_v29 }
  0xdd   :  { %257 = vst.msk [vmem:[%s416_s6 + $0x8] sm:$0xf] %vm254_vm2, %v285_v30  ;;  %v283_v34 = vpack.c.bf16 %v234_v31, %v234_v31  ;;  %v237_v35 = vmax.f32 %v233_v32, 0.0  ;;  %v231_v36 = vadd.f32 %v278_v16, %v220_v33 }
  0xdf   :  { %255 = vst.msk [vmem:[%s416_s6] sm:$0xf] %vm254_vm2, %v283_v34  ;;  %v286_v37 = vpack.c.bf16 %v237_v35, %v237_v35  ;;  %v235_v38 = vmax.f32 %v231_v36, 0.0 }
  0xe1   :  { %258 = vst.msk [vmem:[%s416_s6 + $0xc] sm:$0xf] %vm254_vm2, %v286_v37  ;;  %v284_v39 = vpack.c.bf16 %v235_v38, %v235_v38 }
  0xe3   :  { %256 = vst.msk [vmem:[%s416_s6 + $0x4] sm:$0xf] %vm254_vm2, %v284_v39 }

// kernel: gamsnet_oam_forward.15
= control target key start
LH: loop header
LB: loop body
LE: loop exit
PB: predicated region body
PF: predicated region fallthrough
CT: control target
= control target key end

     0   :  { %v621_v36 = vmov 0.0   ;;  %vm622_vm0 = vmmov 0   ;;  %vm326_vm1 = vcmask 523264   ;;  %s774_s1 = inlined_call_operand.vmem [shape: bf16[576,128], index: 1, kind: input, shape index: {}]   ;;  %s775_s0 = inlined_call_operand.vmem [shape: bf16[8,576], index: 0, kind: input, shape index: {}]   ;;  %s776_s2 = inlined_call_operand.vmem [shape: f32[1,128], index: 2, kind: input, shape index: {}]   ;;  %s777_s3 = inlined_call_operand.vmem [shape: f32[1,128], index: 3, kind: input, shape index: {}]   ;;  %s778_s4 = inlined_call_operand.vmem [shape: bf16[8,128], index: 4, kind: output, shape index: {}]  }
   0x1   :  { %v580_v0 = vld [vmem:[%s774_s1 + $0x78] sm:$0xff]   ;;  %v584_v4 = vld [vmem:[%s774_s1 + $0x70] sm:$0xff]   ;;  %v588_v8 = vld [vmem:[%s774_s1 + $0x68] sm:$0xff]  }
   0x2   :  { %v581_v1 = vld [vmem:[%s774_s1 + $0xf8] sm:$0xff]   ;;  %517 = vmatprep.subr.bf16.mxu0 %v580_v0  ;;  %v585_v5 = vld [vmem:[%s774_s1 + $0xf0] sm:$0xff]   ;;  %v589_v9 = vld [vmem:[%s774_s1 + $0xe8] sm:$0xff]  }
   0x3   :  { %v582_v2 = vld [vmem:[%s774_s1 + $0x38] sm:$0xff]   ;;  %539 = vmatprep.subr.bf16.mxu1 %v581_v1  ;;  %v586_v6 = vld [vmem:[%s774_s1 + $0x30] sm:$0xff]   ;;  %v590_v10 = vld [vmem:[%s774_s1 + $0x28] sm:$0xff]  }
   0x4   :  { %v583_v3 = vld [vmem:[%s774_s1 + $0xb8] sm:$0xff]   ;;  %518 = vmatpush3.bf16.msra.mxu0 %v582_v2  ;;  %v587_v7 = vld [vmem:[%s774_s1 + $0xb0] sm:$0xff]   ;;  %v591_v11 = vld [vmem:[%s774_s1 + $0xa8] sm:$0xff]  }
   0x5   :  { %540 = vmatpush3.bf16.msra.mxu1 %v583_v3  ;;  %519 = vmatprep.subr.bf16.mxu0 %v584_v4  ;;  %v592_v12 = vld [vmem:[%s774_s1 + $0x60] sm:$0xff]   ;;  %v596_v16 = vld [vmem:[%s774_s1 + $0x58] sm:$0xff]   ;;  %v600_v20 = vld [vmem:[%s774_s1 + $0x50] sm:$0xff]  }
   0x6   :  { %541 = vmatprep.subr.bf16.mxu1 %v585_v5  ;;  %v593_v13 = vld [vmem:[%s774_s1 + $0xe0] sm:$0xff]   ;;  %v597_v17 = vld [vmem:[%s774_s1 + $0xd8] sm:$0xff]   ;;  %v601_v21 = vld [vmem:[%s774_s1 + $0xd0] sm:$0xff]  }
   0x7   :  { %v594_v14 = vld [vmem:[%s774_s1 + $0x20] sm:$0xff]   ;;  %v598_v18 = vld [vmem:[%s774_s1 + $0x18] sm:$0xff]   ;;  %v602_v22 = vld [vmem:[%s774_s1 + $0x10] sm:$0xff]  }
   0x8   :  { %520 = vmatpush3.bf16.msra.mxu0 %v586_v6  ;;  %v595_v15 = vld [vmem:[%s774_s1 + $0xa0] sm:$0xff]   ;;  %v599_v19 = vld [vmem:[%s774_s1 + $0x98] sm:$0xff]   ;;  %v603_v23 = vld [vmem:[%s774_s1 + $0x90] sm:$0xff]  }
   0x9   :  { %542 = vmatpush3.bf16.msra.mxu1 %v587_v7  ;;  %521 = vmatprep.subr.bf16.mxu0 %v588_v8  ;;  %v604_v24 = vld [vmem:[%s774_s1 + $0x48] sm:$0xff]   ;;  %v608_v28 = vld [vmem:[%s774_s1 + $0x40] sm:$0xff]   ;;  %v617_v39 = vld [vmem:[%s774_s1 + $0x118] sm:$0xff]  }
   0xa   :  { %543 = vmatprep.subr.bf16.mxu1 %v589_v9  ;;  %v605_v25 = vld [vmem:[%s774_s1 + $0xc8] sm:$0xff]   ;;  %v609_v29 = vld [vmem:[%s774_s1 + $0xc0] sm:$0xff]   ;;  %v618_v40 = vld [vmem:[%s774_s1 + $0x110] sm:$0xff]  }
   0xb   :  { %v606_v26 = vld [vmem:[%s774_s1 + $0x8] sm:$0xff]   ;;  %v610_v30 = vld [vmem:[%s774_s1] sm:$0xff]   ;;  %v614_v43 = vld [vmem:[%s775_s0 + $0x10] ss:$0 sps:$4 sm:$0xff]  }
   0xc   :  { %522 = vmatpush3.bf16.msra.mxu0 %v590_v10  ;;  %v607_v27 = vld [vmem:[%s774_s1 + $0x88] sm:$0xff]   ;;  %v611_v31 = vld [vmem:[%s774_s1 + $0x80] sm:$0xff]  }
   0xd   :  { %544 = vmatpush3.bf16.msra.mxu1 %v591_v11  ;;  %523 = vmatprep.subr.bf16.mxu0 %v592_v12  ;;  %v18_v32 = vld [vmem:[%s775_s0] sm:$0xff]  ;;  %v19_v35 = vld [vmem:[%s775_s0 + $0x8] sm:$0xff] }
   0xe   :  { %545 = vmatprep.subr.bf16.mxu1 %v593_v13  ;;  %v473_v33 = vcombine.low %v18_v32, %v18_v32  ;;  %v474_v34 = vcombine.high %v18_v32, %v18_v32  ;;  %v475_v37 = vcombine.low %v19_v35, %v19_v35  ;;  %v476_v38 = vcombine.high %v19_v35, %v19_v35  ;;  %v619_v41 = vld [vmem:[%s774_s1 + $0x108] sm:$0xff]   ;;  %v620_v42 = vld [vmem:[%s774_s1 + $0x100] sm:$0xff]  }
   0xf   :  { %v515_v56 = vld [vmem:[%s776_s2] ss:$0 sm:$0xff] }
  0x10   :  { %524 = vmatpush3.bf16.msra.mxu0 %v594_v14  ;;  %362 = vmatprep.mubr.bf16.mxu0 %v474_v34  ;;  %v516_v58 = vld [vmem:[%s777_s3] ss:$0 sm:$0xff] }
  0x11   :  { %546 = vmatpush3.bf16.msra.mxu1 %v595_v15  ;;  %525 = vmatprep.subr.bf16.mxu0 %v596_v16 }
  0x12   :  { %547 = vmatprep.subr.bf16.mxu1 %v597_v17  ;;  %402 = vmatprep.mubr.bf16.mxu1 %v476_v38 }
  0x14   :  { %526 = vmatpush3.bf16.msra.mxu0 %v598_v18 }
  0x15   :  { %548 = vmatpush3.bf16.msra.mxu1 %v599_v19  ;;  %527 = vmatprep.subr.bf16.mxu0 %v600_v20 }
  0x16   :  { %549 = vmatprep.subr.bf16.mxu1 %v601_v21 }
  0x18   :  { %528 = vmatpush3.bf16.msra.mxu0 %v602_v22 }
  0x19   :  { %550 = vmatpush3.bf16.msra.mxu1 %v603_v23  ;;  %529 = vmatprep.subr.bf16.mxu0 %v604_v24 }
  0x1a   :  { %551 = vmatprep.subr.bf16.mxu1 %v605_v25 }
  0x1c   :  { %530 = vmatpush3.bf16.msra.mxu0 %v606_v26 }
  0x1d   :  { %552 = vmatpush3.bf16.msra.mxu1 %v607_v27  ;;  %531 = vmatprep.subr.bf16.mxu0 %v608_v28 }
  0x1e   :  { %553 = vmatprep.subr.bf16.mxu1 %v609_v29 }
  0x20   :  { %532 = vmatpush3.bf16.msra.mxu0 %v610_v30 }
  0x21   :  { %554 = vmatpush3.bf16.msra.mxu1 %v611_v31  ;;  %566 = vmatprep.subr.bf16.mxu0 %v621_v36 }
  0x23   :  { %363 = vmatmul.mubr.bf16.vlgmr.msra.gmra.mxu0 %v473_v33 }
  0x24   :  { %403 = vmatmul.mubr.bf16.vlgmr.msra.gmra.mxu1 %v475_v37  ;;  %567 = vmatpush3.bf16.msra.mxu0 %v617_v39 }
  0x25   :  { %568 = vmatprep.subr.bf16.mxu0 %v621_v36  ;;  %574 = vmatprep.mubr.msk.bf16.mxu0 %vm622_vm0, %v621_v36 }
  0x28   :  { %569 = vmatpush3.bf16.msra.mxu0 %v618_v40 }
  0x29   :  { %570 = vmatprep.subr.bf16.mxu0 %v621_v36 }
  0x2c   :  { %571 = vmatpush3.bf16.msra.mxu0 %v619_v41 }
  0x2d   :  { %572 = vmatprep.subr.bf16.mxu0 %v621_v36 }
  0x30   :  { %573 = vmatpush3.bf16.msra.mxu0 %v620_v42 }
  0x33   :  { %575 = vmatmul.mubr.msk.bf16.vlgmr.msra.gmra.mxu0 %vm326_vm1, %v614_v43 }
  0xe3   :  { %v533_v44 = vpop.f32.mrf.mxu0 }
  0xe4   :  { %v555_v45 = vpop.f32.mrf.mxu1 }
  0xe5   :  { %v534_v46 = vpop.f32.mrf.mxu0 }
  0xe6   :  { %v556_v47 = vpop.f32.mrf.mxu1  ;;  %v535_v52 = vadd.f32 %v534_v46, %v533_v44 }
  0xe7   :  { %v536_v48 = vpop.f32.mrf.mxu0  ;;  %v557_v53 = vadd.f32 %v556_v47, %v555_v45 }
  0xe8   :  { %v558_v49 = vpop.f32.mrf.mxu1 }
  0xe9   :  { %v537_v50 = vpop.f32.mrf.mxu0  ;;  %v405_v54 = vadd.f32 %v557_v53, %v535_v52 }
  0xea   :  { %v559_v51 = vpop.f32.mrf.mxu1 }
  0xf3   :  { %v444_v55 = vpop.f32.mrf.mxu0 }
  0xf4   :  { %v445_v57 = vadd.f32 %v444_v55, %v405_v54 }
  0xf5   :  { %v576_v59 = vpop.f32.mrf.mxu0 }
  0xf6   :  { %v457_v60 = vmul.f32 %v515_v56, %v445_v57 }
  0xf7   :  { %v447_v61 = vpop.f32.mrf.mxu0 }
  0xf8   :  { %v465_v62 = vadd.f32 %v516_v58, %v457_v60 }
  0xf9   :  { %v577_v63 = vpop.f32.mrf.mxu0 }
  0xfa   :  { %v466_v0 = vmax.f32 %v465_v62, 0.0 }
  0xfc   :  { %v467_v1 = vpack.c.bf16 %v466_v0, %v466_v0 }
  0xfe   :  { %468 = vst [vmem:[%s778_s4] sm:$0xf] %v467_v1 }

// kernel: gamsnet_oam_forward.19
= control target key start
LH: loop header
LB: loop body
LE: loop exit
PB: predicated region body
PF: predicated region fallthrough
CT: control target
= control target key end

     0   :  { %vm106_vm0 = vcmask 523264   ;;  %vm354_vm1 = vcmask 519168   ;;  %s660_s1 = inlined_call_operand.vmem [shape: bf16[64,64], index: 1, kind: input, shape index: {}]   ;;  %s661_s0 = inlined_call_operand.vmem [shape: bf16[128,64], index: 0, kind: input, shape index: {}]   ;;  %s662_s2 = inlined_call_operand.vmem [shape: f32[1,64], index: 2, kind: input, shape index: {}]   ;;  %s663_s3 = inlined_call_operand.vmem [shape: f32[1,64], index: 3, kind: input, shape index: {}]   ;;  %s664_s4 = inlined_call_operand.vmem [shape: bf16[128,64], index: 4, kind: output, shape index: {}]  }
   0x1   :  { %v473_v0 = vld [vmem:[%s660_s1 + $0x18] sm:$0xff]   ;;  %v474_v1 = vld [vmem:[%s660_s1 + $0x10] sm:$0xff]   ;;  %v475_v2 = vld [vmem:[%s660_s1 + $0x8] sm:$0xff]  }
   0x2   :  { %441 = vmatprep.subr.bf16.mxu0 %v473_v0  ;;  %465 = vmatprep.subr.bf16.mxu1 %v473_v0  ;;  %v477_v3 = vld [vmem:[%s661_s0] sm:$0xff]   ;;  %v479_v6 = vld [vmem:[%s661_s0 + $0x8] sm:$0xff]   ;;  %v481_v8 = vld [vmem:[%s661_s0 + $0x10] sm:$0xff]  }
   0x3   :  { %442 = vmatpush3.bf16.msra.mxu0 %v473_v0  ;;  %469 = vmatpush3.bf16.msra.mxu1 %v473_v0  ;;  %v478_v4 = vld [vmem:[%s661_s0 + $0x20] sm:$0xff]   ;;  %v480_v7 = vld [vmem:[%s661_s0 + $0x28] sm:$0xff]   ;;  %v482_v9 = vld [vmem:[%s661_s0 + $0x30] sm:$0xff]  }
   0x4   :  { %443 = vmatprep.subr.bf16.mxu0 %v474_v1  ;;  %466 = vmatprep.subr.bf16.mxu1 %v474_v1  ;;  %v476_v5 = vld [vmem:[%s660_s1] sm:$0xff]   ;;  %v483_v10 = vld [vmem:[%s661_s0 + $0x18] sm:$0xff]  }
   0x5   :  { %449 = vmatprep.mubr.msk.bf16.mxu0 %vm106_vm0, %v477_v3  ;;  %457 = vmatprep.mubr.msk.bf16.mxu1 %vm106_vm0, %v478_v4  ;;  %v484_v11 = vld [vmem:[%s661_s0 + $0x38] sm:$0xff]   ;;  %v557_v12 = vld [vmem:[%s662_s2] ss:$0 sm:$0xff] }
   0x6   :  { %v562_v14 = vld [vmem:[%s663_s3] ss:$0 sm:$0xff] }
   0x7   :  { %444 = vmatpush3.bf16.msra.mxu0 %v474_v1  ;;  %470 = vmatpush3.bf16.msra.mxu1 %v474_v1 }
   0x8   :  { %445 = vmatprep.subr.bf16.mxu0 %v475_v2  ;;  %467 = vmatprep.subr.bf16.mxu1 %v475_v2 }
   0xb   :  { %446 = vmatpush3.bf16.msra.mxu0 %v475_v2  ;;  %471 = vmatpush3.bf16.msra.mxu1 %v475_v2 }
   0xc   :  { %447 = vmatprep.subr.bf16.mxu0 %v476_v5  ;;  %468 = vmatprep.subr.bf16.mxu1 %v476_v5 }
   0xf   :  { %448 = vmatpush3.bf16.msra.mxu0 %v476_v5  ;;  %472 = vmatpush3.bf16.msra.mxu1 %v476_v5 }
  0x12   :  { %450 = vmatmul.mubr.msk.bf16.vlgmr.msra.gmra.mxu0 %vm106_vm0, %v479_v6  ;;  %458 = vmatmul.mubr.msk.bf16.vlgmr.msra.gmra.mxu1 %vm106_vm0, %v480_v7 }
  0x13   :  { %453 = vmatprep.mubr.msk.bf16.mxu0 %vm106_vm0, %v481_v8  ;;  %461 = vmatprep.mubr.msk.bf16.mxu1 %vm106_vm0, %v482_v9 }
  0x1a   :  { %454 = vmatmul.mubr.msk.bf16.gmra.mxu0 %vm106_vm0, %v483_v10  ;;  %462 = vmatmul.mubr.msk.bf16.gmra.mxu1 %vm106_vm0, %v484_v11 }
  0xd2   :  { %v451_v13 = vpop.f32.mrf.mxu0  ;;  %v459_v15 = vpop.f32.mrf.mxu1 }
  0xd3   :  { %v237_v16 = vmul.f32 %v451_v13, %v557_v12  ;;  %v245_v17 = vmul.f32 %v459_v15, %v557_v12 }
  0xd4   :  { %v165_v18 = vpop.f32.mrf.mxu0  ;;  %v197_v19 = vpop.f32.mrf.mxu1 }
  0xd5   :  { %v260_v20 = vadd.f32 %v562_v14, %v237_v16  ;;  %v268_v21 = vadd.f32 %v562_v14, %v245_v17  ;;  %v235_v22 = vmul.f32 %v557_v12, %v165_v18  ;;  %v243_v23 = vmul.f32 %v557_v12, %v197_v19 }
  0xd6   :  { %v452_v24 = vpop.f32.mrf.mxu0  ;;  %v460_v25 = vpop.f32.mrf.mxu1 }
  0xd7   :  { %v276_v26 = vmax.f32 %v260_v20, 0.0  ;;  %v284_v27 = vmax.f32 %v268_v21, 0.0  ;;  %v258_v28 = vadd.f32 %v562_v14, %v235_v22  ;;  %v266_v29 = vadd.f32 %v562_v14, %v243_v23 }
  0xd8   :  { %v238_v30 = vmul.f32 %v452_v24, %v557_v12  ;;  %v246_v31 = vmul.f32 %v460_v25, %v557_v12  ;;  %v168_v32 = vpop.f32.mrf.mxu0  ;;  %v200_v33 = vpop.f32.mrf.mxu1 }
  0xd9   :  { %v415_v34 = vpack.c.bf16 %v276_v26, %v276_v26  ;;  %v423_v35 = vpack.c.bf16 %v284_v27, %v284_v27  ;;  %v274_v36 = vmax.f32 %v258_v28, 0.0  ;;  %v282_v37 = vmax.f32 %v266_v29, 0.0 }
  0xda   :  { %v261_v38 = vadd.f32 %v562_v14, %v238_v30  ;;  %v269_v39 = vadd.f32 %v562_v14, %v246_v31  ;;  %v236_v40 = vmul.f32 %v557_v12, %v168_v32  ;;  %v244_v41 = vmul.f32 %v557_v12, %v200_v33  ;;  %v455_v42 = vpop.f32.mrf.mxu0  ;;  %v463_v43 = vpop.f32.mrf.mxu1 }
  0xdb   :  { %357 = vst.msk [vmem:[%s664_s4 + $0x8] sm:$0xf] %vm354_vm1, %v415_v34  ;;  %365 = vst.msk [vmem:[%s664_s4 + $0x28] sm:$0xf] %vm354_vm1, %v423_v35  ;;  %v413_v44 = vpack.c.bf16 %v274_v36, %v274_v36  ;;  %v421_v45 = vpack.c.bf16 %v282_v37, %v282_v37  ;;  %v241_v46 = vmul.f32 %v455_v42, %v557_v12 }
  0xdc   :  { %v249_v47 = vmul.f32 %v463_v43, %v557_v12  ;;  %v277_v48 = vmax.f32 %v261_v38, 0.0  ;;  %v285_v49 = vmax.f32 %v269_v39, 0.0  ;;  %v259_v50 = vadd.f32 %v562_v14, %v236_v40  ;;  %v181_v52 = vpop.f32.mrf.mxu0  ;;  %v213_v53 = vpop.f32.mrf.mxu1 }
  0xdd   :  { %v267_v51 = vadd.f32 %v562_v14, %v244_v41  ;;  %355 = vst.msk [vmem:[%s664_s4] sm:$0xf] %vm354_vm1, %v413_v44  ;;  %363 = vst.msk [vmem:[%s664_s4 + $0x20] sm:$0xf] %vm354_vm1, %v421_v45  ;;  %v264_v54 = vadd.f32 %v562_v14, %v241_v46  ;;  %v239_v56 = vmul.f32 %v557_v12, %v181_v52 }
  0xde   :  { %v272_v55 = vadd.f32 %v562_v14, %v249_v47  ;;  %v247_v57 = vmul.f32 %v557_v12, %v213_v53  ;;  %v416_v58 = vpack.c.bf16 %v277_v48, %v277_v48  ;;  %v424_v59 = vpack.c.bf16 %v285_v49, %v285_v49  ;;  %v456_v62 = vpop.f32.mrf.mxu0  ;;  %v464_v63 = vpop.f32.mrf.mxu1 }
  0xdf   :  { %v275_v60 = vmax.f32 %v259_v50, 0.0  ;;  %v283_v61 = vmax.f32 %v267_v51, 0.0  ;;  %v280_v0 = vmax.f32 %v264_v54, 0.0  ;;  %v262_v2 = vadd.f32 %v562_v14, %v239_v56 }
  0xe0   :  { %v288_v1 = vmax.f32 %v272_v55, 0.0  ;;  %v270_v3 = vadd.f32 %v562_v14, %v247_v57  ;;  %358 = vst.msk [vmem:[%s664_s4 + $0xc] sm:$0xf] %vm354_vm1, %v416_v58  ;;  %366 = vst.msk [vmem:[%s664_s4 + $0x2c] sm:$0xf] %vm354_vm1, %v424_v59  ;;  %v242_v6 = vmul.f32 %v456_v62, %v557_v12  ;;  %v250_v7 = vmul.f32 %v464_v63, %v557_v12  ;;  %v184_v8 = vpop.f32.mrf.mxu0  ;;  %v216_v9 = vpop.f32.mrf.mxu1 }
  0xe1   :  { %v414_v4 = vpack.c.bf16 %v275_v60, %v275_v60  ;;  %v422_v5 = vpack.c.bf16 %v283_v61, %v283_v61  ;;  %v419_v10 = vpack.c.bf16 %v280_v0, %v280_v0  ;;  %v278_v13 = vmax.f32 %v262_v2, 0.0 }
  0xe2   :  { %v427_v11 = vpack.c.bf16 %v288_v1, %v288_v1  ;;  %v286_v15 = vmax.f32 %v270_v3, 0.0  ;;  %v265_v16 = vadd.f32 %v562_v14, %v242_v6  ;;  %v273_v17 = vadd.f32 %v562_v14, %v250_v7 }
  0xe3   :  { %356 = vst.msk [vmem:[%s664_s4 + $0x4] sm:$0xf] %vm354_vm1, %v414_v4  ;;  %364 = vst.msk [vmem:[%s664_s4 + $0x24] sm:$0xf] %vm354_vm1, %v422_v5  ;;  %v240_v18 = vmul.f32 %v557_v12, %v184_v8  ;;  %v248_v19 = vmul.f32 %v557_v12, %v216_v9  ;;  %v417_v20 = vpack.c.bf16 %v278_v13, %v278_v13 }
  0xe4   :  { %361 = vst.msk [vmem:[%s664_s4 + $0x18] sm:$0xf] %vm354_vm1, %v419_v10  ;;  %369 = vst.msk [vmem:[%s664_s4 + $0x38] sm:$0xf] %vm354_vm1, %v427_v11  ;;  %v425_v21 = vpack.c.bf16 %v286_v15, %v286_v15  ;;  %v281_v22 = vmax.f32 %v265_v16, 0.0  ;;  %v289_v23 = vmax.f32 %v273_v17, 0.0 }
  0xe5   :  { %v263_v24 = vadd.f32 %v562_v14, %v240_v18  ;;  %v271_v25 = vadd.f32 %v562_v14, %v248_v19  ;;  %359 = vst.msk [vmem:[%s664_s4 + $0x10] sm:$0xf] %vm354_vm1, %v417_v20 }
  0xe6   :  { %367 = vst.msk [vmem:[%s664_s4 + $0x30] sm:$0xf] %vm354_vm1, %v425_v21  ;;  %v420_v12 = vpack.c.bf16 %v281_v22, %v281_v22  ;;  %v428_v26 = vpack.c.bf16 %v289_v23, %v289_v23 }
  0xe7   :  { %v279_v27 = vmax.f32 %v263_v24, 0.0  ;;  %v287_v28 = vmax.f32 %v271_v25, 0.0 }
  0xe8   :  { %362 = vst.msk [vmem:[%s664_s4 + $0x1c] sm:$0xf] %vm354_vm1, %v420_v12  ;;  %370 = vst.msk [vmem:[%s664_s4 + $0x3c] sm:$0xf] %vm354_vm1, %v428_v26 }
  0xe9   :  { %v418_v14 = vpack.c.bf16 %v279_v27, %v279_v27  ;;  %v426_v29 = vpack.c.bf16 %v287_v28, %v287_v28 }
  0xeb   :  { %360 = vst.msk [vmem:[%s664_s4 + $0x14] sm:$0xf] %vm354_vm1, %v418_v14  ;;  %368 = vst.msk [vmem:[%s664_s4 + $0x34] sm:$0xf] %vm354_vm1, %v426_v29 }

// kernel: gamsnet_oam_forward.18
= control target key start
LH: loop header
LB: loop body
LE: loop exit
PB: predicated region body
PF: predicated region fallthrough
CT: control target
= control target key end

     0   :  { %vm112_vm0 = vcmask 130048   ;;  %vm298_vm1 = vcmask 523264   ;;  %vm546_vm2 = vcmask 519168   ;;  %s942_s1 = inlined_call_operand.vmem [shape: bf16[64,64], index: 1, kind: input, shape index: {}]   ;;  %s943_s3 = inlined_call_operand.vmem [shape: bf16[16,64], index: 3, kind: input, shape index: {}]   ;;  %s944_s2 = inlined_call_operand.vmem [shape: bf16[128,16], index: 2, kind: input, shape index: {}]   ;;  %s945_s0 = inlined_call_operand.vmem [shape: bf16[128,64], index: 0, kind: input, shape index: {}]   ;;  %s946_s4 = inlined_call_operand.vmem [shape: f32[1,64], index: 4, kind: input, shape index: {}]   ;;  %s947_s5 = inlined_call_operand.vmem [shape: f32[1,64], index: 5, kind: input, shape index: {}]   ;;  %s948_s6 = inlined_call_operand.vmem [shape: bf16[128,64], index: 6, kind: output, shape index: {}]  }
   0x1   :  { %v701_v0 = vld [vmem:[%s942_s1 + $0x18] sm:$0xff]   ;;  %v702_v1 = vld [vmem:[%s942_s1 + $0x10] sm:$0xff]   ;;  %v703_v2 = vld [vmem:[%s943_s3] sm:$0xff]  }
   0x2   :  { %677 = vmatprep.subr.bf16.mxu1 %v701_v0  ;;  %v704_v3 = vld [vmem:[%s942_s1 + $0x8] sm:$0xff]   ;;  %659 = vmatprep.subr.bf16.mxu0 %v703_v2  ;;  %v705_v4 = vld [vmem:[%s944_s2] sm:$0xff]   ;;  %v710_v8 = vld [vmem:[%s944_s2 + $0x10] sm:$0xff]  }
   0x3   :  { %678 = vmatpush3.bf16.msra.mxu1 %v701_v0  ;;  %660 = vmatpush3.bf16.msra.mxu0 %v703_v2  ;;  %v706_v5 = vld [vmem:[%s944_s2 + $0x8] sm:$0xff]   ;;  %v708_v6 = vld [vmem:[%s945_s0] sm:$0xff]   ;;  %v711_v9 = vld [vmem:[%s944_s2 + $0x18] sm:$0xff]  }
   0x4   :  { %679 = vmatprep.subr.bf16.mxu1 %v702_v1  ;;  %661 = vmatprep.mubr.msk.bf16.mxu0 %vm112_vm0, %v705_v4  ;;  %v707_v7 = vld [vmem:[%s942_s1] sm:$0xff]   ;;  %v709_v11 = vld [vmem:[%s945_s0 + $0x8] sm:$0xff]   ;;  %v712_v12 = vld [vmem:[%s945_s0 + $0x10] sm:$0xff]  }
   0x5   :  { %685 = vmatprep.mubr.msk.bf16.mxu1 %vm298_vm1, %v708_v6  ;;  %v714_v10 = vld [vmem:[%s944_s2 + $0x20] sm:$0xff]   ;;  %v715_v13 = vld [vmem:[%s944_s2 + $0x28] sm:$0xff]   ;;  %v718_v14 = vld [vmem:[%s944_s2 + $0x30] sm:$0xff]  }
   0x6   :  { %662 = vmatmul.mubr.msk.bf16.vlgmr.msra.gmra.mxu0 %vm112_vm0, %v706_v5  ;;  %v713_v15 = vld [vmem:[%s945_s0 + $0x18] sm:$0xff]   ;;  %v716_v16 = vld [vmem:[%s945_s0 + $0x20] sm:$0xff]   ;;  %v717_v18 = vld [vmem:[%s945_s0 + $0x28] sm:$0xff]  }
   0x7   :  { %680 = vmatpush3.bf16.msra.mxu1 %v702_v1  ;;  %665 = vmatprep.mubr.msk.bf16.mxu0 %vm112_vm0, %v710_v8  ;;  %v719_v17 = vld [vmem:[%s944_s2 + $0x38] sm:$0xff]   ;;  %v720_v19 = vld [vmem:[%s945_s0 + $0x30] sm:$0xff]   ;;  %v839_v27 = vld [vmem:[%s946_s4] ss:$0 sm:$0xff] }
   0x8   :  { %681 = vmatprep.subr.bf16.mxu1 %v704_v3  ;;  %v721_v20 = vld [vmem:[%s945_s0 + $0x38] sm:$0xff]   ;;  %v844_v30 = vld [vmem:[%s947_s5] ss:$0 sm:$0xff] }
   0xb   :  { %682 = vmatpush3.bf16.msra.mxu1 %v704_v3 }
   0xc   :  { %683 = vmatprep.subr.bf16.mxu1 %v707_v7 }
   0xe   :  { %666 = vmatmul.mubr.msk.bf16.gmra.mxu0 %vm112_vm0, %v711_v9 }
   0xf   :  { %684 = vmatpush3.bf16.msra.mxu1 %v707_v7  ;;  %669 = vmatprep.mubr.msk.bf16.mxu0 %vm112_vm0, %v714_v10 }
  0x12   :  { %686 = vmatmul.mubr.msk.bf16.vlgmr.msra.gmra.mxu1 %vm298_vm1, %v709_v11 }
  0x13   :  { %689 = vmatprep.mubr.msk.bf16.mxu1 %vm298_vm1, %v712_v12 }
  0x16   :  { %670 = vmatmul.mubr.msk.bf16.gmra.mxu0 %vm112_vm0, %v715_v13 }
  0x17   :  { %673 = vmatprep.mubr.msk.bf16.mxu0 %vm112_vm0, %v718_v14 }
  0x1a   :  { %690 = vmatmul.mubr.msk.bf16.gmra.mxu1 %vm298_vm1, %v713_v15 }
  0x1b   :  { %693 = vmatprep.mubr.msk.bf16.mxu1 %vm298_vm1, %v716_v16 }
  0x1e   :  { %674 = vmatmul.mubr.msk.bf16.gmra.mxu0 %vm112_vm0, %v719_v17 }
  0x22   :  { %694 = vmatmul.mubr.msk.bf16.gmra.mxu1 %vm298_vm1, %v717_v18 }
  0x23   :  { %697 = vmatprep.mubr.msk.bf16.mxu1 %vm298_vm1, %v720_v19 }
  0x2a   :  { %698 = vmatmul.mubr.msk.bf16.gmra.mxu1 %vm298_vm1, %v721_v20 }
  0xc6   :  { %v663_v21 = vpop.f32.mrf.mxu0 }
  0xc8   :  { %v171_v22 = vpop.f32.mrf.mxu0 }
  0xca   :  { %v664_v23 = vpop.f32.mrf.mxu0 }
  0xcc   :  { %v174_v24 = vpop.f32.mrf.mxu0 }
  0xce   :  { %v667_v25 = vpop.f32.mrf.mxu0 }
  0xd0   :  { %v187_v28 = vpop.f32.mrf.mxu0 }
  0xd2   :  { %v687_v26 = vpop.f32.mrf.mxu1  ;;  %v668_v32 = vpop.f32.mrf.mxu0 }
  0xd3   :  { %v366_v29 = vadd.f32 %v687_v26, %v663_v21 }
  0xd4   :  { %v357_v31 = vpop.f32.mrf.mxu1  ;;  %v190_v36 = vpop.f32.mrf.mxu0 }
  0xd5   :  { %v429_v33 = vmul.f32 %v839_v27, %v366_v29  ;;  %v358_v34 = vadd.f32 %v357_v31, %v171_v22 }
  0xd6   :  { %v688_v35 = vpop.f32.mrf.mxu1  ;;  %v671_v41 = vpop.f32.mrf.mxu0 }
  0xd7   :  { %v452_v37 = vadd.f32 %v844_v30, %v429_v33  ;;  %v427_v38 = vmul.f32 %v839_v27, %v358_v34  ;;  %v369_v39 = vadd.f32 %v688_v35, %v664_v23 }
  0xd8   :  { %v360_v40 = vpop.f32.mrf.mxu1  ;;  %v203_v47 = vpop.f32.mrf.mxu0 }
  0xd9   :  { %v468_v42 = vmax.f32 %v452_v37, 0.0  ;;  %v450_v43 = vadd.f32 %v844_v30, %v427_v38  ;;  %v430_v44 = vmul.f32 %v839_v27, %v369_v39  ;;  %v361_v45 = vadd.f32 %v360_v40, %v174_v24 }
  0xda   :  { %v691_v46 = vpop.f32.mrf.mxu1  ;;  %v672_v54 = vpop.f32.mrf.mxu0 }
  0xdb   :  { %v624_v48 = vpack.c.bf16 %v468_v42, %v468_v42  ;;  %v466_v49 = vmax.f32 %v450_v43, 0.0  ;;  %v453_v50 = vadd.f32 %v844_v30, %v430_v44  ;;  %v428_v51 = vmul.f32 %v839_v27, %v361_v45 }
  0xdc   :  { %v382_v52 = vadd.f32 %v691_v46, %v667_v25  ;;  %v373_v53 = vpop.f32.mrf.mxu1  ;;  %v206_v3 = vpop.f32.mrf.mxu0 }
  0xdd   :  { %549 = vst.msk [vmem:[%s948_s6 + $0x8] sm:$0xf] %vm546_vm2, %v624_v48  ;;  %v622_v55 = vpack.c.bf16 %v466_v49, %v466_v49  ;;  %v469_v56 = vmax.f32 %v453_v50, 0.0  ;;  %v451_v57 = vadd.f32 %v844_v30, %v428_v51  ;;  %v374_v58 = vadd.f32 %v373_v53, %v187_v28 }
  0xde   :  { %v433_v59 = vmul.f32 %v839_v27, %v382_v52  ;;  %v692_v60 = vpop.f32.mrf.mxu1  ;;  %v675_v15 = vpop.f32.mrf.mxu0 }
  0xdf   :  { %547 = vst.msk [vmem:[%s948_s6] sm:$0xf] %vm546_vm2, %v622_v55  ;;  %v625_v61 = vpack.c.bf16 %v469_v56, %v469_v56  ;;  %v467_v62 = vmax.f32 %v451_v57, 0.0  ;;  %v431_v63 = vmul.f32 %v839_v27, %v374_v58  ;;  %v385_v0 = vadd.f32 %v692_v60, %v668_v32 }
  0xe0   :  { %v456_v1 = vadd.f32 %v844_v30, %v433_v59  ;;  %v376_v2 = vpop.f32.mrf.mxu1  ;;  %v219_v29 = vpop.f32.mrf.mxu0 }
  0xe1   :  { %550 = vst.msk [vmem:[%s948_s6 + $0xc] sm:$0xf] %vm546_vm2, %v625_v61  ;;  %v623_v4 = vpack.c.bf16 %v467_v62, %v467_v62  ;;  %v454_v5 = vadd.f32 %v844_v30, %v431_v63  ;;  %v434_v6 = vmul.f32 %v839_v27, %v385_v0  ;;  %v377_v7 = vadd.f32 %v376_v2, %v190_v36 }
  0xe2   :  { %v472_v8 = vmax.f32 %v456_v1, 0.0  ;;  %v695_v9 = vpop.f32.mrf.mxu1  ;;  %v676_v43 = vpop.f32.mrf.mxu0 }
  0xe3   :  { %548 = vst.msk [vmem:[%s948_s6 + $0x4] sm:$0xf] %vm546_vm2, %v623_v4  ;;  %v470_v10 = vmax.f32 %v454_v5, 0.0  ;;  %v457_v11 = vadd.f32 %v844_v30, %v434_v6  ;;  %v432_v12 = vmul.f32 %v839_v27, %v377_v7  ;;  %v398_v13 = vadd.f32 %v695_v9, %v671_v41 }
  0xe4   :  { %v628_v14 = vpack.c.bf16 %v472_v8, %v472_v8  ;;  %v389_v16 = vpop.f32.mrf.mxu1  ;;  %v222_v55 = vpop.f32.mrf.mxu0 }
  0xe5   :  { %v626_v17 = vpack.c.bf16 %v470_v10, %v470_v10  ;;  %v473_v18 = vmax.f32 %v457_v11, 0.0  ;;  %v455_v19 = vadd.f32 %v844_v30, %v432_v12  ;;  %v437_v20 = vmul.f32 %v839_v27, %v398_v13 }
  0xe6   :  { %553 = vst.msk [vmem:[%s948_s6 + $0x18] sm:$0xf] %vm546_vm2, %v628_v14  ;;  %v390_v21 = vadd.f32 %v389_v16, %v203_v47  ;;  %v696_v22 = vpop.f32.mrf.mxu1 }
  0xe7   :  { %551 = vst.msk [vmem:[%s948_s6 + $0x10] sm:$0xf] %vm546_vm2, %v626_v17  ;;  %v629_v23 = vpack.c.bf16 %v473_v18, %v473_v18  ;;  %v471_v24 = vmax.f32 %v455_v19, 0.0  ;;  %v460_v25 = vadd.f32 %v844_v30, %v437_v20  ;;  %v401_v26 = vadd.f32 %v696_v22, %v672_v54 }
  0xe8   :  { %v435_v28 = vmul.f32 %v839_v27, %v390_v21  ;;  %v392_v31 = vpop.f32.mrf.mxu1 }
  0xe9   :  { %554 = vst.msk [vmem:[%s948_s6 + $0x1c] sm:$0xf] %vm546_vm2, %v629_v23  ;;  %v627_v32 = vpack.c.bf16 %v471_v24, %v471_v24  ;;  %v476_v33 = vmax.f32 %v460_v25, 0.0  ;;  %v438_v34 = vmul.f32 %v839_v27, %v401_v26  ;;  %v393_v35 = vadd.f32 %v392_v31, %v206_v3 }
  0xea   :  { %v458_v36 = vadd.f32 %v844_v30, %v435_v28  ;;  %v699_v37 = vpop.f32.mrf.mxu1 }
  0xeb   :  { %552 = vst.msk [vmem:[%s948_s6 + $0x14] sm:$0xf] %vm546_vm2, %v627_v32  ;;  %v632_v38 = vpack.c.bf16 %v476_v33, %v476_v33  ;;  %v461_v39 = vadd.f32 %v844_v30, %v438_v34  ;;  %v436_v40 = vmul.f32 %v839_v27, %v393_v35  ;;  %v414_v41 = vadd.f32 %v699_v37, %v675_v15 }
  0xec   :  { %v474_v42 = vmax.f32 %v458_v36, 0.0  ;;  %v405_v44 = vpop.f32.mrf.mxu1 }
  0xed   :  { %557 = vst.msk [vmem:[%s948_s6 + $0x28] sm:$0xf] %vm546_vm2, %v632_v38  ;;  %v477_v45 = vmax.f32 %v461_v39, 0.0  ;;  %v459_v46 = vadd.f32 %v844_v30, %v436_v40  ;;  %v441_v47 = vmul.f32 %v839_v27, %v414_v41  ;;  %v406_v48 = vadd.f32 %v405_v44, %v219_v29 }
  0xee   :  { %v630_v49 = vpack.c.bf16 %v474_v42, %v474_v42  ;;  %v700_v50 = vpop.f32.mrf.mxu1 }
  0xef   :  { %v633_v51 = vpack.c.bf16 %v477_v45, %v477_v45  ;;  %v475_v52 = vmax.f32 %v459_v46, 0.0  ;;  %v464_v53 = vadd.f32 %v844_v30, %v441_v47  ;;  %v439_v54 = vmul.f32 %v839_v27, %v406_v48 }
  0xf0   :  { %555 = vst.msk [vmem:[%s948_s6 + $0x20] sm:$0xf] %vm546_vm2, %v630_v49  ;;  %v417_v56 = vadd.f32 %v700_v50, %v676_v43  ;;  %v408_v57 = vpop.f32.mrf.mxu1 }
  0xf1   :  { %558 = vst.msk [vmem:[%s948_s6 + $0x2c] sm:$0xf] %vm546_vm2, %v633_v51  ;;  %v631_v58 = vpack.c.bf16 %v475_v52, %v475_v52  ;;  %v480_v59 = vmax.f32 %v464_v53, 0.0  ;;  %v462_v60 = vadd.f32 %v844_v30, %v439_v54  ;;  %v409_v61 = vadd.f32 %v408_v57, %v222_v55 }
  0xf2   :  { %v442_v62 = vmul.f32 %v839_v27, %v417_v56 }
  0xf3   :  { %556 = vst.msk [vmem:[%s948_s6 + $0x24] sm:$0xf] %vm546_vm2, %v631_v58  ;;  %v636_v63 = vpack.c.bf16 %v480_v59, %v480_v59  ;;  %v478_v0 = vmax.f32 %v462_v60, 0.0  ;;  %v440_v1 = vmul.f32 %v839_v27, %v409_v61 }
  0xf4   :  { %v465_v2 = vadd.f32 %v844_v30, %v442_v62 }
  0xf5   :  { %561 = vst.msk [vmem:[%s948_s6 + $0x38] sm:$0xf] %vm546_vm2, %v636_v63  ;;  %v634_v3 = vpack.c.bf16 %v478_v0, %v478_v0  ;;  %v463_v4 = vadd.f32 %v844_v30, %v440_v1 }
  0xf6   :  { %v481_v5 = vmax.f32 %v465_v2, 0.0 }
  0xf7   :  { %559 = vst.msk [vmem:[%s948_s6 + $0x30] sm:$0xf] %vm546_vm2, %v634_v3  ;;  %v479_v6 = vmax.f32 %v463_v4, 0.0 }
  0xf8   :  { %v637_v7 = vpack.c.bf16 %v481_v5, %v481_v5 }
  0xf9   :  { %v635_v8 = vpack.c.bf16 %v479_v6, %v479_v6 }
  0xfa   :  { %562 = vst.msk [vmem:[%s948_s6 + $0x3c] sm:$0xf] %vm546_vm2, %v637_v7 }
  0xfb   :  { %560 = vst.msk [vmem:[%s948_s6 + $0x34] sm:$0xf] %vm546_vm2, %v635_v8 }

// kernel: gamsnet_oam_forward.20
= control target key start
LH: loop header
LB: loop body
LE: loop exit
PB: predicated region body
PF: predicated region fallthrough
CT: control target
= control target key end

     0   :  { %s3447_s18 = smov 0   ;;  %s4591_s0 = inlined_call_operand.vmem [shape: bf16[512,256], index: 0, kind: input, shape index: {}]   ;;  %s4592_s1 = inlined_call_operand.vmem [shape: bf16[256,264], index: 1, kind: input, shape index: {}]   ;;  %s4593_s2 = inlined_call_operand.vmem [shape: f32[1,264], index: 2, kind: input, shape index: {}]   ;;  %s4594_s3 = inlined_call_operand.vmem [shape: f32[1,264], index: 3, kind: input, shape index: {}]   ;;  %s4595_s4 = inlined_call_operand.vmem [shape: f32[1,264], index: 4, kind: input, shape index: {}]   ;;  %s4596_s5 = inlined_call_operand.vmem [shape: bf16[512,264], index: 5, kind: output, shape index: {}]  }
   0x1 LB: > { %s2763_s19 = sadd.s32 4294967295, %s3415_s18   ;;  %p2767_p0 = scmp.ge.s32.totalorder %s3415_s18, 1  ;;  %s3415_s18 = sphi %s3447_s18, %s15_s18  }
   0x2   : > { %p189_p1 = scmp.lt.s32.totalorder %s3415_s18, 3 }
   0x4   : > { %p190_p2 = pnand %p2767_p0, %p189_p1 }
   0x5   : > { %s2768_s23 = sshll.u32 (!%p190_p2), %s2763_s19, 5 }
   0x6   : > { %193 = sbr.rel (%p190_p2) target bundleno = 582 (0x246), region = 40  ;;  %p220_p3 = scmp.lt.s32.totalorder (!%p190_p2), %s2768_s23, 63 }
   0xb   : > { %v3105_v0 = vld [vmem:[%s4592_s1 + $0xac] ss:$12 sps:$4 sm:$0xff]   ;;  %v3107_v1 = vld [vmem:[%s4592_s1 + $0xa8] ss:$12 sps:$4 sm:$0xff]   ;;  %v3108_v2 = vld [vmem:[%s4592_s1 + $0x170] ss:$12 sps:$4 sm:$0xff]  }
   0xc   : > { %746 = vmatprep.subr.bf16.mxu0 %v3105_v0  ;;  %v3109_v3 = vld [vmem:[%s4592_s1 + $0xb0] ss:$12 sps:$4 sm:$0xff]   ;;  %2984 = vmatprep.subr.bf16.mxu1 %v3108_v2  ;;  %v3110_v4 = vld [vmem:[%s4592_s1 + $0x94] ss:$12 sps:$4 sm:$0xff]   ;;  %v3113_v6 = vld [vmem:[%s4592_s1 + $0x158] ss:$12 sps:$4 sm:$0xff]  }
   0xd   : > { %747 = vmatpush1.bf16.msra.mxu0 %v3107_v1  ;;  %v3112_v5 = vld [vmem:[%s4592_s1 + $0x90] ss:$12 sps:$4 sm:$0xff]   ;;  %2985 = vmatpush3.bf16.msra.mxu1 %v3109_v3  ;;  %v3114_v7 = vld [vmem:[%s4592_s1 + $0x98] ss:$12 sps:$4 sm:$0xff]   ;;  %v3118_v10 = vld [vmem:[%s4592_s1 + $0x140] ss:$12 sps:$4 sm:$0xff]  }
   0xe   : > { %748 = vmatprep.subr.bf16.mxu0 %v3110_v4  ;;  %2986 = vmatprep.subr.bf16.mxu1 %v3113_v6  ;;  %v3115_v8 = vld [vmem:[%s4592_s1 + $0x7c] ss:$12 sps:$4 sm:$0xff]   ;;  %v3117_v9 = vld [vmem:[%s4592_s1 + $0x78] ss:$12 sps:$4 sm:$0xff]   ;;  %v3119_v11 = vld [vmem:[%s4592_s1 + $0x80] ss:$12 sps:$4 sm:$0xff]  }
   0xf   : > { %v3120_v12 = vld [vmem:[%s4592_s1 + $0x64] ss:$12 sps:$4 sm:$0xff]   ;;  %v3122_v13 = vld [vmem:[%s4592_s1 + $0x60] ss:$12 sps:$4 sm:$0xff]   ;;  %v3123_v14 = vld [vmem:[%s4592_s1 + $0x128] ss:$12 sps:$4 sm:$0xff]  }
  0x10   : > { %v3124_v15 = vld [vmem:[%s4592_s1 + $0x68] ss:$12 sps:$4 sm:$0xff]   ;;  %v3125_v16 = vld [vmem:[%s4592_s1 + $0x4c] ss:$12 sps:$4 sm:$0xff]   ;;  %v3128_v18 = vld [vmem:[%s4592_s1 + $0x110] ss:$12 sps:$4 sm:$0xff]  }
  0x11   : > { %749 = vmatpush1.bf16.msra.mxu0 %v3112_v5  ;;  %2987 = vmatpush3.bf16.msra.mxu1 %v3114_v7  ;;  %v3127_v17 = vld [vmem:[%s4592_s1 + $0x48] ss:$12 sps:$4 sm:$0xff]   ;;  %v3129_v19 = vld [vmem:[%s4592_s1 + $0x50] ss:$12 sps:$4 sm:$0xff]   ;;  %s4598_s23 = smov (!%p220_p3, %s2768_s23), 63  ;;  %vm2641_vm0 = vcmask 60416  }
  0x12   : > { %750 = vmatprep.subr.bf16.mxu0 %v3115_v8  ;;  %2988 = vmatprep.subr.bf16.mxu1 %v3118_v10  ;;  %v3130_v20 = vld [vmem:[%s4592_s1 + $0x34] ss:$12 sps:$4 sm:$0xff]   ;;  %v3133_v21 = vld [vmem:[%s4592_s1 + $0xf8] ss:$12 sps:$4 sm:$0xff]   ;;  %v3132_v22 = vld [vmem:[%s4592_s1 + $0x30] ss:$12 sps:$4 sm:$0xff]  }
  0x13   : > { %v3135_v23 = vld [vmem:[%s4592_s1 + $0x1c] ss:$12 sps:$4 sm:$0xff]   ;;  %v3134_v24 = vld [vmem:[%s4592_s1 + $0x38] ss:$12 sps:$4 sm:$0xff]   ;;  %v3138_v25 = vld [vmem:[%s4592_s1 + $0xe0] ss:$12 sps:$4 sm:$0xff]  }
  0x14   : > { %v3137_v26 = vld [vmem:[%s4592_s1 + $0x18] ss:$12 sps:$4 sm:$0xff]   ;;  %s2919_s29 = sshll.u32 %s4598_s23, 3  ;;  %v3139_v28 = vld [vmem:[%s4592_s1 + $0x20] ss:$12 sps:$4 sm:$0xff]   ;;  %s3096_s9 = smul.u32 12, %s4598_s23 }
  0x15   : > { %751 = vmatpush1.bf16.msra.mxu0 %v3117_v9  ;;  %2989 = vmatpush3.bf16.msra.mxu1 %v3119_v11  ;;  %v3140_v27 = vld [vmem:[%s4592_s1 + $0x4] ss:$12 sps:$4 sm:$0xff]   ;;  %v3143_v29 = vld [vmem:[%s4592_s1 + $0xc8] ss:$12 sps:$4 sm:$0xff]   ;;  %s3551_s12 = scalar_lea.vmem %s4591_s0, %s2919_s29  ;;  %v3142_v30 = vld [vmem:[%s4592_s1] ss:$12 sps:$4 sm:$0xff]  }
  0x16   : > { %752 = vmatprep.subr.bf16.mxu0 %v3120_v12  ;;  %2990 = vmatprep.subr.bf16.mxu1 %v3123_v14  ;;  %v3144_v31 = vld [vmem:[%s4592_s1 + $0x8] ss:$12 sps:$4 sm:$0xff]   ;;  %v3145_v32 = vld [vmem:[%s4592_s1 + $0x16c] ss:$12 sps:$4 sm:$0xff]   ;;  %v3153_v38 = vld [vmem:[%s4592_s1 + $0x150] ss:$12 sps:$4 sm:$0xff]   ;;  %s3739_s11 = scalar_lea.vmem %s4596_s5, %s3096_s9 }
  0x17   : > { %v3150_v33 = vld [vmem:[%s3551_s12 + $0x4] ss:$8 sps:$4 sm:$0xff]   ;;  %v3147_v34 = vld [vmem:[%s4592_s1 + $0x168] ss:$12 sps:$4 sm:$0xff]   ;;  %v3159_v41 = vld [vmem:[%s3551_s12 + $0x10] ss:$8 sps:$4 sm:$0xff]  }
  0x18   : > { %v3148_v35 = vld [vmem:[%s3551_s12] ss:$8 sps:$4 sm:$0xff]   ;;  %971 = vmatprep.mubr.bf16.mxu1 %v3150_v33  ;;  %778 = vmatprep.mubr.bf16.mxu0 %v3150_v33  ;;  %v3157_v37 = vld [vmem:[%s3551_s12 + $0x14] ss:$8 sps:$4 sm:$0xff]   ;;  %v3156_v40 = vld [vmem:[%s4592_s1 + $0x138] ss:$12 sps:$4 sm:$0xff]  }
  0x19   : > { %753 = vmatpush1.bf16.msra.mxu0 %v3122_v13  ;;  %2991 = vmatpush3.bf16.msra.mxu1 %v3124_v15  ;;  %v3151_v36 = vld [vmem:[%s4592_s1 + $0x154] ss:$12 sps:$4 sm:$0xff]   ;;  %v3154_v39 = vld [vmem:[%s4592_s1 + $0x13c] ss:$12 sps:$4 sm:$0xff]   ;;  %v3160_v42 = vld [vmem:[%s4592_s1 + $0x124] ss:$12 sps:$4 sm:$0xff]  }
  0x1a   : > { %754 = vmatprep.subr.bf16.mxu0 %v3125_v16  ;;  %2992 = vmatprep.subr.bf16.mxu1 %v3128_v18  ;;  %v3166_v43 = vld [vmem:[%s3551_s12 + $0x24] ss:$8 sps:$4 sm:$0xff]   ;;  %v3165_v46 = vld [vmem:[%s4592_s1 + $0x108] ss:$12 sps:$4 sm:$0xff]   ;;  %v3171_v50 = vld [vmem:[%s4592_s1 + $0xf0] ss:$12 sps:$4 sm:$0xff]   ;;  %v1102_v16 = vlaneseq }
  0x1b   : > { %v3162_v44 = vld [vmem:[%s4592_s1 + $0x120] ss:$12 sps:$4 sm:$0xff]   ;;  %v3175_v49 = vld [vmem:[%s3551_s12 + $0x34] ss:$8 sps:$4 sm:$0xff]   ;;  %v3174_v52 = vld [vmem:[%s4592_s1 + $0xd8] ss:$12 sps:$4 sm:$0xff]  }
  0x1c   : > { %v3163_v45 = vld [vmem:[%s4592_s1 + $0x10c] ss:$12 sps:$4 sm:$0xff]   ;;  %v3168_v47 = vld [vmem:[%s3551_s12 + $0x20] ss:$8 sps:$4 sm:$0xff]   ;;  %v3178_v54 = vld [vmem:[%s4592_s1 + $0xc4] ss:$12 sps:$4 sm:$0xff]  }
  0x1d   : > { %755 = vmatpush1.bf16.msra.mxu0 %v3127_v17  ;;  %2993 = vmatpush3.bf16.msra.mxu1 %v3129_v19  ;;  %v3169_v48 = vld [vmem:[%s4592_s1 + $0xf4] ss:$12 sps:$4 sm:$0xff]   ;;  %v3172_v51 = vld [vmem:[%s4592_s1 + $0xdc] ss:$12 sps:$4 sm:$0xff]   ;;  %v3177_v53 = vld [vmem:[%s3551_s12 + $0x30] ss:$8 sps:$4 sm:$0xff]  }
  0x1e   : > { %756 = vmatprep.subr.bf16.mxu0 %v3130_v20  ;;  %2994 = vmatprep.subr.bf16.mxu1 %v3133_v21  ;;  %v3181_v55 = vld [vmem:[%s3551_s12 + $0x44] ss:$8 sps:$4 sm:$0xff]   ;;  %v3183_v57 = vld [vmem:[%s3551_s12 + $0x40] ss:$8 sps:$4 sm:$0xff]   ;;  %v3184_v58 = vld [vmem:[%s3551_s12 + $0x54] ss:$8 sps:$4 sm:$0xff]  }
  0x1f   : > { %v3180_v56 = vld [vmem:[%s4592_s1 + $0xc0] ss:$12 sps:$4 sm:$0xff]   ;;  %v3186_v59 = vld [vmem:[%s3551_s12 + $0x50] ss:$8 sps:$4 sm:$0xff]   ;;  %v3190_v62 = vld [vmem:[%s3551_s12 + $0x74] ss:$8 sps:$4 sm:$0xff]  }
  0x20   : > { %v3187_v60 = vld [vmem:[%s3551_s12 + $0x64] ss:$8 sps:$4 sm:$0xff]   ;;  %v3189_v61 = vld [vmem:[%s3551_s12 + $0x60] ss:$8 sps:$4 sm:$0xff]   ;;  %v3192_v63 = vld [vmem:[%s3551_s12 + $0x70] ss:$8 sps:$4 sm:$0xff]  }
  0x21   : > { %757 = vmatpush1.bf16.msra.mxu0 %v3132_v22  ;;  %2995 = vmatpush3.bf16.msra.mxu1 %v3134_v24  ;;  %v3193_v0 = vld [vmem:[%s3551_s12 + $0x84] ss:$8 sps:$4 sm:$0xff]   ;;  %v3195_v1 = vld [vmem:[%s3551_s12 + $0x80] ss:$8 sps:$4 sm:$0xff]   ;;  %v3196_v2 = vld [vmem:[%s3551_s12 + $0x94] ss:$8 sps:$4 sm:$0xff]  }
  0x22   : > { %758 = vmatprep.subr.bf16.mxu0 %v3135_v23  ;;  %2996 = vmatprep.subr.bf16.mxu1 %v3138_v25  ;;  %v3198_v3 = vld [vmem:[%s3551_s12 + $0x90] ss:$8 sps:$4 sm:$0xff]   ;;  %v3199_v4 = vld [vmem:[%s3551_s12 + $0xa4] ss:$8 sps:$4 sm:$0xff]   ;;  %v3201_v5 = vld [vmem:[%s3551_s12 + $0xa0] ss:$8 sps:$4 sm:$0xff]  }
  0x23   : > { %v3202_v6 = vld [vmem:[%s3551_s12 + $0xb4] ss:$8 sps:$4 sm:$0xff]   ;;  %v3204_v7 = vld [vmem:[%s3551_s12 + $0xb0] ss:$8 sps:$4 sm:$0xff]   ;;  %v3205_v8 = vld [vmem:[%s3551_s12 + $0xc4] ss:$8 sps:$4 sm:$0xff]  }
  0x24   : > { %v3207_v9 = vld [vmem:[%s3551_s12 + $0xc0] ss:$8 sps:$4 sm:$0xff]   ;;  %v3208_v10 = vld [vmem:[%s3551_s12 + $0xd4] ss:$8 sps:$4 sm:$0xff]   ;;  %v3210_v11 = vld [vmem:[%s3551_s12 + $0xd0] ss:$8 sps:$4 sm:$0xff]  }
  0x25   : > { %759 = vmatpush1.bf16.msra.mxu0 %v3137_v26  ;;  %2997 = vmatpush3.bf16.msra.mxu1 %v3139_v28  ;;  %v3211_v12 = vld [vmem:[%s3551_s12 + $0xe4] ss:$8 sps:$4 sm:$0xff]   ;;  %v3213_v13 = vld [vmem:[%s3551_s12 + $0xe0] ss:$8 sps:$4 sm:$0xff]   ;;  %v3214_v14 = vld [vmem:[%s3551_s12 + $0xf4] ss:$8 sps:$4 sm:$0xff]  }
  0x26   : > { %760 = vmatprep.subr.bf16.mxu0 %v3140_v27  ;;  %2998 = vmatprep.subr.bf16.mxu1 %v3143_v29  ;;  %v3216_v15 = vld [vmem:[%s3551_s12 + $0xf0] ss:$8 sps:$4 sm:$0xff]   ;;  %v1103_v17 = vshrl.u32 %v1102_v16, 7  ;;  %v3642_v19 = vld [vmem:[%s4593_s2] sm:$0x7] }
  0x27   : > { %v3647_v21 = vld [vmem:[%s4594_s3] sm:$0x7] }
  0x28   : > { %v1112_v18 = vsub.s32 2, %v1103_v17 }
  0x29   : > { %761 = vmatpush1.bf16.msra.mxu0 %v3142_v30  ;;  %2999 = vmatpush3.bf16.msra.mxu1 %v3144_v31 }
  0x2a   : > { %762 = vmatprep.subr.bf16.mxu0 %v3145_v32  ;;  %v3650_v22 = vrot.slane %v3642_v19, %v1112_v18  ;;  %v3653_v25 = vrot.slane %v3647_v21, %v1112_v18 }
  0x2c   : > { %972 = vmatmul.mubr.bf16.vlgmr.msra.gmra.mxu1 %v3148_v35 }
  0x2d   : > { %763 = vmatpush2.bf16.msra.mxu0 %v3147_v34  ;;  %979 = vmatprep.mubr.bf16.mxu1 %v3157_v37 }
  0x2e   : > { %764 = vmatprep.subr.bf16.mxu0 %v3151_v36 }
  0x31   : > { %765 = vmatpush2.bf16.msra.mxu0 %v3153_v38 }
  0x32   : > { %766 = vmatprep.subr.bf16.mxu0 %v3154_v39 }
  0x34   : > { %980 = vmatmul.mubr.bf16.gmra.mxu1 %v3159_v41 }
  0x35   : > { %767 = vmatpush2.bf16.msra.mxu0 %v3156_v40  ;;  %987 = vmatprep.mubr.bf16.mxu1 %v3166_v43 }
  0x36   : > { %768 = vmatprep.subr.bf16.mxu0 %v3160_v42 }
  0x39   : > { %769 = vmatpush2.bf16.msra.mxu0 %v3162_v44 }
  0x3a   : > { %770 = vmatprep.subr.bf16.mxu0 %v3163_v45 }
  0x3c   : > { %988 = vmatmul.mubr.bf16.gmra.mxu1 %v3168_v47 }
  0x3d   : > { %771 = vmatpush2.bf16.msra.mxu0 %v3165_v46  ;;  %995 = vmatprep.mubr.bf16.mxu1 %v3175_v49 }
  0x3e   : > { %772 = vmatprep.subr.bf16.mxu0 %v3169_v48 }
  0x41   : > { %773 = vmatpush2.bf16.msra.mxu0 %v3171_v50 }
  0x42   : > { %774 = vmatprep.subr.bf16.mxu0 %v3172_v51 }
  0x44   : > { %996 = vmatmul.mubr.bf16.gmra.mxu1 %v3177_v53 }
  0x45   : > { %775 = vmatpush2.bf16.msra.mxu0 %v3174_v52  ;;  %1003 = vmatprep.mubr.bf16.mxu1 %v3181_v55 }
  0x46   : > { %776 = vmatprep.subr.bf16.mxu0 %v3178_v54 }
  0x49   : > { %777 = vmatpush2.bf16.msra.mxu0 %v3180_v56 }
  0x4c   : > { %779 = vmatmul.mubr.bf16.vlgmr.msra.gmra.mxu0 %v3148_v35  ;;  %1004 = vmatmul.mubr.bf16.gmra.mxu1 %v3183_v57 }
  0x4d   : > { %788 = vmatprep.mubr.bf16.mxu0 %v3157_v37  ;;  %1011 = vmatprep.mubr.bf16.mxu1 %v3184_v58 }
  0x54   : > { %789 = vmatmul.mubr.bf16.gmra.mxu0 %v3159_v41  ;;  %1012 = vmatmul.mubr.bf16.gmra.mxu1 %v3186_v59 }
  0x55   : > { %798 = vmatprep.mubr.bf16.mxu0 %v3166_v43  ;;  %1019 = vmatprep.mubr.bf16.mxu1 %v3187_v60 }
  0x5c   : > { %799 = vmatmul.mubr.bf16.gmra.mxu0 %v3168_v47  ;;  %1020 = vmatmul.mubr.bf16.gmra.mxu1 %v3189_v61  ;;  %v3674_v47 = vld [vmem:[%s4595_s4] sm:$0x7] }
  0x5d   : > { %808 = vmatprep.mubr.bf16.mxu0 %v3175_v49  ;;  %1027 = vmatprep.mubr.bf16.mxu1 %v3190_v62 }
  0x64   : > { %809 = vmatmul.mubr.bf16.gmra.mxu0 %v3177_v53  ;;  %1028 = vmatmul.mubr.bf16.gmra.mxu1 %v3192_v63  ;;  %v2015_v53 = vsub.f32 1.0, %v3674_v47 }
  0x65   : > { %818 = vmatprep.mubr.bf16.mxu0 %v3181_v55  ;;  %1035 = vmatprep.mubr.bf16.mxu1 %v3193_v0  ;;  %v1104_v55 = vsub.s32 0, %v1103_v17 }
  0x6c   : > { %819 = vmatmul.mubr.bf16.gmra.mxu0 %v3183_v57  ;;  %1036 = vmatmul.mubr.bf16.gmra.mxu1 %v3195_v1 }
  0x6d   : > { %828 = vmatprep.mubr.bf16.mxu0 %v3184_v58  ;;  %1043 = vmatprep.mubr.bf16.mxu1 %v3196_v2 }
  0x74   : > { %829 = vmatmul.mubr.bf16.gmra.mxu0 %v3186_v59  ;;  %1044 = vmatmul.mubr.bf16.gmra.mxu1 %v3198_v3 }
  0x75   : > { %838 = vmatprep.mubr.bf16.mxu0 %v3187_v60  ;;  %1051 = vmatprep.mubr.bf16.mxu1 %v3199_v4  ;;  %v1108_v60 = vsub.s32 1, %v1103_v17 }
  0x77   : > { %v3710_v17 = vrot.slane %v3647_v21, %v1108_v60 }
  0x7c   : > { %839 = vmatmul.mubr.bf16.gmra.mxu0 %v3189_v61  ;;  %1052 = vmatmul.mubr.bf16.gmra.mxu1 %v3201_v5 }
  0x7d   : > { %848 = vmatprep.mubr.bf16.mxu0 %v3190_v62  ;;  %1059 = vmatprep.mubr.bf16.mxu1 %v3202_v6 }
  0x84   : > { %849 = vmatmul.mubr.bf16.gmra.mxu0 %v3192_v63  ;;  %1060 = vmatmul.mubr.bf16.gmra.mxu1 %v3204_v7 }
  0x85   : > { %858 = vmatprep.mubr.bf16.mxu0 %v3193_v0  ;;  %1067 = vmatprep.mubr.bf16.mxu1 %v3205_v8  ;;  %v3688_v0 = vrot.slane %v3674_v47, %v1112_v18 }
  0x8c   : > { %859 = vmatmul.mubr.bf16.gmra.mxu0 %v3195_v1  ;;  %1068 = vmatmul.mubr.bf16.gmra.mxu1 %v3207_v9  ;;  %v3690_v1 = vrot.slane %v2015_v53, %v1112_v18 }
  0x8d   : > { %868 = vmatprep.mubr.bf16.mxu0 %v3196_v2  ;;  %1075 = vmatprep.mubr.bf16.mxu1 %v3208_v10 }
  0x94   : > { %869 = vmatmul.mubr.bf16.gmra.mxu0 %v3198_v3  ;;  %1076 = vmatmul.mubr.bf16.gmra.mxu1 %v3210_v11  ;;  %v3693_v3 = vrot.slane %v3642_v19, %v1104_v55 }
  0x95   : > { %878 = vmatprep.mubr.bf16.mxu0 %v3199_v4  ;;  %1083 = vmatprep.mubr.bf16.mxu1 %v3211_v12  ;;  %v3696_v4 = vrot.slane %v3647_v21, %v1104_v55 }
  0x9c   : > { %879 = vmatmul.mubr.bf16.gmra.mxu0 %v3201_v5  ;;  %1084 = vmatmul.mubr.bf16.gmra.mxu1 %v3213_v13 }
  0x9d   : > { %888 = vmatprep.mubr.bf16.mxu0 %v3202_v6  ;;  %1091 = vmatprep.mubr.bf16.mxu1 %v3214_v14 }
  0xa4   : > { %889 = vmatmul.mubr.bf16.gmra.mxu0 %v3204_v7  ;;  %1092 = vmatmul.mubr.bf16.gmra.mxu1 %v3216_v15 }
  0xa5   : > { %898 = vmatprep.mubr.bf16.mxu0 %v3205_v8 }
  0xac   : > { %899 = vmatmul.mubr.bf16.gmra.mxu0 %v3207_v9 }
  0xad   : > { %908 = vmatprep.mubr.bf16.mxu0 %v3208_v10 }
  0xb4   : > { %909 = vmatmul.mubr.bf16.gmra.mxu0 %v3210_v11 }
  0xb5   : > { %918 = vmatprep.mubr.bf16.mxu0 %v3211_v12  ;;  %v3703_v12 = vrot.slane %v2015_v53, %v1104_v55 }
  0xbc   : > { %919 = vmatmul.mubr.bf16.gmra.mxu0 %v3213_v13  ;;  %v3706_v13 = vrot.slane %v3642_v19, %v1108_v60 }
  0xbd   : > { %928 = vmatprep.mubr.bf16.mxu0 %v3214_v14 }
  0xc4   : > { %929 = vmatmul.mubr.bf16.gmra.mxu0 %v3216_v15 }
  0xec   : > { %v3000_v20 = vpop.f32.mrf.mxu1 }
  0xee   : > { %v3001_v23 = vpop.f32.mrf.mxu1 }
  0xef   : > { %v3002_v24 = vadd.f32 %v3001_v23, %v3000_v20  ;;  %v3714_v23 = vrot.slane %v3674_v47, %v1104_v55 }
  0xf0   : > { %v3003_v26 = vpop.f32.mrf.mxu1 }
  0xf1   : > { %v1119_v27 = vmul.f32 %v3002_v24, %v3650_v22 }
  0xf2   : > { %v3004_v28 = vpop.f32.mrf.mxu1 }
  0xf3   : > { %v3657_v29 = vadd.f32 %v3653_v25, %v1119_v27  ;;  %v3005_v30 = vadd.f32 %v3004_v28, %v3003_v26  ;;  %v3716_v26 = vrot.slane %v2015_v53, %v1108_v60  ;;  %v3744_v53 = vrot.slane %v3674_v47, %v1108_v60 }
  0xf4   : > { %v3006_v31 = vpop.f32.mrf.mxu1 }
  0xf5   : > { %v1329_v32 = vmul.f32 0.5, %v3657_v29  ;;  %v1122_v33 = vmul.f32 %v3005_v30, %v3650_v22  ;;  %v2018_v6 = vmax.f32 %v3657_v29, 0.0 }
  0xf6   : > { %v3007_v34 = vpop.f32.mrf.mxu1 }
  0xf7   : > { %3217 = vtanh.f32 %v1329_v32  ;;  %v3662_v35 = vadd.f32 %v3653_v25, %v1122_v33  ;;  %v3008_v36 = vadd.f32 %v3007_v34, %v3006_v31  ;;  %v2130_v27 = vmul.f32 %v3690_v1, %v2018_v6 }
  0xf8   : > { %v3009_v37 = vpop.f32.mrf.mxu1 }
  0xf9   : > { %v1332_v38 = vmul.f32 0.5, %v3662_v35  ;;  %v1125_v39 = vmul.f32 %v3008_v36, %v3650_v22  ;;  %v2021_v9 = vmax.f32 %v3662_v35, 0.0 }
  0xfa   : > { %v3010_v40 = vpop.f32.mrf.mxu1 }
  0xfb   : > { %3219 = vtanh.f32 %v1332_v38  ;;  %v3667_v41 = vadd.f32 %v3653_v25, %v1125_v39  ;;  %v3011_v42 = vadd.f32 %v3010_v40, %v3009_v37  ;;  %v2133_v21 = vmul.f32 %v3690_v1, %v2021_v9 }
  0xfc   : > { %v3012_v43 = vpop.f32.mrf.mxu1 }
  0xfd   : > { %v1335_v44 = vmul.f32 0.5, %v3667_v41  ;;  %v1128_v45 = vmul.f32 %v3011_v42, %v3650_v22  ;;  %v2024_v39 = vmax.f32 %v3667_v41, 0.0 }
  0xfe   : > { %v3013_v46 = vpop.f32.mrf.mxu1 }
  0xff   : > { %3221 = vtanh.f32 %v1335_v44  ;;  %v3677_v48 = vadd.f32 %v3653_v25, %v1128_v45  ;;  %v3014_v49 = vadd.f32 %v3013_v46, %v3012_v43  ;;  %v2136_v60 = vmul.f32 %v3690_v1, %v2024_v39 }
 0x100   : > { %v3015_v50 = vpop.f32.mrf.mxu1 }
 0x101   : > { %v1338_v51 = vmul.f32 0.5, %v3677_v48  ;;  %v1131_v52 = vmul.f32 %v3014_v49, %v3650_v22  ;;  %v2027_v41 = vmax.f32 %v3677_v48, 0.0 }
 0x102   : > { %v3016_v54 = vpop.f32.mrf.mxu1 }
 0x103   : > { %3223 = vtanh.f32 %v1338_v51  ;;  %v3683_v56 = vadd.f32 %v3653_v25, %v1131_v52  ;;  %v3017_v57 = vadd.f32 %v3016_v54, %v3015_v50 }
 0x104   : > { %v3218_v58 = vpop.eup %3217  ;;  %v3018_v59 = vpop.f32.mrf.mxu1 }
 0x105   : > { %v1521_v61 = vadd.f32 1.0, %v3218_v58  ;;  %v1341_v62 = vmul.f32 0.5, %v3683_v56  ;;  %v1134_v63 = vmul.f32 %v3017_v57, %v3650_v22 }
 0x106   : > { %v3019_v2 = vpop.f32.mrf.mxu1 }
 0x107   : > { %v1617_v5 = vmul.f32 0.5, %v1521_v61  ;;  %3225 = vtanh.f32 %v1341_v62  ;;  %v3700_v7 = vadd.f32 %v3653_v25, %v1134_v63  ;;  %v3020_v10 = vadd.f32 %v3019_v2, %v3018_v59 }
 0x108   : > { %v3220_v8 = vpop.eup %3219  ;;  %v3021_v11 = vpop.f32.mrf.mxu1  ;;  %v2030_v62 = vmax.f32 %v3683_v56, 0.0 }
 0x109   : > { %v1713_v14 = vmax.f32 %v1617_v5, 0.0  ;;  %v1524_v15 = vadd.f32 1.0, %v3220_v8  ;;  %v1344_v16 = vmul.f32 0.5, %v3700_v7  ;;  %v1137_v18 = vmul.f32 %v3020_v10, %v3650_v22 }
 0x10a   : > { %v3022_v24 = vpop.f32.mrf.mxu1  ;;  %v2033_v8 = vmax.f32 %v3700_v7, 0.0 }
 0x10b   : > { %v1809_v19 = vmin.f32 %v1713_v14, 1.0  ;;  %v1620_v28 = vmul.f32 0.5, %v1524_v15  ;;  %3227 = vtanh.f32 %v1344_v16  ;;  %v3722_v30 = vadd.f32 %v3653_v25, %v1137_v18 }
 0x10c   : > { %v780_v20 = vpop.f32.mrf.mxu0  ;;  %v3222_v29 = vpop.eup %3221  ;;  %v3023_v32 = vadd.f32 %v3022_v24, %v3021_v11  ;;  %v2142_v24 = vmul.f32 %v3690_v1, %v2030_v62 }
 0x10d   : > { %v1117_v31 = vmul.f32 %v3693_v3, %v780_v20  ;;  %v1921_v34 = vmul.f32 %v3688_v0, %v1809_v19  ;;  %v1716_v35 = vmax.f32 %v1620_v28, 0.0  ;;  %v1527_v36 = vadd.f32 1.0, %v3222_v29  ;;  %v3024_v38 = vpop.f32.mrf.mxu1 }
 0x10e   : > { %v782_v33 = vpop.f32.mrf.mxu0  ;;  %v1347_v40 = vmul.f32 0.5, %v3722_v30  ;;  %v1140_v43 = vmul.f32 %v3023_v32, %v3650_v22  ;;  %v2139_v20 = vmul.f32 %v3690_v1, %v2027_v41 }
 0x10f   : > { %v1118_v37 = vmul.f32 %v3706_v13, %v782_v33  ;;  %v3730_v42 = vadd.f32 %v3696_v4, %v1117_v31  ;;  %v2226_v45 = vadd.f32 %v2130_v27, %v1921_v34  ;;  %v1812_v46 = vmin.f32 %v1716_v35, 1.0  ;;  %v3025_v59 = vpop.f32.mrf.mxu1 }
 0x110   : > { %v784_v44 = vpop.f32.mrf.mxu0  ;;  %v1623_v49 = vmul.f32 0.5, %v1527_v36  ;;  %v3224_v51 = vpop.eup %3223  ;;  %3229 = vtanh.f32 %v1347_v40  ;;  %v3749_v63 = vadd.f32 %v3653_v25, %v1140_v43  ;;  %v3026_v29 = vadd.f32 %v3025_v59, %v3024_v38 }
 0x111   : > { %v3734_v50 = vadd.f32 %v3710_v17, %v1118_v37  ;;  %v1327_v52 = vmul.f32 0.5, %v3730_v42  ;;  %v2921_v54 = vpack.c.bf16 %v2226_v45, %v2226_v45  ;;  %v1924_v55 = vmul.f32 %v3688_v0, %v1812_v46  ;;  %v3027_v16 = vpop.f32.mrf.mxu1 }
 0x112   : > { %v1719_v57 = vmax.f32 %v1623_v49, 0.0  ;;  %v1530_v58 = vadd.f32 1.0, %v3224_v51  ;;  %v786_v61 = vpop.f32.mrf.mxu0  ;;  %v1350_v9 = vmul.f32 0.5, %v3749_v63  ;;  %v1120_v56 = vmul.f32 %v3693_v3, %v784_v44 }
 0x113   : > { %3231 = vtanh.f32 %v1327_v52  ;;  %v1328_v48 = vmul.f32 0.5, %v3734_v50  ;;  %2642 = vst.msk [vmem:[%s3739_s11 + $0x8] sm:$0xf] %vm2641_vm0, %v2921_v54  ;;  %v2229_v2 = vadd.f32 %v2133_v21, %v1924_v55  ;;  %v2145_v31 = vmul.f32 %v3690_v1, %v2033_v8  ;;  %v3028_v40 = vpop.f32.mrf.mxu1 }
 0x114   : > { %v1815_v47 = vmin.f32 %v1719_v57, 1.0  ;;  %v1626_v5 = vmul.f32 0.5, %v1530_v58  ;;  %v3226_v6 = vpop.eup %3225  ;;  %v790_v18 = vpop.f32.mrf.mxu0  ;;  %v3762_v19 = vadd.f32 %v3696_v4, %v1120_v56  ;;  %v1121_v33 = vmul.f32 %v3706_v13, %v786_v61 }
 0x115   : > { %3233 = vtanh.f32 %v1328_v48  ;;  %v2923_v10 = vpack.c.bf16 %v2229_v2, %v2229_v2  ;;  %v1533_v15 = vadd.f32 1.0, %v3226_v6  ;;  %v1123_v34 = vmul.f32 %v3693_v3, %v790_v18 }
 0x116   : > { %v1927_v11 = vmul.f32 %v3688_v0, %v1815_v47  ;;  %v1722_v14 = vmax.f32 %v1626_v5, 0.0  ;;  %3235 = vtanh.f32 %v1350_v9  ;;  %v1330_v32 = vmul.f32 0.5, %v3762_v19 }
 0x117   : > { %2644 = vst.msk [vmem:[%s3739_s11 + $0x14] sm:$0xf] %vm2641_vm0, %v2923_v10  ;;  %v1629_v28 = vmul.f32 0.5, %v1533_v15  ;;  %v2036_v43 = vmax.f32 %v3722_v30, 0.0  ;;  %v1143_v38 = vmul.f32 %v3026_v29, %v3650_v22  ;;  %v3774_v44 = vadd.f32 %v3710_v17, %v1121_v33 }
 0x118   : > { %v2232_v7 = vadd.f32 %v2136_v60, %v1927_v11  ;;  %v1818_v27 = vmin.f32 %v1722_v14, 1.0  ;;  %v3228_v21 = vpop.eup %3227  ;;  %3237 = vtanh.f32 %v1330_v32  ;;  %v3779_v51 = vadd.f32 %v3696_v4, %v1123_v34 }
 0x119   : > { %v1725_v37 = vmax.f32 %v1629_v28, 0.0  ;;  %v1536_v39 = vadd.f32 1.0, %v3228_v21  ;;  %v2016_v41 = vmax.f32 %v3730_v42, 0.0  ;;  %v3783_v52 = vadd.f32 %v3653_v25, %v1143_v38  ;;  %v792_v42 = vpop.f32.mrf.mxu0 }
 0x11a   : > { %v2925_v35 = vpack.c.bf16 %v2232_v7, %v2232_v7  ;;  %v1930_v36 = vmul.f32 %v3688_v0, %v1818_v27  ;;  %v1331_v30 = vmul.f32 0.5, %v3774_v44  ;;  %v3029_v54 = vadd.f32 %v3028_v40, %v3027_v16  ;;  %v3030_v40 = vpop.f32.mrf.mxu1 }
 0x11b   : > { %v1821_v46 = vmin.f32 %v1725_v37, 1.0  ;;  %v1632_v49 = vmul.f32 0.5, %v1536_v39  ;;  %v1333_v61 = vmul.f32 0.5, %v3779_v51  ;;  %v2148_v48 = vmul.f32 %v3690_v1, %v2036_v43  ;;  %v794_v7 = vpop.f32.mrf.mxu0 }
 0x11c   : > { %2646 = vst.msk [vmem:[%s3739_s11 + $0x20] sm:$0xf] %vm2641_vm0, %v2925_v35  ;;  %v2235_v45 = vadd.f32 %v2139_v20, %v1930_v36  ;;  %v1353_v2 = vmul.f32 0.5, %v3783_v52  ;;  %3239 = vtanh.f32 %v1331_v30  ;;  %v2039_v6 = vmax.f32 %v3749_v63, 0.0 }
 0x11d   : > { %v3230_v55 = vpop.eup %3229  ;;  %v1933_v58 = vmul.f32 %v3688_v0, %v1821_v46  ;;  %v1728_v59 = vmax.f32 %v1632_v49, 0.0  ;;  %3241 = vtanh.f32 %v1333_v61  ;;  %v2128_v56 = vmul.f32 %v3703_v12, %v2016_v41 }
 0x11e   : > { %v2927_v57 = vpack.c.bf16 %v2235_v45, %v2235_v45  ;;  %v1539_v62 = vadd.f32 1.0, %v3230_v55  ;;  %3243 = vtanh.f32 %v1353_v2  ;;  %v2017_v15 = vmax.f32 %v3734_v50, 0.0 }
 0x11f   : > { %v2238_v60 = vadd.f32 %v2142_v24, %v1933_v58  ;;  %v1824_v5 = vmin.f32 %v1728_v59, 1.0  ;;  %v1146_v16 = vmul.f32 %v3029_v54, %v3650_v22  ;;  %v1124_v63 = vmul.f32 %v3706_v13, %v792_v42  ;;  %v796_v54 = vpop.f32.mrf.mxu0  ;;  %v3031_v42 = vpop.f32.mrf.mxu1 }
 0x120   : > { %v3232_v47 = vpop.eup %3231  ;;  %2648 = vst.msk [vmem:[%s3739_s11 + $0x2c] sm:$0xf] %vm2641_vm0, %v2927_v57  ;;  %v1635_v8 = vmul.f32 0.5, %v1539_v62  ;;  %v2151_v29 = vmul.f32 %v3690_v1, %v2039_v6  ;;  %v2019_v21 = vmax.f32 %v3762_v19, 0.0  ;;  %v2129_v49 = vmul.f32 %v3716_v26, %v2017_v15 }
 0x121   : > { %v1519_v9 = vadd.f32 1.0, %v3232_v47  ;;  %v2929_v11 = vpack.c.bf16 %v2238_v60, %v2238_v60  ;;  %v1936_v14 = vmul.f32 %v3688_v0, %v1824_v5  ;;  %v3803_v32 = vadd.f32 %v3653_v25, %v1146_v16 }
 0x122   : > { %v3234_v10 = vpop.eup %3233  ;;  %v1731_v18 = vmax.f32 %v1635_v8, 0.0  ;;  %v3807_v39 = vadd.f32 %v3710_v17, %v1124_v63  ;;  %v3815_v41 = vmul.f32 %v3703_v12, %v2019_v21  ;;  %v2020_v62 = vmax.f32 %v3774_v44, 0.0 }
 0x123   : > { %v1615_v20 = vmul.f32 0.5, %v1519_v9  ;;  %v1520_v24 = vadd.f32 1.0, %v3234_v10  ;;  %v3236_v27 = vpop.eup %3235  ;;  %2650 = vst.msk [vmem:[%s3739_s11 + $0x38] sm:$0xf] %vm2641_vm0, %v2929_v11  ;;  %v2241_v28 = vadd.f32 %v2145_v31, %v1936_v14  ;;  %v1356_v37 = vmul.f32 0.5, %v3803_v32  ;;  %v800_v14 = vpop.f32.mrf.mxu0 }
 0x124   : > { %v1827_v50 = vmin.f32 %v1731_v18, 1.0  ;;  %v1542_v34 = vadd.f32 1.0, %v3236_v27  ;;  %v1126_v31 = vmul.f32 %v3693_v3, %v794_v7  ;;  %v1334_v30 = vmul.f32 0.5, %v3807_v39  ;;  %v3033_v7 = vpop.f32.mrf.mxu1 }
 0x125   : > { %v1711_v33 = vmax.f32 %v1615_v20, 0.0  ;;  %v1616_v35 = vmul.f32 0.5, %v1520_v24  ;;  %v2931_v36 = vpack.c.bf16 %v2241_v28, %v2241_v28  ;;  %v3238_v46 = vpop.eup %3237  ;;  %3245 = vtanh.f32 %v1356_v37  ;;  %v802_v37 = vpop.f32.mrf.mxu0 }
 0x126   : > { %v1939_v43 = vmul.f32 %v3688_v0, %v1827_v50  ;;  %v1638_v38 = vmul.f32 0.5, %v1542_v34  ;;  %v1522_v61 = vadd.f32 1.0, %v3238_v46  ;;  %3247 = vtanh.f32 %v1334_v30  ;;  %v3034_v46 = vpop.f32.mrf.mxu1 }
 0x127   : > { %v1807_v19 = vmin.f32 %v1711_v33, 1.0  ;;  %v1712_v45 = vmax.f32 %v1616_v35, 0.0  ;;  %2652 = vst.msk [vmem:[%s3739_s11 + $0x44] sm:$0xf] %vm2641_vm0, %v2931_v36  ;;  %v3821_v2 = vadd.f32 %v3696_v4, %v1126_v31  ;;  %v2042_v6 = vmax.f32 %v3783_v52, 0.0 }
 0x128   : > { %v2244_v55 = vadd.f32 %v2148_v48, %v1939_v43  ;;  %v1734_v58 = vmax.f32 %v1638_v38, 0.0  ;;  %v1618_v9 = vmul.f32 0.5, %v1522_v61  ;;  %v3032_v11 = vadd.f32 %v3031_v42, %v3030_v40 }
 0x129   : > { %v1919_v57 = vmul.f32 %v3714_v23, %v1807_v19  ;;  %v1808_v59 = vmin.f32 %v1712_v45, 1.0  ;;  %v3240_v48 = vpop.eup %3239  ;;  %v1336_v10 = vmul.f32 0.5, %v3821_v2  ;;  %v1127_v20 = vmul.f32 %v3706_v13, %v796_v54 }
 0x12a   : > { %v2933_v47 = vpack.c.bf16 %v2244_v55, %v2244_v55  ;;  %v1830_v60 = vmin.f32 %v1734_v58, 1.0  ;;  %v3242_v15 = vpop.eup %3241  ;;  %v1523_v18 = vadd.f32 1.0, %v3240_v48  ;;  %v1714_v63 = vmax.f32 %v1618_v9, 0.0 }
 0x12b   : > { %v1920_v5 = vmul.f32 %v3744_v53, %v1808_v59  ;;  %v2224_v8 = vadd.f32 %v2128_v56, %v1919_v57  ;;  %v3244_v24 = vpop.eup %3243  ;;  %v1525_v52 = vadd.f32 1.0, %v3242_v15  ;;  %v2022_v56 = vmax.f32 %v3779_v51, 0.0  ;;  %v804_v59 = vpop.f32.mrf.mxu0 }
 0x12c   : > { %2654 = vst.msk [vmem:[%s3739_s11 + $0x50] sm:$0xf] %vm2641_vm0, %v2933_v47  ;;  %v1942_v44 = vmul.f32 %v3688_v0, %v1830_v60  ;;  %3249 = vtanh.f32 %v1336_v10  ;;  %v1545_v21 = vadd.f32 1.0, %v3244_v24  ;;  %v1619_v50 = vmul.f32 0.5, %v1523_v18 }
 0x12d   : > { %v2225_v16 = vadd.f32 %v2129_v49, %v1920_v5  ;;  %v1810_v33 = vmin.f32 %v1714_v63, 1.0  ;;  %v1621_v34 = vmul.f32 0.5, %v1525_v52  ;;  %v1149_v35 = vmul.f32 %v3032_v11, %v3650_v22 }
 0x12e   : > { %v2247_v27 = vadd.f32 %v2151_v29, %v1942_v44  ;;  %v3833_v36 = vadd.f32 %v3710_v17, %v1127_v20  ;;  %v1641_v31 = vmul.f32 0.5, %v1545_v21  ;;  %v1715_v43 = vmax.f32 %v1619_v50, 0.0  ;;  %v806_v20 = vpop.f32.mrf.mxu0 }
 0x12f   : > { %v2920_v28 = vpack.c.bf16 %v2225_v16, %v2224_v8  ;;  %v1129_v51 = vmul.f32 %v3693_v3, %v800_v14  ;;  %v2045_v29 = vmax.f32 %v3803_v32, 0.0  ;;  %v2023_v19 = vmax.f32 %v3807_v39, 0.0 }
 0x130   : > { %v2935_v40 = vpack.c.bf16 %v2247_v27, %v2247_v27  ;;  %v3840_v38 = vadd.f32 %v3653_v25, %v1149_v35  ;;  %v1337_v45 = vmul.f32 0.5, %v3833_v36  ;;  %v1922_v49 = vmul.f32 %v3714_v23, %v1810_v33 }
 0x131   : > { %2640 = vst [vmem:[%s3739_s11] sm:$0xff] %v2920_v28  ;;  %v1737_v30 = vmax.f32 %v1641_v31, 0.0  ;;  %v1811_v54 = vmin.f32 %v1715_v43, 1.0  ;;  %v3847_v55 = vadd.f32 %v3696_v4, %v1129_v51  ;;  %v2154_v57 = vmul.f32 %v3690_v1, %v2042_v6  ;;  %v3036_v6 = vpop.f32.mrf.mxu1 }
 0x132   : > { %2656 = vst.msk [vmem:[%s3739_s11 + $0x5c] sm:$0xf] %vm2641_vm0, %v2935_v40  ;;  %v2132_v32 = vmul.f32 %v3716_v26, %v2020_v62  ;;  %v3852_v39 = vmul.f32 %v3703_v12, %v2022_v56  ;;  %v1359_v58 = vmul.f32 0.5, %v3840_v38  ;;  %v3246_v61 = vpop.eup %3245  ;;  %v1717_v60 = vmax.f32 %v1621_v34, 0.0 }
 0x133   : > { %v1833_v42 = vmin.f32 %v1737_v30, 1.0  ;;  %v1923_v47 = vmul.f32 %v3744_v53, %v1811_v54  ;;  %3251 = vtanh.f32 %v1337_v45  ;;  %v1548_v5 = vadd.f32 1.0, %v3246_v61  ;;  %v3248_v62 = vpop.eup %3247  ;;  %v3037_v21 = vpop.f32.mrf.mxu1 }
 0x134   : > { %v2157_v48 = vmul.f32 %v3690_v1, %v2045_v29  ;;  %v2135_v8 = vmul.f32 %v3716_v26, %v2023_v19  ;;  %3253 = vtanh.f32 %v1359_v58  ;;  %v2227_v9 = vadd.f32 %v3815_v41, %v1922_v49  ;;  %v810_v54 = vpop.f32.mrf.mxu0 }
 0x135   : > { %v1945_v10 = vmul.f32 %v3688_v0, %v1833_v42  ;;  %v2228_v11 = vadd.f32 %v2132_v32, %v1923_v47  ;;  %v1339_v14 = vmul.f32 0.5, %v3847_v55  ;;  %v1644_v15 = vmul.f32 0.5, %v1548_v5  ;;  %v3039_v5 = vpop.f32.mrf.mxu1 }
 0x136   : > { %v1526_v44 = vadd.f32 1.0, %v3248_v62  ;;  %v2025_v16 = vmax.f32 %v3821_v2, 0.0  ;;  %v3035_v18 = vadd.f32 %v3034_v46, %v3033_v7  ;;  %v1813_v52 = vmin.f32 %v1717_v60, 1.0 }
 0x137   : > { %v2250_v24 = vadd.f32 %v2154_v57, %v1945_v10  ;;  %v2922_v63 = vpack.c.bf16 %v2228_v11, %v2227_v9  ;;  %3255 = vtanh.f32 %v1339_v14  ;;  %v1740_v56 = vmax.f32 %v1644_v15, 0.0  ;;  %v812_v11 = vpop.f32.mrf.mxu0 }
 0x138   : > { %v1622_v27 = vmul.f32 0.5, %v1526_v44  ;;  %v1152_v41 = vmul.f32 %v3035_v18, %v3650_v22  ;;  %v1130_v28 = vmul.f32 %v3706_v13, %v802_v37  ;;  %v1132_v34 = vmul.f32 %v3693_v3, %v804_v59 }
 0x139   : > { %v3250_v50 = vpop.eup %3249  ;;  %v2937_v33 = vpack.c.bf16 %v2250_v24, %v2250_v24  ;;  %2643 = vst [vmem:[%s3739_s11 + $0xc] sm:$0xff] %v2922_v63  ;;  %v3038_v2 = vadd.f32 %v3037_v21, %v3036_v6  ;;  %v1133_v7 = vmul.f32 %v3706_v13, %v806_v20  ;;  %v1836_v35 = vmin.f32 %v1740_v56, 1.0  ;;  %v814_v21 = vpop.f32.mrf.mxu0 }
 0x13a   : > { %v1718_v40 = vmax.f32 %v1622_v27, 0.0  ;;  %v1528_v31 = vadd.f32 1.0, %v3250_v50  ;;  %v3868_v43 = vadd.f32 %v3653_v25, %v1152_v41  ;;  %v1925_v51 = vmul.f32 %v3714_v23, %v1813_v52 }
 0x13b   : > { %2658 = vst.msk [vmem:[%s3739_s11 + $0x68] sm:$0xf] %vm2641_vm0, %v2937_v33  ;;  %v2026_v37 = vmax.f32 %v3833_v36, 0.0  ;;  %v3875_v29 = vadd.f32 %v3710_v17, %v1130_v28  ;;  %v3878_v19 = vadd.f32 %v3696_v4, %v1132_v34  ;;  %v1948_v45 = vmul.f32 %v3688_v0, %v1836_v35 }
 0x13c   : > { %v1814_v46 = vmin.f32 %v1718_v40, 1.0  ;;  %v1624_v49 = vmul.f32 0.5, %v1528_v31  ;;  %v1362_v30 = vmul.f32 0.5, %v3868_v43  ;;  %v1155_v58 = vmul.f32 %v3038_v2, %v3650_v22 }
 0x13d   : > { %v1340_v57 = vmul.f32 0.5, %v3875_v29  ;;  %v1342_v32 = vmul.f32 0.5, %v3878_v19  ;;  %v3886_v36 = vadd.f32 %v3710_v17, %v1133_v7  ;;  %v2253_v59 = vadd.f32 %v2157_v48, %v1948_v45 }
 0x13e   : > { %v1926_v61 = vmul.f32 %v3744_v53, %v1814_v46  ;;  %v2048_v42 = vmax.f32 %v3840_v38, 0.0  ;;  %3257 = vtanh.f32 %v1362_v30  ;;  %v1720_v47 = vmax.f32 %v1624_v49, 0.0 }
 0x13f   : > { %v2028_v60 = vmax.f32 %v3847_v55, 0.0  ;;  %3259 = vtanh.f32 %v1340_v57  ;;  %v2230_v62 = vadd.f32 %v3852_v39, %v1925_v51  ;;  %v2939_v9 = vpack.c.bf16 %v2253_v59, %v2253_v59 }
 0x140   : > { %v3252_v6 = vpop.eup %3251  ;;  %v2231_v10 = vadd.f32 %v2135_v8, %v1926_v61  ;;  %3261 = vtanh.f32 %v1342_v32  ;;  %v2137_v48 = vmul.f32 %v3703_v12, %v2025_v16  ;;  %v3894_v38 = vadd.f32 %v3653_v25, %v1155_v58  ;;  %v3040_v16 = vpop.f32.mrf.mxu1 }
 0x141   : > { %v3254_v14 = vpop.eup %3253  ;;  %v1529_v15 = vadd.f32 1.0, %v3252_v6  ;;  %v1343_v44 = vmul.f32 0.5, %v3886_v36  ;;  %2660 = vst.msk [vmem:[%s3739_s11 + $0x74] sm:$0xf] %vm2641_vm0, %v2939_v9  ;;  %v2160_v39 = vmul.f32 %v3690_v1, %v2048_v42  ;;  %v2138_v8 = vmul.f32 %v3716_v26, %v2026_v37 }
 0x142   : > { %v2924_v55 = vpack.c.bf16 %v2231_v10, %v2230_v62  ;;  %v1551_v18 = vadd.f32 1.0, %v3254_v14  ;;  %v1816_v20 = vmin.f32 %v1720_v47, 1.0  ;;  %v1365_v63 = vmul.f32 0.5, %v3894_v38  ;;  %v3042_v30 = vpop.f32.mrf.mxu1 }
 0x143   : > { %v1625_v24 = vmul.f32 0.5, %v1529_v15  ;;  %3263 = vtanh.f32 %v1343_v44  ;;  %v3904_v27 = vmul.f32 %v3703_v12, %v2028_v60  ;;  %v2051_v41 = vmax.f32 %v3868_v43, 0.0 }
 0x144   : > { %v3256_v52 = vpop.eup %3255  ;;  %2645 = vst [vmem:[%s3739_s11 + $0x18] sm:$0xff] %v2924_v55  ;;  %v1647_v56 = vmul.f32 0.5, %v1551_v18  ;;  %v1135_v28 = vmul.f32 %v3693_v3, %v810_v54  ;;  %v2029_v34 = vmax.f32 %v3875_v29, 0.0  ;;  %3265 = vtanh.f32 %v1365_v63 }
 0x145   : > { %v1721_v50 = vmax.f32 %v1625_v24, 0.0  ;;  %v1531_v33 = vadd.f32 1.0, %v3256_v52  ;;  %v3041_v35 = vadd.f32 %v3040_v16, %v3039_v5  ;;  %v1136_v40 = vmul.f32 %v3706_v13, %v812_v11  ;;  %v816_v24 = vpop.f32.mrf.mxu0 }
 0x146   : > { %v1743_v2 = vmax.f32 %v1647_v56, 0.0  ;;  %v3910_v7 = vadd.f32 %v3696_v4, %v1135_v28  ;;  %v1928_v31 = vmul.f32 %v3714_v23, %v1816_v20  ;;  %v1138_v43 = vmul.f32 %v3693_v3, %v814_v21 }
 0x147   : > { %v1817_v51 = vmin.f32 %v1721_v50, 1.0  ;;  %v1627_v37 = vmul.f32 0.5, %v1531_v33  ;;  %v3916_v46 = vmul.f32 %v3690_v1, %v2051_v41  ;;  %v1158_v49 = vmul.f32 %v3041_v35, %v3650_v22 }
 0x148   : > { %v1839_v45 = vmin.f32 %v1743_v2, 1.0  ;;  %v1345_v29 = vmul.f32 0.5, %v3910_v7  ;;  %v2031_v32 = vmax.f32 %v3878_v19, 0.0  ;;  %v3923_v58 = vadd.f32 %v3710_v17, %v1136_v40 }
 0x149   : > { %v1929_v54 = vmul.f32 %v3744_v53, %v1817_v51  ;;  %v1723_v57 = vmax.f32 %v1627_v37, 0.0  ;;  %v2032_v61 = vmax.f32 %v3886_v36, 0.0  ;;  %v3928_v42 = vadd.f32 %v3653_v25, %v1158_v49  ;;  %v3043_v36 = vpop.f32.mrf.mxu1 }
 0x14a   : > { %v1951_v59 = vmul.f32 %v3688_v0, %v1839_v45  ;;  %3267 = vtanh.f32 %v1345_v29  ;;  %v2233_v60 = vadd.f32 %v2137_v48, %v1928_v31  ;;  %v1346_v6 = vmul.f32 0.5, %v3923_v58 }
 0x14b   : > { %v3258_v47 = vpop.eup %3257  ;;  %v2234_v5 = vadd.f32 %v2138_v8, %v1929_v54  ;;  %v3932_v62 = vadd.f32 %v3696_v4, %v1138_v43  ;;  %v1819_v10 = vmin.f32 %v1723_v57, 1.0  ;;  %v1368_v14 = vmul.f32 0.5, %v3928_v42  ;;  %v3045_v49 = vpop.f32.mrf.mxu1 }
 0x14c   : > { %v3260_v19 = vpop.eup %3259  ;;  %v2256_v9 = vadd.f32 %v2160_v39, %v1951_v59  ;;  %v1554_v11 = vadd.f32 1.0, %v3258_v47  ;;  %3269 = vtanh.f32 %v1346_v6  ;;  %v3044_v48 = vadd.f32 %v3043_v36, %v3042_v30  ;;  %v820_v30 = vpop.f32.mrf.mxu0 }
 0x14d   : > { %v3262_v15 = vpop.eup %3261  ;;  %v2926_v44 = vpack.c.bf16 %v2234_v5, %v2233_v60  ;;  %v1532_v55 = vadd.f32 1.0, %v3260_v19  ;;  %3271 = vtanh.f32 %v1368_v14  ;;  %v2141_v39 = vmul.f32 %v3716_v26, %v2029_v34 }
 0x14e   : > { %v2941_v18 = vpack.c.bf16 %v2256_v9, %v2256_v9  ;;  %v1650_v8 = vmul.f32 0.5, %v1554_v11  ;;  %v1534_v20 = vadd.f32 1.0, %v3262_v15  ;;  %v2143_v16 = vmul.f32 %v3703_v12, %v2031_v32  ;;  %v3046_v15 = vpop.f32.mrf.mxu1 }
 0x14f   : > { %2647 = vst [vmem:[%s3739_s11 + $0x24] sm:$0xff] %v2926_v44  ;;  %v1628_v63 = vmul.f32 0.5, %v1532_v55  ;;  %v2054_v52 = vmax.f32 %v3894_v38, 0.0  ;;  %v1931_v41 = vmul.f32 %v3714_v23, %v1819_v10  ;;  %v1348_v50 = vmul.f32 0.5, %v3932_v62 }
 0x150   : > { %v3264_v56 = vpop.eup %3263  ;;  %2662 = vst.msk [vmem:[%s3739_s11 + $0x80] sm:$0xf] %vm2641_vm0, %v2941_v18  ;;  %v1746_v28 = vmax.f32 %v1650_v8, 0.0  ;;  %v1630_v21 = vmul.f32 0.5, %v1534_v20  ;;  %v1161_v35 = vmul.f32 %v3044_v48, %v3650_v22  ;;  %v1139_v40 = vmul.f32 %v3706_v13, %v816_v24  ;;  %v822_v18 = vpop.f32.mrf.mxu0 }
 0x151   : > { %v1724_v33 = vmax.f32 %v1628_v63, 0.0  ;;  %v1535_v2 = vadd.f32 1.0, %v3264_v56  ;;  %v3266_v34 = vpop.eup %3265  ;;  %v2144_v38 = vmul.f32 %v3716_v26, %v2032_v61  ;;  %3273 = vtanh.f32 %v1348_v50 }
 0x152   : > { %v1842_v31 = vmin.f32 %v1746_v28, 1.0  ;;  %v1726_v51 = vmax.f32 %v1630_v21, 0.0  ;;  %v1557_v43 = vadd.f32 1.0, %v3266_v34  ;;  %v3947_v29 = vadd.f32 %v3653_v25, %v1161_v35 }
 0x153   : > { %v1820_v37 = vmin.f32 %v1724_v33, 1.0  ;;  %v1631_v45 = vmul.f32 0.5, %v1535_v2  ;;  %v2236_v54 = vadd.f32 %v3904_v27, %v1931_v41  ;;  %v3952_v59 = vadd.f32 %v3710_v17, %v1139_v40  ;;  %v3048_v2 = vpop.f32.mrf.mxu1 }
 0x154   : > { %v1954_v57 = vmul.f32 %v3688_v0, %v1842_v31  ;;  %v1822_v32 = vmin.f32 %v1726_v51, 1.0  ;;  %v1653_v61 = vmul.f32 0.5, %v1557_v43  ;;  %v1371_v5 = vmul.f32 0.5, %v3947_v29  ;;  %v824_v31 = vpop.f32.mrf.mxu0 }
 0x155   : > { %v1932_v47 = vmul.f32 %v3744_v53, %v1820_v37  ;;  %v1727_v60 = vmax.f32 %v1631_v45, 0.0  ;;  %v1349_v9 = vmul.f32 0.5, %v3952_v59  ;;  %v1141_v27 = vmul.f32 %v3693_v3, %v820_v30 }
 0x156   : > { %v2259_v6 = vadd.f32 %v3916_v46, %v1954_v57  ;;  %v1934_v19 = vmul.f32 %v3714_v23, %v1822_v32  ;;  %v1749_v14 = vmax.f32 %v1653_v61, 0.0  ;;  %3275 = vtanh.f32 %v1371_v5  ;;  %v3049_v61 = vpop.f32.mrf.mxu1 }
 0x157   : > { %v3268_v10 = vpop.eup %3267  ;;  %v2237_v11 = vadd.f32 %v2141_v39, %v1932_v47  ;;  %v1823_v36 = vmin.f32 %v1727_v60, 1.0  ;;  %v2166_v55 = vmul.f32 %v3690_v1, %v2054_v52  ;;  %v2034_v46 = vmax.f32 %v3910_v7, 0.0 }
 0x158   : > { %v2943_v44 = vpack.c.bf16 %v2259_v6, %v2259_v6  ;;  %v1537_v48 = vadd.f32 1.0, %v3268_v10  ;;  %v1845_v20 = vmin.f32 %v1749_v14, 1.0  ;;  %3277 = vtanh.f32 %v1349_v9 }
 0x159   : > { %v2928_v8 = vpack.c.bf16 %v2237_v11, %v2236_v54  ;;  %v1935_v24 = vmul.f32 %v3744_v53, %v1823_v36  ;;  %v3270_v63 = vpop.eup %3269  ;;  %v2239_v39 = vadd.f32 %v2143_v16, %v1934_v19  ;;  %v3966_v41 = vadd.f32 %v3696_v4, %v1141_v27  ;;  %v826_v19 = vpop.f32.mrf.mxu0 }
 0x15a   : > { %2664 = vst.msk [vmem:[%s3739_s11 + $0x8c] sm:$0xf] %vm2641_vm0, %v2943_v44  ;;  %v1633_v56 = vmul.f32 0.5, %v1537_v48  ;;  %v3047_v28 = vadd.f32 %v3046_v15, %v3045_v49  ;;  %v3272_v21 = vpop.eup %3271  ;;  %v1957_v52 = vmul.f32 %v3688_v0, %v1845_v20  ;;  %v1538_v50 = vadd.f32 1.0, %v3270_v63 }
 0x15b   : > { %2649 = vst [vmem:[%s3739_s11 + $0x30] sm:$0xff] %v2928_v8  ;;  %v2240_v7 = vadd.f32 %v2144_v38, %v1935_v24  ;;  %v1142_v33 = vmul.f32 %v3706_v13, %v822_v18  ;;  %v1560_v40 = vadd.f32 1.0, %v3272_v21  ;;  %v2057_v34 = vmax.f32 %v3928_v42, 0.0  ;;  %v3051_v18 = vpop.f32.mrf.mxu1 }
 0x15c   : > { %v1729_v35 = vmax.f32 %v1633_v56, 0.0  ;;  %v1351_v16 = vmul.f32 0.5, %v3966_v41  ;;  %v2262_v51 = vadd.f32 %v2166_v55, %v1957_v52  ;;  %v1634_v43 = vmul.f32 0.5, %v1538_v50 }
 0x15d   : > { %v2930_v37 = vpack.c.bf16 %v2240_v7, %v2239_v39  ;;  %v2035_v45 = vmax.f32 %v3923_v58, 0.0  ;;  %v1656_v38 = vmul.f32 0.5, %v1560_v40  ;;  %v1164_v30 = vmul.f32 %v3047_v28, %v3650_v22  ;;  %v830_v39 = vpop.f32.mrf.mxu0 }
 0x15e   : > { %v1825_v49 = vmin.f32 %v1729_v35, 1.0  ;;  %3279 = vtanh.f32 %v1351_v16  ;;  %v3274_v54 = vpop.eup %3273  ;;  %v2945_v57 = vpack.c.bf16 %v2262_v51, %v2262_v51  ;;  %v2146_v32 = vmul.f32 %v3703_v12, %v2034_v46 }
 0x15f   : > { %2651 = vst [vmem:[%s3739_s11 + $0x3c] sm:$0xff] %v2930_v37  ;;  %v1730_v42 = vmax.f32 %v1634_v43, 0.0  ;;  %v3978_v47 = vadd.f32 %v3710_v17, %v1142_v33  ;;  %v1752_v60 = vmax.f32 %v1656_v38, 0.0  ;;  %v2169_v5 = vmul.f32 %v3690_v1, %v2057_v34  ;;  %v832_v43 = vpop.f32.mrf.mxu0 }
 0x160   : > { %v1540_v58 = vadd.f32 1.0, %v3274_v54  ;;  %v3982_v6 = vadd.f32 %v3653_v25, %v1164_v30  ;;  %2666 = vst.msk [vmem:[%s3739_s11 + $0x98] sm:$0xf] %vm2641_vm0, %v2945_v57  ;;  %v1937_v9 = vmul.f32 %v3714_v23, %v1825_v49  ;;  %v1144_v11 = vmul.f32 %v3693_v3, %v824_v31  ;;  %v3052_v31 = vpop.f32.mrf.mxu1 }
 0x161   : > { %v1826_v27 = vmin.f32 %v1730_v42, 1.0  ;;  %v1352_v10 = vmul.f32 0.5, %v3978_v47  ;;  %v1848_v14 = vmin.f32 %v1752_v60, 1.0  ;;  %v2147_v36 = vmul.f32 %v3716_v26, %v2035_v45 }
 0x162   : > { %v1636_v15 = vmul.f32 0.5, %v1540_v58  ;;  %v1374_v44 = vmul.f32 0.5, %v3982_v6  ;;  %v2037_v48 = vmax.f32 %v3932_v62, 0.0  ;;  %v2060_v46 = vmax.f32 %v3947_v29, 0.0 }
 0x163   : > { %v1938_v55 = vmul.f32 %v3744_v53, %v1826_v27  ;;  %3281 = vtanh.f32 %v1352_v10  ;;  %v3276_v8 = vpop.eup %3275  ;;  %v1960_v20 = vmul.f32 %v3688_v0, %v1848_v14  ;;  %v3996_v63 = vadd.f32 %v3696_v4, %v1144_v11 }
 0x164   : > { %v1732_v24 = vmax.f32 %v1636_v15, 0.0  ;;  %3283 = vtanh.f32 %v1374_v44  ;;  %v2242_v56 = vadd.f32 %v2146_v32, %v1937_v9  ;;  %v1563_v21 = vadd.f32 1.0, %v3276_v8  ;;  %v834_v15 = vpop.f32.mrf.mxu0 }
 0x165   : > { %v2243_v28 = vadd.f32 %v2147_v36, %v1938_v55  ;;  %v3050_v52 = vadd.f32 %v3049_v61, %v3048_v2  ;;  %v3278_v7 = vpop.eup %3277  ;;  %v2265_v62 = vadd.f32 %v2169_v5, %v1960_v20  ;;  %v2038_v29 = vmax.f32 %v3952_v59, 0.0 }
 0x166   : > { %v1828_v50 = vmin.f32 %v1732_v24, 1.0  ;;  %v1354_v33 = vmul.f32 0.5, %v3996_v63  ;;  %v1659_v40 = vmul.f32 0.5, %v1563_v21  ;;  %v1541_v34 = vadd.f32 1.0, %v3278_v7 }
 0x167   : > { %v2932_v35 = vpack.c.bf16 %v2243_v28, %v2242_v56  ;;  %v1167_v16 = vmul.f32 %v3050_v52, %v3650_v22  ;;  %v2947_v51 = vpack.c.bf16 %v2265_v62, %v2265_v62  ;;  %v2149_v37 = vmul.f32 %v3703_v12, %v2037_v48 }
 0x168   : > { %v2172_v2 = vmul.f32 %v3690_v1, %v2060_v46  ;;  %3285 = vtanh.f32 %v1354_v33  ;;  %v1755_v45 = vmax.f32 %v1659_v40, 0.0  ;;  %v1637_v49 = vmul.f32 0.5, %v1541_v34 }
 0x169   : > { %2653 = vst [vmem:[%s3739_s11 + $0x48] sm:$0xff] %v2932_v35  ;;  %v4005_v59 = vadd.f32 %v3653_v25, %v1167_v16  ;;  %v1145_v38 = vmul.f32 %v3706_v13, %v826_v19  ;;  %2668 = vst.msk [vmem:[%s3739_s11 + $0xa4] sm:$0xf] %vm2641_vm0, %v2947_v51  ;;  %v1940_v30 = vmul.f32 %v3714_v23, %v1828_v50  ;;  %v2040_v36 = vmax.f32 %v3966_v41, 0.0  ;;  %v836_v50 = vpop.f32.mrf.mxu0 }
 0x16a   : > { %v2150_v54 = vmul.f32 %v3716_v26, %v2038_v29  ;;  %v1147_v57 = vmul.f32 %v3693_v3, %v830_v39  ;;  %v3053_v32 = vadd.f32 %v3052_v31, %v3051_v18  ;;  %v1851_v61 = vmin.f32 %v1755_v45, 1.0  ;;  %v3054_v18 = vpop.f32.mrf.mxu1 }
 0x16b   : > { %v3280_v42 = vpop.eup %3279  ;;  %v1733_v60 = vmax.f32 %v1637_v49, 0.0  ;;  %v1377_v5 = vmul.f32 0.5, %v4005_v59  ;;  %v1148_v58 = vmul.f32 %v3706_v13, %v832_v43  ;;  %v4016_v27 = vadd.f32 %v3710_v17, %v1145_v38  ;;  %v840_v38 = vpop.f32.mrf.mxu0 }
 0x16c   : > { %v1543_v9 = vadd.f32 1.0, %v3280_v42  ;;  %v4019_v19 = vadd.f32 %v3696_v4, %v1147_v57  ;;  %v1170_v10 = vmul.f32 %v3053_v32, %v3650_v22  ;;  %v1963_v11 = vmul.f32 %v3688_v0, %v1851_v61  ;;  %v3055_v40 = vpop.f32.mrf.mxu1 }
 0x16d   : > { %v1829_v14 = vmin.f32 %v1733_v60, 1.0  ;;  %3287 = vtanh.f32 %v1377_v5  ;;  %v2041_v55 = vmax.f32 %v3978_v47, 0.0  ;;  %v1355_v48 = vmul.f32 0.5, %v4016_v27 }
 0x16e   : > { %v1639_v44 = vmul.f32 0.5, %v1543_v9  ;;  %v1357_v46 = vmul.f32 0.5, %v4019_v19  ;;  %v2268_v8 = vadd.f32 %v2172_v2, %v1963_v11  ;;  %v2063_v24 = vmax.f32 %v3982_v6, 0.0  ;;  %v3057_v42 = vpop.f32.mrf.mxu1 }
 0x16f   : > { %v1941_v20 = vmul.f32 %v3744_v53, %v1829_v14  ;;  %v4030_v39 = vadd.f32 %v3653_v25, %v1170_v10  ;;  %v2245_v41 = vadd.f32 %v2149_v37, %v1940_v30  ;;  %3289 = vtanh.f32 %v1355_v48 }
 0x170   : > { %v3282_v56 = vpop.eup %3281  ;;  %v1735_v28 = vmax.f32 %v1639_v44, 0.0  ;;  %v4033_v47 = vadd.f32 %v3710_v17, %v1148_v58  ;;  %v2949_v52 = vpack.c.bf16 %v2268_v8, %v2268_v8  ;;  %3291 = vtanh.f32 %v1357_v46 }
 0x171   : > { %v3284_v21 = vpop.eup %3283  ;;  %v2246_v7 = vadd.f32 %v2150_v54, %v1941_v20  ;;  %v1544_v62 = vadd.f32 1.0, %v3282_v56  ;;  %v2043_v33 = vmax.f32 %v3996_v63, 0.0  ;;  %v1380_v35 = vmul.f32 0.5, %v4030_v39 }
 0x172   : > { %v1831_v29 = vmin.f32 %v1735_v28, 1.0  ;;  %v1566_v6 = vadd.f32 1.0, %v3284_v21  ;;  %2670 = vst.msk [vmem:[%s3739_s11 + $0xb0] sm:$0xf] %vm2641_vm0, %v2949_v52  ;;  %v1358_v31 = vmul.f32 0.5, %v4033_v47  ;;  %v2152_v51 = vmul.f32 %v3703_v12, %v2040_v36 }
 0x173   : > { %v2934_v34 = vpack.c.bf16 %v2246_v7, %v2245_v41  ;;  %v1640_v16 = vmul.f32 0.5, %v1544_v62  ;;  %v2153_v2 = vmul.f32 %v3716_v26, %v2041_v55  ;;  %3293 = vtanh.f32 %v1380_v35 }
 0x174   : > { %v1662_v37 = vmul.f32 0.5, %v1566_v6  ;;  %v2175_v45 = vmul.f32 %v3690_v1, %v2063_v24  ;;  %3295 = vtanh.f32 %v1358_v31  ;;  %v1150_v49 = vmul.f32 %v3693_v3, %v834_v15 }
 0x175   : > { %v3286_v43 = vpop.eup %3285  ;;  %2655 = vst [vmem:[%s3739_s11 + $0x54] sm:$0xff] %v2934_v34  ;;  %v1736_v63 = vmax.f32 %v1640_v16, 0.0  ;;  %v1943_v30 = vmul.f32 %v3714_v23, %v1831_v29  ;;  %v4047_v32 = vmul.f32 %v3703_v12, %v2043_v33  ;;  %v3056_v5 = vadd.f32 %v3055_v40, %v3054_v18 }
 0x176   : > { %v1758_v54 = vmax.f32 %v1662_v37, 0.0  ;;  %v1546_v57 = vadd.f32 1.0, %v3286_v43  ;;  %v4050_v60 = vadd.f32 %v3696_v4, %v1150_v49  ;;  %v1151_v58 = vmul.f32 %v3706_v13, %v836_v50  ;;  %v842_v37 = vpop.f32.mrf.mxu0 }
 0x177   : > { %v1832_v61 = vmin.f32 %v1736_v63, 1.0  ;;  %v2066_v11 = vmax.f32 %v4005_v59, 0.0  ;;  %v1153_v14 = vmul.f32 %v3693_v3, %v840_v38  ;;  %v2044_v15 = vmax.f32 %v4016_v27, 0.0  ;;  %v3058_v59 = vpop.f32.mrf.mxu1 }
 0x178   : > { %v1854_v9 = vmin.f32 %v1758_v54, 1.0  ;;  %v1642_v10 = vmul.f32 0.5, %v1546_v57  ;;  %v1360_v44 = vmul.f32 0.5, %v4050_v60  ;;  %v1173_v55 = vmul.f32 %v3056_v5, %v3650_v22 }
 0x179   : > { %v1944_v36 = vmul.f32 %v3744_v53, %v1832_v61  ;;  %v4061_v8 = vadd.f32 %v3710_v17, %v1151_v58  ;;  %v4064_v20 = vadd.f32 %v3696_v4, %v1153_v14  ;;  %v2248_v24 = vadd.f32 %v2152_v51, %v1943_v30  ;;  %v844_v14 = vpop.f32.mrf.mxu0 }
 0x17a   : > { %v3288_v48 = vpop.eup %3287  ;;  %v1966_v46 = vmul.f32 %v3688_v0, %v1854_v9  ;;  %v1738_v18 = vmax.f32 %v1642_v10, 0.0  ;;  %3297 = vtanh.f32 %v1360_v44  ;;  %v2046_v28 = vmax.f32 %v4019_v19, 0.0 }
 0x17b   : > { %v2249_v56 = vadd.f32 %v2153_v2, %v1944_v36  ;;  %v1569_v41 = vadd.f32 1.0, %v3288_v48  ;;  %v4068_v21 = vadd.f32 %v3653_v25, %v1173_v55  ;;  %v1361_v52 = vmul.f32 0.5, %v4061_v8 }
 0x17c   : > { %v2271_v27 = vadd.f32 %v2175_v45, %v1966_v46  ;;  %v3290_v7 = vpop.eup %3289  ;;  %v1363_v29 = vmul.f32 0.5, %v4064_v20  ;;  %v3059_v6 = vadd.f32 %v3058_v59, %v3057_v42  ;;  %v1834_v40 = vmin.f32 %v1738_v18, 1.0 }
 0x17d   : > { %v2936_v62 = vpack.c.bf16 %v2249_v56, %v2248_v24  ;;  %v1665_v50 = vmul.f32 0.5, %v1569_v41  ;;  %v3292_v33 = vpop.eup %3291  ;;  %v1547_v34 = vadd.f32 1.0, %v3290_v7  ;;  %v1383_v16 = vmul.f32 0.5, %v4068_v21 }
 0x17e   : > { %v2951_v35 = vpack.c.bf16 %v2271_v27, %v2271_v27  ;;  %v2178_v31 = vmul.f32 %v3690_v1, %v2066_v11  ;;  %v1549_v51 = vadd.f32 1.0, %v3292_v33  ;;  %3299 = vtanh.f32 %v1361_v52  ;;  %v3060_v27 = vpop.f32.mrf.mxu1 }
 0x17f   : > { %2657 = vst [vmem:[%s3739_s11 + $0x60] sm:$0xff] %v2936_v62  ;;  %v1761_v19 = vmax.f32 %v1665_v50, 0.0  ;;  %v1643_v2 = vmul.f32 0.5, %v1547_v34  ;;  %v2156_v43 = vmul.f32 %v3716_v26, %v2044_v15  ;;  %v2158_v45 = vmul.f32 %v3703_v12, %v2046_v28  ;;  %v846_v62 = vpop.f32.mrf.mxu0 }
 0x180   : > { %2672 = vst.msk [vmem:[%s3739_s11 + $0xbc] sm:$0xf] %vm2641_vm0, %v2951_v35  ;;  %3301 = vtanh.f32 %v1383_v16  ;;  %v3294_v63 = vpop.eup %3293  ;;  %v1645_v38 = vmul.f32 0.5, %v1549_v51  ;;  %v2069_v30 = vmax.f32 %v4030_v39, 0.0  ;;  %v1946_v57 = vmul.f32 %v3714_v23, %v1834_v40  ;;  %v3061_v51 = vpop.f32.mrf.mxu1 }
 0x181   : > { %v1857_v49 = vmin.f32 %v1761_v19, 1.0  ;;  %3303 = vtanh.f32 %v1363_v29  ;;  %v3296_v54 = vpop.eup %3295  ;;  %v1739_v42 = vmax.f32 %v1643_v2, 0.0  ;;  %v1572_v61 = vadd.f32 1.0, %v3294_v63 }
 0x182   : > { %v1176_v5 = vmul.f32 %v3059_v6, %v3650_v22  ;;  %v1741_v9 = vmax.f32 %v1645_v38, 0.0  ;;  %v1550_v10 = vadd.f32 1.0, %v3296_v54  ;;  %v1154_v11 = vmul.f32 %v3706_v13, %v842_v37 }
 0x183   : > { %v1969_v58 = vmul.f32 %v3688_v0, %v1857_v49  ;;  %v1835_v36 = vmin.f32 %v1739_v42, 1.0  ;;  %v1668_v15 = vmul.f32 0.5, %v1572_v61  ;;  %v2047_v44 = vmax.f32 %v4033_v47, 0.0  ;;  %v850_v49 = vpop.f32.mrf.mxu0 }
 0x184   : > { %v4086_v39 = vadd.f32 %v3653_v25, %v1176_v5  ;;  %v1837_v48 = vmin.f32 %v1741_v9, 1.0  ;;  %v1646_v46 = vmul.f32 0.5, %v1550_v10  ;;  %v4089_v18 = vadd.f32 %v3710_v17, %v1154_v11 }
 0x185   : > { %v2274_v55 = vadd.f32 %v2178_v31, %v1969_v58  ;;  %v1947_v59 = vmul.f32 %v3744_v53, %v1835_v36  ;;  %v1764_v24 = vmax.f32 %v1668_v15, 0.0  ;;  %v2181_v56 = vmul.f32 %v3690_v1, %v2069_v30 }
 0x186   : > { %v1386_v41 = vmul.f32 0.5, %v4086_v39  ;;  %v2251_v47 = vadd.f32 %v4047_v32, %v1946_v57  ;;  %v1742_v52 = vmax.f32 %v1646_v46, 0.0  ;;  %v1364_v7 = vmul.f32 0.5, %v4089_v18 }
 0x187   : > { %v2953_v28 = vpack.c.bf16 %v2274_v55, %v2274_v55  ;;  %v3298_v50 = vpop.eup %3297  ;;  %v2252_v29 = vadd.f32 %v2156_v43, %v1947_v59  ;;  %v1949_v6 = vmul.f32 %v3714_v23, %v1837_v48  ;;  %v1860_v33 = vmin.f32 %v1764_v24, 1.0 }
 0x188   : > { %3305 = vtanh.f32 %v1386_v41  ;;  %v1838_v35 = vmin.f32 %v1742_v52, 1.0  ;;  %v2159_v40 = vmul.f32 %v3716_v26, %v2047_v44  ;;  %v1552_v34 = vadd.f32 1.0, %v3298_v50 }
 0x189   : > { %2674 = vst.msk [vmem:[%s3739_s11 + $0xc8] sm:$0xf] %vm2641_vm0, %v2953_v28  ;;  %3307 = vtanh.f32 %v1364_v7  ;;  %v2938_v32 = vpack.c.bf16 %v2252_v29, %v2251_v47  ;;  %v1972_v16 = vmul.f32 %v3688_v0, %v1860_v33  ;;  %v2049_v19 = vmax.f32 %v4050_v60, 0.0 }
 0x18a   : > { %v1156_v31 = vmul.f32 %v3693_v3, %v844_v14  ;;  %v1950_v37 = vmul.f32 %v3744_v53, %v1838_v35  ;;  %v1648_v2 = vmul.f32 0.5, %v1552_v34  ;;  %v2050_v43 = vmax.f32 %v4061_v8, 0.0 }
 0x18b   : > { %v3062_v63 = vadd.f32 %v3061_v51, %v3060_v27  ;;  %v3300_v38 = vpop.eup %3299  ;;  %2659 = vst [vmem:[%s3739_s11 + $0x6c] sm:$0xff] %v2938_v32  ;;  %v2254_v30 = vadd.f32 %v2158_v45, %v1949_v6  ;;  %v2277_v54 = vadd.f32 %v2181_v56, %v1972_v16  ;;  %v1157_v42 = vmul.f32 %v3706_v13, %v846_v62  ;;  %v3063_v45 = vpop.f32.mrf.mxu1 }
 0x18c   : > { %v4107_v57 = vadd.f32 %v3696_v4, %v1156_v31  ;;  %v2255_v61 = vadd.f32 %v2159_v40, %v1950_v37  ;;  %v1744_v5 = vmax.f32 %v1648_v2, 0.0  ;;  %v1553_v58 = vadd.f32 1.0, %v3300_v38 }
 0x18d   : > { %v3302_v60 = vpop.eup %3301  ;;  %v1179_v9 = vmul.f32 %v3062_v63, %v3650_v22  ;;  %v2955_v10 = vpack.c.bf16 %v2277_v54, %v2277_v54  ;;  %v1159_v36 = vmul.f32 %v3693_v3, %v850_v49  ;;  %v2072_v59 = vmax.f32 %v4068_v21, 0.0  ;;  %v3064_v21 = vpop.f32.mrf.mxu1 }
 0x18e   : > { %v3304_v8 = vpop.eup %3303  ;;  %v1575_v11 = vadd.f32 1.0, %v3302_v60  ;;  %v1366_v14 = vmul.f32 0.5, %v4107_v57  ;;  %v2940_v15 = vpack.c.bf16 %v2255_v61, %v2254_v30  ;;  %v1840_v44 = vmin.f32 %v1744_v5, 1.0 }
 0x18f   : > { %v1649_v55 = vmul.f32 0.5, %v1553_v58  ;;  %v1555_v48 = vadd.f32 1.0, %v3304_v8  ;;  %2676 = vst.msk [vmem:[%s3739_s11 + $0xd4] sm:$0xf] %vm2641_vm0, %v2955_v10  ;;  %v4117_v24 = vadd.f32 %v3653_v25, %v1179_v9  ;;  %v2052_v27 = vmax.f32 %v4064_v20, 0.0  ;;  %v852_v20 = vpop.f32.mrf.mxu0  ;;  %v3066_v49 = vpop.f32.mrf.mxu1 }
 0x190   : > { %v1671_v46 = vmul.f32 0.5, %v1575_v11  ;;  %3309 = vtanh.f32 %v1366_v14  ;;  %2661 = vst [vmem:[%s3739_s11 + $0x78] sm:$0xff] %v2940_v15  ;;  %v4122_v47 = vadd.f32 %v3710_v17, %v1157_v42  ;;  %v2075_v52 = vmax.f32 %v4086_v39, 0.0 }
 0x191   : > { %v1745_v56 = vmax.f32 %v1649_v55, 0.0  ;;  %v1651_v41 = vmul.f32 0.5, %v1555_v48  ;;  %v1389_v7 = vmul.f32 0.5, %v4117_v24  ;;  %v4127_v62 = vadd.f32 %v3696_v4, %v1159_v36  ;;  %v854_v54 = vpop.f32.mrf.mxu0 }
 0x192   : > { %v1767_v28 = vmax.f32 %v1671_v46, 0.0  ;;  %v1952_v50 = vmul.f32 %v3714_v23, %v1840_v44  ;;  %v2161_v29 = vmul.f32 %v3703_v12, %v2049_v19  ;;  %v1367_v33 = vmul.f32 0.5, %v4122_v47  ;;  %v3067_v44 = vpop.f32.mrf.mxu1 }
 0x193   : > { %v1841_v6 = vmin.f32 %v1745_v56, 1.0  ;;  %v2184_v40 = vmul.f32 %v3690_v1, %v2072_v59  ;;  %v2162_v34 = vmul.f32 %v3716_v26, %v2050_v43  ;;  %3311 = vtanh.f32 %v1389_v7  ;;  %v856_v46 = vpop.f32.mrf.mxu0 }
 0x194   : > { %v1863_v35 = vmin.f32 %v1767_v28, 1.0  ;;  %v1747_v16 = vmax.f32 %v1651_v41, 0.0  ;;  %3313 = vtanh.f32 %v1367_v33  ;;  %v1369_v31 = vmul.f32 0.5, %v4127_v62 }
 0x195   : > { %v3306_v39 = vpop.eup %3305  ;;  %v1953_v32 = vmul.f32 %v3744_v53, %v1841_v6  ;;  %v2164_v37 = vmul.f32 %v3703_v12, %v2052_v27  ;;  %v2187_v63 = vmul.f32 %v3690_v1, %v2075_v52  ;;  %v2257_v38 = vadd.f32 %v2161_v29, %v1952_v50 }
 0x196   : > { %v3308_v51 = vpop.eup %3307  ;;  %v1975_v19 = vmul.f32 %v3688_v0, %v1863_v35  ;;  %v1578_v2 = vadd.f32 1.0, %v3306_v39  ;;  %3315 = vtanh.f32 %v1369_v31  ;;  %v2053_v61 = vmax.f32 %v4089_v18, 0.0 }
 0x197   : > { %v2258_v30 = vadd.f32 %v2162_v34, %v1953_v32  ;;  %v1556_v43 = vadd.f32 1.0, %v3308_v51  ;;  %v3065_v5 = vadd.f32 %v3064_v21, %v3063_v45  ;;  %v1843_v9 = vmin.f32 %v1747_v16, 1.0  ;;  %v860_v34 = vpop.f32.mrf.mxu0 }
 0x198   : > { %v2280_v42 = vadd.f32 %v2184_v40, %v1975_v19  ;;  %v1674_v60 = vmul.f32 0.5, %v1578_v2  ;;  %v1160_v10 = vmul.f32 %v3706_v13, %v852_v20  ;;  %v1162_v15 = vmul.f32 %v3693_v3, %v854_v54 }
 0x199   : > { %v2942_v58 = vpack.c.bf16 %v2258_v30, %v2257_v38  ;;  %v1652_v8 = vmul.f32 0.5, %v1556_v43  ;;  %v1182_v36 = vmul.f32 %v3065_v5, %v3650_v22  ;;  %v2055_v48 = vmax.f32 %v4107_v57, 0.0 }
 0x19a   : > { %v2957_v11 = vpack.c.bf16 %v2280_v42, %v2280_v42  ;;  %v1770_v14 = vmax.f32 %v1674_v60, 0.0  ;;  %v4146_v18 = vadd.f32 %v3710_v17, %v1160_v10  ;;  %v3068_v45 = vadd.f32 %v3067_v44, %v3066_v49  ;;  %v3069_v49 = vpop.f32.mrf.mxu1 }
 0x19b   : > { %2663 = vst [vmem:[%s3739_s11 + $0x84] sm:$0xff] %v2942_v58  ;;  %v1748_v55 = vmax.f32 %v1652_v8, 0.0  ;;  %v2165_v56 = vmul.f32 %v3716_v26, %v2053_v61  ;;  %v4152_v41 = vadd.f32 %v3653_v25, %v1182_v36  ;;  %v4155_v27 = vadd.f32 %v3696_v4, %v1162_v15  ;;  %v862_v61 = vpop.f32.mrf.mxu0 }
 0x19c   : > { %2678 = vst.msk [vmem:[%s3739_s11 + $0xe0] sm:$0xf] %vm2641_vm0, %v2957_v11  ;;  %v1866_v59 = vmin.f32 %v1770_v14, 1.0  ;;  %v1955_v52 = vmul.f32 %v3714_v23, %v1843_v9  ;;  %v1370_v7 = vmul.f32 0.5, %v4146_v18  ;;  %v1185_v21 = vmul.f32 %v3068_v45, %v3650_v22  ;;  %v3070_v15 = vpop.f32.mrf.mxu1 }
 0x19d   : > { %v3310_v28 = vpop.eup %3309  ;;  %v1844_v57 = vmin.f32 %v1748_v55, 1.0  ;;  %v1392_v6 = vmul.f32 0.5, %v4152_v41  ;;  %v1163_v33 = vmul.f32 %v3706_v13, %v856_v46  ;;  %v2167_v35 = vmul.f32 %v3703_v12, %v2055_v48 }
 0x19e   : > { %v1978_v50 = vmul.f32 %v3688_v0, %v1866_v59  ;;  %v1558_v29 = vadd.f32 1.0, %v3310_v28  ;;  %3317 = vtanh.f32 %v1370_v7  ;;  %v1372_v40 = vmul.f32 0.5, %v4155_v27  ;;  %v864_v28 = vpop.f32.mrf.mxu0 }
 0x19f   : > { %v1956_v20 = vmul.f32 %v3744_v53, %v1844_v57  ;;  %v2078_v16 = vmax.f32 %v4117_v24, 0.0  ;;  %3319 = vtanh.f32 %v1392_v6  ;;  %v2260_v51 = vadd.f32 %v2164_v37, %v1955_v52 }
 0x1a0   : > { %v2283_v39 = vadd.f32 %v2187_v63, %v1978_v50  ;;  %v1654_v32 = vmul.f32 0.5, %v1558_v29  ;;  %v3312_v31 = vpop.eup %3311  ;;  %3321 = vtanh.f32 %v1372_v40  ;;  %v4168_v2 = vadd.f32 %v3653_v25, %v1185_v21 }
 0x1a1   : > { %v2261_v19 = vadd.f32 %v2165_v56, %v1956_v20  ;;  %v3314_v38 = vpop.eup %3313  ;;  %v1581_v54 = vadd.f32 1.0, %v3312_v31  ;;  %v4171_v63 = vadd.f32 %v3710_v17, %v1163_v33  ;;  %v1165_v37 = vmul.f32 %v3693_v3, %v860_v34 }
 0x1a2   : > { %v2959_v30 = vpack.c.bf16 %v2283_v39, %v2283_v39  ;;  %v1750_v43 = vmax.f32 %v1654_v32, 0.0  ;;  %v1559_v24 = vadd.f32 1.0, %v3314_v38  ;;  %v1395_v60 = vmul.f32 0.5, %v4168_v2 }
 0x1a3   : > { %v2944_v42 = vpack.c.bf16 %v2261_v19, %v2260_v51  ;;  %v3316_v5 = vpop.eup %3315  ;;  %v1677_v9 = vmul.f32 0.5, %v1581_v54  ;;  %v2190_v8 = vmul.f32 %v3690_v1, %v2078_v16  ;;  %v1373_v10 = vmul.f32 0.5, %v4171_v63 }
 0x1a4   : > { %2680 = vst.msk [vmem:[%s3739_s11 + $0xec] sm:$0xf] %vm2641_vm0, %v2959_v30  ;;  %v1846_v58 = vmin.f32 %v1750_v43, 1.0  ;;  %v1655_v11 = vmul.f32 0.5, %v1559_v24  ;;  %v2056_v14 = vmax.f32 %v4122_v47, 0.0  ;;  %v1561_v36 = vadd.f32 1.0, %v3316_v5  ;;  %v3072_v43 = vpop.f32.mrf.mxu1 }
 0x1a5   : > { %2665 = vst [vmem:[%s3739_s11 + $0x90] sm:$0xff] %v2944_v42  ;;  %3323 = vtanh.f32 %v1395_v60  ;;  %v1773_v44 = vmax.f32 %v1677_v9, 0.0  ;;  %v2058_v55 = vmax.f32 %v4127_v62, 0.0  ;;  %v2059_v48 = vmax.f32 %v4146_v18, 0.0 }
 0x1a6   : > { %3325 = vtanh.f32 %v1373_v10  ;;  %v1751_v45 = vmax.f32 %v1655_v11, 0.0  ;;  %v1657_v46 = vmul.f32 0.5, %v1561_v36  ;;  %v2081_v59 = vmax.f32 %v4152_v41, 0.0 }
 0x1a7   : > { %v4185_v56 = vadd.f32 %v3696_v4, %v1165_v37  ;;  %v1958_v52 = vmul.f32 %v3714_v23, %v1846_v58  ;;  %v1869_v47 = vmin.f32 %v1773_v44, 1.0  ;;  %v3071_v57 = vadd.f32 %v3070_v15, %v3069_v49 }
 0x1a8   : > { %v1166_v7 = vmul.f32 %v3706_v13, %v862_v61  ;;  %v1847_v21 = vmin.f32 %v1751_v45, 1.0  ;;  %v2168_v62 = vmul.f32 %v3716_v26, %v2056_v14  ;;  %v1753_v50 = vmax.f32 %v1657_v46, 0.0 }
 0x1a9   : > { %v1375_v18 = vmul.f32 0.5, %v4185_v56  ;;  %v1981_v29 = vmul.f32 %v3688_v0, %v1869_v47  ;;  %v1188_v41 = vmul.f32 %v3071_v57, %v3650_v22  ;;  %v1168_v33 = vmul.f32 %v3693_v3, %v864_v28 }
 0x1aa   : > { %v4194_v6 = vadd.f32 %v3710_v17, %v1166_v7  ;;  %v1959_v20 = vmul.f32 %v3744_v53, %v1847_v21  ;;  %v2170_v40 = vmul.f32 %v3703_v12, %v2058_v55  ;;  %v2171_v34 = vmul.f32 %v3716_v26, %v2059_v48  ;;  %v3073_v55 = vpop.f32.mrf.mxu1 }
 0x1ab   : > { %3327 = vtanh.f32 %v1375_v18  ;;  %v3318_v39 = vpop.eup %3317  ;;  %v2263_v32 = vadd.f32 %v2167_v35, %v1958_v52  ;;  %v2286_v16 = vadd.f32 %v2190_v8, %v1981_v29  ;;  %v2193_v31 = vmul.f32 %v3690_v1, %v2081_v59  ;;  %v866_v8 = vpop.f32.mrf.mxu0 }
 0x1ac   : > { %v4202_v51 = vadd.f32 %v3653_v25, %v1188_v41  ;;  %v3320_v19 = vpop.eup %3319  ;;  %v2264_v49 = vadd.f32 %v2168_v62, %v1959_v20  ;;  %v1562_v38 = vadd.f32 1.0, %v3318_v39  ;;  %v1376_v30 = vmul.f32 0.5, %v4194_v6 }
 0x1ad   : > { %v4206_v54 = vadd.f32 %v3696_v4, %v1168_v33  ;;  %v3322_v42 = vpop.eup %3321  ;;  %v2961_v24 = vpack.c.bf16 %v2286_v16, %v2286_v16  ;;  %v1849_v35 = vmin.f32 %v1753_v50, 1.0  ;;  %v1584_v60 = vadd.f32 1.0, %v3320_v19  ;;  %v3075_v33 = vpop.f32.mrf.mxu1 }
 0x1ae   : > { %v1398_v37 = vmul.f32 0.5, %v4202_v51  ;;  %v2946_v61 = vpack.c.bf16 %v2264_v49, %v2263_v32  ;;  %v1658_v5 = vmul.f32 0.5, %v1562_v38  ;;  %v1564_v58 = vadd.f32 1.0, %v3322_v42 }
 0x1af   : > { %v2061_v9 = vmax.f32 %v4155_v27, 0.0  ;;  %2682 = vst.msk [vmem:[%s3739_s11 + $0xf8] sm:$0xf] %vm2641_vm0, %v2961_v24  ;;  %v1680_v10 = vmul.f32 0.5, %v1584_v60  ;;  %v2084_v11 = vmax.f32 %v4168_v2, 0.0  ;;  %v2062_v14 = vmax.f32 %v4171_v63, 0.0  ;;  %v870_v63 = vpop.f32.mrf.mxu0 }
 0x1b0   : > { %3329 = vtanh.f32 %v1398_v37  ;;  %2667 = vst [vmem:[%s3739_s11 + $0x9c] sm:$0xff] %v2946_v61  ;;  %v1754_v36 = vmax.f32 %v1658_v5, 0.0  ;;  %v1660_v15 = vmul.f32 0.5, %v1564_v58  ;;  %v1378_v44 = vmul.f32 0.5, %v4206_v54 }
 0x1b1   : > { %3331 = vtanh.f32 %v1376_v30  ;;  %v1961_v45 = vmul.f32 %v3714_v23, %v1849_v35  ;;  %v1776_v27 = vmax.f32 %v1680_v10, 0.0  ;;  %v3074_v46 = vadd.f32 %v3073_v55, %v3072_v43  ;;  %v872_v43 = vpop.f32.mrf.mxu0 }
 0x1b2   : > { %v3324_v48 = vpop.eup %3323  ;;  %v1169_v59 = vmul.f32 %v3706_v13, %v866_v8  ;;  %v1850_v52 = vmin.f32 %v1754_v36, 1.0  ;;  %v1756_v2 = vmax.f32 %v1660_v15, 0.0  ;;  %3333 = vtanh.f32 %v1378_v44 }
 0x1b3   : > { %v3326_v28 = vpop.eup %3325  ;;  %v1587_v47 = vadd.f32 1.0, %v3324_v48  ;;  %v1872_v57 = vmin.f32 %v1776_v27, 1.0  ;;  %v2196_v7 = vmul.f32 %v3690_v1, %v2084_v11  ;;  %v1191_v62 = vmul.f32 %v3074_v46, %v3650_v22  ;;  %v874_v15 = vpop.f32.mrf.mxu0 }
 0x1b4   : > { %v1565_v21 = vadd.f32 1.0, %v3326_v28  ;;  %v1962_v50 = vmul.f32 %v3744_v53, %v1850_v52  ;;  %v1852_v18 = vmin.f32 %v1756_v2, 1.0  ;;  %v4222_v41 = vadd.f32 %v3710_v17, %v1169_v59 }
 0x1b5   : > { %v1683_v29 = vmul.f32 0.5, %v1587_v47  ;;  %v1984_v20 = vmul.f32 %v3688_v0, %v1872_v57  ;;  %v2064_v32 = vmax.f32 %v4185_v56, 0.0  ;;  %v4227_v16 = vadd.f32 %v3653_v25, %v1191_v62 }
 0x1b6   : > { %v1661_v39 = vmul.f32 0.5, %v1565_v21  ;;  %v2266_v19 = vadd.f32 %v2170_v40, %v1961_v45  ;;  %v2267_v49 = vadd.f32 %v2171_v34, %v1962_v50  ;;  %v1379_v30 = vmul.f32 0.5, %v4222_v41  ;;  %v3076_v40 = vpop.f32.mrf.mxu1 }
 0x1b7   : > { %v1779_v38 = vmax.f32 %v1683_v29, 0.0  ;;  %v2289_v24 = vadd.f32 %v2193_v31, %v1984_v20  ;;  %v1401_v60 = vmul.f32 0.5, %v4227_v16  ;;  %v1171_v37 = vmul.f32 %v3693_v3, %v870_v63 }
 0x1b8   : > { %v3328_v42 = vpop.eup %3327  ;;  %v1757_v35 = vmax.f32 %v1661_v39, 0.0  ;;  %v2948_v61 = vpack.c.bf16 %v2267_v49, %v2266_v19  ;;  %v1964_v56 = vmul.f32 %v3714_v23, %v1852_v18  ;;  %v2173_v8 = vmul.f32 %v3703_v12, %v2061_v9  ;;  %v3078_v63 = vpop.f32.mrf.mxu1 }
 0x1b9   : > { %v1875_v5 = vmin.f32 %v1779_v38, 1.0  ;;  %v1567_v58 = vadd.f32 1.0, %v3328_v42  ;;  %v2963_v34 = vpack.c.bf16 %v2289_v24, %v2289_v24  ;;  %3335 = vtanh.f32 %v1401_v60  ;;  %v876_v38 = vpop.f32.mrf.mxu0 }
 0x1ba   : > { %v1853_v10 = vmin.f32 %v1757_v35, 1.0  ;;  %2669 = vst [vmem:[%s3739_s11 + $0xa8] sm:$0xff] %v2948_v61  ;;  %v2174_v11 = vmul.f32 %v3716_v26, %v2062_v14  ;;  %3337 = vtanh.f32 %v1379_v30  ;;  %v4241_v55 = vmul.f32 %v3703_v12, %v2064_v32  ;;  %v3079_v24 = vpop.f32.mrf.mxu1 }
 0x1bb   : > { %v1987_v31 = vmul.f32 %v3688_v0, %v1875_v5  ;;  %v1663_v36 = vmul.f32 0.5, %v1567_v58  ;;  %2684 = vst.msk [vmem:[%s3739_s11 + $0x104] sm:$0xf] %vm2641_vm0, %v2963_v34  ;;  %v4244_v48 = vadd.f32 %v3696_v4, %v1171_v37  ;;  %v3077_v9 = vadd.f32 %v3076_v40, %v3075_v33 }
 0x1bc   : > { %v1965_v44 = vmul.f32 %v3744_v53, %v1853_v10  ;;  %v2269_v27 = vadd.f32 %v2173_v8, %v1964_v56  ;;  %v1172_v14 = vmul.f32 %v3706_v13, %v872_v43  ;;  %v1174_v57 = vmul.f32 %v3693_v3, %v874_v15  ;;  %v880_v8 = vpop.f32.mrf.mxu0 }
 0x1bd   : > { %v3330_v45 = vpop.eup %3329  ;;  %v2292_v46 = vadd.f32 %v2196_v7, %v1987_v31  ;;  %v1759_v59 = vmax.f32 %v1663_v36, 0.0  ;;  %v1381_v47 = vmul.f32 0.5, %v4244_v48  ;;  %v2087_v62 = vmax.f32 %v4202_v51, 0.0  ;;  %v3081_v36 = vpop.f32.mrf.mxu1 }
 0x1be   : > { %v3332_v28 = vpop.eup %3331  ;;  %v2270_v52 = vadd.f32 %v2174_v11, %v1965_v44  ;;  %v1590_v2 = vadd.f32 1.0, %v3330_v45  ;;  %v1194_v18 = vmul.f32 %v3077_v9, %v3650_v22  ;;  %v2065_v32 = vmax.f32 %v4194_v6, 0.0 }
 0x1bf   : > { %v2965_v21 = vpack.c.bf16 %v2292_v46, %v2292_v46  ;;  %v1568_v50 = vadd.f32 1.0, %v3332_v28  ;;  %v3334_v7 = vpop.eup %3333  ;;  %v1855_v33 = vmin.f32 %v1759_v59, 1.0  ;;  %3339 = vtanh.f32 %v1381_v47 }
 0x1c0   : > { %v2950_v29 = vpack.c.bf16 %v2270_v52, %v2269_v27  ;;  %v1686_v20 = vmul.f32 0.5, %v1590_v2  ;;  %v1570_v19 = vadd.f32 1.0, %v3334_v7  ;;  %v4255_v49 = vadd.f32 %v3653_v25, %v1194_v18 }
 0x1c1   : > { %2686 = vst.msk [vmem:[%s3739_s11 + $0x110] sm:$0xf] %vm2641_vm0, %v2965_v21  ;;  %v1664_v39 = vmul.f32 0.5, %v1568_v50  ;;  %v2067_v30 = vmax.f32 %v4206_v54, 0.0  ;;  %v4260_v43 = vadd.f32 %v3710_v17, %v1172_v14  ;;  %v4263_v42 = vadd.f32 %v3696_v4, %v1174_v57  ;;  %v882_v57 = vpop.f32.mrf.mxu0  ;;  %v3082_v50 = vpop.f32.mrf.mxu1 }
 0x1c2   : > { %2671 = vst [vmem:[%s3739_s11 + $0xb4] sm:$0xff] %v2950_v29  ;;  %v1782_v51 = vmax.f32 %v1686_v20, 0.0  ;;  %v2199_v35 = vmul.f32 %v3690_v1, %v2087_v62  ;;  %v1666_v6 = vmul.f32 0.5, %v1570_v19  ;;  %v1404_v37 = vmul.f32 0.5, %v4255_v49 }
 0x1c3   : > { %v1760_v60 = vmax.f32 %v1664_v39, 0.0  ;;  %v1967_v61 = vmul.f32 %v3714_v23, %v1855_v33  ;;  %v1382_v5 = vmul.f32 0.5, %v4260_v43  ;;  %v3080_v58 = vadd.f32 %v3079_v24, %v3078_v63 }
 0x1c4   : > { %v1878_v56 = vmin.f32 %v1782_v51, 1.0  ;;  %v1762_v40 = vmax.f32 %v1666_v6, 0.0  ;;  %3341 = vtanh.f32 %v1404_v37  ;;  %v1384_v34 = vmul.f32 0.5, %v4263_v42 }
 0x1c5   : > { %v1856_v54 = vmin.f32 %v1760_v60, 1.0  ;;  %v2177_v31 = vmul.f32 %v3716_v26, %v2065_v32  ;;  %v2179_v11 = vmul.f32 %v3703_v12, %v2067_v30  ;;  %3343 = vtanh.f32 %v1382_v5 }
 0x1c6   : > { %v1990_v10 = vmul.f32 %v3688_v0, %v1878_v56  ;;  %v3336_v15 = vpop.eup %3335  ;;  %v2090_v9 = vmax.f32 %v4227_v16, 0.0  ;;  %v2068_v45 = vmax.f32 %v4222_v41, 0.0  ;;  %3345 = vtanh.f32 %v1384_v34 }
 0x1c7   : > { %v1968_v44 = vmul.f32 %v3744_v53, %v1856_v54  ;;  %v3338_v27 = vpop.eup %3337  ;;  %v1593_v59 = vadd.f32 1.0, %v3336_v15  ;;  %v1197_v14 = vmul.f32 %v3080_v58, %v3650_v22  ;;  %v1175_v28 = vmul.f32 %v3706_v13, %v876_v38 }
 0x1c8   : > { %v2295_v46 = vadd.f32 %v2199_v35, %v1990_v10  ;;  %v2272_v52 = vadd.f32 %v4241_v55, %v1967_v61  ;;  %v1858_v47 = vmin.f32 %v1762_v40, 1.0  ;;  %v1571_v63 = vadd.f32 1.0, %v3338_v27  ;;  %v884_v35 = vpop.f32.mrf.mxu0 }
 0x1c9   : > { %v2273_v2 = vadd.f32 %v2177_v31, %v1968_v44  ;;  %v1689_v16 = vmul.f32 0.5, %v1593_v59  ;;  %v4280_v41 = vadd.f32 %v3653_v25, %v1197_v14  ;;  %v4283_v62 = vadd.f32 %v3710_v17, %v1175_v28 }
 0x1ca   : > { %v2967_v21 = vpack.c.bf16 %v2295_v46, %v2295_v46  ;;  %v2202_v7 = vmul.f32 %v3690_v1, %v2090_v9  ;;  %v1667_v29 = vmul.f32 0.5, %v1571_v63  ;;  %v1177_v55 = vmul.f32 %v3693_v3, %v880_v8  ;;  %v886_v31 = vpop.f32.mrf.mxu0 }
 0x1cb   : > { %v2952_v18 = vpack.c.bf16 %v2273_v2, %v2272_v52  ;;  %v1785_v33 = vmax.f32 %v1689_v16, 0.0  ;;  %v2180_v20 = vmul.f32 %v3716_v26, %v2068_v45  ;;  %v1407_v39 = vmul.f32 0.5, %v4280_v41 }
 0x1cc   : > { %2688 = vst.msk [vmem:[%s3739_s11 + $0x11c] sm:$0xf] %vm2641_vm0, %v2967_v21  ;;  %v1385_v32 = vmul.f32 0.5, %v4283_v62  ;;  %v3340_v19 = vpop.eup %3339  ;;  %v1763_v38 = vmax.f32 %v1667_v29, 0.0  ;;  %v2070_v51 = vmax.f32 %v4244_v48, 0.0  ;;  %v4295_v30 = vadd.f32 %v3696_v4, %v1177_v55  ;;  %v3084_v21 = vpop.f32.mrf.mxu1 }
 0x1cd   : > { %2673 = vst [vmem:[%s3739_s11 + $0xc0] sm:$0xff] %v2952_v18  ;;  %v3083_v24 = vadd.f32 %v3082_v50, %v3081_v36  ;;  %v1970_v60 = vmul.f32 %v3714_v23, %v1858_v47  ;;  %v1881_v6 = vmin.f32 %v1785_v33, 1.0  ;;  %v1573_v37 = vadd.f32 1.0, %v3340_v19  ;;  %v890_v16 = vpop.f32.mrf.mxu0 }
 0x1ce   : > { %3347 = vtanh.f32 %v1407_v39  ;;  %v1859_v61 = vmin.f32 %v1763_v38, 1.0  ;;  %v2093_v56 = vmax.f32 %v4255_v49, 0.0  ;;  %v1387_v5 = vmul.f32 0.5, %v4295_v30 }
 0x1cf   : > { %3349 = vtanh.f32 %v1385_v32  ;;  %v1993_v58 = vmul.f32 %v3688_v0, %v1881_v6  ;;  %v1669_v54 = vmul.f32 0.5, %v1573_v37  ;;  %v2071_v48 = vmax.f32 %v4260_v43, 0.0  ;;  %v892_v6 = vpop.f32.mrf.mxu0 }
 0x1d0   : > { %v1200_v40 = vmul.f32 %v3083_v24, %v3650_v22  ;;  %v1971_v34 = vmul.f32 %v3744_v53, %v1859_v61  ;;  %3351 = vtanh.f32 %v1387_v5  ;;  %v1178_v8 = vmul.f32 %v3706_v13, %v882_v57 }
 0x1d1   : > { %v1180_v10 = vmul.f32 %v3693_v3, %v884_v35  ;;  %v3342_v36 = vpop.eup %3341  ;;  %v2275_v49 = vadd.f32 %v2179_v11, %v1970_v60  ;;  %v2298_v15 = vadd.f32 %v2202_v7, %v1993_v58  ;;  %v1765_v44 = vmax.f32 %v1669_v54, 0.0  ;;  %v3085_v60 = vpop.f32.mrf.mxu1 }
 0x1d2   : > { %v4307_v9 = vadd.f32 %v3653_v25, %v1200_v40  ;;  %v3344_v45 = vpop.eup %3343  ;;  %v2276_v43 = vadd.f32 %v2180_v20, %v1971_v34  ;;  %v1596_v27 = vadd.f32 1.0, %v3342_v36  ;;  %v4310_v46 = vadd.f32 %v3710_v17, %v1178_v8 }
 0x1d3   : > { %v4313_v59 = vadd.f32 %v3696_v4, %v1180_v10  ;;  %v3346_v14 = vpop.eup %3345  ;;  %v2969_v28 = vpack.c.bf16 %v2298_v15, %v2298_v15  ;;  %v1861_v52 = vmin.f32 %v1765_v44, 1.0  ;;  %v1574_v11 = vadd.f32 1.0, %v3344_v45  ;;  %v3087_v15 = vpop.f32.mrf.mxu1 }
 0x1d4   : > { %v1410_v2 = vmul.f32 0.5, %v4307_v9  ;;  %v2954_v47 = vpack.c.bf16 %v2276_v43, %v2275_v49  ;;  %v1692_v63 = vmul.f32 0.5, %v1596_v27  ;;  %v1576_v57 = vadd.f32 1.0, %v3346_v14 }
 0x1d5   : > { %2690 = vst.msk [vmem:[%s3739_s11 + $0x128] sm:$0xf] %vm2641_vm0, %v2969_v28  ;;  %v2182_v50 = vmul.f32 %v3703_v12, %v2070_v51  ;;  %v1670_v18 = vmul.f32 0.5, %v1574_v11  ;;  %v1388_v7 = vmul.f32 0.5, %v4310_v46  ;;  %v1973_v29 = vmul.f32 %v3714_v23, %v1861_v52 }
 0x1d6   : > { %3353 = vtanh.f32 %v1410_v2  ;;  %2675 = vst [vmem:[%s3739_s11 + $0xcc] sm:$0xff] %v2954_v47  ;;  %v1788_v55 = vmax.f32 %v1692_v63, 0.0  ;;  %v2205_v33 = vmul.f32 %v3690_v1, %v2093_v56  ;;  %v1672_v20 = vmul.f32 0.5, %v1576_v57 }
 0x1d7   : > { %v1766_v39 = vmax.f32 %v1670_v18, 0.0  ;;  %v2183_v32 = vmul.f32 %v3716_v26, %v2071_v48  ;;  %3355 = vtanh.f32 %v1388_v7  ;;  %v1390_v19 = vmul.f32 0.5, %v4313_v59 }
 0x1d8   : > { %v1884_v38 = vmin.f32 %v1788_v55, 1.0  ;;  %v1768_v24 = vmax.f32 %v1672_v20, 0.0  ;;  %v2073_v51 = vmax.f32 %v4263_v42, 0.0  ;;  %v2096_v35 = vmax.f32 %v4280_v41, 0.0 }
 0x1d9   : > { %v1862_v37 = vmin.f32 %v1766_v39, 1.0  ;;  %3357 = vtanh.f32 %v1390_v19  ;;  %v3086_v61 = vadd.f32 %v3085_v60, %v3084_v21  ;;  %v1181_v56 = vmul.f32 %v3706_v13, %v886_v31 }
 0x1da   : > { %v2278_v58 = vadd.f32 %v2182_v50, %v1973_v29  ;;  %v1996_v54 = vmul.f32 %v3688_v0, %v1884_v38  ;;  %v2074_v48 = vmax.f32 %v4283_v62, 0.0  ;;  %v1183_v40 = vmul.f32 %v3693_v3, %v890_v16  ;;  %v894_v62 = vpop.f32.mrf.mxu0  ;;  %v3088_v29 = vpop.f32.mrf.mxu1 }
 0x1db   : > { %v3348_v5 = vpop.eup %3347  ;;  %v1974_v42 = vmul.f32 %v3744_v53, %v1862_v37  ;;  %v1203_v41 = vmul.f32 %v3086_v61, %v3650_v22  ;;  %v4334_v10 = vadd.f32 %v3710_v17, %v1181_v56  ;;  %v1864_v49 = vmin.f32 %v1768_v24, 1.0 }
 0x1dc   : > { %v3350_v34 = vpop.eup %3349  ;;  %v1599_v8 = vadd.f32 1.0, %v3348_v5  ;;  %v2301_v36 = vadd.f32 %v2205_v33, %v1996_v54  ;;  %v4337_v44 = vadd.f32 %v3696_v4, %v1183_v40  ;;  %v2185_v11 = vmul.f32 %v3703_v12, %v2073_v51  ;;  %v4349_v55 = vpop.f32.mrf.mxu0 }
 0x1dd   : > { %v1577_v31 = vadd.f32 1.0, %v3350_v34  ;;  %v3352_v45 = vpop.eup %3351  ;;  %v2279_v43 = vadd.f32 %v2183_v32, %v1974_v42  ;;  %v4340_v14 = vadd.f32 %v3653_v25, %v1203_v41  ;;  %v1391_v28 = vmul.f32 0.5, %v4334_v10 }
 0x1de   : > { %v1695_v27 = vmul.f32 0.5, %v1599_v8  ;;  %v2971_v52 = vpack.c.bf16 %v2301_v36, %v2301_v36  ;;  %v1579_v47 = vadd.f32 1.0, %v3352_v45  ;;  %v2208_v21 = vmul.f32 %v3690_v1, %v2096_v35  ;;  %v900_v40 = vpop.f32.mrf.mxu0 }
 0x1df   : > { %v1673_v2 = vmul.f32 0.5, %v1577_v31  ;;  %v2956_v63 = vpack.c.bf16 %v2279_v43, %v2278_v58  ;;  %v1413_v16 = vmul.f32 0.5, %v4340_v14  ;;  %v1976_v50 = vmul.f32 %v3714_v23, %v1864_v49 }
 0x1e0   : > { %v1791_v57 = vmax.f32 %v1695_v27, 0.0  ;;  %2692 = vst.msk [vmem:[%s3739_s11 + $0x134] sm:$0xf] %vm2641_vm0, %v2971_v52  ;;  %v1675_v7 = vmul.f32 0.5, %v1579_v47  ;;  %3359 = vtanh.f32 %v1391_v28  ;;  %v2186_v20 = vmul.f32 %v3716_v26, %v2074_v48  ;;  %v3090_v48 = vpop.f32.mrf.mxu1 }
 0x1e1   : > { %v1769_v18 = vmax.f32 %v1673_v2, 0.0  ;;  %2677 = vst [vmem:[%s3739_s11 + $0xd8] sm:$0xff] %v2956_v63  ;;  %3361 = vtanh.f32 %v1413_v16  ;;  %v1393_v39 = vmul.f32 0.5, %v4337_v44  ;;  %v2076_v24 = vmax.f32 %v4295_v30, 0.0  ;;  %v4370_v2 = vpop.f32.mrf.mxu0 }
 0x1e2   : > { %v1887_v33 = vmin.f32 %v1791_v57, 1.0  ;;  %v1771_v38 = vmax.f32 %v1675_v7, 0.0  ;;  %v2099_v51 = vmax.f32 %v4307_v9, 0.0  ;;  %v3089_v37 = vadd.f32 %v3088_v29, %v3087_v15 }
 0x1e3   : > { %v3354_v32 = vpop.eup %3353  ;;  %v1865_v19 = vmin.f32 %v1769_v18, 1.0  ;;  %3363 = vtanh.f32 %v1393_v39  ;;  %v2281_v56 = vadd.f32 %v2185_v11, %v1976_v50  ;;  %v2077_v58 = vmax.f32 %v4310_v46, 0.0  ;;  %v3091_v11 = vpop.f32.mrf.mxu1 }
 0x1e4   : > { %v1999_v35 = vmul.f32 %v3688_v0, %v1887_v33  ;;  %v1602_v60 = vadd.f32 1.0, %v3354_v32  ;;  %v3356_v61 = vpop.eup %3355  ;;  %v1184_v54 = vmul.f32 %v3706_v13, %v892_v6  ;;  %v1206_v9 = vmul.f32 %v3089_v37, %v3650_v22 }
 0x1e5   : > { %v1977_v5 = vmul.f32 %v3744_v53, %v1865_v19  ;;  %v1580_v30 = vadd.f32 1.0, %v3356_v61  ;;  %v1867_v36 = vmin.f32 %v1771_v38, 1.0  ;;  %v1186_v31 = vmul.f32 %v3693_v3, %v894_v62  ;;  %v3093_v32 = vpop.f32.mrf.mxu1  ;;  %v4386_v19 = vpop.f32.mrf.mxu0 }
 0x1e6   : > { %v2304_v34 = vadd.f32 %v2208_v21, %v1999_v35  ;;  %v1698_v42 = vmul.f32 0.5, %v1602_v60  ;;  %v3358_v8 = vpop.eup %3357  ;;  %v4362_v49 = vadd.f32 %v3710_v17, %v1184_v54  ;;  %v2079_v27 = vmax.f32 %v4313_v59, 0.0 }
 0x1e7   : > { %v2282_v41 = vadd.f32 %v2186_v20, %v1977_v5  ;;  %v1676_v6 = vmul.f32 0.5, %v1580_v30  ;;  %v1582_v45 = vadd.f32 1.0, %v3358_v8  ;;  %v4367_v28 = vadd.f32 %v3653_v25, %v1206_v9 }
 0x1e8   : > { %v2973_v46 = vpack.c.bf16 %v2304_v34, %v2304_v34  ;;  %v1794_v15 = vmax.f32 %v1698_v42, 0.0  ;;  %v1394_v52 = vmul.f32 0.5, %v4362_v49  ;;  %v2211_v62 = vmul.f32 %v3690_v1, %v2099_v51 }
 0x1e9   : > { %v2958_v43 = vpack.c.bf16 %v2282_v41, %v2281_v56  ;;  %v1772_v63 = vmax.f32 %v1676_v6, 0.0  ;;  %v1678_v57 = vmul.f32 0.5, %v1582_v45  ;;  %v1979_v21 = vmul.f32 %v3714_v23, %v1867_v36  ;;  %v3094_v41 = vpop.f32.mrf.mxu1  ;;  %v4397_v36 = vpop.f32.mrf.mxu0 }
 0x1ea   : > { %2694 = vst.msk [vmem:[%s3739_s11 + $0x140] sm:$0xf] %vm2641_vm0, %v2973_v46  ;;  %v1890_v47 = vmin.f32 %v1794_v15, 1.0  ;;  %v1416_v59 = vmul.f32 0.5, %v4367_v28  ;;  %3365 = vtanh.f32 %v1394_v52  ;;  %v4379_v16 = vadd.f32 %v3696_v4, %v1186_v31 }
 0x1eb   : > { %2679 = vst [vmem:[%s3739_s11 + $0xe4] sm:$0xff] %v2958_v43  ;;  %v2188_v50 = vmul.f32 %v3703_v12, %v2076_v24  ;;  %v1868_v7 = vmin.f32 %v1772_v63, 1.0  ;;  %v1774_v29 = vmax.f32 %v1678_v57, 0.0  ;;  %v2189_v33 = vmul.f32 %v3716_v26, %v2077_v58  ;;  %v910_v57 = vpop.f32.mrf.mxu0 }
 0x1ec   : > { %v2002_v18 = vmul.f32 %v3688_v0, %v1890_v47  ;;  %v2191_v20 = vmul.f32 %v3703_v12, %v2079_v27  ;;  %3367 = vtanh.f32 %v1416_v59  ;;  %v1396_v39 = vmul.f32 0.5, %v4379_v16 }
 0x1ed   : > { %v3360_v38 = vpop.eup %3359  ;;  %v1980_v35 = vmul.f32 %v3744_v53, %v1868_v7  ;;  %v2102_v24 = vmax.f32 %v4340_v14, 0.0  ;;  %v3092_v60 = vadd.f32 %v3091_v11, %v3090_v48  ;;  %v2284_v61 = vadd.f32 %v2188_v50, %v1979_v21 }
 0x1ee   : > { %v2307_v51 = vadd.f32 %v2211_v62, %v2002_v18  ;;  %v3362_v37 = vpop.eup %3361  ;;  %v1583_v56 = vadd.f32 1.0, %v3360_v38  ;;  %3369 = vtanh.f32 %v1396_v39  ;;  %v1187_v5 = vmul.f32 %v3706_v13, %v4349_v55 }
 0x1ef   : > { %v2285_v54 = vadd.f32 %v2189_v33, %v1980_v35  ;;  %v1870_v34 = vmin.f32 %v1774_v29, 1.0  ;;  %v1605_v42 = vadd.f32 1.0, %v3362_v37  ;;  %v1209_v8 = vmul.f32 %v3092_v60, %v3650_v22  ;;  %v912_v37 = vpop.f32.mrf.mxu0 }
 0x1f0   : > { %v2975_v58 = vpack.c.bf16 %v2307_v51, %v2307_v51  ;;  %v3364_v30 = vpop.eup %3363  ;;  %v1679_v9 = vmul.f32 0.5, %v1583_v56  ;;  %v4394_v14 = vadd.f32 %v3710_v17, %v1187_v5  ;;  %v1189_v48 = vmul.f32 %v3693_v3, %v900_v40 }
 0x1f1   : > { %v2960_v55 = vpack.c.bf16 %v2285_v54, %v2284_v61  ;;  %v1701_v31 = vmul.f32 0.5, %v1605_v42  ;;  %v2080_v46 = vmax.f32 %v4334_v10, 0.0  ;;  %v1585_v15 = vadd.f32 1.0, %v3364_v30 }
 0x1f2   : > { %2696 = vst.msk [vmem:[%s3739_s11 + $0x14c] sm:$0xf] %vm2641_vm0, %v2975_v58  ;;  %v1775_v6 = vmax.f32 %v1679_v9, 0.0  ;;  %v2082_v45 = vmax.f32 %v4337_v44, 0.0  ;;  %v4404_v43 = vadd.f32 %v3653_v25, %v1209_v8  ;;  %v1397_v27 = vmul.f32 0.5, %v4394_v14 }
 0x1f3   : > { %2681 = vst [vmem:[%s3739_s11 + $0xf0] sm:$0xff] %v2960_v55  ;;  %v1797_v40 = vmax.f32 %v1701_v31, 0.0  ;;  %v1681_v52 = vmul.f32 0.5, %v1585_v15  ;;  %v4409_v11 = vadd.f32 %v3696_v4, %v1189_v48  ;;  %v3095_v47 = vadd.f32 %v3094_v41, %v3093_v32  ;;  %v914_v55 = vpop.f32.mrf.mxu0 }
 0x1f4   : > { %v1982_v62 = vmul.f32 %v3714_v23, %v1870_v34  ;;  %v1871_v63 = vmin.f32 %v1775_v6, 1.0  ;;  %v1419_v10 = vmul.f32 0.5, %v4404_v43  ;;  %3371 = vtanh.f32 %v1397_v27 }
 0x1f5   : > { %v1893_v44 = vmin.f32 %v1797_v40, 1.0  ;;  %v2214_v21 = vmul.f32 %v3690_v1, %v2102_v24  ;;  %v1777_v59 = vmax.f32 %v1681_v52, 0.0  ;;  %v1399_v50 = vmul.f32 0.5, %v4409_v11 }
 0x1f6   : > { %v1983_v18 = vmul.f32 %v3744_v53, %v1871_v63  ;;  %v2192_v7 = vmul.f32 %v3716_v26, %v2080_v46  ;;  %v2194_v29 = vmul.f32 %v3703_v12, %v2082_v45  ;;  %3373 = vtanh.f32 %v1419_v10 }
 0x1f7   : > { %v3366_v33 = vpop.eup %3365  ;;  %v2005_v39 = vmul.f32 %v3688_v0, %v1893_v44  ;;  %v2083_v32 = vmax.f32 %v4362_v49, 0.0  ;;  %3375 = vtanh.f32 %v1399_v50  ;;  %v1212_v38 = vmul.f32 %v3095_v47, %v3650_v22  ;;  %v916_v44 = vpop.f32.mrf.mxu0 }
 0x1f8   : > { %v2287_v51 = vadd.f32 %v2191_v20, %v1982_v62  ;;  %v2288_v35 = vadd.f32 %v2192_v7, %v1983_v18  ;;  %v1586_v24 = vadd.f32 1.0, %v3366_v33  ;;  %v1190_v60 = vmul.f32 %v3706_v13, %v4370_v2 }
 0x1f9   : > { %v3368_v61 = vpop.eup %3367  ;;  %v2310_v56 = vadd.f32 %v2214_v21, %v2005_v39  ;;  %v1873_v5 = vmin.f32 %v1777_v59, 1.0  ;;  %v4424_v58 = vadd.f32 %v3653_v25, %v1212_v38  ;;  %v1192_v49 = vmul.f32 %v3693_v3, %v4386_v19 }
 0x1fa   : > { %v2962_v54 = vpack.c.bf16 %v2288_v35, %v2287_v51  ;;  %v1608_v22 = vadd.f32 1.0, %v3368_v61  ;;  %v1682_v20 = vmul.f32 0.5, %v1586_v24  ;;  %v4429_v34 = vadd.f32 %v3710_v17, %v1190_v60  ;;  %v920_v61 = vpop.f32.mrf.mxu0 }
 0x1fb   : > { %v3370_v42 = vpop.eup %3369  ;;  %v2977_v2 = vpack.c.bf16 %v2310_v56, %v2310_v56  ;;  %v2105_v30 = vmax.f32 %v4367_v28, 0.0  ;;  %v2085_v9 = vmax.f32 %v4379_v16, 0.0  ;;  %v1422_v8 = vmul.f32 0.5, %v4424_v58 }
 0x1fc   : > { %2683 = vst [vmem:[%s3739_s11 + $0xfc] sm:$0xff] %v2962_v54  ;;  %v1704_v25 = vmul.f32 0.5, %v1608_v22  ;;  %v1778_v48 = vmax.f32 %v1682_v20, 0.0  ;;  %v1588_v41 = vadd.f32 1.0, %v3370_v42  ;;  %v1400_v19 = vmul.f32 0.5, %v4429_v34 }
 0x1fd   : > { %2698 = vst.msk [vmem:[%s3739_s11 + $0x158] sm:$0xf] %vm2641_vm0, %v2977_v2  ;;  %v1985_v31 = vmul.f32 %v3714_v23, %v1873_v5  ;;  %v2195_v46 = vmul.f32 %v3716_v26, %v2083_v32  ;;  %3377 = vtanh.f32 %v1422_v8  ;;  %v4441_v28 = vadd.f32 %v3696_v4, %v1192_v49 }
 0x1fe   : > { %v1800_v16 = vmax.f32 %v1704_v25, 0.0  ;;  %v1874_v15 = vmin.f32 %v1778_v48, 1.0  ;;  %v1684_v6 = vmul.f32 0.5, %v1588_v41  ;;  %3379 = vtanh.f32 %v1400_v19  ;;  %v922_v48 = vpop.f32.mrf.mxu0 }
 0x1ff   : > { %v2217_v45 = vmul.f32 %v3690_v1, %v2105_v30  ;;  %v2197_v27 = vmul.f32 %v3703_v12, %v2085_v9  ;;  %v1402_v40 = vmul.f32 0.5, %v4441_v28  ;;  %v1193_v52 = vmul.f32 %v3706_v13, %v4397_v36 }
 0x200   : > { %v1896_v47 = vmin.f32 %v1800_v16, 1.0  ;;  %v1986_v62 = vmul.f32 %v3744_v53, %v1874_v15  ;;  %v1780_v63 = vmax.f32 %v1684_v6, 0.0  ;;  %v1195_v10 = vmul.f32 %v3693_v3, %v910_v57 }
 0x201   : > { %v3372_v21 = vpop.eup %3371  ;;  %v2086_v59 = vmax.f32 %v4394_v14, 0.0  ;;  %3381 = vtanh.f32 %v1402_v40  ;;  %v4452_v50 = vadd.f32 %v3710_v17, %v1193_v52  ;;  %v1196_v18 = vmul.f32 %v3706_v13, %v912_v37 }
 0x202   : > { %v2290_v7 = vadd.f32 %v2194_v29, %v1985_v31  ;;  %v2008_v33 = vmul.f32 %v3688_v0, %v1896_v47  ;;  %v2291_v36 = vadd.f32 %v2195_v46, %v1986_v62  ;;  %v1589_v39 = vadd.f32 1.0, %v3372_v21 }
 0x203   : > { %v3374_v32 = vpop.eup %3373  ;;  %v2108_v38 = vmax.f32 %v4404_v43, 0.0  ;;  %v1403_v57 = vmul.f32 0.5, %v4452_v50  ;;  %v4459_v51 = vadd.f32 %v3696_v4, %v1195_v10  ;;  %v4462_v14 = vadd.f32 %v3710_v17, %v1196_v18 }
 0x204   : > { %v3376_v35 = vpop.eup %3375  ;;  %v2313_v24 = vadd.f32 %v2217_v45, %v2008_v33  ;;  %v2964_v60 = vpack.c.bf16 %v2291_v36, %v2290_v7  ;;  %v1876_v29 = vmin.f32 %v1780_v63, 1.0  ;;  %v1611_v37 = vadd.f32 1.0, %v3374_v32 }
 0x205   : > { %v1685_v56 = vmul.f32 0.5, %v1589_v39  ;;  %v1591_v5 = vadd.f32 1.0, %v3376_v35  ;;  %v2088_v49 = vmax.f32 %v4409_v11, 0.0  ;;  %3383 = vtanh.f32 %v1403_v57 }
 0x206   : > { %v2979_v43 = vpack.c.bf16 %v2313_v24, %v2313_v24  ;;  %2685 = vst [vmem:[%s3739_s11 + $0x108] sm:$0xff] %v2964_v60  ;;  %v1707_v54 = vmul.f32 0.5, %v1611_v37  ;;  %v2198_v22 = vmul.f32 %v3716_v26, %v2086_v59  ;;  %v1405_v20 = vmul.f32 0.5, %v4459_v51  ;;  %v924_v59 = vpop.f32.mrf.mxu0 }
 0x207   : > { %v1781_v42 = vmax.f32 %v1685_v56, 0.0  ;;  %v1687_v2 = vmul.f32 0.5, %v1591_v5  ;;  %v2111_v30 = vmax.f32 %v4424_v58, 0.0  ;;  %v1406_v9 = vmul.f32 0.5, %v4462_v14 }
 0x208   : > { %2700 = vst.msk [vmem:[%s3739_s11 + $0x164] sm:$0xf] %vm2641_vm0, %v2979_v43  ;;  %v1988_v8 = vmul.f32 %v3714_v23, %v1876_v29  ;;  %v1803_v25 = vmax.f32 %v1707_v54, 0.0  ;;  %3385 = vtanh.f32 %v1405_v20  ;;  %v1198_v11 = vmul.f32 %v3693_v3, %v914_v55  ;;  %v926_v37 = vpop.f32.mrf.mxu0 }
 0x209   : > { %v2220_v41 = vmul.f32 %v3690_v1, %v2108_v38  ;;  %v1877_v19 = vmin.f32 %v1781_v42, 1.0  ;;  %v2200_v31 = vmul.f32 %v3703_v12, %v2088_v49  ;;  %3387 = vtanh.f32 %v1406_v9 }
 0x20a   : > { %v3378_v46 = vpop.eup %3377  ;;  %v1899_v16 = vmin.f32 %v1803_v25, 1.0  ;;  %v1783_v58 = vmax.f32 %v1687_v2, 0.0  ;;  %v4477_v15 = vadd.f32 %v3696_v4, %v1198_v11  ;;  %v1199_v6 = vmul.f32 %v3706_v13, %v916_v44 }
 0x20b   : > { %v3380_v45 = vpop.eup %3379  ;;  %v1989_v40 = vmul.f32 %v3744_v53, %v1877_v19  ;;  %v1614_v52 = vadd.f32 1.0, %v3378_v46  ;;  %v2223_v55 = vmul.f32 %v3690_v1, %v2111_v30  ;;  %v2089_v47 = vmax.f32 %v4429_v34, 0.0 }
 0x20c   : > { %v2293_v62 = vadd.f32 %v2197_v27, %v1988_v8  ;;  %v2011_v63 = vmul.f32 %v3688_v0, %v1899_v16  ;;  %v1592_v10 = vadd.f32 1.0, %v3380_v45  ;;  %v1408_v21 = vmul.f32 0.5, %v4477_v15 }
 0x20d   : > { %v2294_v18 = vadd.f32 %v2198_v22, %v1989_v40  ;;  %v1710_v7 = vmul.f32 0.5, %v1614_v52  ;;  %v4486_v33 = vadd.f32 %v3710_v17, %v1199_v6  ;;  %v1201_v44 = vmul.f32 %v3693_v3, %v920_v61 }
 0x20e   : > { %v3382_v36 = vpop.eup %3381  ;;  %v2316_v39 = vadd.f32 %v2220_v41, %v2011_v63  ;;  %v1879_v1 = vmin.f32 %v1783_v58, 1.0  ;;  %v1688_v32 = vmul.f32 0.5, %v1592_v10  ;;  %3389 = vtanh.f32 %v1408_v21 }
 0x20f   : > { %v2966_v34 = vpack.c.bf16 %v2294_v18, %v2293_v62  ;;  %v1806_v27 = vmax.f32 %v1710_v7, 0.0  ;;  %v2201_v38 = vmul.f32 %v3716_v26, %v2089_v47  ;;  %v1594_v57 = vadd.f32 1.0, %v3382_v36 }
 0x210   : > { %v2981_v35 = vpack.c.bf16 %v2316_v39, %v2316_v39  ;;  %v1784_v24 = vmax.f32 %v1688_v32, 0.0  ;;  %v2091_v60 = vmax.f32 %v4441_v28, 0.0  ;;  %v1409_v29 = vmul.f32 0.5, %v4486_v33 }
 0x211   : > { %2687 = vst [vmem:[%s3739_s11 + $0x114] sm:$0xff] %v2966_v34  ;;  %v1902_v61 = vmin.f32 %v1806_v27, 1.0  ;;  %v1690_v56 = vmul.f32 0.5, %v1594_v57  ;;  %v4494_v5 = vadd.f32 %v3696_v4, %v1201_v44  ;;  %v1202_v49 = vmul.f32 %v3706_v13, %v922_v48  ;;  %v930_v48 = vpop.f32.mrf.mxu0 }
 0x212   : > { %v3384_v43 = vpop.eup %3383  ;;  %2702 = vst.msk [vmem:[%s3739_s11 + $0x170] sm:$0xf] %vm2641_vm0, %v2981_v35  ;;  %v1991_v54 = vmul.f32 %v3714_v23, %v1879_v1  ;;  %v1880_v22 = vmin.f32 %v1784_v24, 1.0  ;;  %3391 = vtanh.f32 %v1409_v29  ;;  %v1204_v28 = vmul.f32 %v3693_v3, %v924_v59 }
 0x213   : > { %v2014_v20 = vmul.f32 %v3688_v0, %v1902_v61  ;;  %v1786_v42 = vmax.f32 %v1690_v56, 0.0  ;;  %v1595_v2 = vadd.f32 1.0, %v3384_v43  ;;  %v1411_v30 = vmul.f32 0.5, %v4494_v5  ;;  %v932_v21 = vpop.f32.mrf.mxu0 }
 0x214   : > { %v1992_v9 = vmul.f32 %v3744_v53, %v1880_v22  ;;  %v2092_v8 = vmax.f32 %v4452_v50, 0.0  ;;  %v4506_v25 = vadd.f32 %v3710_v17, %v1202_v49  ;;  %v4509_v11 = vadd.f32 %v3696_v4, %v1204_v28 }
 0x215   : > { %v3386_v41 = vpop.eup %3385  ;;  %v2319_v19 = vadd.f32 %v2223_v55, %v2014_v20  ;;  %v1882_v46 = vmin.f32 %v1786_v42, 1.0  ;;  %v1691_v16 = vmul.f32 0.5, %v1595_v2  ;;  %3393 = vtanh.f32 %v1411_v30 }
 0x216   : > { %v3388_v0 = vpop.eup %3387  ;;  %v2296_v58 = vadd.f32 %v2200_v31, %v1991_v54  ;;  %v2297_v6 = vadd.f32 %v2201_v38, %v1992_v9  ;;  %v1597_v45 = vadd.f32 1.0, %v3386_v41  ;;  %v1412_v50 = vmul.f32 0.5, %v4506_v25 }
 0x217   : > { %v2983_v40 = vpack.c.bf16 %v2319_v19, %v2319_v19  ;;  %v2203_v52 = vmul.f32 %v3703_v12, %v2091_v60  ;;  %v1787_v47 = vmax.f32 %v1691_v16, 0.0  ;;  %v1598_v62 = vadd.f32 1.0, %v3388_v0  ;;  %v934_v60 = vpop.f32.mrf.mxu0 }
 0x218   : > { %v2968_v63 = vpack.c.bf16 %v2297_v6, %v2296_v58  ;;  %v1693_v10 = vmul.f32 0.5, %v1597_v45  ;;  %v2094_v55 = vmax.f32 %v4459_v51, 0.0  ;;  %3395 = vtanh.f32 %v1412_v50 }
 0x219   : > { %2704 = vst.msk [vmem:[%s3739_s11 + $0x17c] sm:$0xf] %vm2641_vm0, %v2983_v40  ;;  %v1994_v31 = vmul.f32 %v3714_v23, %v1882_v46  ;;  %v1883_v59 = vmin.f32 %v1787_v47, 1.0  ;;  %v1694_v18 = vmul.f32 0.5, %v1598_v62  ;;  %v1414_v7 = vmul.f32 0.5, %v4509_v11 }
 0x21a   : > { %2689 = vst [vmem:[%s3739_s11 + $0x120] sm:$0xff] %v2968_v63  ;;  %v2204_v44 = vmul.f32 %v3716_v26, %v2092_v8  ;;  %v1789_v36 = vmax.f32 %v1693_v10, 0.0  ;;  %v2095_v39 = vmax.f32 %v4462_v14, 0.0  ;;  %v1205_v1 = vmul.f32 %v3706_v13, %v926_v37  ;;  %v936_v8 = vpop.f32.mrf.mxu0 }
 0x21b   : > { %v3390_v32 = vpop.eup %3389  ;;  %v1995_v51 = vmul.f32 %v3744_v53, %v1883_v59  ;;  %v1790_v34 = vmax.f32 %v1694_v18, 0.0  ;;  %3397 = vtanh.f32 %v1414_v7  ;;  %v1207_v27 = vmul.f32 %v3693_v3, %v930_v48 }
 0x21c   : > { %v1885_v38 = vmin.f32 %v1789_v36, 1.0  ;;  %v2206_v57 = vmul.f32 %v3703_v12, %v2094_v55  ;;  %v1600_v35 = vadd.f32 1.0, %v3390_v32  ;;  %v4526_v24 = vadd.f32 %v3710_v17, %v1205_v1 }
 0x21d   : > { %v2299_v29 = vadd.f32 %v2203_v52, %v1994_v31  ;;  %v2300_v61 = vadd.f32 %v2204_v44, %v1995_v51  ;;  %v1886_v14 = vmin.f32 %v1790_v34, 1.0  ;;  %v4529_v37 = vadd.f32 %v3696_v4, %v1207_v27 }
 0x21e   : > { %v1997_v56 = vmul.f32 %v3714_v23, %v1885_v38  ;;  %v1696_v49 = vmul.f32 0.5, %v1600_v35  ;;  %v1415_v43 = vmul.f32 0.5, %v4526_v24  ;;  %v1208_v54 = vmul.f32 %v3706_v13, %v932_v21 }
 0x21f   : > { %v3392_v22 = vpop.eup %3391  ;;  %v2970_v28 = vpack.c.bf16 %v2300_v61, %v2299_v29  ;;  %v1998_v20 = vmul.f32 %v3744_v53, %v1886_v14  ;;  %v2207_v42 = vmul.f32 %v3716_v26, %v2095_v39  ;;  %v1417_v2 = vmul.f32 0.5, %v4529_v37 }
 0x220   : > { %v1792_v30 = vmax.f32 %v1696_v49, 0.0  ;;  %v1601_v9 = vadd.f32 1.0, %v3392_v22  ;;  %3399 = vtanh.f32 %v1415_v43  ;;  %v2302_v48 = vadd.f32 %v2206_v57, %v1997_v56 }
 0x221   : > { %2691 = vst [vmem:[%s3739_s11 + $0x12c] sm:$0xff] %v2970_v28  ;;  %v2303_v41 = vadd.f32 %v2207_v42, %v1998_v20  ;;  %v2097_v19 = vmax.f32 %v4477_v15, 0.0  ;;  %3401 = vtanh.f32 %v1417_v2  ;;  %v4540_v58 = vadd.f32 %v3710_v17, %v1208_v54 }
 0x222   : > { %v3394_v46 = vpop.eup %3393  ;;  %v1888_v16 = vmin.f32 %v1792_v30, 1.0  ;;  %v1697_v0 = vmul.f32 0.5, %v1601_v9  ;;  %v1210_v6 = vmul.f32 %v3693_v3, %v934_v60  ;;  %v2098_v50 = vmax.f32 %v4486_v33, 0.0 }
 0x223   : > { %v2972_v45 = vpack.c.bf16 %v2303_v41, %v2302_v48  ;;  %v1603_v40 = vadd.f32 1.0, %v3394_v46  ;;  %v1211_v52 = vmul.f32 %v3706_v13, %v936_v8  ;;  %v1418_v62 = vmul.f32 0.5, %v4540_v58 }
 0x224   : > { %v1793_v47 = vmax.f32 %v1697_v0, 0.0  ;;  %v4548_v10 = vadd.f32 %v3696_v4, %v1210_v6  ;;  %v2000_v3 = vmul.f32 %v3714_v23, %v1888_v16  ;;  %v2209_v33 = vmul.f32 %v3703_v12, %v2097_v19 }
 0x225   : > { %v3396_v63 = vpop.eup %3395  ;;  %2693 = vst [vmem:[%s3739_s11 + $0x138] sm:$0xff] %v2972_v45  ;;  %v1699_v15 = vmul.f32 0.5, %v1603_v40  ;;  %v4551_v55 = vadd.f32 %v3710_v17, %v1211_v52  ;;  %3403 = vtanh.f32 %v1418_v62  ;;  %v2210_v13 = vmul.f32 %v3716_v26, %v2098_v50 }
 0x226   : > { %v1889_v21 = vmin.f32 %v1793_v47, 1.0  ;;  %v1604_v31 = vadd.f32 1.0, %v3396_v63  ;;  %v1420_v18 = vmul.f32 0.5, %v4548_v10  ;;  %v2100_v4 = vmax.f32 %v4494_v5, 0.0 }
 0x227   : > { %v1795_v59 = vmax.f32 %v1699_v15, 0.0  ;;  %v1421_v17 = vmul.f32 0.5, %v4551_v55  ;;  %v2101_v1 = vmax.f32 %v4506_v25, 0.0  ;;  %v2305_v51 = vadd.f32 %v2209_v33, %v2000_v3 }
 0x228   : > { %v3398_v7 = vpop.eup %3397  ;;  %v2001_v44 = vmul.f32 %v3744_v53, %v1889_v21  ;;  %v1700_v36 = vmul.f32 0.5, %v1604_v31  ;;  %3405 = vtanh.f32 %v1420_v18  ;;  %v2212_v14 = vmul.f32 %v3703_v12, %v2100_v4 }
 0x229   : > { %v1891_v39 = vmin.f32 %v1795_v59, 1.0  ;;  %v1606_v32 = vadd.f32 1.0, %v3398_v7  ;;  %3407 = vtanh.f32 %v1421_v17  ;;  %v2213_v56 = vmul.f32 %v3716_v26, %v2101_v1 }
 0x22a   : > { %v2306_v34 = vadd.f32 %v2210_v13, %v2001_v44  ;;  %v1796_v27 = vmax.f32 %v1700_v36, 0.0  ;;  %v2103_v42 = vmax.f32 %v4509_v11, 0.0  ;;  %v2104_v8 = vmax.f32 %v4526_v24, 0.0 }
 0x22b   : > { %v1702_v38 = vmul.f32 0.5, %v1606_v32  ;;  %v2003_v35 = vmul.f32 %v3714_v23, %v1891_v39  ;;  %v2106_v24 = vmax.f32 %v4529_v37, 0.0  ;;  %v2107_v47 = vmax.f32 %v4540_v58, 0.0 }
 0x22c   : > { %v2974_v57 = vpack.c.bf16 %v2306_v34, %v2305_v51  ;;  %v1892_v60 = vmin.f32 %v1796_v27, 1.0  ;;  %v2215_v0 = vmul.f32 %v3703_v12, %v2103_v42  ;;  %v2216_v50 = vmul.f32 %v3716_v26, %v2104_v8 }
 0x22d   : > { %v3400_v29 = vpop.eup %3399  ;;  %v1798_v5 = vmax.f32 %v1702_v38, 0.0  ;;  %v2308_v54 = vadd.f32 %v2212_v14, %v2003_v35  ;;  %v2218_v7 = vmul.f32 %v3703_v12, %v2106_v24  ;;  %v2219_v44 = vmul.f32 %v3716_v26, %v2107_v47 }
 0x22e   : > { %v3402_v61 = vpop.eup %3401  ;;  %2695 = vst [vmem:[%s3739_s11 + $0x144] sm:$0xff] %v2974_v57  ;;  %v2004_v25 = vmul.f32 %v3744_v53, %v1892_v60  ;;  %v1607_v49 = vadd.f32 1.0, %v3400_v29  ;;  %v2109_v58 = vmax.f32 %v4548_v10, 0.0  ;;  %v2110_v17 = vmax.f32 %v4551_v55, 0.0 }
 0x22f   : > { %v1609_v43 = vadd.f32 1.0, %v3402_v61  ;;  %v1894_v28 = vmin.f32 %v1798_v5, 1.0 }
 0x230   : > { %v2309_v22 = vadd.f32 %v2213_v56, %v2004_v25  ;;  %v1703_v20 = vmul.f32 0.5, %v1607_v49  ;;  %v2221_v38 = vmul.f32 %v3703_v12, %v2109_v58  ;;  %v2222_v35 = vmul.f32 %v3716_v26, %v2110_v17 }
 0x231   : > { %v1705_v2 = vmul.f32 0.5, %v1609_v43  ;;  %v2006_v19 = vmul.f32 %v3714_v23, %v1894_v28 }
 0x232   : > { %v2976_v30 = vpack.c.bf16 %v2309_v22, %v2308_v54  ;;  %v1799_v9 = vmax.f32 %v1703_v20, 0.0  ;;  %v3404_v48 = vpop.eup %3403 }
 0x233   : > { %v1801_v41 = vmax.f32 %v1705_v2, 0.0  ;;  %v1610_v16 = vadd.f32 1.0, %v3404_v48  ;;  %v2311_v63 = vadd.f32 %v2215_v0, %v2006_v19 }
 0x234   : > { %2697 = vst [vmem:[%s3739_s11 + $0x150] sm:$0xff] %v2976_v30  ;;  %v1895_v46 = vmin.f32 %v1799_v9, 1.0 }
 0x235   : > { %v3406_v6 = vpop.eup %3405  ;;  %v1897_v11 = vmin.f32 %v1801_v41, 1.0  ;;  %v1706_v40 = vmul.f32 0.5, %v1610_v16 }
 0x236   : > { %v2007_v45 = vmul.f32 %v3744_v53, %v1895_v46  ;;  %v3408_v52 = vpop.eup %3407  ;;  %v1612_v62 = vadd.f32 1.0, %v3406_v6 }
 0x237   : > { %v1802_v3 = vmax.f32 %v1706_v40, 0.0  ;;  %v1613_v21 = vadd.f32 1.0, %v3408_v52  ;;  %v2009_v13 = vmul.f32 %v3714_v23, %v1897_v11 }
 0x238   : > { %v2312_v15 = vadd.f32 %v2216_v50, %v2007_v45  ;;  %v1708_v31 = vmul.f32 0.5, %v1612_v62 }
 0x239   : > { %v1898_v59 = vmin.f32 %v1802_v3, 1.0  ;;  %v1709_v18 = vmul.f32 0.5, %v1613_v21  ;;  %v2314_v1 = vadd.f32 %v2218_v7, %v2009_v13 }
 0x23a   : > { %v2978_v33 = vpack.c.bf16 %v2312_v15, %v2311_v63  ;;  %v1804_v4 = vmax.f32 %v1708_v31, 0.0 }
 0x23b   : > { %v2010_v37 = vmul.f32 %v3744_v53, %v1898_v59  ;;  %v1805_v36 = vmax.f32 %v1709_v18, 0.0 }
 0x23c   : > { %2699 = vst [vmem:[%s3739_s11 + $0x15c] sm:$0xff] %v2978_v33  ;;  %v1900_v39 = vmin.f32 %v1804_v4, 1.0 }
 0x23d   : > { %v2315_v32 = vadd.f32 %v2219_v44, %v2010_v37  ;;  %v1901_v51 = vmin.f32 %v1805_v36, 1.0 }
 0x23e   : > { %v2012_v34 = vmul.f32 %v3714_v23, %v1900_v39 }
 0x23f   : > { %v2980_v27 = vpack.c.bf16 %v2315_v32, %v2314_v1  ;;  %v2013_v57 = vmul.f32 %v3744_v53, %v1901_v51 }
 0x240   : > { %v2317_v60 = vadd.f32 %v2221_v38, %v2012_v34 }
 0x241   : > { %2701 = vst [vmem:[%s3739_s11 + $0x168] sm:$0xff] %v2980_v27  ;;  %v2318_v10 = vadd.f32 %v2222_v35, %v2013_v57 }
 0x243   : > { %v2982_v29 = vpack.c.bf16 %v2318_v10, %v2317_v60 }
 0x245   : > { %2703 = vst [vmem:[%s3739_s11 + $0x174] sm:$0xff] %v2982_v29 }
 0x246 PF: > { %s15_s18 = sadd.s32 1, %s3415_s18  }
 0x247   : > { %p12_p4 = scmp.ge.s32.totalorder %s15_s18, 4  }
 0x249   :  { %14 = sbr.rel (!%p12_p4) target bundleno = 1 (0x1), region = 70 }

// kernel: gamsnet_oam_forward.21
= control target key start
LH: loop header
LB: loop body
LE: loop exit
PB: predicated region body
PF: predicated region fallthrough
CT: control target
= control target key end

     0   :  { %s1846_s29 = smov 0   ;;  %s2333_s0 = inlined_call_operand.vmem [shape: bf16[2048,2], index: 0, kind: input, shape index: {}]   ;;  %s2334_s1 = inlined_call_operand.vmem [shape: bf16[2048,64], index: 1, kind: input, shape index: {}]   ;;  %s2335_s2 = inlined_call_operand.vmem [shape: bf16[64,64], index: 2, kind: input, shape index: {}]   ;;  %s2336_s3 = inlined_call_operand.vmem [shape: f32[1,64], index: 3, kind: input, shape index: {}]   ;;  %s2337_s4 = inlined_call_operand.vmem [shape: f32[1,64], index: 4, kind: input, shape index: {}]   ;;  %s2338_s5 = inlined_call_operand.vmem [shape: f32[1,2], index: 5, kind: input, shape index: {}]   ;;  %s2339_s6 = inlined_call_operand.vmem [shape: f32[1,64], index: 6, kind: input, shape index: {}]   ;;  %s2340_s7 = inlined_call_operand.<no memory space> [shape: f32[1,1], index: 7, kind: input, shape index: {}]   ;;  %s2341_s8 = inlined_call_operand.vmem [shape: f32[2048,1], index: 8, kind: output, shape index: {}]  }
   0x1   :  { %v13_v0 = vstv %s2340_s7 }
   0x2   :  { %14 = vst [vmem:[#allocation2] sm:$0x1] %v13_v0 }
   0x3 LB: > { %s1497_s30 = sadd.s32 4294967295, %s1796_s29   ;;  %p1501_p0 = scmp.ge.s32.totalorder %s1796_s29, 1  ;;  %s1796_s29 = sphi %s1846_s29, %s20_s29  }
   0x4   : > { %p276_p1 = scmp.lt.s32.totalorder %s1796_s29, 9 }
   0x6   : > { %p277_p2 = pnand %p1501_p0, %p276_p1 }
   0x7   : > { %s1502_s7 = sshll.u32 (!%p277_p2), %s1497_s30, 5 }
   0x8   : > { %280 = sbr.rel (%p277_p2) target bundleno = 463 (0x1cf), region = 52  ;;  %p316_p3 = scmp.lt.s32.totalorder (!%p277_p2), %s1502_s7, 255 }
   0xd   : > { %v1706_v1 = vld [vmem:[%s2335_s2 + $0x18] sm:$0xff]   ;;  %v1707_v2 = vld [vmem:[%s2335_s2 + $0x10] sm:$0xff]   ;;  %s2343_s7 = smov (!%p316_p3, %s1502_s7), 255  ;;  %v1708_v3 = vld [vmem:[%s2335_s2 + $0x8] sm:$0xff]   ;;  %vm478_vm0 = vcmask 523264   ;;  %vm901_vm1 = vcmask 15360  }
   0xe   : > { %1650 = vmatprep.subr.bf16.mxu0 %v1706_v1  ;;  %1690 = vmatprep.subr.bf16.mxu1 %v1706_v1  ;;  %s1503_s15 = sshll.u32 %s2343_s7, 2  ;;  %v1709_v4 = vld [vmem:[%s2335_s2] sm:$0xff]   ;;  %s1507_s11 = sshll.u32 %s2343_s7, 3  ;;  %vm1396_vm2 = vcmask 7168  }
   0xf   : > { %1651 = vmatpush3.bf16.msra.mxu0 %v1706_v1  ;;  %1694 = vmatpush3.bf16.msra.mxu1 %v1706_v1  ;;  %s1872_s20 = scalar_lea.vmem %s2334_s1, %s1503_s15  ;;  %s1891_s23 = scalar_lea.vmem %s2333_s0, %s1503_s15  ;;  %v1897_v14 = vld [vmem:[%s2338_s5] ss:$0 sm:$0xff] }
  0x10   : > { %1652 = vmatprep.subr.bf16.mxu0 %v1707_v2  ;;  %1691 = vmatprep.subr.bf16.mxu1 %v1707_v2  ;;  %v1710_v5 = vld [vmem:[%s1872_s20] sm:$0xff]   ;;  %v1712_v7 = vld [vmem:[%s1872_s20 + $0x8] sm:$0xff]   ;;  %v1714_v9 = vld [vmem:[%s1872_s20 + $0x10] sm:$0xff]   ;;  %s2223_s7 = scalar_lea.vmem %s2341_s8, %s1507_s11 }
  0x11   : > { %v1711_v6 = vld [vmem:[%s1872_s20 + $0x40] sm:$0xff]   ;;  %1658 = vmatprep.mubr.msk.bf16.mxu0 %vm478_vm0, %v1710_v5  ;;  %v1713_v8 = vld [vmem:[%s1872_s20 + $0x48] sm:$0xff]   ;;  %v1716_v10 = vld [vmem:[%s1872_s20 + $0x50] sm:$0xff]  }
  0x12   : > { %1674 = vmatprep.mubr.msk.bf16.mxu1 %vm478_vm0, %v1711_v6  ;;  %v1715_v11 = vld [vmem:[%s1872_s20 + $0x18] sm:$0xff]   ;;  %v1718_v13 = vld [vmem:[%s1872_s20 + $0x20] sm:$0xff]   ;;  %v1615_v17 = vld [vmem:[%s1891_s23 + $0x8] sm:$0xff]  }
  0x13   : > { %1653 = vmatpush3.bf16.msra.mxu0 %v1707_v2  ;;  %1695 = vmatpush3.bf16.msra.mxu1 %v1707_v2  ;;  %v1717_v12 = vld [vmem:[%s1872_s20 + $0x58] sm:$0xff]   ;;  %v1720_v15 = vld [vmem:[%s1872_s20 + $0x60] sm:$0xff]   ;;  %v1616_v18 = vld [vmem:[%s1891_s23 + $0x10] sm:$0xff]   ;;  %v1557_v20 = vunpack.c.l.bf16 %v1615_v17  ;;  %v1558_v22 = vunpack.c.h.bf16 %v1615_v17 }
  0x14   : > { %1654 = vmatprep.subr.bf16.mxu0 %v1708_v3  ;;  %1692 = vmatprep.subr.bf16.mxu1 %v1708_v3  ;;  %v1552_v16 = vld [vmem:[%s1891_s23] sm:$0xff]   ;;  %v1561_v23 = vunpack.c.l.bf16 %v1616_v18  ;;  %v1562_v27 = vunpack.c.h.bf16 %v1616_v18  ;;  %v1617_v28 = vld [vmem:[%s1891_s23 + $0x18] sm:$0xff]   ;;  %v1719_v34 = vld [vmem:[%s1872_s20 + $0x28] sm:$0xff]  }
  0x15   : > { %v1553_v19 = vunpack.c.l.bf16 %v1552_v16  ;;  %v1554_v21 = vunpack.c.h.bf16 %v1552_v16  ;;  %v871_v25 = vmul.f32 %v1557_v20, %v1897_v14  ;;  %v872_v29 = vmul.f32 %v1558_v22, %v1897_v14  ;;  %v1721_v35 = vld [vmem:[%s1872_s20 + $0x68] sm:$0xff]   ;;  %v1618_v40 = vld [vmem:[%s1891_s23 + $0x20] sm:$0xff]   ;;  %v1722_v41 = vld [vmem:[%s1872_s20 + $0x30] sm:$0xff]  }
  0x16   : > { %v1565_v32 = vunpack.c.l.bf16 %v1617_v28  ;;  %v1566_v33 = vunpack.c.h.bf16 %v1617_v28  ;;  %v873_v38 = vmul.f32 %v1561_v23, %v1897_v14  ;;  %v874_v39 = vmul.f32 %v1562_v27, %v1897_v14  ;;  %v1724_v42 = vld [vmem:[%s1872_s20 + $0x70] sm:$0xff]   ;;  %v1619_v49 = vld [vmem:[%s1891_s23 + $0x28] sm:$0xff]   ;;  %v1723_v52 = vld [vmem:[%s1872_s20 + $0x38] sm:$0xff]  }
  0x17   : > { %1655 = vmatpush3.bf16.msra.mxu0 %v1708_v3  ;;  %1696 = vmatpush3.bf16.msra.mxu1 %v1708_v3  ;;  %v869_v24 = vmul.f32 %v1553_v19, %v1897_v14  ;;  %v870_v26 = vmul.f32 %v1554_v21, %v1897_v14  ;;  %v908_v31 = vsel %vm901_vm1, %v871_v25, 0.0  ;;  %v911_v37 = vsel %vm901_vm1, %v872_v29, 0.0  ;;  %v1725_v53 = vld [vmem:[%s1872_s20 + $0x78] sm:$0xff]   ;;  %v1620_v58 = vld [vmem:[%s1891_s23 + $0x30] sm:$0xff]   ;;  %v1623_v16 = vld [vmem:[%s1891_s23 + $0x48] sm:$0xff]  }
  0x18   : > { %1656 = vmatprep.subr.bf16.mxu0 %v1709_v4  ;;  %1693 = vmatprep.subr.bf16.mxu1 %v1709_v4  ;;  %v875_v43 = vmul.f32 %v1565_v32, %v1897_v14  ;;  %v1569_v44 = vunpack.c.l.bf16 %v1618_v40  ;;  %v914_v45 = vsel %vm901_vm1, %v873_v38, 0.0  ;;  %v917_v46 = vsel %vm901_vm1, %v874_v39, 0.0  ;;  %v1621_v1 = vld [vmem:[%s1891_s23 + $0x38] sm:$0xff]   ;;  %v1624_v23 = vld [vmem:[%s1891_s23 + $0x50] sm:$0xff]  }
  0x19   : > { %v902_v30 = vsel %vm901_vm1, %v869_v24, 0.0  ;;  %909 = vadd.xlane.f32.xlu1 %v908_v31  ;;  %v905_v36 = vsel %vm901_vm1, %v870_v26, 0.0  ;;  %v876_v47 = vmul.f32 %v1566_v33, %v1897_v14  ;;  %v1570_v48 = vunpack.c.h.bf16 %v1618_v40 }
  0x1a   : > { %903 = vadd.xlane.f32.xlu0 %v902_v30  ;;  %v920_v50 = vsel %vm901_vm1, %v875_v43, 0.0  ;;  %v877_v51 = vmul.f32 %v1569_v44, %v1897_v14  ;;  %v1573_v56 = vunpack.c.l.bf16 %v1619_v49  ;;  %v1574_v57 = vunpack.c.h.bf16 %v1619_v49  ;;  %v1625_v30 = vld [vmem:[%s1891_s23 + $0x58] sm:$0xff]   ;;  %v1627_v44 = vld [vmem:[%s1891_s23 + $0x68] sm:$0xff]  }
  0x1b   : > { %1657 = vmatpush3.bf16.msra.mxu0 %v1709_v4  ;;  %1697 = vmatpush3.bf16.msra.mxu1 %v1709_v4  ;;  %v923_v54 = vsel %vm901_vm1, %v876_v47, 0.0  ;;  %v878_v55 = vmul.f32 %v1570_v48, %v1897_v14  ;;  %v1577_v59 = vunpack.c.l.bf16 %v1620_v58  ;;  %v1578_v60 = vunpack.c.h.bf16 %v1620_v58 }
  0x1c   : > { %v926_v61 = vsel %vm901_vm1, %v877_v51, 0.0  ;;  %v879_v63 = vmul.f32 %v1573_v56, %v1897_v14  ;;  %v880_v0 = vmul.f32 %v1574_v57, %v1897_v14  ;;  %v1581_v3 = vunpack.c.l.bf16 %v1621_v1 }
  0x1d   : > { %912 = vadd.xlane.f32.xlu1 %v911_v37  ;;  %v929_v62 = vsel %vm901_vm1, %v878_v55, 0.0  ;;  %v881_v2 = vmul.f32 %v1577_v59, %v1897_v14  ;;  %v882_v6 = vmul.f32 %v1578_v60, %v1897_v14  ;;  %v1589_v21 = vunpack.c.l.bf16 %v1623_v16  ;;  %v1626_v37 = vld [vmem:[%s1891_s23 + $0x60] sm:$0xff]  }
  0x1e   : > { %1659 = vmatmul.mubr.msk.bf16.vlgmr.msra.gmra.mxu0 %vm478_vm0, %v1712_v7  ;;  %1675 = vmatmul.mubr.msk.bf16.vlgmr.msra.gmra.mxu1 %vm478_vm0, %v1713_v8  ;;  %v932_v4 = vsel %vm901_vm1, %v879_v63, 0.0  ;;  %v935_v5 = vsel %vm901_vm1, %v880_v0, 0.0  ;;  %v1582_v7 = vunpack.c.h.bf16 %v1621_v1  ;;  %v1622_v8 = vld [vmem:[%s1891_s23 + $0x40] sm:$0xff]   ;;  %v1590_v22 = vunpack.c.h.bf16 %v1623_v16 }
  0x1f   : > { %1662 = vmatprep.mubr.msk.bf16.mxu0 %vm478_vm0, %v1714_v9  ;;  %1678 = vmatprep.mubr.msk.bf16.mxu1 %vm478_vm0, %v1716_v10  ;;  %v883_v9 = vmul.f32 %v1581_v3, %v1897_v14  ;;  %v1585_v10 = vunpack.c.l.bf16 %v1622_v8  ;;  %v1593_v24 = vunpack.c.l.bf16 %v1624_v23  ;;  %v1594_v25 = vunpack.c.h.bf16 %v1624_v23  ;;  %v2015_v23 = vld [vmem:[%s2339_s6] ss:$0 sm:$0xff] }
  0x20   : > { %906 = vadd.xlane.f32.xlu0 %v905_v36  ;;  %v887_v28 = vmul.f32 %v1589_v21, %v1897_v14  ;;  %v888_v29 = vmul.f32 %v1590_v22, %v1897_v14  ;;  %v1597_v32 = vunpack.c.l.bf16 %v1625_v30  ;;  %v1598_v36 = vunpack.c.h.bf16 %v1625_v30 }
  0x21   : > { %918 = vadd.xlane.f32.xlu1 %v917_v46  ;;  %v944_v17 = vsel %vm901_vm1, %v883_v9, 0.0  ;;  %v885_v18 = vmul.f32 %v1585_v10, %v1897_v14  ;;  %v889_v31 = vmul.f32 %v1593_v24, %v1897_v14  ;;  %v1601_v39 = vunpack.c.l.bf16 %v1626_v37  ;;  %v2004_v9 = vld [vmem:[%s2337_s4] ss:$0 sm:$0xff] }
  0x22   : > { %v956_v33 = vsel %vm901_vm1, %v887_v28, 0.0  ;;  %v891_v38 = vmul.f32 %v1597_v32, %v1897_v14  ;;  %v1602_v43 = vunpack.c.h.bf16 %v1626_v37  ;;  %v1605_v49 = vunpack.c.l.bf16 %v1627_v44 }
  0x23   : > { %v950_v26 = vsel %vm901_vm1, %v885_v18, 0.0  ;;  %v962_v40 = vsel %vm901_vm1, %v889_v31, 0.0  ;;  %v893_v47 = vmul.f32 %v1601_v39, %v1897_v14  ;;  %v1606_v55 = vunpack.c.h.bf16 %v1627_v44 }
  0x24   : > { %915 = vadd.xlane.f32.xlu0 %v914_v45  ;;  %v968_v45 = vsel %vm901_vm1, %v891_v38, 0.0  ;;  %v894_v48 = vmul.f32 %v1602_v43, %v1897_v14 }
  0x25   : > { %924 = vadd.xlane.f32.xlu1 %v923_v54  ;;  %v1628_v54 = vld [vmem:[%s1891_s23 + $0x70] sm:$0xff]   ;;  %v896_v57 = vmul.f32 %v1606_v55, %v1897_v14 }
  0x26   : > { %1663 = vmatmul.mubr.msk.bf16.gmra.mxu0 %vm478_vm0, %v1715_v11  ;;  %1679 = vmatmul.mubr.msk.bf16.gmra.mxu1 %vm478_vm0, %v1717_v12  ;;  %v938_v11 = vsel %vm901_vm1, %v881_v2, 0.0  ;;  %v941_v12 = vsel %vm901_vm1, %v882_v6, 0.0  ;;  %v977_v51 = vsel %vm901_vm1, %v894_v48, 0.0  ;;  %v1609_v56 = vunpack.c.l.bf16 %v1628_v54 }
  0x27   : > { %1666 = vmatprep.mubr.msk.bf16.mxu0 %vm478_vm0, %v1718_v13  ;;  %1682 = vmatprep.mubr.msk.bf16.mxu1 %vm478_vm0, %v1720_v15  ;;  %v884_v13 = vmul.f32 %v1582_v7, %v1897_v14  ;;  %v1586_v15 = vunpack.c.h.bf16 %v1622_v8  ;;  %v983_v59 = vsel %vm901_vm1, %v896_v57, 0.0  ;;  %v1999_v7 = vld [vmem:[%s2336_s3] ss:$0 sm:$0xff] }
  0x28   : > { %921 = vadd.xlane.f32.xlu0 %v920_v50  ;;  %v974_v50 = vsel %vm901_vm1, %v893_v47, 0.0  ;;  %v897_v58 = vmul.f32 %v1609_v56, %v1897_v14 }
  0x29   : > { %930 = vadd.xlane.f32.xlu1 %v929_v62  ;;  %v947_v19 = vsel %vm901_vm1, %v884_v13, 0.0  ;;  %v886_v20 = vmul.f32 %v1586_v15, %v1897_v14  ;;  %v1610_v62 = vunpack.c.h.bf16 %v1628_v54 }
  0x2a   : > { %v986_v60 = vsel %vm901_vm1, %v897_v58, 0.0 }
  0x2b   : > { %v953_v27 = vsel %vm901_vm1, %v886_v20, 0.0  ;;  %v898_v0 = vmul.f32 %v1610_v62, %v1897_v14 }
  0x2c   : > { %927 = vadd.xlane.f32.xlu0 %v926_v61  ;;  %v1629_v61 = vld [vmem:[%s1891_s23 + $0x78] sm:$0xff]  }
  0x2d   : > { %936 = vadd.xlane.f32.xlu1 %v935_v5  ;;  %v1613_v63 = vunpack.c.l.bf16 %v1629_v61  ;;  %v989_v2 = vsel %vm901_vm1, %v898_v0, 0.0 }
  0x2e   : > { %1667 = vmatmul.mubr.msk.bf16.gmra.mxu0 %vm478_vm0, %v1719_v34  ;;  %1683 = vmatmul.mubr.msk.bf16.gmra.mxu1 %vm478_vm0, %v1721_v35  ;;  %v959_v34 = vsel %vm901_vm1, %v888_v29, 0.0  ;;  %v890_v35 = vmul.f32 %v1594_v25, %v1897_v14 }
  0x2f   : > { %1670 = vmatprep.mubr.msk.bf16.mxu0 %vm478_vm0, %v1722_v41  ;;  %1686 = vmatprep.mubr.msk.bf16.mxu1 %vm478_vm0, %v1724_v42  ;;  %v892_v42 = vmul.f32 %v1598_v36, %v1897_v14  ;;  %v899_v1 = vmul.f32 %v1613_v63, %v1897_v14 }
  0x30   : > { %933 = vadd.xlane.f32.xlu0 %v932_v4  ;;  %v965_v41 = vsel %vm901_vm1, %v890_v35, 0.0  ;;  %v1614_v4 = vunpack.c.h.bf16 %v1629_v61 }
  0x31   : > { %942 = vadd.xlane.f32.xlu1 %v941_v12  ;;  %v971_v46 = vsel %vm901_vm1, %v892_v42, 0.0  ;;  %v992_v3 = vsel %vm901_vm1, %v899_v1, 0.0 }
  0x32   : > { %v900_v5 = vmul.f32 %v1614_v4, %v1897_v14 }
  0x34   : > { %939 = vadd.xlane.f32.xlu0 %v938_v11  ;;  %v995_v6 = vsel %vm901_vm1, %v900_v5, 0.0 }
  0x35   : > { %948 = vadd.xlane.f32.xlu1 %v947_v19 }
  0x36   : > { %1671 = vmatmul.mubr.msk.bf16.gmra.mxu0 %vm478_vm0, %v1723_v52  ;;  %1687 = vmatmul.mubr.msk.bf16.gmra.mxu1 %vm478_vm0, %v1725_v53  ;;  %v895_v52 = vmul.f32 %v1605_v49, %v1897_v14 }
  0x38   : > { %945 = vadd.xlane.f32.xlu0 %v944_v17  ;;  %v980_v53 = vsel %vm901_vm1, %v895_v52, 0.0 }
  0x39   : > { %954 = vadd.xlane.f32.xlu1 %v953_v27 }
  0x3c   : > { %951 = vadd.xlane.f32.xlu0 %v950_v26 }
  0x3d   : > { %960 = vadd.xlane.f32.xlu1 %v959_v34 }
  0x40   : > { %957 = vadd.xlane.f32.xlu0 %v956_v33 }
  0x41   : > { %966 = vadd.xlane.f32.xlu1 %v965_v41 }
  0x44   : > { %963 = vadd.xlane.f32.xlu0 %v962_v40 }
  0x45   : > { %972 = vadd.xlane.f32.xlu1 %v971_v46 }
  0x48   : > { %969 = vadd.xlane.f32.xlu0 %v968_v45 }
  0x49   : > { %978 = vadd.xlane.f32.xlu1 %v977_v51 }
  0x4c   : > { %975 = vadd.xlane.f32.xlu0 %v974_v50 }
  0x4d   : > { %984 = vadd.xlane.f32.xlu1 %v983_v59 }
  0x50   : > { %981 = vadd.xlane.f32.xlu0 %v980_v53 }
  0x51   : > { %990 = vadd.xlane.f32.xlu1 %v989_v2 }
  0x54   : > { %987 = vadd.xlane.f32.xlu0 %v986_v60 }
  0x55   : > { %996 = vadd.xlane.f32.xlu1 %v995_v6 }
  0x58   : > { %993 = vadd.xlane.f32.xlu0 %v992_v3 }
  0xde   : > { %v1660_v8 = vpop.f32.mrf.mxu0  ;;  %v1676_v10 = vpop.f32.mrf.mxu1 }
  0xdf   : > { %v697_v11 = vmul.f32 %v1660_v8, %v1999_v7  ;;  %v713_v12 = vmul.f32 %v1676_v10, %v1999_v7 }
  0xe0   : > { %v561_v14 = vpop.f32.mrf.mxu0  ;;  %v625_v13 = vpop.f32.mrf.mxu1 }
  0xe1   : > { %v736_v15 = vadd.f32 %v2004_v9, %v697_v11  ;;  %v752_v16 = vadd.f32 %v2004_v9, %v713_v12  ;;  %v695_v17 = vmul.f32 %v1999_v7, %v561_v14  ;;  %v711_v22 = vmul.f32 %v1999_v7, %v625_v13 }
  0xe2   : > { %v1661_v18 = vpop.f32.mrf.mxu0  ;;  %v1677_v19 = vpop.f32.mrf.mxu1 }
  0xe3   : > { %v768_v20 = vmax.f32 %v736_v15, 0.0  ;;  %v784_v21 = vmax.f32 %v752_v16, 0.0  ;;  %v698_v24 = vmul.f32 %v1661_v18, %v1999_v7  ;;  %v714_v25 = vmul.f32 %v1677_v19, %v1999_v7 }
  0xe4   : > { %v564_v26 = vpop.f32.mrf.mxu0  ;;  %v628_v27 = vpop.f32.mrf.mxu1  ;;  %v734_v28 = vadd.f32 %v2004_v9, %v695_v17  ;;  %v750_v36 = vadd.f32 %v2004_v9, %v711_v22 }
  0xe5   : > { %v696_v29 = vmul.f32 %v1999_v7, %v564_v26  ;;  %v737_v30 = vadd.f32 %v2004_v9, %v698_v24  ;;  %v753_v31 = vadd.f32 %v2004_v9, %v714_v25  ;;  %v1007_v33 = vmul.f32 %v2015_v23, %v768_v20 }
  0xe6   : > { %v1664_v32 = vpop.f32.mrf.mxu0  ;;  %v1680_v34 = vpop.f32.mrf.mxu1  ;;  %v1023_v35 = vmul.f32 %v2015_v23, %v784_v21  ;;  %v712_v37 = vmul.f32 %v1999_v7, %v628_v27  ;;  %v766_v45 = vmax.f32 %v734_v28, 0.0  ;;  %v782_v54 = vmax.f32 %v750_v36, 0.0 }
  0xe7   : > { %v701_v38 = vmul.f32 %v1664_v32, %v1999_v7  ;;  %v769_v39 = vmax.f32 %v737_v30, 0.0  ;;  %v785_v40 = vmax.f32 %v753_v31, 0.0  ;;  %v735_v41 = vadd.f32 %v2004_v9, %v696_v29 }
  0xe8   : > { %v1043_v42 = vsel %vm478_vm0, %v1007_v33, 0.0  ;;  %v577_v43 = vpop.f32.mrf.mxu0  ;;  %v641_v44 = vpop.f32.mrf.mxu1  ;;  %v717_v47 = vmul.f32 %v1680_v34, %v1999_v7  ;;  %v1091_v49 = vsel %vm478_vm0, %v1023_v35, 0.0  ;;  %v751_v51 = vadd.f32 %v2004_v9, %v712_v37 }
  0xe9   : > { %1044 = vadd.xlane.f32.xlu0 %v1043_v42  ;;  %v740_v46 = vadd.f32 %v2004_v9, %v701_v38  ;;  %v1008_v48 = vmul.f32 %v2015_v23, %v769_v39  ;;  %v1024_v53 = vmul.f32 %v2015_v23, %v785_v40  ;;  %v767_v55 = vmax.f32 %v735_v41, 0.0 }
  0xea   : > { %v1681_v50 = vpop.f32.mrf.mxu1  ;;  %v1665_v52 = vpop.f32.mrf.mxu0  ;;  %v756_v60 = vadd.f32 %v2004_v9, %v717_v47  ;;  %v1005_v61 = vmul.f32 %v2015_v23, %v766_v45  ;;  %v783_v63 = vmax.f32 %v751_v51, 0.0  ;;  %v699_v0 = vmul.f32 %v1999_v7, %v577_v43 }
  0xeb   : > { %v702_v56 = vmul.f32 %v1665_v52, %v1999_v7  ;;  %v1046_v57 = vsel %vm478_vm0, %v1008_v48, 0.0  ;;  %v772_v59 = vmax.f32 %v740_v46, 0.0  ;;  %v718_v1 = vmul.f32 %v1681_v50, %v1999_v7 }
  0xec   : > { %v644_v58 = vpop.f32.mrf.mxu1  ;;  %1047 = vadd.xlane.f32.xlu1 %v1046_v57  ;;  %v1094_v2 = vsel %vm478_vm0, %v1024_v53, 0.0  ;;  %v580_v4 = vpop.f32.mrf.mxu0  ;;  %v1037_v5 = vsel %vm478_vm0, %v1005_v61, 0.0  ;;  %v1006_v6 = vmul.f32 %v2015_v23, %v767_v55  ;;  %v1021_v8 = vmul.f32 %v2015_v23, %v782_v54 }
  0xed   : > { %1092 = vadd.xlane.f32.xlu0 %v1091_v49  ;;  %v741_v3 = vadd.f32 %v2004_v9, %v702_v56  ;;  %v788_v11 = vmax.f32 %v756_v60, 0.0  ;;  %v1011_v14 = vmul.f32 %v2015_v23, %v772_v59  ;;  %v738_v13 = vadd.f32 %v2004_v9, %v699_v0 }
  0xee   : > { %v1684_v62 = vpop.f32.mrf.mxu1  ;;  %v1668_v12 = vpop.f32.mrf.mxu0  ;;  %v700_v15 = vmul.f32 %v1999_v7, %v580_v4  ;;  %v715_v16 = vmul.f32 %v1999_v7, %v641_v44  ;;  %v757_v17 = vadd.f32 %v2004_v9, %v718_v1  ;;  %v1040_v20 = vsel %vm478_vm0, %v1006_v6, 0.0 }
  0xef   : > { %v773_v19 = vmax.f32 %v741_v3, 0.0  ;;  %v1085_v21 = vsel %vm478_vm0, %v1021_v8, 0.0  ;;  %v1022_v22 = vmul.f32 %v2015_v23, %v783_v63  ;;  %v705_v24 = vmul.f32 %v1668_v12, %v1999_v7 }
  0xf0   : > { %v2047_v10 = vpop.f32.mrf.mxu1  ;;  %1095 = vadd.xlane.f32.xlu1 %v1094_v2  ;;  %v1055_v25 = vsel %vm478_vm0, %v1011_v14, 0.0  ;;  %v593_v26 = vpop.f32.mrf.mxu0  ;;  %v1027_v27 = vmul.f32 %v2015_v23, %v788_v11  ;;  %v770_v28 = vmax.f32 %v738_v13, 0.0  ;;  %v754_v29 = vadd.f32 %v2004_v9, %v715_v16 }
  0xf1   : > { %1038 = vadd.xlane.f32.xlu0 %v1037_v5  ;;  %v716_v30 = vmul.f32 %v1999_v7, %v644_v58  ;;  %v739_v32 = vadd.f32 %v2004_v9, %v700_v15  ;;  %v789_v33 = vmax.f32 %v757_v17, 0.0  ;;  %v1088_v34 = vsel %vm478_vm0, %v1022_v22, 0.0 }
  0xf2   : > { %v1685_v18 = vpop.f32.mrf.mxu1  ;;  %v1012_v35 = vmul.f32 %v2015_v23, %v773_v19  ;;  %v744_v37 = vadd.f32 %v2004_v9, %v705_v24  ;;  %v1669_v38 = vpop.f32.mrf.mxu0  ;;  %v721_v39 = vmul.f32 %v1684_v62, %v1999_v7  ;;  %v1103_v40 = vsel %vm478_vm0, %v1027_v27, 0.0 }
  0xf3   : > { %v786_v41 = vmax.f32 %v754_v29, 0.0  ;;  %v755_v42 = vadd.f32 %v2004_v9, %v716_v30  ;;  %v706_v43 = vmul.f32 %v1669_v38, %v1999_v7  ;;  %v771_v44 = vmax.f32 %v739_v32, 0.0 }
  0xf4   : > { %1041 = vadd.xlane.f32.xlu1 %v1040_v20  ;;  %v660_v31 = vpop.f32.mrf.mxu1  ;;  %v1058_v45 = vsel %vm478_vm0, %v1012_v35, 0.0  ;;  %v1028_v46 = vmul.f32 %v2015_v23, %v789_v33  ;;  %v1009_v47 = vmul.f32 %v2015_v23, %v770_v28  ;;  %v776_v49 = vmax.f32 %v744_v37, 0.0  ;;  %v596_v52 = vpop.f32.mrf.mxu0 }
  0xf5   : > { %1086 = vadd.xlane.f32.xlu0 %v1085_v21  ;;  %v703_v50 = vmul.f32 %v1999_v7, %v593_v26  ;;  %v760_v51 = vadd.f32 %v2004_v9, %v721_v39  ;;  %v787_v53 = vmax.f32 %v755_v42, 0.0  ;;  %v745_v54 = vadd.f32 %v2004_v9, %v706_v43 }
  0xf6   : > { %v2065_v36 = vpop.f32.mrf.mxu1  ;;  %v722_v55 = vmul.f32 %v1685_v18, %v1999_v7  ;;  %v1106_v56 = vsel %vm478_vm0, %v1028_v46, 0.0  ;;  %v1049_v57 = vsel %vm478_vm0, %v1009_v47, 0.0  ;;  %v1010_v58 = vmul.f32 %v2015_v23, %v771_v44  ;;  %v1672_v60 = vpop.f32.mrf.mxu0 }
  0xf7   : > { %v1025_v59 = vmul.f32 %v2015_v23, %v786_v41  ;;  %v742_v62 = vadd.f32 %v2004_v9, %v703_v50  ;;  %v792_v63 = vmax.f32 %v760_v51, 0.0  ;;  %v1015_v0 = vmul.f32 %v2015_v23, %v776_v49 }
  0xf8   : > { %1089 = vadd.xlane.f32.xlu1 %v1088_v34  ;;  %v2075_v48 = vpop.f32.mrf.mxu1  ;;  %v777_v2 = vmax.f32 %v745_v54, 0.0  ;;  %v704_v3 = vmul.f32 %v1999_v7, %v596_v52  ;;  %v719_v4 = vmul.f32 %v1999_v7, %v2047_v10  ;;  %v761_v5 = vadd.f32 %v2004_v9, %v722_v55  ;;  %v609_v12 = vpop.f32.mrf.mxu0 }
  0xf9   : > { %1056 = vadd.xlane.f32.xlu0 %v1055_v25  ;;  %v1052_v6 = vsel %vm478_vm0, %v1010_v58, 0.0  ;;  %v1097_v8 = vsel %vm478_vm0, %v1025_v59, 0.0  ;;  %v1026_v11 = vmul.f32 %v2015_v23, %v787_v53  ;;  %v720_v13 = vmul.f32 %v1999_v7, %v660_v31  ;;  %v2127_v53 = vpop.xlane.xlu0 %903 }
  0xfa   : > { %v1689_v61 = vpop.f32.mrf.mxu1  ;;  %v709_v15 = vmul.f32 %v1672_v60, %v1999_v7  ;;  %v1067_v16 = vsel %vm478_vm0, %v1015_v0, 0.0  ;;  %v1031_v10 = vmul.f32 %v2015_v23, %v792_v63  ;;  %v774_v18 = vmax.f32 %v742_v62, 0.0  ;;  %v1673_v24 = vpop.f32.mrf.mxu0 }
  0xfb   : > { %v726_v1 = vmul.f32 %v1689_v61, %v1999_v7  ;;  %v743_v19 = vadd.f32 %v2004_v9, %v704_v3  ;;  %v758_v20 = vadd.f32 %v2004_v9, %v719_v4  ;;  %v793_v21 = vmax.f32 %v761_v5, 0.0  ;;  %v910_v61 = vpop.xlane.xlu1 %909 }
  0xfc   : > { %1059 = vadd.xlane.f32.xlu1 %v1058_v45  ;;  %v1100_v22 = vsel %vm478_vm0, %v1026_v11, 0.0  ;;  %v1016_v25 = vmul.f32 %v2015_v23, %v777_v2  ;;  %v759_v27 = vadd.f32 %v2004_v9, %v720_v13  ;;  %v748_v28 = vadd.f32 %v2004_v9, %v709_v15  ;;  %v612_v35 = vpop.f32.mrf.mxu0  ;;  %v676_v47 = vpop.f32.mrf.mxu1 }
  0xfd   : > { %1104 = vadd.xlane.f32.xlu0 %v1103_v40  ;;  %v765_v14 = vadd.f32 %v2004_v9, %v726_v1  ;;  %v1115_v29 = vsel %vm478_vm0, %v1031_v10, 0.0  ;;  %v775_v30 = vmax.f32 %v743_v19, 0.0  ;;  %v707_v31 = vmul.f32 %v1999_v7, %v609_v12  ;;  %v2141_v4 = vpop.xlane.xlu0 %906 }
  0xfe   : > { %v710_v32 = vmul.f32 %v1673_v24, %v1999_v7  ;;  %v790_v33 = vmax.f32 %v758_v20, 0.0  ;;  %v1070_v34 = vsel %vm478_vm0, %v1016_v25, 0.0  ;;  %v1032_v37 = vmul.f32 %v2015_v23, %v793_v21 }
  0xff   : > { %v797_v17 = vmax.f32 %v765_v14, 0.0  ;;  %v1013_v38 = vmul.f32 %v2015_v23, %v774_v18  ;;  %v791_v39 = vmax.f32 %v759_v27, 0.0  ;;  %v780_v40 = vmax.f32 %v748_v28, 0.0  ;;  %v913_v14 = vpop.xlane.xlu1 %912 }
 0x100   : > { %1107 = vadd.xlane.f32.xlu1 %v1106_v56  ;;  %v746_v41 = vadd.f32 %v2004_v9, %v707_v31  ;;  %v749_v42 = vadd.f32 %v2004_v9, %v710_v32  ;;  %v708_v43 = vmul.f32 %v1999_v7, %v612_v35  ;;  %v723_v44 = vmul.f32 %v1999_v7, %v2075_v48 }
 0x101   : > { %1050 = vadd.xlane.f32.xlu0 %v1049_v57  ;;  %v2105_v26 = vmul.f32 %v2015_v23, %v797_v17  ;;  %v1118_v45 = vsel %vm478_vm0, %v1032_v37, 0.0  ;;  %v1061_v46 = vsel %vm478_vm0, %v1013_v38, 0.0  ;;  %v1014_v49 = vmul.f32 %v2015_v23, %v775_v30  ;;  %v2147_v13 = vpop.xlane.xlu0 %915 }
 0x102   : > { %v1029_v50 = vmul.f32 %v2015_v23, %v790_v33  ;;  %v725_v51 = vmul.f32 %v2065_v36, %v1999_v7  ;;  %v1019_v52 = vmul.f32 %v2015_v23, %v780_v40  ;;  %v778_v54 = vmax.f32 %v746_v41, 0.0 }
 0x103   : > { %v781_v48 = vmax.f32 %v749_v42, 0.0  ;;  %v747_v55 = vadd.f32 %v2004_v9, %v708_v43  ;;  %v724_v56 = vmul.f32 %v1999_v7, %v676_v47  ;;  %v762_v57 = vadd.f32 %v2004_v9, %v723_v44  ;;  %v2153_v18 = vpop.xlane.xlu1 %918 }
 0x104   : > { %1053 = vadd.xlane.f32.xlu1 %v1052_v6  ;;  %v1064_v58 = vsel %vm478_vm0, %v1014_v49, 0.0  ;;  %v1109_v59 = vsel %vm478_vm0, %v1029_v50, 0.0  ;;  %v1030_v60 = vmul.f32 %v2015_v23, %v791_v39  ;;  %v1079_v36 = vsel %vm478_vm0, %v1019_v52, 0.0  ;;  %v2201_v50 = vld [vmem:[#allocation2] ss:$0 sm:$0xff] }
 0x105   : > { %1098 = vadd.xlane.f32.xlu0 %v1097_v8  ;;  %v779_v62 = vmax.f32 %v747_v55, 0.0  ;;  %v764_v63 = vadd.f32 %v2004_v9, %v725_v51  ;;  %v763_v0 = vadd.f32 %v2004_v9, %v724_v56  ;;  %v794_v1 = vmax.f32 %v762_v57, 0.0  ;;  %v2157_v21 = vpop.xlane.xlu0 %921 }
 0x106   : > { %v1112_v7 = vsel %vm478_vm0, %v1030_v60, 0.0  ;;  %v1020_v2 = vmul.f32 %v2015_v23, %v781_v48  ;;  %v1017_v3 = vmul.f32 %v2015_v23, %v778_v54 }
 0x107   : > { %v796_v5 = vmax.f32 %v764_v63, 0.0  ;;  %v795_v6 = vmax.f32 %v763_v0, 0.0  ;;  %v1018_v12 = vmul.f32 %v2015_v23, %v779_v62  ;;  %v1033_v9 = vmul.f32 %v2015_v23, %v794_v1  ;;  %v2161_v24 = vpop.xlane.xlu1 %924 }
 0x108   : > { %1101 = vadd.xlane.f32.xlu1 %v1100_v22  ;;  %v1082_v8 = vsel %vm478_vm0, %v1020_v2, 0.0  ;;  %v1073_v11 = vsel %vm478_vm0, %v1017_v3, 0.0  ;;  %v1130_v22 = vsel %vm478_vm0, %v2105_v26, 0.0 }
 0x109   : > { %1068 = vadd.xlane.f32.xlu0 %v1067_v16  ;;  %v1076_v15 = vsel %vm478_vm0, %v1018_v12, 0.0  ;;  %v1121_v16 = vsel %vm478_vm0, %v1033_v9, 0.0  ;;  %v1034_v10 = vmul.f32 %v2015_v23, %v795_v6  ;;  %v1035_v17 = vmul.f32 %v2015_v23, %v796_v5  ;;  %v2163_v25 = vpop.xlane.xlu0 %927 }
 0x10b   : > { %v1124_v19 = vsel %vm478_vm0, %v1034_v10, 0.0  ;;  %v1127_v20 = vsel %vm478_vm0, %v1035_v17, 0.0  ;;  %v2165_v23 = vpop.xlane.xlu1 %930 }
 0x10c   : > { %1071 = vadd.xlane.f32.xlu1 %v1070_v34 }
 0x10d   : > { %1116 = vadd.xlane.f32.xlu0 %v1115_v29  ;;  %v2167_v27 = vpop.xlane.xlu0 %933 }
 0x10f   : > { %v2169_v28 = vpop.xlane.xlu1 %936 }
 0x110   : > { %1119 = vadd.xlane.f32.xlu1 %v1118_v45 }
 0x111   : > { %1062 = vadd.xlane.f32.xlu0 %v1061_v46  ;;  %v2171_v29 = vpop.xlane.xlu0 %939 }
 0x113   : > { %v2173_v30 = vpop.xlane.xlu1 %942 }
 0x114   : > { %1065 = vadd.xlane.f32.xlu1 %v1064_v58 }
 0x115   : > { %1110 = vadd.xlane.f32.xlu0 %v1109_v59  ;;  %v2175_v31 = vpop.xlane.xlu0 %945 }
 0x117   : > { %v2177_v32 = vpop.xlane.xlu1 %948 }
 0x118   : > { %1113 = vadd.xlane.f32.xlu1 %v1112_v7 }
 0x119   : > { %1080 = vadd.xlane.f32.xlu0 %v1079_v36  ;;  %v952_v26 = vpop.xlane.xlu0 %951 }
 0x11b   : > { %v955_v33 = vpop.xlane.xlu1 %954 }
 0x11c   : > { %1083 = vadd.xlane.f32.xlu1 %v1082_v8 }
 0x11d   : > { %1074 = vadd.xlane.f32.xlu0 %v1073_v11  ;;  %v958_v34 = vpop.xlane.xlu0 %957 }
 0x11f   : > { %v961_v35 = vpop.xlane.xlu1 %960 }
 0x120   : > { %1077 = vadd.xlane.f32.xlu1 %v1076_v15 }
 0x121   : > { %1122 = vadd.xlane.f32.xlu0 %v1121_v16  ;;  %v2179_v37 = vpop.xlane.xlu0 %963 }
 0x123   : > { %v2181_v38 = vpop.xlane.xlu1 %966 }
 0x124   : > { %1125 = vadd.xlane.f32.xlu1 %v1124_v19 }
 0x125   : > { %1128 = vadd.xlane.f32.xlu0 %v1127_v20  ;;  %v970_v39 = vpop.xlane.xlu0 %969 }
 0x127   : > { %v2183_v40 = vpop.xlane.xlu1 %972 }
 0x128   : > { %1131 = vadd.xlane.f32.xlu1 %v1130_v22 }
 0x129   : > { %v2185_v41 = vpop.xlane.xlu0 %975 }
 0x12b   : > { %v2187_v42 = vpop.xlane.xlu1 %978 }
 0x12d   : > { %v2189_v43 = vpop.xlane.xlu0 %981 }
 0x12f   : > { %v2191_v44 = vpop.xlane.xlu1 %984 }
 0x131   : > { %v2193_v45 = vpop.xlane.xlu0 %987 }
 0x133   : > { %v2195_v46 = vpop.xlane.xlu1 %990 }
 0x135   : > { %v2197_v47 = vpop.xlane.xlu0 %993 }
 0x137   : > { %v2199_v49 = vpop.xlane.xlu1 %996 }
 0x172   : > { %v1045_v51 = vpop.xlane.xlu0 %1044 }
 0x173   : > { %v1135_v52 = vadd.f32 %v1045_v51, %v910_v61 }
 0x175   : > { %v1174_v54 = vadd.f32 %v2201_v50, %v1135_v52  ;;  %v1048_v48 = vpop.xlane.xlu1 %1047 }
 0x176   : > { %v1093_v55 = vpop.xlane.xlu0 %1092  ;;  %v1136_v57 = vadd.f32 %v1048_v48, %v913_v14 }
 0x177   : > { %v1206_v56 = vmul.f32 0.5, %v1174_v54  ;;  %v1151_v58 = vadd.f32 %v1093_v55, %v958_v34 }
 0x178   : > { %v1175_v59 = vadd.f32 %v2201_v50, %v1136_v57 }
 0x179   : > { %1726 = vtanh.f32 %v1206_v56  ;;  %v1190_v60 = vadd.f32 %v2201_v50, %v1151_v58  ;;  %v1096_v36 = vpop.xlane.xlu1 %1095 }
 0x17a   : > { %v1039_v62 = vpop.xlane.xlu0 %1038  ;;  %v1207_v63 = vmul.f32 0.5, %v1175_v59  ;;  %v1152_v1 = vadd.f32 %v1096_v36, %v961_v35 }
 0x17b   : > { %v1222_v0 = vmul.f32 0.5, %v1190_v60  ;;  %v1133_v7 = vadd.f32 %v1039_v62, %v2127_v53 }
 0x17c   : > { %1728 = vtanh.f32 %v1207_v63  ;;  %v1191_v61 = vadd.f32 %v2201_v50, %v1152_v1 }
 0x17d   : > { %v1172_v2 = vadd.f32 %v2201_v50, %v1133_v7  ;;  %1730 = vtanh.f32 %v1222_v0  ;;  %v1042_v3 = vpop.xlane.xlu1 %1041 }
 0x17e   : > { %v1087_v5 = vpop.xlane.xlu0 %1086  ;;  %v1223_v6 = vmul.f32 0.5, %v1191_v61  ;;  %v1134_v11 = vadd.f32 %v1042_v3, %v2141_v4 }
 0x17f   : > { %v1204_v8 = vmul.f32 0.5, %v1172_v2  ;;  %v1149_v12 = vadd.f32 %v1087_v5, %v952_v26 }
 0x180   : > { %1732 = vtanh.f32 %v1223_v6  ;;  %v1173_v9 = vadd.f32 %v2201_v50, %v1134_v11 }
 0x181   : > { %v1188_v14 = vadd.f32 %v2201_v50, %v1149_v12  ;;  %1734 = vtanh.f32 %v1204_v8  ;;  %v1090_v53 = vpop.xlane.xlu1 %1089 }
 0x182   : > { %v1057_v15 = vpop.xlane.xlu0 %1056  ;;  %v1205_v16 = vmul.f32 0.5, %v1173_v9  ;;  %v1150_v17 = vadd.f32 %v1090_v53, %v955_v33 }
 0x183   : > { %v1220_v10 = vmul.f32 0.5, %v1188_v14  ;;  %v1139_v19 = vadd.f32 %v1057_v15, %v2157_v21 }
 0x184   : > { %1736 = vtanh.f32 %v1205_v16  ;;  %v1189_v20 = vadd.f32 %v2201_v50, %v1150_v17 }
 0x185   : > { %v1178_v4 = vadd.f32 %v2201_v50, %v1139_v19  ;;  %1738 = vtanh.f32 %v1220_v10  ;;  %v1060_v26 = vpop.xlane.xlu1 %1059 }
 0x186   : > { %v1727_v22 = vpop.eup %1726  ;;  %v1105_v34 = vpop.xlane.xlu0 %1104  ;;  %v1221_v51 = vmul.f32 0.5, %v1189_v20  ;;  %v1140_v54 = vadd.f32 %v1060_v26, %v2161_v24 }
 0x187   : > { %v1270_v35 = vadd.f32 1.0, %v1727_v22  ;;  %v1210_v52 = vmul.f32 0.5, %v1178_v4  ;;  %v1155_v48 = vadd.f32 %v1105_v34, %v970_v39 }
 0x188   : > { %1740 = vtanh.f32 %v1221_v51  ;;  %v1179_v21 = vadd.f32 %v2201_v50, %v1140_v54 }
 0x189   : > { %v1302_v55 = vmul.f32 0.5, %v1270_v35  ;;  %v1729_v33 = vpop.eup %1728  ;;  %1742 = vtanh.f32 %v1210_v52  ;;  %v1194_v56 = vadd.f32 %v2201_v50, %v1155_v48  ;;  %v1108_v57 = vpop.xlane.xlu1 %1107 }
 0x18a   : > { %v1051_v58 = vpop.xlane.xlu0 %1050  ;;  %v1731_v59 = vpop.eup %1730  ;;  %v1271_v36 = vadd.f32 1.0, %v1729_v33  ;;  %v1211_v62 = vmul.f32 0.5, %v1179_v21  ;;  %v1156_v63 = vadd.f32 %v1108_v57, %v2183_v40 }
 0x18b   : > { %v1334_v60 = vmax.f32 %v1302_v55, 0.0  ;;  %v1286_v24 = vadd.f32 1.0, %v1731_v59  ;;  %v1226_v39 = vmul.f32 0.5, %v1194_v56  ;;  %v1137_v0 = vadd.f32 %v1051_v58, %v2147_v13 }
 0x18c   : > { %v1303_v7 = vmul.f32 0.5, %v1271_v36  ;;  %1744 = vtanh.f32 %v1211_v62  ;;  %v1195_v61 = vadd.f32 %v2201_v50, %v1156_v63 }
 0x18d   : > { %v1366_v1 = vmin.f32 %v1334_v60, 1.0  ;;  %v1733_v2 = vpop.eup %1732  ;;  %v1318_v3 = vmul.f32 0.5, %v1286_v24  ;;  %1746 = vtanh.f32 %v1226_v39  ;;  %v1176_v40 = vadd.f32 %v2201_v50, %v1137_v0  ;;  %v1054_v5 = vpop.xlane.xlu1 %1053 }
 0x18e   : > { %v1099_v6 = vpop.xlane.xlu0 %1098  ;;  %v1735_v8 = vpop.eup %1734  ;;  %v1335_v11 = vmax.f32 %v1303_v7, 0.0  ;;  %v1287_v12 = vadd.f32 1.0, %v1733_v2  ;;  %v1227_v9 = vmul.f32 0.5, %v1195_v61  ;;  %v1138_v13 = vadd.f32 %v1054_v5, %v2153_v18 }
 0x18f   : > { %1399 = vst.msk [vmem:[%s2223_s7 + $0x10] sm:$0xff] %vm1396_vm2, %v1366_v1  ;;  %v1350_v14 = vmax.f32 %v1318_v3, 0.0  ;;  %v1268_v53 = vadd.f32 1.0, %v1735_v8  ;;  %v1208_v15 = vmul.f32 0.5, %v1176_v40  ;;  %v1153_v16 = vadd.f32 %v1099_v6, %v2179_v37 }
 0x190   : > { %v1367_v10 = vmin.f32 %v1335_v11, 1.0  ;;  %v1319_v17 = vmul.f32 0.5, %v1287_v12  ;;  %1748 = vtanh.f32 %v1227_v9  ;;  %v1177_v19 = vadd.f32 %v2201_v50, %v1138_v13 }
 0x191   : > { %v1737_v20 = vpop.eup %1736  ;;  %v1382_v4 = vmin.f32 %v1350_v14, 1.0  ;;  %v1300_v22 = vmul.f32 0.5, %v1268_v53  ;;  %1750 = vtanh.f32 %v1208_v15  ;;  %v1192_v26 = vadd.f32 %v2201_v50, %v1153_v16  ;;  %v1102_v34 = vpop.xlane.xlu1 %1101 }
 0x192   : > { %v1069_v18 = vpop.xlane.xlu0 %1068  ;;  %v1739_v35 = vpop.eup %1738  ;;  %1400 = vst.msk [vmem:[%s2223_s7 + $0x18] sm:$0xff] %vm1396_vm2, %v1367_v10  ;;  %v1351_v51 = vmax.f32 %v1319_v17, 0.0  ;;  %v1269_v52 = vadd.f32 1.0, %v1737_v20  ;;  %v1209_v37 = vmul.f32 0.5, %v1177_v19  ;;  %v1154_v54 = vadd.f32 %v1102_v34, %v2181_v38 }
 0x193   : > { %1415 = vst.msk [vmem:[%s2223_s7 + $0x90] sm:$0xff] %vm1396_vm2, %v1382_v4  ;;  %v1332_v48 = vmax.f32 %v1300_v22, 0.0  ;;  %v1284_v55 = vadd.f32 1.0, %v1739_v35  ;;  %v1224_v21 = vmul.f32 0.5, %v1192_v26  ;;  %v1143_v33 = vadd.f32 %v1069_v18, %v2167_v27 }
 0x194   : > { %v1383_v56 = vmin.f32 %v1351_v51, 1.0  ;;  %v1301_v57 = vmul.f32 0.5, %v1269_v52  ;;  %1752 = vtanh.f32 %v1209_v37  ;;  %v1193_v58 = vadd.f32 %v2201_v50, %v1154_v54 }
 0x195   : > { %v1741_v59 = vpop.eup %1740  ;;  %v1364_v60 = vmin.f32 %v1332_v48, 1.0  ;;  %v1316_v36 = vmul.f32 0.5, %v1284_v55  ;;  %1754 = vtanh.f32 %v1224_v21  ;;  %v1182_v38 = vadd.f32 %v2201_v50, %v1143_v33  ;;  %v1072_v62 = vpop.xlane.xlu1 %1071 }
 0x196   : > { %v1117_v63 = vpop.xlane.xlu0 %1116  ;;  %v1743_v24 = vpop.eup %1742  ;;  %1416 = vst.msk [vmem:[%s2223_s7 + $0x98] sm:$0xff] %vm1396_vm2, %v1383_v56  ;;  %v1333_v39 = vmax.f32 %v1301_v57, 0.0  ;;  %v1285_v0 = vadd.f32 1.0, %v1741_v59  ;;  %v1225_v27 = vmul.f32 0.5, %v1193_v58  ;;  %v1144_v1 = vadd.f32 %v1072_v62, %v2169_v28 }
 0x197   : > { %1397 = vst.msk [vmem:[%s2223_s7] sm:$0xff] %vm1396_vm2, %v1364_v60  ;;  %v1348_v7 = vmax.f32 %v1316_v36, 0.0  ;;  %v1274_v61 = vadd.f32 1.0, %v1743_v24  ;;  %v1214_v2 = vmul.f32 0.5, %v1182_v38  ;;  %v1159_v3 = vadd.f32 %v1117_v63, %v2189_v43 }
 0x198   : > { %v1365_v40 = vmin.f32 %v1333_v39, 1.0  ;;  %v1317_v5 = vmul.f32 0.5, %v1285_v0  ;;  %1756 = vtanh.f32 %v1225_v27  ;;  %v1183_v6 = vadd.f32 %v2201_v50, %v1144_v1 }
 0x199   : > { %v1745_v8 = vpop.eup %1744  ;;  %v1380_v11 = vmin.f32 %v1348_v7, 1.0  ;;  %v1306_v12 = vmul.f32 0.5, %v1274_v61  ;;  %1758 = vtanh.f32 %v1214_v2  ;;  %v1198_v28 = vadd.f32 %v2201_v50, %v1159_v3  ;;  %v1120_v9 = vpop.xlane.xlu1 %1119 }
 0x19a   : > { %v1063_v13 = vpop.xlane.xlu0 %1062  ;;  %v1747_v14 = vpop.eup %1746  ;;  %1398 = vst.msk [vmem:[%s2223_s7 + $0x8] sm:$0xff] %vm1396_vm2, %v1365_v40  ;;  %v1349_v53 = vmax.f32 %v1317_v5, 0.0  ;;  %v1275_v15 = vadd.f32 1.0, %v1745_v8  ;;  %v1215_v43 = vmul.f32 0.5, %v1183_v6  ;;  %v1160_v16 = vadd.f32 %v1120_v9, %v2191_v44 }
 0x19b   : > { %1413 = vst.msk [vmem:[%s2223_s7 + $0x80] sm:$0xff] %vm1396_vm2, %v1380_v11  ;;  %v1338_v10 = vmax.f32 %v1306_v12, 0.0  ;;  %v1290_v17 = vadd.f32 1.0, %v1747_v14  ;;  %v1230_v19 = vmul.f32 0.5, %v1198_v28  ;;  %v1141_v20 = vadd.f32 %v1063_v13, %v2163_v25 }
 0x19c   : > { %v1381_v4 = vmin.f32 %v1349_v53, 1.0  ;;  %v1307_v22 = vmul.f32 0.5, %v1275_v15  ;;  %1760 = vtanh.f32 %v1215_v43  ;;  %v1199_v26 = vadd.f32 %v2201_v50, %v1160_v16 }
 0x19d   : > { %v1749_v34 = vpop.eup %1748  ;;  %v1370_v18 = vmin.f32 %v1338_v10, 1.0  ;;  %v1322_v35 = vmul.f32 0.5, %v1290_v17  ;;  %1762 = vtanh.f32 %v1230_v19  ;;  %v1180_v44 = vadd.f32 %v2201_v50, %v1141_v20  ;;  %v1066_v51 = vpop.xlane.xlu1 %1065 }
 0x19e   : > { %v1111_v52 = vpop.xlane.xlu0 %1110  ;;  %v1751_v37 = vpop.eup %1750  ;;  %1414 = vst.msk [vmem:[%s2223_s7 + $0x88] sm:$0xff] %vm1396_vm2, %v1381_v4  ;;  %v1339_v54 = vmax.f32 %v1307_v22, 0.0  ;;  %v1291_v48 = vadd.f32 1.0, %v1749_v34  ;;  %v1231_v25 = vmul.f32 0.5, %v1199_v26  ;;  %v1142_v55 = vadd.f32 %v1066_v51, %v2165_v23 }
 0x19f   : > { %1403 = vst.msk [vmem:[%s2223_s7 + $0x30] sm:$0xff] %vm1396_vm2, %v1370_v18  ;;  %v1354_v21 = vmax.f32 %v1322_v35, 0.0  ;;  %v1272_v33 = vadd.f32 1.0, %v1751_v37  ;;  %v1212_v56 = vmul.f32 0.5, %v1180_v44  ;;  %v1157_v57 = vadd.f32 %v1111_v52, %v2185_v41 }
 0x1a0   : > { %v1371_v58 = vmin.f32 %v1339_v54, 1.0  ;;  %v1323_v59 = vmul.f32 0.5, %v1291_v48  ;;  %1764 = vtanh.f32 %v1231_v25  ;;  %v1181_v60 = vadd.f32 %v2201_v50, %v1142_v55 }
 0x1a1   : > { %v1753_v36 = vpop.eup %1752  ;;  %v1386_v38 = vmin.f32 %v1354_v21, 1.0  ;;  %v1304_v62 = vmul.f32 0.5, %v1272_v33  ;;  %1766 = vtanh.f32 %v1212_v56  ;;  %v1196_v23 = vadd.f32 %v2201_v50, %v1157_v57  ;;  %v1114_v63 = vpop.xlane.xlu1 %1113 }
 0x1a2   : > { %v1081_v24 = vpop.xlane.xlu0 %1080  ;;  %v1755_v39 = vpop.eup %1754  ;;  %1404 = vst.msk [vmem:[%s2223_s7 + $0x38] sm:$0xff] %vm1396_vm2, %v1371_v58  ;;  %v1355_v0 = vmax.f32 %v1323_v59, 0.0  ;;  %v1273_v27 = vadd.f32 1.0, %v1753_v36  ;;  %v1213_v41 = vmul.f32 0.5, %v1181_v60  ;;  %v1158_v1 = vadd.f32 %v1114_v63, %v2187_v42 }
 0x1a3   : > { %1419 = vst.msk [vmem:[%s2223_s7 + $0xb0] sm:$0xff] %vm1396_vm2, %v1386_v38  ;;  %v1336_v7 = vmax.f32 %v1304_v62, 0.0  ;;  %v1288_v61 = vadd.f32 1.0, %v1755_v39  ;;  %v1228_v2 = vmul.f32 0.5, %v1196_v23  ;;  %v1147_v3 = vadd.f32 %v1081_v24, %v2175_v31 }
 0x1a4   : > { %v1387_v40 = vmin.f32 %v1355_v0, 1.0  ;;  %v1305_v5 = vmul.f32 0.5, %v1273_v27  ;;  %1768 = vtanh.f32 %v1213_v41  ;;  %v1197_v6 = vadd.f32 %v2201_v50, %v1158_v1 }
 0x1a5   : > { %v1757_v8 = vpop.eup %1756  ;;  %v1368_v11 = vmin.f32 %v1336_v7, 1.0  ;;  %v1320_v12 = vmul.f32 0.5, %v1288_v61  ;;  %1770 = vtanh.f32 %v1228_v2  ;;  %v1186_v42 = vadd.f32 %v2201_v50, %v1147_v3  ;;  %v1084_v28 = vpop.xlane.xlu1 %1083 }
 0x1a6   : > { %v1075_v9 = vpop.xlane.xlu0 %1074  ;;  %v1759_v13 = vpop.eup %1758  ;;  %1420 = vst.msk [vmem:[%s2223_s7 + $0xb8] sm:$0xff] %vm1396_vm2, %v1387_v40  ;;  %v1337_v14 = vmax.f32 %v1305_v5, 0.0  ;;  %v1289_v53 = vadd.f32 1.0, %v1757_v8  ;;  %v1229_v31 = vmul.f32 0.5, %v1197_v6  ;;  %v1148_v15 = vadd.f32 %v1084_v28, %v2177_v32 }
 0x1a7   : > { %1401 = vst.msk [vmem:[%s2223_s7 + $0x20] sm:$0xff] %vm1396_vm2, %v1368_v11  ;;  %v1352_v43 = vmax.f32 %v1320_v12, 0.0  ;;  %v1278_v16 = vadd.f32 1.0, %v1759_v13  ;;  %v1218_v10 = vmul.f32 0.5, %v1186_v42  ;;  %v1145_v17 = vadd.f32 %v1075_v9, %v2171_v29 }
 0x1a8   : > { %v1369_v19 = vmin.f32 %v1337_v14, 1.0  ;;  %v1321_v20 = vmul.f32 0.5, %v1289_v53  ;;  %1772 = vtanh.f32 %v1229_v31  ;;  %v1187_v4 = vadd.f32 %v2201_v50, %v1148_v15 }
 0x1a9   : > { %v1761_v22 = vpop.eup %1760  ;;  %v1384_v26 = vmin.f32 %v1352_v43, 1.0  ;;  %v1310_v34 = vmul.f32 0.5, %v1278_v16  ;;  %1774 = vtanh.f32 %v1218_v10  ;;  %v1184_v32 = vadd.f32 %v2201_v50, %v1145_v17  ;;  %v1078_v18 = vpop.xlane.xlu1 %1077 }
 0x1aa   : > { %v1123_v35 = vpop.xlane.xlu0 %1122  ;;  %v1763_v44 = vpop.eup %1762  ;;  %1402 = vst.msk [vmem:[%s2223_s7 + $0x28] sm:$0xff] %vm1396_vm2, %v1369_v19  ;;  %v1353_v51 = vmax.f32 %v1321_v20, 0.0  ;;  %v1279_v52 = vadd.f32 1.0, %v1761_v22  ;;  %v1219_v29 = vmul.f32 0.5, %v1187_v4  ;;  %v1146_v37 = vadd.f32 %v1078_v18, %v2173_v30 }
 0x1ab   : > { %1417 = vst.msk [vmem:[%s2223_s7 + $0xa0] sm:$0xff] %vm1396_vm2, %v1384_v26  ;;  %v1342_v54 = vmax.f32 %v1310_v34, 0.0  ;;  %v1294_v48 = vadd.f32 1.0, %v1763_v44  ;;  %v1216_v25 = vmul.f32 0.5, %v1184_v32  ;;  %v1161_v55 = vadd.f32 %v1123_v35, %v2193_v45 }
 0x1ac   : > { %v1385_v21 = vmin.f32 %v1353_v51, 1.0  ;;  %v1311_v33 = vmul.f32 0.5, %v1279_v52  ;;  %1776 = vtanh.f32 %v1219_v29  ;;  %v1185_v56 = vadd.f32 %v2201_v50, %v1146_v37 }
 0x1ad   : > { %v1765_v57 = vpop.eup %1764  ;;  %v1374_v58 = vmin.f32 %v1342_v54, 1.0  ;;  %v1326_v59 = vmul.f32 0.5, %v1294_v48  ;;  %1778 = vtanh.f32 %v1216_v25  ;;  %v1200_v30 = vadd.f32 %v2201_v50, %v1161_v55  ;;  %v1126_v60 = vpop.xlane.xlu1 %1125 }
 0x1ae   : > { %v1129_v36 = vpop.xlane.xlu0 %1128  ;;  %v1767_v38 = vpop.eup %1766  ;;  %1418 = vst.msk [vmem:[%s2223_s7 + $0xa8] sm:$0xff] %vm1396_vm2, %v1385_v21  ;;  %v1343_v62 = vmax.f32 %v1311_v33, 0.0  ;;  %v1295_v23 = vadd.f32 1.0, %v1765_v57  ;;  %v1217_v45 = vmul.f32 0.5, %v1185_v56  ;;  %v1162_v63 = vadd.f32 %v1126_v60, %v2195_v46 }
 0x1af   : > { %1407 = vst.msk [vmem:[%s2223_s7 + $0x50] sm:$0xff] %vm1396_vm2, %v1374_v58  ;;  %v1358_v24 = vmax.f32 %v1326_v59, 0.0  ;;  %v1276_v39 = vadd.f32 1.0, %v1767_v38  ;;  %v1232_v0 = vmul.f32 0.5, %v1200_v30  ;;  %v1163_v27 = vadd.f32 %v1129_v36, %v2197_v47 }
 0x1b0   : > { %v1375_v41 = vmin.f32 %v1343_v62, 1.0  ;;  %v1327_v1 = vmul.f32 0.5, %v1295_v23  ;;  %1780 = vtanh.f32 %v1217_v45  ;;  %v1201_v7 = vadd.f32 %v2201_v50, %v1162_v63 }
 0x1b1   : > { %v1769_v61 = vpop.eup %1768  ;;  %v1390_v2 = vmin.f32 %v1358_v24, 1.0  ;;  %v1308_v3 = vmul.f32 0.5, %v1276_v39  ;;  %1782 = vtanh.f32 %v1232_v0  ;;  %v1202_v46 = vadd.f32 %v2201_v50, %v1163_v27  ;;  %v1132_v40 = vpop.xlane.xlu1 %1131 }
 0x1b2   : > { %v1771_v5 = vpop.eup %1770  ;;  %1408 = vst.msk [vmem:[%s2223_s7 + $0x58] sm:$0xff] %vm1396_vm2, %v1375_v41  ;;  %v1359_v6 = vmax.f32 %v1327_v1, 0.0  ;;  %v1277_v8 = vadd.f32 1.0, %v1769_v61  ;;  %v1233_v47 = vmul.f32 0.5, %v1201_v7  ;;  %v1164_v11 = vadd.f32 %v1132_v40, %v2199_v49 }
 0x1b3   : > { %1423 = vst.msk [vmem:[%s2223_s7 + $0xd0] sm:$0xff] %vm1396_vm2, %v1390_v2  ;;  %v1340_v12 = vmax.f32 %v1308_v3, 0.0  ;;  %v1292_v42 = vadd.f32 1.0, %v1771_v5  ;;  %v1234_v28 = vmul.f32 0.5, %v1202_v46 }
 0x1b4   : > { %v1391_v9 = vmin.f32 %v1359_v6, 1.0  ;;  %v1309_v13 = vmul.f32 0.5, %v1277_v8  ;;  %1784 = vtanh.f32 %v1233_v47  ;;  %v1203_v14 = vadd.f32 %v2201_v50, %v1164_v11 }
 0x1b5   : > { %v1773_v53 = vpop.eup %1772  ;;  %v1372_v31 = vmin.f32 %v1340_v12, 1.0  ;;  %v1324_v15 = vmul.f32 0.5, %v1292_v42  ;;  %1786 = vtanh.f32 %v1234_v28 }
 0x1b6   : > { %v1775_v43 = vpop.eup %1774  ;;  %1424 = vst.msk [vmem:[%s2223_s7 + $0xd8] sm:$0xff] %vm1396_vm2, %v1391_v9  ;;  %v1341_v49 = vmax.f32 %v1309_v13, 0.0  ;;  %v1293_v16 = vadd.f32 1.0, %v1773_v53  ;;  %v1235_v10 = vmul.f32 0.5, %v1203_v14 }
 0x1b7   : > { %1405 = vst.msk [vmem:[%s2223_s7 + $0x40] sm:$0xff] %vm1396_vm2, %v1372_v31  ;;  %v1356_v17 = vmax.f32 %v1324_v15, 0.0  ;;  %v1282_v19 = vadd.f32 1.0, %v1775_v43 }
 0x1b8   : > { %v1373_v20 = vmin.f32 %v1341_v49, 1.0  ;;  %v1325_v4 = vmul.f32 0.5, %v1293_v16  ;;  %1788 = vtanh.f32 %v1235_v10 }
 0x1b9   : > { %v1777_v50 = vpop.eup %1776  ;;  %v1388_v22 = vmin.f32 %v1356_v17, 1.0  ;;  %v1314_v26 = vmul.f32 0.5, %v1282_v19 }
 0x1ba   : > { %v1779_v34 = vpop.eup %1778  ;;  %1406 = vst.msk [vmem:[%s2223_s7 + $0x48] sm:$0xff] %vm1396_vm2, %v1373_v20  ;;  %v1357_v32 = vmax.f32 %v1325_v4, 0.0  ;;  %v1283_v18 = vadd.f32 1.0, %v1777_v50 }
 0x1bb   : > { %1421 = vst.msk [vmem:[%s2223_s7 + $0xc0] sm:$0xff] %vm1396_vm2, %v1388_v22  ;;  %v1346_v35 = vmax.f32 %v1314_v26, 0.0  ;;  %v1280_v44 = vadd.f32 1.0, %v1779_v34 }
 0x1bc   : > { %v1389_v51 = vmin.f32 %v1357_v32, 1.0  ;;  %v1315_v52 = vmul.f32 0.5, %v1283_v18 }
 0x1bd   : > { %v1781_v29 = vpop.eup %1780  ;;  %v1378_v37 = vmin.f32 %v1346_v35, 1.0  ;;  %v1312_v54 = vmul.f32 0.5, %v1280_v44 }
 0x1be   : > { %v1783_v48 = vpop.eup %1782  ;;  %1422 = vst.msk [vmem:[%s2223_s7 + $0xc8] sm:$0xff] %vm1396_vm2, %v1389_v51  ;;  %v1347_v25 = vmax.f32 %v1315_v52, 0.0  ;;  %v1281_v55 = vadd.f32 1.0, %v1781_v29 }
 0x1bf   : > { %1411 = vst.msk [vmem:[%s2223_s7 + $0x70] sm:$0xff] %vm1396_vm2, %v1378_v37  ;;  %v1344_v21 = vmax.f32 %v1312_v54, 0.0  ;;  %v1296_v33 = vadd.f32 1.0, %v1783_v48 }
 0x1c0   : > { %v1379_v56 = vmin.f32 %v1347_v25, 1.0  ;;  %v1313_v57 = vmul.f32 0.5, %v1281_v55 }
 0x1c1   : > { %v1785_v58 = vpop.eup %1784  ;;  %v1376_v59 = vmin.f32 %v1344_v21, 1.0  ;;  %v1328_v30 = vmul.f32 0.5, %v1296_v33 }
 0x1c2   : > { %v1787_v60 = vpop.eup %1786  ;;  %1412 = vst.msk [vmem:[%s2223_s7 + $0x78] sm:$0xff] %vm1396_vm2, %v1379_v56  ;;  %v1345_v36 = vmax.f32 %v1313_v57, 0.0  ;;  %v1297_v38 = vadd.f32 1.0, %v1785_v58 }
 0x1c3   : > { %1409 = vst.msk [vmem:[%s2223_s7 + $0x60] sm:$0xff] %vm1396_vm2, %v1376_v59  ;;  %v1360_v62 = vmax.f32 %v1328_v30, 0.0  ;;  %v1298_v23 = vadd.f32 1.0, %v1787_v60 }
 0x1c4   : > { %v1377_v45 = vmin.f32 %v1345_v36, 1.0  ;;  %v1329_v63 = vmul.f32 0.5, %v1297_v38 }
 0x1c5   : > { %v1789_v24 = vpop.eup %1788  ;;  %v1392_v39 = vmin.f32 %v1360_v62, 1.0  ;;  %v1330_v0 = vmul.f32 0.5, %v1298_v23 }
 0x1c6   : > { %1410 = vst.msk [vmem:[%s2223_s7 + $0x68] sm:$0xff] %vm1396_vm2, %v1377_v45  ;;  %v1361_v27 = vmax.f32 %v1329_v63, 0.0  ;;  %v1299_v41 = vadd.f32 1.0, %v1789_v24 }
 0x1c7   : > { %1425 = vst.msk [vmem:[%s2223_s7 + $0xe0] sm:$0xff] %vm1396_vm2, %v1392_v39  ;;  %v1362_v1 = vmax.f32 %v1330_v0, 0.0 }
 0x1c8   : > { %v1393_v7 = vmin.f32 %v1361_v27, 1.0  ;;  %v1331_v61 = vmul.f32 0.5, %v1299_v41 }
 0x1c9   : > { %v1394_v2 = vmin.f32 %v1362_v1, 1.0 }
 0x1ca   : > { %1426 = vst.msk [vmem:[%s2223_s7 + $0xe8] sm:$0xff] %vm1396_vm2, %v1393_v7  ;;  %v1363_v3 = vmax.f32 %v1331_v61, 0.0 }
 0x1cb   : > { %1427 = vst.msk [vmem:[%s2223_s7 + $0xf0] sm:$0xff] %vm1396_vm2, %v1394_v2 }
 0x1cc   : > { %v1395_v46 = vmin.f32 %v1363_v3, 1.0 }
 0x1ce   : > { %1428 = vst.msk [vmem:[%s2223_s7 + $0xf8] sm:$0xff] %vm1396_vm2, %v1395_v46 }
 0x1cf PF: > { %s20_s29 = sadd.s32 1, %s1796_s29  }
 0x1d0   : > { %p17_p4 = scmp.ge.s32.totalorder %s20_s29, 10  }
 0x1d2   :  { %19 = sbr.rel (!%p17_p4) target bundleno = 3 (0x3), region = 85 }

</bundles_post_ra>
